<compile_context>
chip_gen: v7x
topology: tpu7x:2x2x1
jax: 0.10.0
libtpu: 0.0.40
codegen_flags: <defaults>
</compile_context>

<pallas_src>
import jax
import jax.numpy as jnp
from jax import lax
from jax.experimental import pallas as pl
from jax.experimental.pallas import tpu as pltpu

KH, KW = 3, 3  # conv kernel size fixed by the module: nn.Conv2d(C, C, 3, padding=1)


def _make_upsample_conv_kernel(C: int, H: int, W: int):
    """Fused nearest-2x upsample + 3x3 conv for one batch element.

    x_ref : (1, C, H, W)        VMEM  original-resolution input block
    wr_ref: (2*C*C*2*3,)        SMEM  row-phase aggregated weights (flattened)
    b_ref : (C,)                SMEM  bias
    o_ref : (1, C, 2H, 2W)      VMEM  output block
    xc_ref: (C, H+2, 2W+2)      VMEM  column-upsampled, zero-bordered scratch
    """
    Hp, Wp = 2 * H, 2 * W

    def kernel(x_ref, wr_ref, b_ref, o_ref, xc_ref):
        # ---- 1) fused nearest-2x column upsample + zero pad (VMEM only) ------
        # xc[ci, 1+r, 1+s] = x[ci, r, s//2]; 1-pixel zero border handles padding.
        xc_ref[...] = jnp.zeros_like(xc_ref)
        for ci in range(C):
            xi = x_ref[0, ci, :, :].astype(jnp.float32)            # (H, W)
            for q in range(W):
                col = xi[:, q:q + 1]                               # (H, 1)
                xc_ref[ci, 1:H + 1, 1 + 2 * q:3 + 2 * q] = jnp.broadcast_to(col, (H, 2))

        # ---- 2) row-phase conv: 2 (row) x 3 (kw) taps per output pixel -------
        # acc[co][a][p, j] accumulates output row 2p+a (a=0 even rows, a=1 odd).
        acc = [[jnp.zeros((H, Wp), jnp.float32) for _ in range(2)] for _ in range(C)]
        for ci in range(C):
            # Hoisted: the 9 shifted patches of this input channel, computed once
            # and reused for every output channel and both row phases.
            patch = [[xc_ref[ci, kr:kr + H, kc:kc + Wp] for kc in range(KW)]
                     for kr in range(3)]
            for co in range(C):
                for a in range(2):
                    s = acc[co][a]
                    for dr in range(2):
                        for kw in range(KW):
                            widx = (((a * C + co) * C + ci) * 2 + dr) * KW + kw
                            s = s + patch[a + dr][kw] * wr_ref[widx]
                    acc[co][a] = s

        # ---- 3) bias, cast, interleave the two row phases into the output ----
        # Full-output-width row stores (unmasked in the lane dim once 2W >= 128).
        for co in range(C):
            r_even = (acc[co][0] + b_ref[co]).astype(o_ref.dtype)
            r_odd = (acc[co][1] + b_ref[co]).astype(o_ref.dtype)
            for p in range(H):
                o_ref[0, co, 2 * p:2 * p + 1, :] = r_even[p:p + 1, :]
                o_ref[0, co, 2 * p + 1:2 * p + 2, :] = r_odd[p:p + 1, :]

    return kernel


def upsample_forward(x_nchw, weight_oihw, bias):
    """Equivalent of: F.interpolate(x, scale_factor=2) -> Conv2d(C, C, 3, padding=1)."""
    B, C, H, W = x_nchw.shape
    Hp, Wp = 2 * H, 2 * W

    # Row-phase aggregation of the kh taps (pure weight preprocessing):
    #   even output rows (a=0): orig row p-1 gets w[kh=0],       orig row p   gets w[kh=1]+w[kh=2]
    #   odd  output rows (a=1): orig row p   gets w[kh=0]+w[kh=1], orig row p+1 gets w[kh=2]
    agg = jnp.array([[[1., 0.], [0., 1.], [0., 1.]],
                     [[1., 0.], [1., 0.], [0., 1.]]], dtype=jnp.float32)  # (a, kh, dr)
    wr = jnp.einsum('oikl,akd->aoidl', weight_oihw.astype(jnp.float32), agg)  # (2,C,C,2,3)
    wr_flat = wr.reshape(-1)

    kernel = _make_upsample_conv_kernel(C, H, W)
    out = pl.pallas_call(
        kernel,
        out_shape=jax.ShapeDtypeStruct((B, C, Hp, Wp), x_nchw.dtype),
        grid=(B,),
        in_specs=[
            pl.BlockSpec((1, C, H, W), lambda b: (b, 0, 0, 0)),
            pl.BlockSpec(memory_space=pltpu.MemorySpace.SMEM),
            pl.BlockSpec(memory_space=pltpu.MemorySpace.SMEM),
        ],
        out_specs=pl.BlockSpec((1, C, Hp, Wp), lambda b: (b, 0, 0, 0)),
        scratch_shapes=[pltpu.VMEM((C, H + 2, Wp + 2), jnp.float32)],
        compiler_params=pltpu.CompilerParams(dimension_semantics=("parallel",)),
    )(x_nchw, wr_flat, bias.astype(jnp.float32))
    return out


def _reference(x_nchw, weight_oihw, bias):
    """Plain-JAX reference reproducing the PyTorch forward."""
    x_up = jnp.repeat(jnp.repeat(x_nchw, 2, axis=2), 2, axis=3)
    y = lax.conv_general_dilated(
        x_up, weight_oihw, window_strides=(1, 1), padding=((1, 1), (1, 1)),
        dimension_numbers=("NCHW", "OIHW", "NCHW"))
    return y + bias[None, :, None, None]


if __name__ == "__main__":
    B, C, H, W = 2, 4, 16, 16

    key = jax.random.PRNGKey(0)
    kx, kw, kb = jax.random.split(key, 3)

    # Deterministic synthetic parameters (Conv2d(C, C, 3) shapes: OIHW + bias).
    x = jax.random.normal(kx, (B, C, H, W), dtype=jnp.float32)
    weight = jax.random.normal(kw, (C, C, KH, KW), dtype=jnp.float32) * 0.1
    bias = jax.random.normal(kb, (C,), dtype=jnp.float32) * 0.1

    out = jax.block_until_ready(upsample_forward(x, weight, bias))
    ref = jax.block_until_ready(_reference(x, weight, bias))

    assert out.shape == (B, C, 2 * H, 2 * W), out.shape
    assert jnp.allclose(out, ref, rtol=1e-5, atol=1e-5), float(jnp.max(jnp.abs(out - ref)))

    print("KERNEL_OK")
</pallas_src>

<mosaic_0001>
module attributes {stable_mosaic.version = 11 : i64} {
  func.func @kernel(%arg0: i32, %arg1: memref<1x4x16x16xf32, #tpu.memory_space<vmem>>, %arg2: memref<192xf32, #tpu.memory_space<smem>>, %arg3: memref<4xf32, #tpu.memory_space<smem>>, %arg4: memref<1x4x32x32xf32, #tpu.memory_space<vmem>>, %arg5: memref<4x18x34xf32, #tpu.memory_space<vmem>>) attributes {dimension_semantics = [#tpu.dimension_semantics<parallel>], iteration_bounds = array<i64: 2>, scalar_prefetch = 0 : i64, scratch_operands = 1 : i64, tpu.core_type = #tpu.core_type<tc>, window_params = [{transform_indices = @transform_0, window_bounds = array<i64: 1, 4, 16, 16>}, {transform_indices = @transform_1, window_bounds = array<i64: 192>}, {transform_indices = @transform_2, window_bounds = array<i64: 4>}, {transform_indices = @transform_3, window_bounds = array<i64: 1, 4, 32, 32>}]} {
    %cst = arith.constant 0.000000e+00 : f32
    %0 = vector.broadcast %cst : f32 to vector<4x18x34xf32>
    %c0 = arith.constant 0 : index
    %c0_0 = arith.constant 0 : index
    %c0_1 = arith.constant 0 : index
    %1 = vector.load %arg5[%c0, %c0_0, %c0_1] : memref<4x18x34xf32, #tpu.memory_space<vmem>>, vector<4x18x34xf32>
    tpu.vector_store %arg5[%c0, %c0_0, %c0_1], %0 {strides = array<i32>} : memref<4x18x34xf32, #tpu.memory_space<vmem>>, vector<4x18x34xf32>,
    %c0_2 = arith.constant 0 : index
    %c0_3 = arith.constant 0 : index
    %c0_4 = arith.constant 0 : index
    %c0_5 = arith.constant 0 : index
    %2 = vector.load %arg1[%c0_2, %c0_3, %c0_4, %c0_5] : memref<1x4x16x16xf32, #tpu.memory_space<vmem>>, vector<1x1x16x16xf32>
    %3 = vector.shape_cast %2 : vector<1x1x16x16xf32> to vector<16x16xf32>
    %4 = vector.extract_strided_slice %3 {offsets = [0, 0], sizes = [16, 1], strides = [1, 1]} : vector<16x16xf32> to vector<16x1xf32>
    %5 = vector.shape_cast %4 : vector<16x1xf32> to vector<16x1xf32>
    %6 = vector.broadcast %5 : vector<16x1xf32> to vector<16x2xf32>
    %c0_6 = arith.constant 0 : index
    %c1 = arith.constant 1 : index
    %c1_7 = arith.constant 1 : index
    %7 = vector.load %arg5[%c0_6, %c1, %c1_7] : memref<4x18x34xf32, #tpu.memory_space<vmem>>, vector<1x16x2xf32>
    %8 = vector.shape_cast %7 : vector<1x16x2xf32> to vector<16x2xf32>
    %9 = vector.shape_cast %6 : vector<16x2xf32> to vector<1x16x2xf32>
    tpu.vector_store %arg5[%c0_6, %c1, %c1_7], %9 {strides = array<i32>} : memref<4x18x34xf32, #tpu.memory_space<vmem>>, vector<1x16x2xf32>,
    %10 = vector.extract_strided_slice %3 {offsets = [0, 1], sizes = [16, 1], strides = [1, 1]} : vector<16x16xf32> to vector<16x1xf32>
    %11 = vector.shape_cast %10 : vector<16x1xf32> to vector<16x1xf32>
    %12 = vector.broadcast %11 : vector<16x1xf32> to vector<16x2xf32>
    %c0_8 = arith.constant 0 : index
    %c1_9 = arith.constant 1 : index
    %c3 = arith.constant 3 : index
    %13 = vector.load %arg5[%c0_8, %c1_9, %c3] : memref<4x18x34xf32, #tpu.memory_space<vmem>>, vector<1x16x2xf32>
    %14 = vector.shape_cast %13 : vector<1x16x2xf32> to vector<16x2xf32>
    %15 = vector.shape_cast %12 : vector<16x2xf32> to vector<1x16x2xf32>
    tpu.vector_store %arg5[%c0_8, %c1_9, %c3], %15 {strides = array<i32>} : memref<4x18x34xf32, #tpu.memory_space<vmem>>, vector<1x16x2xf32>,
    %16 = vector.extract_strided_slice %3 {offsets = [0, 2], sizes = [16, 1], strides = [1, 1]} : vector<16x16xf32> to vector<16x1xf32>
    %17 = vector.shape_cast %16 : vector<16x1xf32> to vector<16x1xf32>
    %18 = vector.broadcast %17 : vector<16x1xf32> to vector<16x2xf32>
    %c0_10 = arith.constant 0 : index
    %c1_11 = arith.constant 1 : index
    %c5 = arith.constant 5 : index
    %19 = vector.load %arg5[%c0_10, %c1_11, %c5] : memref<4x18x34xf32, #tpu.memory_space<vmem>>, vector<1x16x2xf32>
    %20 = vector.shape_cast %19 : vector<1x16x2xf32> to vector<16x2xf32>
    %21 = vector.shape_cast %18 : vector<16x2xf32> to vector<1x16x2xf32>
    tpu.vector_store %arg5[%c0_10, %c1_11, %c5], %21 {strides = array<i32>} : memref<4x18x34xf32, #tpu.memory_space<vmem>>, vector<1x16x2xf32>,
    %22 = vector.extract_strided_slice %3 {offsets = [0, 3], sizes = [16, 1], strides = [1, 1]} : vector<16x16xf32> to vector<16x1xf32>
    %23 = vector.shape_cast %22 : vector<16x1xf32> to vector<16x1xf32>
    %24 = vector.broadcast %23 : vector<16x1xf32> to vector<16x2xf32>
    %c0_12 = arith.constant 0 : index
    %c1_13 = arith.constant 1 : index
    %c7 = arith.constant 7 : index
    %25 = vector.load %arg5[%c0_12, %c1_13, %c7] : memref<4x18x34xf32, #tpu.memory_space<vmem>>, vector<1x16x2xf32>
    %26 = vector.shape_cast %25 : vector<1x16x2xf32> to vector<16x2xf32>
    %27 = vector.shape_cast %24 : vector<16x2xf32> to vector<1x16x2xf32>
    tpu.vector_store %arg5[%c0_12, %c1_13, %c7], %27 {strides = array<i32>} : memref<4x18x34xf32, #tpu.memory_space<vmem>>, vector<1x16x2xf32>,
    %28 = vector.extract_strided_slice %3 {offsets = [0, 4], sizes = [16, 1], strides = [1, 1]} : vector<16x16xf32> to vector<16x1xf32>
    %29 = vector.shape_cast %28 : vector<16x1xf32> to vector<16x1xf32>
    %30 = vector.broadcast %29 : vector<16x1xf32> to vector<16x2xf32>
    %c0_14 = arith.constant 0 : index
    %c1_15 = arith.constant 1 : index
    %c9 = arith.constant 9 : index
    %31 = vector.load %arg5[%c0_14, %c1_15, %c9] : memref<4x18x34xf32, #tpu.memory_space<vmem>>, vector<1x16x2xf32>
    %32 = vector.shape_cast %31 : vector<1x16x2xf32> to vector<16x2xf32>
    %33 = vector.shape_cast %30 : vector<16x2xf32> to vector<1x16x2xf32>
    tpu.vector_store %arg5[%c0_14, %c1_15, %c9], %33 {strides = array<i32>} : memref<4x18x34xf32, #tpu.memory_space<vmem>>, vector<1x16x2xf32>,
    %34 = vector.extract_strided_slice %3 {offsets = [0, 5], sizes = [16, 1], strides = [1, 1]} : vector<16x16xf32> to vector<16x1xf32>
    %35 = vector.shape_cast %34 : vector<16x1xf32> to vector<16x1xf32>
    %36 = vector.broadcast %35 : vector<16x1xf32> to vector<16x2xf32>
    %c0_16 = arith.constant 0 : index
    %c1_17 = arith.constant 1 : index
    %c11 = arith.constant 11 : index
    %37 = vector.load %arg5[%c0_16, %c1_17, %c11] : memref<4x18x34xf32, #tpu.memory_space<vmem>>, vector<1x16x2xf32>
    %38 = vector.shape_cast %37 : vector<1x16x2xf32> to vector<16x2xf32>
    %39 = vector.shape_cast %36 : vector<16x2xf32> to vector<1x16x2xf32>
    tpu.vector_store %arg5[%c0_16, %c1_17, %c11], %39 {strides = array<i32>} : memref<4x18x34xf32, #tpu.memory_space<vmem>>, vector<1x16x2xf32>,
    %40 = vector.extract_strided_slice %3 {offsets = [0, 6], sizes = [16, 1], strides = [1, 1]} : vector<16x16xf32> to vector<16x1xf32>
    %41 = vector.shape_cast %40 : vector<16x1xf32> to vector<16x1xf32>
    %42 = vector.broadcast %41 : vector<16x1xf32> to vector<16x2xf32>
    %c0_18 = arith.constant 0 : index
    %c1_19 = arith.constant 1 : index
    %c13 = arith.constant 13 : index
    %43 = vector.load %arg5[%c0_18, %c1_19, %c13] : memref<4x18x34xf32, #tpu.memory_space<vmem>>, vector<1x16x2xf32>
    %44 = vector.shape_cast %43 : vector<1x16x2xf32> to vector<16x2xf32>
    %45 = vector.shape_cast %42 : vector<16x2xf32> to vector<1x16x2xf32>
    tpu.vector_store %arg5[%c0_18, %c1_19, %c13], %45 {strides = array<i32>} : memref<4x18x34xf32, #tpu.memory_space<vmem>>, vector<1x16x2xf32>,
    %46 = vector.extract_strided_slice %3 {offsets = [0, 7], sizes = [16, 1], strides = [1, 1]} : vector<16x16xf32> to vector<16x1xf32>
    %47 = vector.shape_cast %46 : vector<16x1xf32> to vector<16x1xf32>
    %48 = vector.broadcast %47 : vector<16x1xf32> to vector<16x2xf32>
    %c0_20 = arith.constant 0 : index
    %c1_21 = arith.constant 1 : index
    %c15 = arith.constant 15 : index
    %49 = vector.load %arg5[%c0_20, %c1_21, %c15] : memref<4x18x34xf32, #tpu.memory_space<vmem>>, vector<1x16x2xf32>
    %50 = vector.shape_cast %49 : vector<1x16x2xf32> to vector<16x2xf32>
    %51 = vector.shape_cast %48 : vector<16x2xf32> to vector<1x16x2xf32>
    tpu.vector_store %arg5[%c0_20, %c1_21, %c15], %51 {strides = array<i32>} : memref<4x18x34xf32, #tpu.memory_space<vmem>>, vector<1x16x2xf32>,
    %52 = vector.extract_strided_slice %3 {offsets = [0, 8], sizes = [16, 1], strides = [1, 1]} : vector<16x16xf32> to vector<16x1xf32>
    %53 = vector.shape_cast %52 : vector<16x1xf32> to vector<16x1xf32>
    %54 = vector.broadcast %53 : vector<16x1xf32> to vector<16x2xf32>
    %c0_22 = arith.constant 0 : index
    %c1_23 = arith.constant 1 : index
    %c17 = arith.constant 17 : index
    %55 = vector.load %arg5[%c0_22, %c1_23, %c17] : memref<4x18x34xf32, #tpu.memory_space<vmem>>, vector<1x16x2xf32>
    %56 = vector.shape_cast %55 : vector<1x16x2xf32> to vector<16x2xf32>
    %57 = vector.shape_cast %54 : vector<16x2xf32> to vector<1x16x2xf32>
    tpu.vector_store %arg5[%c0_22, %c1_23, %c17], %57 {strides = array<i32>} : memref<4x18x34xf32, #tpu.memory_space<vmem>>, vector<1x16x2xf32>,
    %58 = vector.extract_strided_slice %3 {offsets = [0, 9], sizes = [16, 1], strides = [1, 1]} : vector<16x16xf32> to vector<16x1xf32>
    %59 = vector.shape_cast %58 : vector<16x1xf32> to vector<16x1xf32>
    %60 = vector.broadcast %59 : vector<16x1xf32> to vector<16x2xf32>
    %c0_24 = arith.constant 0 : index
    %c1_25 = arith.constant 1 : index
    %c19 = arith.constant 19 : index
    %61 = vector.load %arg5[%c0_24, %c1_25, %c19] : memref<4x18x34xf32, #tpu.memory_space<vmem>>, vector<1x16x2xf32>
    %62 = vector.shape_cast %61 : vector<1x16x2xf32> to vector<16x2xf32>
    %63 = vector.shape_cast %60 : vector<16x2xf32> to vector<1x16x2xf32>
    tpu.vector_store %arg5[%c0_24, %c1_25, %c19], %63 {strides = array<i32>} : memref<4x18x34xf32, #tpu.memory_space<vmem>>, vector<1x16x2xf32>,
    %64 = vector.extract_strided_slice %3 {offsets = [0, 10], sizes = [16, 1], strides = [1, 1]} : vector<16x16xf32> to vector<16x1xf32>
    %65 = vector.shape_cast %64 : vector<16x1xf32> to vector<16x1xf32>
    %66 = vector.broadcast %65 : vector<16x1xf32> to vector<16x2xf32>
    %c0_26 = arith.constant 0 : index
    %c1_27 = arith.constant 1 : index
    %c21 = arith.constant 21 : index
    %67 = vector.load %arg5[%c0_26, %c1_27, %c21] : memref<4x18x34xf32, #tpu.memory_space<vmem>>, vector<1x16x2xf32>
    %68 = vector.shape_cast %67 : vector<1x16x2xf32> to vector<16x2xf32>
    %69 = vector.shape_cast %66 : vector<16x2xf32> to vector<1x16x2xf32>
    tpu.vector_store %arg5[%c0_26, %c1_27, %c21], %69 {strides = array<i32>} : memref<4x18x34xf32, #tpu.memory_space<vmem>>, vector<1x16x2xf32>,
    %70 = vector.extract_strided_slice %3 {offsets = [0, 11], sizes = [16, 1], strides = [1, 1]} : vector<16x16xf32> to vector<16x1xf32>
    %71 = vector.shape_cast %70 : vector<16x1xf32> to vector<16x1xf32>
    %72 = vector.broadcast %71 : vector<16x1xf32> to vector<16x2xf32>
    %c0_28 = arith.constant 0 : index
    %c1_29 = arith.constant 1 : index
    %c23 = arith.constant 23 : index
    %73 = vector.load %arg5[%c0_28, %c1_29, %c23] : memref<4x18x34xf32, #tpu.memory_space<vmem>>, vector<1x16x2xf32>
    %74 = vector.shape_cast %73 : vector<1x16x2xf32> to vector<16x2xf32>
    %75 = vector.shape_cast %72 : vector<16x2xf32> to vector<1x16x2xf32>
    tpu.vector_store %arg5[%c0_28, %c1_29, %c23], %75 {strides = array<i32>} : memref<4x18x34xf32, #tpu.memory_space<vmem>>, vector<1x16x2xf32>,
    %76 = vector.extract_strided_slice %3 {offsets = [0, 12], sizes = [16, 1], strides = [1, 1]} : vector<16x16xf32> to vector<16x1xf32>
    %77 = vector.shape_cast %76 : vector<16x1xf32> to vector<16x1xf32>
    %78 = vector.broadcast %77 : vector<16x1xf32> to vector<16x2xf32>
    %c0_30 = arith.constant 0 : index
    %c1_31 = arith.constant 1 : index
    %c25 = arith.constant 25 : index
    %79 = vector.load %arg5[%c0_30, %c1_31, %c25] : memref<4x18x34xf32, #tpu.memory_space<vmem>>, vector<1x16x2xf32>
    %80 = vector.shape_cast %79 : vector<1x16x2xf32> to vector<16x2xf32>
    %81 = vector.shape_cast %78 : vector<16x2xf32> to vector<1x16x2xf32>
    tpu.vector_store %arg5[%c0_30, %c1_31, %c25], %81 {strides = array<i32>} : memref<4x18x34xf32, #tpu.memory_space<vmem>>, vector<1x16x2xf32>,
    %82 = vector.extract_strided_slice %3 {offsets = [0, 13], sizes = [16, 1], strides = [1, 1]} : vector<16x16xf32> to vector<16x1xf32>
    %83 = vector.shape_cast %82 : vector<16x1xf32> to vector<16x1xf32>
    %84 = vector.broadcast %83 : vector<16x1xf32> to vector<16x2xf32>
    %c0_32 = arith.constant 0 : index
    %c1_33 = arith.constant 1 : index
    %c27 = arith.constant 27 : index
    %85 = vector.load %arg5[%c0_32, %c1_33, %c27] : memref<4x18x34xf32, #tpu.memory_space<vmem>>, vector<1x16x2xf32>
    %86 = vector.shape_cast %85 : vector<1x16x2xf32> to vector<16x2xf32>
    %87 = vector.shape_cast %84 : vector<16x2xf32> to vector<1x16x2xf32>
    tpu.vector_store %arg5[%c0_32, %c1_33, %c27], %87 {strides = array<i32>} : memref<4x18x34xf32, #tpu.memory_space<vmem>>, vector<1x16x2xf32>,
    %88 = vector.extract_strided_slice %3 {offsets = [0, 14], sizes = [16, 1], strides = [1, 1]} : vector<16x16xf32> to vector<16x1xf32>
    %89 = vector.shape_cast %88 : vector<16x1xf32> to vector<16x1xf32>
    %90 = vector.broadcast %89 : vector<16x1xf32> to vector<16x2xf32>
    %c0_34 = arith.constant 0 : index
    %c1_35 = arith.constant 1 : index
    %c29 = arith.constant 29 : index
    %91 = vector.load %arg5[%c0_34, %c1_35, %c29] : memref<4x18x34xf32, #tpu.memory_space<vmem>>, vector<1x16x2xf32>
    %92 = vector.shape_cast %91 : vector<1x16x2xf32> to vector<16x2xf32>
    %93 = vector.shape_cast %90 : vector<16x2xf32> to vector<1x16x2xf32>
    tpu.vector_store %arg5[%c0_34, %c1_35, %c29], %93 {strides = array<i32>} : memref<4x18x34xf32, #tpu.memory_space<vmem>>, vector<1x16x2xf32>,
    %94 = vector.extract_strided_slice %3 {offsets = [0, 15], sizes = [16, 1], strides = [1, 1]} : vector<16x16xf32> to vector<16x1xf32>
    %95 = vector.shape_cast %94 : vector<16x1xf32> to vector<16x1xf32>
    %96 = vector.broadcast %95 : vector<16x1xf32> to vector<16x2xf32>
    %c0_36 = arith.constant 0 : index
    %c1_37 = arith.constant 1 : index
    %c31 = arith.constant 31 : index
    %97 = vector.load %arg5[%c0_36, %c1_37, %c31] : memref<4x18x34xf32, #tpu.memory_space<vmem>>, vector<1x16x2xf32>
    %98 = vector.shape_cast %97 : vector<1x16x2xf32> to vector<16x2xf32>
    %99 = vector.shape_cast %96 : vector<16x2xf32> to vector<1x16x2xf32>
    tpu.vector_store %arg5[%c0_36, %c1_37, %c31], %99 {strides = array<i32>} : memref<4x18x34xf32, #tpu.memory_space<vmem>>, vector<1x16x2xf32>,
    %c0_38 = arith.constant 0 : index
    %c1_39 = arith.constant 1 : index
    %c0_40 = arith.constant 0 : index
    %c0_41 = arith.constant 0 : index
    %100 = vector.load %arg1[%c0_38, %c1_39, %c0_40, %c0_41] : memref<1x4x16x16xf32, #tpu.memory_space<vmem>>, vector<1x1x16x16xf32>
    %101 = vector.shape_cast %100 : vector<1x1x16x16xf32> to vector<16x16xf32>
    %102 = vector.extract_strided_slice %101 {offsets = [0, 0], sizes = [16, 1], strides = [1, 1]} : vector<16x16xf32> to vector<16x1xf32>
    %103 = vector.shape_cast %102 : vector<16x1xf32> to vector<16x1xf32>
    %104 = vector.broadcast %103 : vector<16x1xf32> to vector<16x2xf32>
    %c1_42 = arith.constant 1 : index
    %c1_43 = arith.constant 1 : index
    %c1_44 = arith.constant 1 : index
    %105 = vector.load %arg5[%c1_42, %c1_43, %c1_44] : memref<4x18x34xf32, #tpu.memory_space<vmem>>, vector<1x16x2xf32>
    %106 = vector.shape_cast %105 : vector<1x16x2xf32> to vector<16x2xf32>
    %107 = vector.shape_cast %104 : vector<16x2xf32> to vector<1x16x2xf32>
    tpu.vector_store %arg5[%c1_42, %c1_43, %c1_44], %107 {strides = array<i32>} : memref<4x18x34xf32, #tpu.memory_space<vmem>>, vector<1x16x2xf32>,
    %108 = vector.extract_strided_slice %101 {offsets = [0, 1], sizes = [16, 1], strides = [1, 1]} : vector<16x16xf32> to vector<16x1xf32>
    %109 = vector.shape_cast %108 : vector<16x1xf32> to vector<16x1xf32>
    %110 = vector.broadcast %109 : vector<16x1xf32> to vector<16x2xf32>
    %c1_45 = arith.constant 1 : index
    %c1_46 = arith.constant 1 : index
    %c3_47 = arith.constant 3 : index
    %111 = vector.load %arg5[%c1_45, %c1_46, %c3_47] : memref<4x18x34xf32, #tpu.memory_space<vmem>>, vector<1x16x2xf32>
    %112 = vector.shape_cast %111 : vector<1x16x2xf32> to vector<16x2xf32>
    %113 = vector.shape_cast %110 : vector<16x2xf32> to vector<1x16x2xf32>
    tpu.vector_store %arg5[%c1_45, %c1_46, %c3_47], %113 {strides = array<i32>} : memref<4x18x34xf32, #tpu.memory_space<vmem>>, vector<1x16x2xf32>,
    %114 = vector.extract_strided_slice %101 {offsets = [0, 2], sizes = [16, 1], strides = [1, 1]} : vector<16x16xf32> to vector<16x1xf32>
    %115 = vector.shape_cast %114 : vector<16x1xf32> to vector<16x1xf32>
    %116 = vector.broadcast %115 : vector<16x1xf32> to vector<16x2xf32>
    %c1_48 = arith.constant 1 : index
    %c1_49 = arith.constant 1 : index
    %c5_50 = arith.constant 5 : index
    %117 = vector.load %arg5[%c1_48, %c1_49, %c5_50] : memref<4x18x34xf32, #tpu.memory_space<vmem>>, vector<1x16x2xf32>
    %118 = vector.shape_cast %117 : vector<1x16x2xf32> to vector<16x2xf32>
    %119 = vector.shape_cast %116 : vector<16x2xf32> to vector<1x16x2xf32>
    tpu.vector_store %arg5[%c1_48, %c1_49, %c5_50], %119 {strides = array<i32>} : memref<4x18x34xf32, #tpu.memory_space<vmem>>, vector<1x16x2xf32>,
    %120 = vector.extract_strided_slice %101 {offsets = [0, 3], sizes = [16, 1], strides = [1, 1]} : vector<16x16xf32> to vector<16x1xf32>
    %121 = vector.shape_cast %120 : vector<16x1xf32> to vector<16x1xf32>
    %122 = vector.broadcast %121 : vector<16x1xf32> to vector<16x2xf32>
    %c1_51 = arith.constant 1 : index
    %c1_52 = arith.constant 1 : index
    %c7_53 = arith.constant 7 : index
    %123 = vector.load %arg5[%c1_51, %c1_52, %c7_53] : memref<4x18x34xf32, #tpu.memory_space<vmem>>, vector<1x16x2xf32>
    %124 = vector.shape_cast %123 : vector<1x16x2xf32> to vector<16x2xf32>
    %125 = vector.shape_cast %122 : vector<16x2xf32> to vector<1x16x2xf32>
    tpu.vector_store %arg5[%c1_51, %c1_52, %c7_53], %125 {strides = array<i32>} : memref<4x18x34xf32, #tpu.memory_space<vmem>>, vector<1x16x2xf32>,
    %126 = vector.extract_strided_slice %101 {offsets = [0, 4], sizes = [16, 1], strides = [1, 1]} : vector<16x16xf32> to vector<16x1xf32>
    %127 = vector.shape_cast %126 : vector<16x1xf32> to vector<16x1xf32>
    %128 = vector.broadcast %127 : vector<16x1xf32> to vector<16x2xf32>
    %c1_54 = arith.constant 1 : index
    %c1_55 = arith.constant 1 : index
    %c9_56 = arith.constant 9 : index
    %129 = vector.load %arg5[%c1_54, %c1_55, %c9_56] : memref<4x18x34xf32, #tpu.memory_space<vmem>>, vector<1x16x2xf32>
    %130 = vector.shape_cast %129 : vector<1x16x2xf32> to vector<16x2xf32>
    %131 = vector.shape_cast %128 : vector<16x2xf32> to vector<1x16x2xf32>
    tpu.vector_store %arg5[%c1_54, %c1_55, %c9_56], %131 {strides = array<i32>} : memref<4x18x34xf32, #tpu.memory_space<vmem>>, vector<1x16x2xf32>,
    %132 = vector.extract_strided_slice %101 {offsets = [0, 5], sizes = [16, 1], strides = [1, 1]} : vector<16x16xf32> to vector<16x1xf32>
    %133 = vector.shape_cast %132 : vector<16x1xf32> to vector<16x1xf32>
    %134 = vector.broadcast %133 : vector<16x1xf32> to vector<16x2xf32>
    %c1_57 = arith.constant 1 : index
    %c1_58 = arith.constant 1 : index
    %c11_59 = arith.constant 11 : index
    %135 = vector.load %arg5[%c1_57, %c1_58, %c11_59] : memref<4x18x34xf32, #tpu.memory_space<vmem>>, vector<1x16x2xf32>
    %136 = vector.shape_cast %135 : vector<1x16x2xf32> to vector<16x2xf32>
    %137 = vector.shape_cast %134 : vector<16x2xf32> to vector<1x16x2xf32>
    tpu.vector_store %arg5[%c1_57, %c1_58, %c11_59], %137 {strides = array<i32>} : memref<4x18x34xf32, #tpu.memory_space<vmem>>, vector<1x16x2xf32>,
    %138 = vector.extract_strided_slice %101 {offsets = [0, 6], sizes = [16, 1], strides = [1, 1]} : vector<16x16xf32> to vector<16x1xf32>
    %139 = vector.shape_cast %138 : vector<16x1xf32> to vector<16x1xf32>
    %140 = vector.broadcast %139 : vector<16x1xf32> to vector<16x2xf32>
    %c1_60 = arith.constant 1 : index
    %c1_61 = arith.constant 1 : index
    %c13_62 = arith.constant 13 : index
    %141 = vector.load %arg5[%c1_60, %c1_61, %c13_62] : memref<4x18x34xf32, #tpu.memory_space<vmem>>, vector<1x16x2xf32>
    %142 = vector.shape_cast %141 : vector<1x16x2xf32> to vector<16x2xf32>
    %143 = vector.shape_cast %140 : vector<16x2xf32> to vector<1x16x2xf32>
    tpu.vector_store %arg5[%c1_60, %c1_61, %c13_62], %143 {strides = array<i32>} : memref<4x18x34xf32, #tpu.memory_space<vmem>>, vector<1x16x2xf32>,
    %144 = vector.extract_strided_slice %101 {offsets = [0, 7], sizes = [16, 1], strides = [1, 1]} : vector<16x16xf32> to vector<16x1xf32>
    %145 = vector.shape_cast %144 : vector<16x1xf32> to vector<16x1xf32>
    %146 = vector.broadcast %145 : vector<16x1xf32> to vector<16x2xf32>
    %c1_63 = arith.constant 1 : index
    %c1_64 = arith.constant 1 : index
    %c15_65 = arith.constant 15 : index
    %147 = vector.load %arg5[%c1_63, %c1_64, %c15_65] : memref<4x18x34xf32, #tpu.memory_space<vmem>>, vector<1x16x2xf32>
    %148 = vector.shape_cast %147 : vector<1x16x2xf32> to vector<16x2xf32>
    %149 = vector.shape_cast %146 : vector<16x2xf32> to vector<1x16x2xf32>
    tpu.vector_store %arg5[%c1_63, %c1_64, %c15_65], %149 {strides = array<i32>} : memref<4x18x34xf32, #tpu.memory_space<vmem>>, vector<1x16x2xf32>,
    %150 = vector.extract_strided_slice %101 {offsets = [0, 8], sizes = [16, 1], strides = [1, 1]} : vector<16x16xf32> to vector<16x1xf32>
    %151 = vector.shape_cast %150 : vector<16x1xf32> to vector<16x1xf32>
    %152 = vector.broadcast %151 : vector<16x1xf32> to vector<16x2xf32>
    %c1_66 = arith.constant 1 : index
    %c1_67 = arith.constant 1 : index
    %c17_68 = arith.constant 17 : index
    %153 = vector.load %arg5[%c1_66, %c1_67, %c17_68] : memref<4x18x34xf32, #tpu.memory_space<vmem>>, vector<1x16x2xf32>
    %154 = vector.shape_cast %153 : vector<1x16x2xf32> to vector<16x2xf32>
    %155 = vector.shape_cast %152 : vector<16x2xf32> to vector<1x16x2xf32>
    tpu.vector_store %arg5[%c1_66, %c1_67, %c17_68], %155 {strides = array<i32>} : memref<4x18x34xf32, #tpu.memory_space<vmem>>, vector<1x16x2xf32>,
    %156 = vector.extract_strided_slice %101 {offsets = [0, 9], sizes = [16, 1], strides = [1, 1]} : vector<16x16xf32> to vector<16x1xf32>
    %157 = vector.shape_cast %156 : vector<16x1xf32> to vector<16x1xf32>
    %158 = vector.broadcast %157 : vector<16x1xf32> to vector<16x2xf32>
    %c1_69 = arith.constant 1 : index
    %c1_70 = arith.constant 1 : index
    %c19_71 = arith.constant 19 : index
    %159 = vector.load %arg5[%c1_69, %c1_70, %c19_71] : memref<4x18x34xf32, #tpu.memory_space<vmem>>, vector<1x16x2xf32>
    %160 = vector.shape_cast %159 : vector<1x16x2xf32> to vector<16x2xf32>
    %161 = vector.shape_cast %158 : vector<16x2xf32> to vector<1x16x2xf32>
    tpu.vector_store %arg5[%c1_69, %c1_70, %c19_71], %161 {strides = array<i32>} : memref<4x18x34xf32, #tpu.memory_space<vmem>>, vector<1x16x2xf32>,
    %162 = vector.extract_strided_slice %101 {offsets = [0, 10], sizes = [16, 1], strides = [1, 1]} : vector<16x16xf32> to vector<16x1xf32>
    %163 = vector.shape_cast %162 : vector<16x1xf32> to vector<16x1xf32>
    %164 = vector.broadcast %163 : vector<16x1xf32> to vector<16x2xf32>
    %c1_72 = arith.constant 1 : index
    %c1_73 = arith.constant 1 : index
    %c21_74 = arith.constant 21 : index
    %165 = vector.load %arg5[%c1_72, %c1_73, %c21_74] : memref<4x18x34xf32, #tpu.memory_space<vmem>>, vector<1x16x2xf32>
    %166 = vector.shape_cast %165 : vector<1x16x2xf32> to vector<16x2xf32>
    %167 = vector.shape_cast %164 : vector<16x2xf32> to vector<1x16x2xf32>
    tpu.vector_store %arg5[%c1_72, %c1_73, %c21_74], %167 {strides = array<i32>} : memref<4x18x34xf32, #tpu.memory_space<vmem>>, vector<1x16x2xf32>,
    %168 = vector.extract_strided_slice %101 {offsets = [0, 11], sizes = [16, 1], strides = [1, 1]} : vector<16x16xf32> to vector<16x1xf32>
    %169 = vector.shape_cast %168 : vector<16x1xf32> to vector<16x1xf32>
    %170 = vector.broadcast %169 : vector<16x1xf32> to vector<16x2xf32>
    %c1_75 = arith.constant 1 : index
    %c1_76 = arith.constant 1 : index
    %c23_77 = arith.constant 23 : index
    %171 = vector.load %arg5[%c1_75, %c1_76, %c23_77] : memref<4x18x34xf32, #tpu.memory_space<vmem>>, vector<1x16x2xf32>
    %172 = vector.shape_cast %171 : vector<1x16x2xf32> to vector<16x2xf32>
    %173 = vector.shape_cast %170 : vector<16x2xf32> to vector<1x16x2xf32>
    tpu.vector_store %arg5[%c1_75, %c1_76, %c23_77], %173 {strides = array<i32>} : memref<4x18x34xf32, #tpu.memory_space<vmem>>, vector<1x16x2xf32>,
    %174 = vector.extract_strided_slice %101 {offsets = [0, 12], sizes = [16, 1], strides = [1, 1]} : vector<16x16xf32> to vector<16x1xf32>
    %175 = vector.shape_cast %174 : vector<16x1xf32> to vector<16x1xf32>
    %176 = vector.broadcast %175 : vector<16x1xf32> to vector<16x2xf32>
    %c1_78 = arith.constant 1 : index
    %c1_79 = arith.constant 1 : index
    %c25_80 = arith.constant 25 : index
    %177 = vector.load %arg5[%c1_78, %c1_79, %c25_80] : memref<4x18x34xf32, #tpu.memory_space<vmem>>, vector<1x16x2xf32>
    %178 = vector.shape_cast %177 : vector<1x16x2xf32> to vector<16x2xf32>
    %179 = vector.shape_cast %176 : vector<16x2xf32> to vector<1x16x2xf32>
    tpu.vector_store %arg5[%c1_78, %c1_79, %c25_80], %179 {strides = array<i32>} : memref<4x18x34xf32, #tpu.memory_space<vmem>>, vector<1x16x2xf32>,
    %180 = vector.extract_strided_slice %101 {offsets = [0, 13], sizes = [16, 1], strides = [1, 1]} : vector<16x16xf32> to vector<16x1xf32>
    %181 = vector.shape_cast %180 : vector<16x1xf32> to vector<16x1xf32>
    %182 = vector.broadcast %181 : vector<16x1xf32> to vector<16x2xf32>
    %c1_81 = arith.constant 1 : index
    %c1_82 = arith.constant 1 : index
    %c27_83 = arith.constant 27 : index
    %183 = vector.load %arg5[%c1_81, %c1_82, %c27_83] : memref<4x18x34xf32, #tpu.memory_space<vmem>>, vector<1x16x2xf32>
    %184 = vector.shape_cast %183 : vector<1x16x2xf32> to vector<16x2xf32>
    %185 = vector.shape_cast %182 : vector<16x2xf32> to vector<1x16x2xf32>
    tpu.vector_store %arg5[%c1_81, %c1_82, %c27_83], %185 {strides = array<i32>} : memref<4x18x34xf32, #tpu.memory_space<vmem>>, vector<1x16x2xf32>,
    %186 = vector.extract_strided_slice %101 {offsets = [0, 14], sizes = [16, 1], strides = [1, 1]} : vector<16x16xf32> to vector<16x1xf32>
    %187 = vector.shape_cast %186 : vector<16x1xf32> to vector<16x1xf32>
    %188 = vector.broadcast %187 : vector<16x1xf32> to vector<16x2xf32>
    %c1_84 = arith.constant 1 : index
    %c1_85 = arith.constant 1 : index
    %c29_86 = arith.constant 29 : index
    %189 = vector.load %arg5[%c1_84, %c1_85, %c29_86] : memref<4x18x34xf32, #tpu.memory_space<vmem>>, vector<1x16x2xf32>
    %190 = vector.shape_cast %189 : vector<1x16x2xf32> to vector<16x2xf32>
    %191 = vector.shape_cast %188 : vector<16x2xf32> to vector<1x16x2xf32>
    tpu.vector_store %arg5[%c1_84, %c1_85, %c29_86], %191 {strides = array<i32>} : memref<4x18x34xf32, #tpu.memory_space<vmem>>, vector<1x16x2xf32>,
    %192 = vector.extract_strided_slice %101 {offsets = [0, 15], sizes = [16, 1], strides = [1, 1]} : vector<16x16xf32> to vector<16x1xf32>
    %193 = vector.shape_cast %192 : vector<16x1xf32> to vector<16x1xf32>
    %194 = vector.broadcast %193 : vector<16x1xf32> to vector<16x2xf32>
    %c1_87 = arith.constant 1 : index
    %c1_88 = arith.constant 1 : index
    %c31_89 = arith.constant 31 : index
    %195 = vector.load %arg5[%c1_87, %c1_88, %c31_89] : memref<4x18x34xf32, #tpu.memory_space<vmem>>, vector<1x16x2xf32>
    %196 = vector.shape_cast %195 : vector<1x16x2xf32> to vector<16x2xf32>
    %197 = vector.shape_cast %194 : vector<16x2xf32> to vector<1x16x2xf32>
    tpu.vector_store %arg5[%c1_87, %c1_88, %c31_89], %197 {strides = array<i32>} : memref<4x18x34xf32, #tpu.memory_space<vmem>>, vector<1x16x2xf32>,
    %c0_90 = arith.constant 0 : index
    %c2 = arith.constant 2 : index
    %c0_91 = arith.constant 0 : index
    %c0_92 = arith.constant 0 : index
    %198 = vector.load %arg1[%c0_90, %c2, %c0_91, %c0_92] : memref<1x4x16x16xf32, #tpu.memory_space<vmem>>, vector<1x1x16x16xf32>
    %199 = vector.shape_cast %198 : vector<1x1x16x16xf32> to vector<16x16xf32>
    %200 = vector.extract_strided_slice %199 {offsets = [0, 0], sizes = [16, 1], strides = [1, 1]} : vector<16x16xf32> to vector<16x1xf32>
    %201 = vector.shape_cast %200 : vector<16x1xf32> to vector<16x1xf32>
    %202 = vector.broadcast %201 : vector<16x1xf32> to vector<16x2xf32>
    %c2_93 = arith.constant 2 : index
    %c1_94 = arith.constant 1 : index
    %c1_95 = arith.constant 1 : index
    %203 = vector.load %arg5[%c2_93, %c1_94, %c1_95] : memref<4x18x34xf32, #tpu.memory_space<vmem>>, vector<1x16x2xf32>
    %204 = vector.shape_cast %203 : vector<1x16x2xf32> to vector<16x2xf32>
    %205 = vector.shape_cast %202 : vector<16x2xf32> to vector<1x16x2xf32>
    tpu.vector_store %arg5[%c2_93, %c1_94, %c1_95], %205 {strides = array<i32>} : memref<4x18x34xf32, #tpu.memory_space<vmem>>, vector<1x16x2xf32>,
    %206 = vector.extract_strided_slice %199 {offsets = [0, 1], sizes = [16, 1], strides = [1, 1]} : vector<16x16xf32> to vector<16x1xf32>
    %207 = vector.shape_cast %206 : vector<16x1xf32> to vector<16x1xf32>
    %208 = vector.broadcast %207 : vector<16x1xf32> to vector<16x2xf32>
    %c2_96 = arith.constant 2 : index
    %c1_97 = arith.constant 1 : index
    %c3_98 = arith.constant 3 : index
    %209 = vector.load %arg5[%c2_96, %c1_97, %c3_98] : memref<4x18x34xf32, #tpu.memory_space<vmem>>, vector<1x16x2xf32>
    %210 = vector.shape_cast %209 : vector<1x16x2xf32> to vector<16x2xf32>
    %211 = vector.shape_cast %208 : vector<16x2xf32> to vector<1x16x2xf32>
    tpu.vector_store %arg5[%c2_96, %c1_97, %c3_98], %211 {strides = array<i32>} : memref<4x18x34xf32, #tpu.memory_space<vmem>>, vector<1x16x2xf32>,
    %212 = vector.extract_strided_slice %199 {offsets = [0, 2], sizes = [16, 1], strides = [1, 1]} : vector<16x16xf32> to vector<16x1xf32>
    %213 = vector.shape_cast %212 : vector<16x1xf32> to vector<16x1xf32>
    %214 = vector.broadcast %213 : vector<16x1xf32> to vector<16x2xf32>
    %c2_99 = arith.constant 2 : index
    %c1_100 = arith.constant 1 : index
    %c5_101 = arith.constant 5 : index
    %215 = vector.load %arg5[%c2_99, %c1_100, %c5_101] : memref<4x18x34xf32, #tpu.memory_space<vmem>>, vector<1x16x2xf32>
    %216 = vector.shape_cast %215 : vector<1x16x2xf32> to vector<16x2xf32>
    %217 = vector.shape_cast %214 : vector<16x2xf32> to vector<1x16x2xf32>
    tpu.vector_store %arg5[%c2_99, %c1_100, %c5_101], %217 {strides = array<i32>} : memref<4x18x34xf32, #tpu.memory_space<vmem>>, vector<1x16x2xf32>,
    %218 = vector.extract_strided_slice %199 {offsets = [0, 3], sizes = [16, 1], strides = [1, 1]} : vector<16x16xf32> to vector<16x1xf32>
    %219 = vector.shape_cast %218 : vector<16x1xf32> to vector<16x1xf32>
    %220 = vector.broadcast %219 : vector<16x1xf32> to vector<16x2xf32>
    %c2_102 = arith.constant 2 : index
    %c1_103 = arith.constant 1 : index
    %c7_104 = arith.constant 7 : index
    %221 = vector.load %arg5[%c2_102, %c1_103, %c7_104] : memref<4x18x34xf32, #tpu.memory_space<vmem>>, vector<1x16x2xf32>
    %222 = vector.shape_cast %221 : vector<1x16x2xf32> to vector<16x2xf32>
    %223 = vector.shape_cast %220 : vector<16x2xf32> to vector<1x16x2xf32>
    tpu.vector_store %arg5[%c2_102, %c1_103, %c7_104], %223 {strides = array<i32>} : memref<4x18x34xf32, #tpu.memory_space<vmem>>, vector<1x16x2xf32>,
    %224 = vector.extract_strided_slice %199 {offsets = [0, 4], sizes = [16, 1], strides = [1, 1]} : vector<16x16xf32> to vector<16x1xf32>
    %225 = vector.shape_cast %224 : vector<16x1xf32> to vector<16x1xf32>
    %226 = vector.broadcast %225 : vector<16x1xf32> to vector<16x2xf32>
    %c2_105 = arith.constant 2 : index
    %c1_106 = arith.constant 1 : index
    %c9_107 = arith.constant 9 : index
    %227 = vector.load %arg5[%c2_105, %c1_106, %c9_107] : memref<4x18x34xf32, #tpu.memory_space<vmem>>, vector<1x16x2xf32>
    %228 = vector.shape_cast %227 : vector<1x16x2xf32> to vector<16x2xf32>
    %229 = vector.shape_cast %226 : vector<16x2xf32> to vector<1x16x2xf32>
    tpu.vector_store %arg5[%c2_105, %c1_106, %c9_107], %229 {strides = array<i32>} : memref<4x18x34xf32, #tpu.memory_space<vmem>>, vector<1x16x2xf32>,
    %230 = vector.extract_strided_slice %199 {offsets = [0, 5], sizes = [16, 1], strides = [1, 1]} : vector<16x16xf32> to vector<16x1xf32>
    %231 = vector.shape_cast %230 : vector<16x1xf32> to vector<16x1xf32>
    %232 = vector.broadcast %231 : vector<16x1xf32> to vector<16x2xf32>
    %c2_108 = arith.constant 2 : index
    %c1_109 = arith.constant 1 : index
    %c11_110 = arith.constant 11 : index
    %233 = vector.load %arg5[%c2_108, %c1_109, %c11_110] : memref<4x18x34xf32, #tpu.memory_space<vmem>>, vector<1x16x2xf32>
    %234 = vector.shape_cast %233 : vector<1x16x2xf32> to vector<16x2xf32>
    %235 = vector.shape_cast %232 : vector<16x2xf32> to vector<1x16x2xf32>
    tpu.vector_store %arg5[%c2_108, %c1_109, %c11_110], %235 {strides = array<i32>} : memref<4x18x34xf32, #tpu.memory_space<vmem>>, vector<1x16x2xf32>,
    %236 = vector.extract_strided_slice %199 {offsets = [0, 6], sizes = [16, 1], strides = [1, 1]} : vector<16x16xf32> to vector<16x1xf32>
    %237 = vector.shape_cast %236 : vector<16x1xf32> to vector<16x1xf32>
    %238 = vector.broadcast %237 : vector<16x1xf32> to vector<16x2xf32>
    %c2_111 = arith.constant 2 : index
    %c1_112 = arith.constant 1 : index
    %c13_113 = arith.constant 13 : index
    %239 = vector.load %arg5[%c2_111, %c1_112, %c13_113] : memref<4x18x34xf32, #tpu.memory_space<vmem>>, vector<1x16x2xf32>
    %240 = vector.shape_cast %239 : vector<1x16x2xf32> to vector<16x2xf32>
    %241 = vector.shape_cast %238 : vector<16x2xf32> to vector<1x16x2xf32>
    tpu.vector_store %arg5[%c2_111, %c1_112, %c13_113], %241 {strides = array<i32>} : memref<4x18x34xf32, #tpu.memory_space<vmem>>, vector<1x16x2xf32>,
    %242 = vector.extract_strided_slice %199 {offsets = [0, 7], sizes = [16, 1], strides = [1, 1]} : vector<16x16xf32> to vector<16x1xf32>
    %243 = vector.shape_cast %242 : vector<16x1xf32> to vector<16x1xf32>
    %244 = vector.broadcast %243 : vector<16x1xf32> to vector<16x2xf32>
    %c2_114 = arith.constant 2 : index
    %c1_115 = arith.constant 1 : index
    %c15_116 = arith.constant 15 : index
    %245 = vector.load %arg5[%c2_114, %c1_115, %c15_116] : memref<4x18x34xf32, #tpu.memory_space<vmem>>, vector<1x16x2xf32>
    %246 = vector.shape_cast %245 : vector<1x16x2xf32> to vector<16x2xf32>
    %247 = vector.shape_cast %244 : vector<16x2xf32> to vector<1x16x2xf32>
    tpu.vector_store %arg5[%c2_114, %c1_115, %c15_116], %247 {strides = array<i32>} : memref<4x18x34xf32, #tpu.memory_space<vmem>>, vector<1x16x2xf32>,
    %248 = vector.extract_strided_slice %199 {offsets = [0, 8], sizes = [16, 1], strides = [1, 1]} : vector<16x16xf32> to vector<16x1xf32>
    %249 = vector.shape_cast %248 : vector<16x1xf32> to vector<16x1xf32>
    %250 = vector.broadcast %249 : vector<16x1xf32> to vector<16x2xf32>
    %c2_117 = arith.constant 2 : index
    %c1_118 = arith.constant 1 : index
    %c17_119 = arith.constant 17 : index
    %251 = vector.load %arg5[%c2_117, %c1_118, %c17_119] : memref<4x18x34xf32, #tpu.memory_space<vmem>>, vector<1x16x2xf32>
    %252 = vector.shape_cast %251 : vector<1x16x2xf32> to vector<16x2xf32>
    %253 = vector.shape_cast %250 : vector<16x2xf32> to vector<1x16x2xf32>
    tpu.vector_store %arg5[%c2_117, %c1_118, %c17_119], %253 {strides = array<i32>} : memref<4x18x34xf32, #tpu.memory_space<vmem>>, vector<1x16x2xf32>,
    %254 = vector.extract_strided_slice %199 {offsets = [0, 9], sizes = [16, 1], strides = [1, 1]} : vector<16x16xf32> to vector<16x1xf32>
    %255 = vector.shape_cast %254 : vector<16x1xf32> to vector<16x1xf32>
    %256 = vector.broadcast %255 : vector<16x1xf32> to vector<16x2xf32>
    %c2_120 = arith.constant 2 : index
    %c1_121 = arith.constant 1 : index
    %c19_122 = arith.constant 19 : index
    %257 = vector.load %arg5[%c2_120, %c1_121, %c19_122] : memref<4x18x34xf32, #tpu.memory_space<vmem>>, vector<1x16x2xf32>
    %258 = vector.shape_cast %257 : vector<1x16x2xf32> to vector<16x2xf32>
    %259 = vector.shape_cast %256 : vector<16x2xf32> to vector<1x16x2xf32>
    tpu.vector_store %arg5[%c2_120, %c1_121, %c19_122], %259 {strides = array<i32>} : memref<4x18x34xf32, #tpu.memory_space<vmem>>, vector<1x16x2xf32>,
    %260 = vector.extract_strided_slice %199 {offsets = [0, 10], sizes = [16, 1], strides = [1, 1]} : vector<16x16xf32> to vector<16x1xf32>
    %261 = vector.shape_cast %260 : vector<16x1xf32> to vector<16x1xf32>
    %262 = vector.broadcast %261 : vector<16x1xf32> to vector<16x2xf32>
    %c2_123 = arith.constant 2 : index
    %c1_124 = arith.constant 1 : index
    %c21_125 = arith.constant 21 : index
    %263 = vector.load %arg5[%c2_123, %c1_124, %c21_125] : memref<4x18x34xf32, #tpu.memory_space<vmem>>, vector<1x16x2xf32>
    %264 = vector.shape_cast %263 : vector<1x16x2xf32> to vector<16x2xf32>
    %265 = vector.shape_cast %262 : vector<16x2xf32> to vector<1x16x2xf32>
    tpu.vector_store %arg5[%c2_123, %c1_124, %c21_125], %265 {strides = array<i32>} : memref<4x18x34xf32, #tpu.memory_space<vmem>>, vector<1x16x2xf32>,
    %266 = vector.extract_strided_slice %199 {offsets = [0, 11], sizes = [16, 1], strides = [1, 1]} : vector<16x16xf32> to vector<16x1xf32>
    %267 = vector.shape_cast %266 : vector<16x1xf32> to vector<16x1xf32>
    %268 = vector.broadcast %267 : vector<16x1xf32> to vector<16x2xf32>
    %c2_126 = arith.constant 2 : index
    %c1_127 = arith.constant 1 : index
    %c23_128 = arith.constant 23 : index
    %269 = vector.load %arg5[%c2_126, %c1_127, %c23_128] : memref<4x18x34xf32, #tpu.memory_space<vmem>>, vector<1x16x2xf32>
    %270 = vector.shape_cast %269 : vector<1x16x2xf32> to vector<16x2xf32>
    %271 = vector.shape_cast %268 : vector<16x2xf32> to vector<1x16x2xf32>
    tpu.vector_store %arg5[%c2_126, %c1_127, %c23_128], %271 {strides = array<i32>} : memref<4x18x34xf32, #tpu.memory_space<vmem>>, vector<1x16x2xf32>,
    %272 = vector.extract_strided_slice %199 {offsets = [0, 12], sizes = [16, 1], strides = [1, 1]} : vector<16x16xf32> to vector<16x1xf32>
    %273 = vector.shape_cast %272 : vector<16x1xf32> to vector<16x1xf32>
    %274 = vector.broadcast %273 : vector<16x1xf32> to vector<16x2xf32>
    %c2_129 = arith.constant 2 : index
    %c1_130 = arith.constant 1 : index
    %c25_131 = arith.constant 25 : index
    %275 = vector.load %arg5[%c2_129, %c1_130, %c25_131] : memref<4x18x34xf32, #tpu.memory_space<vmem>>, vector<1x16x2xf32>
    %276 = vector.shape_cast %275 : vector<1x16x2xf32> to vector<16x2xf32>
    %277 = vector.shape_cast %274 : vector<16x2xf32> to vector<1x16x2xf32>
    tpu.vector_store %arg5[%c2_129, %c1_130, %c25_131], %277 {strides = array<i32>} : memref<4x18x34xf32, #tpu.memory_space<vmem>>, vector<1x16x2xf32>,
    %278 = vector.extract_strided_slice %199 {offsets = [0, 13], sizes = [16, 1], strides = [1, 1]} : vector<16x16xf32> to vector<16x1xf32>
    %279 = vector.shape_cast %278 : vector<16x1xf32> to vector<16x1xf32>
    %280 = vector.broadcast %279 : vector<16x1xf32> to vector<16x2xf32>
    %c2_132 = arith.constant 2 : index
    %c1_133 = arith.constant 1 : index
    %c27_134 = arith.constant 27 : index
    %281 = vector.load %arg5[%c2_132, %c1_133, %c27_134] : memref<4x18x34xf32, #tpu.memory_space<vmem>>, vector<1x16x2xf32>
    %282 = vector.shape_cast %281 : vector<1x16x2xf32> to vector<16x2xf32>
    %283 = vector.shape_cast %280 : vector<16x2xf32> to vector<1x16x2xf32>
    tpu.vector_store %arg5[%c2_132, %c1_133, %c27_134], %283 {strides = array<i32>} : memref<4x18x34xf32, #tpu.memory_space<vmem>>, vector<1x16x2xf32>,
    %284 = vector.extract_strided_slice %199 {offsets = [0, 14], sizes = [16, 1], strides = [1, 1]} : vector<16x16xf32> to vector<16x1xf32>
    %285 = vector.shape_cast %284 : vector<16x1xf32> to vector<16x1xf32>
    %286 = vector.broadcast %285 : vector<16x1xf32> to vector<16x2xf32>
    %c2_135 = arith.constant 2 : index
    %c1_136 = arith.constant 1 : index
    %c29_137 = arith.constant 29 : index
    %287 = vector.load %arg5[%c2_135, %c1_136, %c29_137] : memref<4x18x34xf32, #tpu.memory_space<vmem>>, vector<1x16x2xf32>
    %288 = vector.shape_cast %287 : vector<1x16x2xf32> to vector<16x2xf32>
    %289 = vector.shape_cast %286 : vector<16x2xf32> to vector<1x16x2xf32>
    tpu.vector_store %arg5[%c2_135, %c1_136, %c29_137], %289 {strides = array<i32>} : memref<4x18x34xf32, #tpu.memory_space<vmem>>, vector<1x16x2xf32>,
    %290 = vector.extract_strided_slice %199 {offsets = [0, 15], sizes = [16, 1], strides = [1, 1]} : vector<16x16xf32> to vector<16x1xf32>
    %291 = vector.shape_cast %290 : vector<16x1xf32> to vector<16x1xf32>
    %292 = vector.broadcast %291 : vector<16x1xf32> to vector<16x2xf32>
    %c2_138 = arith.constant 2 : index
    %c1_139 = arith.constant 1 : index
    %c31_140 = arith.constant 31 : index
    %293 = vector.load %arg5[%c2_138, %c1_139, %c31_140] : memref<4x18x34xf32, #tpu.memory_space<vmem>>, vector<1x16x2xf32>
    %294 = vector.shape_cast %293 : vector<1x16x2xf32> to vector<16x2xf32>
    %295 = vector.shape_cast %292 : vector<16x2xf32> to vector<1x16x2xf32>
    tpu.vector_store %arg5[%c2_138, %c1_139, %c31_140], %295 {strides = array<i32>} : memref<4x18x34xf32, #tpu.memory_space<vmem>>, vector<1x16x2xf32>,
    %c0_141 = arith.constant 0 : index
    %c3_142 = arith.constant 3 : index
    %c0_143 = arith.constant 0 : index
    %c0_144 = arith.constant 0 : index
    %296 = vector.load %arg1[%c0_141, %c3_142, %c0_143, %c0_144] : memref<1x4x16x16xf32, #tpu.memory_space<vmem>>, vector<1x1x16x16xf32>
    %297 = vector.shape_cast %296 : vector<1x1x16x16xf32> to vector<16x16xf32>
    %298 = vector.extract_strided_slice %297 {offsets = [0, 0], sizes = [16, 1], strides = [1, 1]} : vector<16x16xf32> to vector<16x1xf32>
    %299 = vector.shape_cast %298 : vector<16x1xf32> to vector<16x1xf32>
    %300 = vector.broadcast %299 : vector<16x1xf32> to vector<16x2xf32>
    %c3_145 = arith.constant 3 : index
    %c1_146 = arith.constant 1 : index
    %c1_147 = arith.constant 1 : index
    %301 = vector.load %arg5[%c3_145, %c1_146, %c1_147] : memref<4x18x34xf32, #tpu.memory_space<vmem>>, vector<1x16x2xf32>
    %302 = vector.shape_cast %301 : vector<1x16x2xf32> to vector<16x2xf32>
    %303 = vector.shape_cast %300 : vector<16x2xf32> to vector<1x16x2xf32>
    tpu.vector_store %arg5[%c3_145, %c1_146, %c1_147], %303 {strides = array<i32>} : memref<4x18x34xf32, #tpu.memory_space<vmem>>, vector<1x16x2xf32>,
    %304 = vector.extract_strided_slice %297 {offsets = [0, 1], sizes = [16, 1], strides = [1, 1]} : vector<16x16xf32> to vector<16x1xf32>
    %305 = vector.shape_cast %304 : vector<16x1xf32> to vector<16x1xf32>
    %306 = vector.broadcast %305 : vector<16x1xf32> to vector<16x2xf32>
    %c3_148 = arith.constant 3 : index
    %c1_149 = arith.constant 1 : index
    %c3_150 = arith.constant 3 : index
    %307 = vector.load %arg5[%c3_148, %c1_149, %c3_150] : memref<4x18x34xf32, #tpu.memory_space<vmem>>, vector<1x16x2xf32>
    %308 = vector.shape_cast %307 : vector<1x16x2xf32> to vector<16x2xf32>
    %309 = vector.shape_cast %306 : vector<16x2xf32> to vector<1x16x2xf32>
    tpu.vector_store %arg5[%c3_148, %c1_149, %c3_150], %309 {strides = array<i32>} : memref<4x18x34xf32, #tpu.memory_space<vmem>>, vector<1x16x2xf32>,
    %310 = vector.extract_strided_slice %297 {offsets = [0, 2], sizes = [16, 1], strides = [1, 1]} : vector<16x16xf32> to vector<16x1xf32>
    %311 = vector.shape_cast %310 : vector<16x1xf32> to vector<16x1xf32>
    %312 = vector.broadcast %311 : vector<16x1xf32> to vector<16x2xf32>
    %c3_151 = arith.constant 3 : index
    %c1_152 = arith.constant 1 : index
    %c5_153 = arith.constant 5 : index
    %313 = vector.load %arg5[%c3_151, %c1_152, %c5_153] : memref<4x18x34xf32, #tpu.memory_space<vmem>>, vector<1x16x2xf32>
    %314 = vector.shape_cast %313 : vector<1x16x2xf32> to vector<16x2xf32>
    %315 = vector.shape_cast %312 : vector<16x2xf32> to vector<1x16x2xf32>
    tpu.vector_store %arg5[%c3_151, %c1_152, %c5_153], %315 {strides = array<i32>} : memref<4x18x34xf32, #tpu.memory_space<vmem>>, vector<1x16x2xf32>,
    %316 = vector.extract_strided_slice %297 {offsets = [0, 3], sizes = [16, 1], strides = [1, 1]} : vector<16x16xf32> to vector<16x1xf32>
    %317 = vector.shape_cast %316 : vector<16x1xf32> to vector<16x1xf32>
    %318 = vector.broadcast %317 : vector<16x1xf32> to vector<16x2xf32>
    %c3_154 = arith.constant 3 : index
    %c1_155 = arith.constant 1 : index
    %c7_156 = arith.constant 7 : index
    %319 = vector.load %arg5[%c3_154, %c1_155, %c7_156] : memref<4x18x34xf32, #tpu.memory_space<vmem>>, vector<1x16x2xf32>
    %320 = vector.shape_cast %319 : vector<1x16x2xf32> to vector<16x2xf32>
    %321 = vector.shape_cast %318 : vector<16x2xf32> to vector<1x16x2xf32>
    tpu.vector_store %arg5[%c3_154, %c1_155, %c7_156], %321 {strides = array<i32>} : memref<4x18x34xf32, #tpu.memory_space<vmem>>, vector<1x16x2xf32>,
    %322 = vector.extract_strided_slice %297 {offsets = [0, 4], sizes = [16, 1], strides = [1, 1]} : vector<16x16xf32> to vector<16x1xf32>
    %323 = vector.shape_cast %322 : vector<16x1xf32> to vector<16x1xf32>
    %324 = vector.broadcast %323 : vector<16x1xf32> to vector<16x2xf32>
    %c3_157 = arith.constant 3 : index
    %c1_158 = arith.constant 1 : index
    %c9_159 = arith.constant 9 : index
    %325 = vector.load %arg5[%c3_157, %c1_158, %c9_159] : memref<4x18x34xf32, #tpu.memory_space<vmem>>, vector<1x16x2xf32>
    %326 = vector.shape_cast %325 : vector<1x16x2xf32> to vector<16x2xf32>
    %327 = vector.shape_cast %324 : vector<16x2xf32> to vector<1x16x2xf32>
    tpu.vector_store %arg5[%c3_157, %c1_158, %c9_159], %327 {strides = array<i32>} : memref<4x18x34xf32, #tpu.memory_space<vmem>>, vector<1x16x2xf32>,
    %328 = vector.extract_strided_slice %297 {offsets = [0, 5], sizes = [16, 1], strides = [1, 1]} : vector<16x16xf32> to vector<16x1xf32>
    %329 = vector.shape_cast %328 : vector<16x1xf32> to vector<16x1xf32>
    %330 = vector.broadcast %329 : vector<16x1xf32> to vector<16x2xf32>
    %c3_160 = arith.constant 3 : index
    %c1_161 = arith.constant 1 : index
    %c11_162 = arith.constant 11 : index
    %331 = vector.load %arg5[%c3_160, %c1_161, %c11_162] : memref<4x18x34xf32, #tpu.memory_space<vmem>>, vector<1x16x2xf32>
    %332 = vector.shape_cast %331 : vector<1x16x2xf32> to vector<16x2xf32>
    %333 = vector.shape_cast %330 : vector<16x2xf32> to vector<1x16x2xf32>
    tpu.vector_store %arg5[%c3_160, %c1_161, %c11_162], %333 {strides = array<i32>} : memref<4x18x34xf32, #tpu.memory_space<vmem>>, vector<1x16x2xf32>,
    %334 = vector.extract_strided_slice %297 {offsets = [0, 6], sizes = [16, 1], strides = [1, 1]} : vector<16x16xf32> to vector<16x1xf32>
    %335 = vector.shape_cast %334 : vector<16x1xf32> to vector<16x1xf32>
    %336 = vector.broadcast %335 : vector<16x1xf32> to vector<16x2xf32>
    %c3_163 = arith.constant 3 : index
    %c1_164 = arith.constant 1 : index
    %c13_165 = arith.constant 13 : index
    %337 = vector.load %arg5[%c3_163, %c1_164, %c13_165] : memref<4x18x34xf32, #tpu.memory_space<vmem>>, vector<1x16x2xf32>
    %338 = vector.shape_cast %337 : vector<1x16x2xf32> to vector<16x2xf32>
    %339 = vector.shape_cast %336 : vector<16x2xf32> to vector<1x16x2xf32>
    tpu.vector_store %arg5[%c3_163, %c1_164, %c13_165], %339 {strides = array<i32>} : memref<4x18x34xf32, #tpu.memory_space<vmem>>, vector<1x16x2xf32>,
    %340 = vector.extract_strided_slice %297 {offsets = [0, 7], sizes = [16, 1], strides = [1, 1]} : vector<16x16xf32> to vector<16x1xf32>
    %341 = vector.shape_cast %340 : vector<16x1xf32> to vector<16x1xf32>
    %342 = vector.broadcast %341 : vector<16x1xf32> to vector<16x2xf32>
    %c3_166 = arith.constant 3 : index
    %c1_167 = arith.constant 1 : index
    %c15_168 = arith.constant 15 : index
    %343 = vector.load %arg5[%c3_166, %c1_167, %c15_168] : memref<4x18x34xf32, #tpu.memory_space<vmem>>, vector<1x16x2xf32>
    %344 = vector.shape_cast %343 : vector<1x16x2xf32> to vector<16x2xf32>
    %345 = vector.shape_cast %342 : vector<16x2xf32> to vector<1x16x2xf32>
    tpu.vector_store %arg5[%c3_166, %c1_167, %c15_168], %345 {strides = array<i32>} : memref<4x18x34xf32, #tpu.memory_space<vmem>>, vector<1x16x2xf32>,
    %346 = vector.extract_strided_slice %297 {offsets = [0, 8], sizes = [16, 1], strides = [1, 1]} : vector<16x16xf32> to vector<16x1xf32>
    %347 = vector.shape_cast %346 : vector<16x1xf32> to vector<16x1xf32>
    %348 = vector.broadcast %347 : vector<16x1xf32> to vector<16x2xf32>
    %c3_169 = arith.constant 3 : index
    %c1_170 = arith.constant 1 : index
    %c17_171 = arith.constant 17 : index
    %349 = vector.load %arg5[%c3_169, %c1_170, %c17_171] : memref<4x18x34xf32, #tpu.memory_space<vmem>>, vector<1x16x2xf32>
    %350 = vector.shape_cast %349 : vector<1x16x2xf32> to vector<16x2xf32>
    %351 = vector.shape_cast %348 : vector<16x2xf32> to vector<1x16x2xf32>
    tpu.vector_store %arg5[%c3_169, %c1_170, %c17_171], %351 {strides = array<i32>} : memref<4x18x34xf32, #tpu.memory_space<vmem>>, vector<1x16x2xf32>,
    %352 = vector.extract_strided_slice %297 {offsets = [0, 9], sizes = [16, 1], strides = [1, 1]} : vector<16x16xf32> to vector<16x1xf32>
    %353 = vector.shape_cast %352 : vector<16x1xf32> to vector<16x1xf32>
    %354 = vector.broadcast %353 : vector<16x1xf32> to vector<16x2xf32>
    %c3_172 = arith.constant 3 : index
    %c1_173 = arith.constant 1 : index
    %c19_174 = arith.constant 19 : index
    %355 = vector.load %arg5[%c3_172, %c1_173, %c19_174] : memref<4x18x34xf32, #tpu.memory_space<vmem>>, vector<1x16x2xf32>
    %356 = vector.shape_cast %355 : vector<1x16x2xf32> to vector<16x2xf32>
    %357 = vector.shape_cast %354 : vector<16x2xf32> to vector<1x16x2xf32>
    tpu.vector_store %arg5[%c3_172, %c1_173, %c19_174], %357 {strides = array<i32>} : memref<4x18x34xf32, #tpu.memory_space<vmem>>, vector<1x16x2xf32>,
    %358 = vector.extract_strided_slice %297 {offsets = [0, 10], sizes = [16, 1], strides = [1, 1]} : vector<16x16xf32> to vector<16x1xf32>
    %359 = vector.shape_cast %358 : vector<16x1xf32> to vector<16x1xf32>
    %360 = vector.broadcast %359 : vector<16x1xf32> to vector<16x2xf32>
    %c3_175 = arith.constant 3 : index
    %c1_176 = arith.constant 1 : index
    %c21_177 = arith.constant 21 : index
    %361 = vector.load %arg5[%c3_175, %c1_176, %c21_177] : memref<4x18x34xf32, #tpu.memory_space<vmem>>, vector<1x16x2xf32>
    %362 = vector.shape_cast %361 : vector<1x16x2xf32> to vector<16x2xf32>
    %363 = vector.shape_cast %360 : vector<16x2xf32> to vector<1x16x2xf32>
    tpu.vector_store %arg5[%c3_175, %c1_176, %c21_177], %363 {strides = array<i32>} : memref<4x18x34xf32, #tpu.memory_space<vmem>>, vector<1x16x2xf32>,
    %364 = vector.extract_strided_slice %297 {offsets = [0, 11], sizes = [16, 1], strides = [1, 1]} : vector<16x16xf32> to vector<16x1xf32>
    %365 = vector.shape_cast %364 : vector<16x1xf32> to vector<16x1xf32>
    %366 = vector.broadcast %365 : vector<16x1xf32> to vector<16x2xf32>
    %c3_178 = arith.constant 3 : index
    %c1_179 = arith.constant 1 : index
    %c23_180 = arith.constant 23 : index
    %367 = vector.load %arg5[%c3_178, %c1_179, %c23_180] : memref<4x18x34xf32, #tpu.memory_space<vmem>>, vector<1x16x2xf32>
    %368 = vector.shape_cast %367 : vector<1x16x2xf32> to vector<16x2xf32>
    %369 = vector.shape_cast %366 : vector<16x2xf32> to vector<1x16x2xf32>
    tpu.vector_store %arg5[%c3_178, %c1_179, %c23_180], %369 {strides = array<i32>} : memref<4x18x34xf32, #tpu.memory_space<vmem>>, vector<1x16x2xf32>,
    %370 = vector.extract_strided_slice %297 {offsets = [0, 12], sizes = [16, 1], strides = [1, 1]} : vector<16x16xf32> to vector<16x1xf32>
    %371 = vector.shape_cast %370 : vector<16x1xf32> to vector<16x1xf32>
    %372 = vector.broadcast %371 : vector<16x1xf32> to vector<16x2xf32>
    %c3_181 = arith.constant 3 : index
    %c1_182 = arith.constant 1 : index
    %c25_183 = arith.constant 25 : index
    %373 = vector.load %arg5[%c3_181, %c1_182, %c25_183] : memref<4x18x34xf32, #tpu.memory_space<vmem>>, vector<1x16x2xf32>
    %374 = vector.shape_cast %373 : vector<1x16x2xf32> to vector<16x2xf32>
    %375 = vector.shape_cast %372 : vector<16x2xf32> to vector<1x16x2xf32>
    tpu.vector_store %arg5[%c3_181, %c1_182, %c25_183], %375 {strides = array<i32>} : memref<4x18x34xf32, #tpu.memory_space<vmem>>, vector<1x16x2xf32>,
    %376 = vector.extract_strided_slice %297 {offsets = [0, 13], sizes = [16, 1], strides = [1, 1]} : vector<16x16xf32> to vector<16x1xf32>
    %377 = vector.shape_cast %376 : vector<16x1xf32> to vector<16x1xf32>
    %378 = vector.broadcast %377 : vector<16x1xf32> to vector<16x2xf32>
    %c3_184 = arith.constant 3 : index
    %c1_185 = arith.constant 1 : index
    %c27_186 = arith.constant 27 : index
    %379 = vector.load %arg5[%c3_184, %c1_185, %c27_186] : memref<4x18x34xf32, #tpu.memory_space<vmem>>, vector<1x16x2xf32>
    %380 = vector.shape_cast %379 : vector<1x16x2xf32> to vector<16x2xf32>
    %381 = vector.shape_cast %378 : vector<16x2xf32> to vector<1x16x2xf32>
    tpu.vector_store %arg5[%c3_184, %c1_185, %c27_186], %381 {strides = array<i32>} : memref<4x18x34xf32, #tpu.memory_space<vmem>>, vector<1x16x2xf32>,
    %382 = vector.extract_strided_slice %297 {offsets = [0, 14], sizes = [16, 1], strides = [1, 1]} : vector<16x16xf32> to vector<16x1xf32>
    %383 = vector.shape_cast %382 : vector<16x1xf32> to vector<16x1xf32>
    %384 = vector.broadcast %383 : vector<16x1xf32> to vector<16x2xf32>
    %c3_187 = arith.constant 3 : index
    %c1_188 = arith.constant 1 : index
    %c29_189 = arith.constant 29 : index
    %385 = vector.load %arg5[%c3_187, %c1_188, %c29_189] : memref<4x18x34xf32, #tpu.memory_space<vmem>>, vector<1x16x2xf32>
    %386 = vector.shape_cast %385 : vector<1x16x2xf32> to vector<16x2xf32>
    %387 = vector.shape_cast %384 : vector<16x2xf32> to vector<1x16x2xf32>
    tpu.vector_store %arg5[%c3_187, %c1_188, %c29_189], %387 {strides = array<i32>} : memref<4x18x34xf32, #tpu.memory_space<vmem>>, vector<1x16x2xf32>,
    %388 = vector.extract_strided_slice %297 {offsets = [0, 15], sizes = [16, 1], strides = [1, 1]} : vector<16x16xf32> to vector<16x1xf32>
    %389 = vector.shape_cast %388 : vector<16x1xf32> to vector<16x1xf32>
    %390 = vector.broadcast %389 : vector<16x1xf32> to vector<16x2xf32>
    %c3_190 = arith.constant 3 : index
    %c1_191 = arith.constant 1 : index
    %c31_192 = arith.constant 31 : index
    %391 = vector.load %arg5[%c3_190, %c1_191, %c31_192] : memref<4x18x34xf32, #tpu.memory_space<vmem>>, vector<1x16x2xf32>
    %392 = vector.shape_cast %391 : vector<1x16x2xf32> to vector<16x2xf32>
    %393 = vector.shape_cast %390 : vector<16x2xf32> to vector<1x16x2xf32>
    tpu.vector_store %arg5[%c3_190, %c1_191, %c31_192], %393 {strides = array<i32>} : memref<4x18x34xf32, #tpu.memory_space<vmem>>, vector<1x16x2xf32>,
    %cst_193 = arith.constant 0.000000e+00 : f32
    %394 = vector.broadcast %cst_193 : f32 to vector<16x32xf32>
    %cst_194 = arith.constant 0.000000e+00 : f32
    %395 = vector.broadcast %cst_194 : f32 to vector<16x32xf32>
    %cst_195 = arith.constant 0.000000e+00 : f32
    %396 = vector.broadcast %cst_195 : f32 to vector<16x32xf32>
    %cst_196 = arith.constant 0.000000e+00 : f32
    %397 = vector.broadcast %cst_196 : f32 to vector<16x32xf32>
    %cst_197 = arith.constant 0.000000e+00 : f32
    %398 = vector.broadcast %cst_197 : f32 to vector<16x32xf32>
    %cst_198 = arith.constant 0.000000e+00 : f32
    %399 = vector.broadcast %cst_198 : f32 to vector<16x32xf32>
    %cst_199 = arith.constant 0.000000e+00 : f32
    %400 = vector.broadcast %cst_199 : f32 to vector<16x32xf32>
    %cst_200 = arith.constant 0.000000e+00 : f32
    %401 = vector.broadcast %cst_200 : f32 to vector<16x32xf32>
    %c0_201 = arith.constant 0 : index
    %c0_202 = arith.constant 0 : index
    %c0_203 = arith.constant 0 : index
    %402 = vector.load %arg5[%c0_201, %c0_202, %c0_203] : memref<4x18x34xf32, #tpu.memory_space<vmem>>, vector<1x16x32xf32>
    %403 = vector.shape_cast %402 : vector<1x16x32xf32> to vector<16x32xf32>
    %c0_204 = arith.constant 0 : index
    %c0_205 = arith.constant 0 : index
    %c1_206 = arith.constant 1 : index
    %404 = vector.load %arg5[%c0_204, %c0_205, %c1_206] : memref<4x18x34xf32, #tpu.memory_space<vmem>>, vector<1x16x32xf32>
    %405 = vector.shape_cast %404 : vector<1x16x32xf32> to vector<16x32xf32>
    %c0_207 = arith.constant 0 : index
    %c0_208 = arith.constant 0 : index
    %c2_209 = arith.constant 2 : index
    %406 = vector.load %arg5[%c0_207, %c0_208, %c2_209] : memref<4x18x34xf32, #tpu.memory_space<vmem>>, vector<1x16x32xf32>
    %407 = vector.shape_cast %406 : vector<1x16x32xf32> to vector<16x32xf32>
    %c0_210 = arith.constant 0 : index
    %c1_211 = arith.constant 1 : index
    %c0_212 = arith.constant 0 : index
    %408 = vector.load %arg5[%c0_210, %c1_211, %c0_212] : memref<4x18x34xf32, #tpu.memory_space<vmem>>, vector<1x16x32xf32>
    %409 = vector.shape_cast %408 : vector<1x16x32xf32> to vector<16x32xf32>
    %c0_213 = arith.constant 0 : index
    %c1_214 = arith.constant 1 : index
    %c1_215 = arith.constant 1 : index
    %410 = vector.load %arg5[%c0_213, %c1_214, %c1_215] : memref<4x18x34xf32, #tpu.memory_space<vmem>>, vector<1x16x32xf32>
    %411 = vector.shape_cast %410 : vector<1x16x32xf32> to vector<16x32xf32>
    %c0_216 = arith.constant 0 : index
    %c1_217 = arith.constant 1 : index
    %c2_218 = arith.constant 2 : index
    %412 = vector.load %arg5[%c0_216, %c1_217, %c2_218] : memref<4x18x34xf32, #tpu.memory_space<vmem>>, vector<1x16x32xf32>
    %413 = vector.shape_cast %412 : vector<1x16x32xf32> to vector<16x32xf32>
    %c0_219 = arith.constant 0 : index
    %c2_220 = arith.constant 2 : index
    %c0_221 = arith.constant 0 : index
    %414 = vector.load %arg5[%c0_219, %c2_220, %c0_221] : memref<4x18x34xf32, #tpu.memory_space<vmem>>, vector<1x16x32xf32>
    %415 = vector.shape_cast %414 : vector<1x16x32xf32> to vector<16x32xf32>
    %c0_222 = arith.constant 0 : index
    %c2_223 = arith.constant 2 : index
    %c1_224 = arith.constant 1 : index
    %416 = vector.load %arg5[%c0_222, %c2_223, %c1_224] : memref<4x18x34xf32, #tpu.memory_space<vmem>>, vector<1x16x32xf32>
    %417 = vector.shape_cast %416 : vector<1x16x32xf32> to vector<16x32xf32>
    %c0_225 = arith.constant 0 : index
    %c2_226 = arith.constant 2 : index
    %c2_227 = arith.constant 2 : index
    %418 = vector.load %arg5[%c0_225, %c2_226, %c2_227] : memref<4x18x34xf32, #tpu.memory_space<vmem>>, vector<1x16x32xf32>
    %419 = vector.shape_cast %418 : vector<1x16x32xf32> to vector<16x32xf32>
    %c0_228 = arith.constant 0 : index
    %420 = memref.load %arg2[%c0_228] : memref<192xf32, #tpu.memory_space<smem>>
    %421 = vector.broadcast %420 : f32 to vector<16x32xf32>
    %422 = arith.mulf %403, %421 : vector<16x32xf32>
    %423 = arith.addf %394, %422 : vector<16x32xf32>
    %c1_229 = arith.constant 1 : index
    %424 = memref.load %arg2[%c1_229] : memref<192xf32, #tpu.memory_space<smem>>
    %425 = vector.broadcast %424 : f32 to vector<16x32xf32>
    %426 = arith.mulf %405, %425 : vector<16x32xf32>
    %427 = arith.addf %423, %426 : vector<16x32xf32>
    %c2_230 = arith.constant 2 : index
    %428 = memref.load %arg2[%c2_230] : memref<192xf32, #tpu.memory_space<smem>>
    %429 = vector.broadcast %428 : f32 to vector<16x32xf32>
    %430 = arith.mulf %407, %429 : vector<16x32xf32>
    %431 = arith.addf %427, %430 : vector<16x32xf32>
    %c3_231 = arith.constant 3 : index
    %432 = memref.load %arg2[%c3_231] : memref<192xf32, #tpu.memory_space<smem>>
    %433 = vector.broadcast %432 : f32 to vector<16x32xf32>
    %434 = arith.mulf %409, %433 : vector<16x32xf32>
    %435 = arith.addf %431, %434 : vector<16x32xf32>
    %c4 = arith.constant 4 : index
    %436 = memref.load %arg2[%c4] : memref<192xf32, #tpu.memory_space<smem>>
    %437 = vector.broadcast %436 : f32 to vector<16x32xf32>
    %438 = arith.mulf %411, %437 : vector<16x32xf32>
    %439 = arith.addf %435, %438 : vector<16x32xf32>
    %c5_232 = arith.constant 5 : index
    %440 = memref.load %arg2[%c5_232] : memref<192xf32, #tpu.memory_space<smem>>
    %441 = vector.broadcast %440 : f32 to vector<16x32xf32>
    %442 = arith.mulf %413, %441 : vector<16x32xf32>
    %443 = arith.addf %439, %442 : vector<16x32xf32>
    %c96 = arith.constant 96 : index
    %444 = memref.load %arg2[%c96] : memref<192xf32, #tpu.memory_space<smem>>
    %445 = vector.broadcast %444 : f32 to vector<16x32xf32>
    %446 = arith.mulf %409, %445 : vector<16x32xf32>
    %447 = arith.addf %395, %446 : vector<16x32xf32>
    %c97 = arith.constant 97 : index
    %448 = memref.load %arg2[%c97] : memref<192xf32, #tpu.memory_space<smem>>
    %449 = vector.broadcast %448 : f32 to vector<16x32xf32>
    %450 = arith.mulf %411, %449 : vector<16x32xf32>
    %451 = arith.addf %447, %450 : vector<16x32xf32>
    %c98 = arith.constant 98 : index
    %452 = memref.load %arg2[%c98] : memref<192xf32, #tpu.memory_space<smem>>
    %453 = vector.broadcast %452 : f32 to vector<16x32xf32>
    %454 = arith.mulf %413, %453 : vector<16x32xf32>
    %455 = arith.addf %451, %454 : vector<16x32xf32>
    %c99 = arith.constant 99 : index
    %456 = memref.load %arg2[%c99] : memref<192xf32, #tpu.memory_space<smem>>
    %457 = vector.broadcast %456 : f32 to vector<16x32xf32>
    %458 = arith.mulf %415, %457 : vector<16x32xf32>
    %459 = arith.addf %455, %458 : vector<16x32xf32>
    %c100 = arith.constant 100 : index
    %460 = memref.load %arg2[%c100] : memref<192xf32, #tpu.memory_space<smem>>
    %461 = vector.broadcast %460 : f32 to vector<16x32xf32>
    %462 = arith.mulf %417, %461 : vector<16x32xf32>
    %463 = arith.addf %459, %462 : vector<16x32xf32>
    %c101 = arith.constant 101 : index
    %464 = memref.load %arg2[%c101] : memref<192xf32, #tpu.memory_space<smem>>
    %465 = vector.broadcast %464 : f32 to vector<16x32xf32>
    %466 = arith.mulf %419, %465 : vector<16x32xf32>
    %467 = arith.addf %463, %466 : vector<16x32xf32>
    %c24 = arith.constant 24 : index
    %468 = memref.load %arg2[%c24] : memref<192xf32, #tpu.memory_space<smem>>
    %469 = vector.broadcast %468 : f32 to vector<16x32xf32>
    %470 = arith.mulf %403, %469 : vector<16x32xf32>
    %471 = arith.addf %396, %470 : vector<16x32xf32>
    %c25_233 = arith.constant 25 : index
    %472 = memref.load %arg2[%c25_233] : memref<192xf32, #tpu.memory_space<smem>>
    %473 = vector.broadcast %472 : f32 to vector<16x32xf32>
    %474 = arith.mulf %405, %473 : vector<16x32xf32>
    %475 = arith.addf %471, %474 : vector<16x32xf32>
    %c26 = arith.constant 26 : index
    %476 = memref.load %arg2[%c26] : memref<192xf32, #tpu.memory_space<smem>>
    %477 = vector.broadcast %476 : f32 to vector<16x32xf32>
    %478 = arith.mulf %407, %477 : vector<16x32xf32>
    %479 = arith.addf %475, %478 : vector<16x32xf32>
    %c27_234 = arith.constant 27 : index
    %480 = memref.load %arg2[%c27_234] : memref<192xf32, #tpu.memory_space<smem>>
    %481 = vector.broadcast %480 : f32 to vector<16x32xf32>
    %482 = arith.mulf %409, %481 : vector<16x32xf32>
    %483 = arith.addf %479, %482 : vector<16x32xf32>
    %c28 = arith.constant 28 : index
    %484 = memref.load %arg2[%c28] : memref<192xf32, #tpu.memory_space<smem>>
    %485 = vector.broadcast %484 : f32 to vector<16x32xf32>
    %486 = arith.mulf %411, %485 : vector<16x32xf32>
    %487 = arith.addf %483, %486 : vector<16x32xf32>
    %c29_235 = arith.constant 29 : index
    %488 = memref.load %arg2[%c29_235] : memref<192xf32, #tpu.memory_space<smem>>
    %489 = vector.broadcast %488 : f32 to vector<16x32xf32>
    %490 = arith.mulf %413, %489 : vector<16x32xf32>
    %491 = arith.addf %487, %490 : vector<16x32xf32>
    %c120 = arith.constant 120 : index
    %492 = memref.load %arg2[%c120] : memref<192xf32, #tpu.memory_space<smem>>
    %493 = vector.broadcast %492 : f32 to vector<16x32xf32>
    %494 = arith.mulf %409, %493 : vector<16x32xf32>
    %495 = arith.addf %397, %494 : vector<16x32xf32>
    %c121 = arith.constant 121 : index
    %496 = memref.load %arg2[%c121] : memref<192xf32, #tpu.memory_space<smem>>
    %497 = vector.broadcast %496 : f32 to vector<16x32xf32>
    %498 = arith.mulf %411, %497 : vector<16x32xf32>
    %499 = arith.addf %495, %498 : vector<16x32xf32>
    %c122 = arith.constant 122 : index
    %500 = memref.load %arg2[%c122] : memref<192xf32, #tpu.memory_space<smem>>
    %501 = vector.broadcast %500 : f32 to vector<16x32xf32>
    %502 = arith.mulf %413, %501 : vector<16x32xf32>
    %503 = arith.addf %499, %502 : vector<16x32xf32>
    %c123 = arith.constant 123 : index
    %504 = memref.load %arg2[%c123] : memref<192xf32, #tpu.memory_space<smem>>
    %505 = vector.broadcast %504 : f32 to vector<16x32xf32>
    %506 = arith.mulf %415, %505 : vector<16x32xf32>
    %507 = arith.addf %503, %506 : vector<16x32xf32>
    %c124 = arith.constant 124 : index
    %508 = memref.load %arg2[%c124] : memref<192xf32, #tpu.memory_space<smem>>
    %509 = vector.broadcast %508 : f32 to vector<16x32xf32>
    %510 = arith.mulf %417, %509 : vector<16x32xf32>
    %511 = arith.addf %507, %510 : vector<16x32xf32>
    %c125 = arith.constant 125 : index
    %512 = memref.load %arg2[%c125] : memref<192xf32, #tpu.memory_space<smem>>
    %513 = vector.broadcast %512 : f32 to vector<16x32xf32>
    %514 = arith.mulf %419, %513 : vector<16x32xf32>
    %515 = arith.addf %511, %514 : vector<16x32xf32>
    %c48 = arith.constant 48 : index
    %516 = memref.load %arg2[%c48] : memref<192xf32, #tpu.memory_space<smem>>
    %517 = vector.broadcast %516 : f32 to vector<16x32xf32>
    %518 = arith.mulf %403, %517 : vector<16x32xf32>
    %519 = arith.addf %398, %518 : vector<16x32xf32>
    %c49 = arith.constant 49 : index
    %520 = memref.load %arg2[%c49] : memref<192xf32, #tpu.memory_space<smem>>
    %521 = vector.broadcast %520 : f32 to vector<16x32xf32>
    %522 = arith.mulf %405, %521 : vector<16x32xf32>
    %523 = arith.addf %519, %522 : vector<16x32xf32>
    %c50 = arith.constant 50 : index
    %524 = memref.load %arg2[%c50] : memref<192xf32, #tpu.memory_space<smem>>
    %525 = vector.broadcast %524 : f32 to vector<16x32xf32>
    %526 = arith.mulf %407, %525 : vector<16x32xf32>
    %527 = arith.addf %523, %526 : vector<16x32xf32>
    %c51 = arith.constant 51 : index
    %528 = memref.load %arg2[%c51] : memref<192xf32, #tpu.memory_space<smem>>
    %529 = vector.broadcast %528 : f32 to vector<16x32xf32>
    %530 = arith.mulf %409, %529 : vector<16x32xf32>
    %531 = arith.addf %527, %530 : vector<16x32xf32>
    %c52 = arith.constant 52 : index
    %532 = memref.load %arg2[%c52] : memref<192xf32, #tpu.memory_space<smem>>
    %533 = vector.broadcast %532 : f32 to vector<16x32xf32>
    %534 = arith.mulf %411, %533 : vector<16x32xf32>
    %535 = arith.addf %531, %534 : vector<16x32xf32>
    %c53 = arith.constant 53 : index
    %536 = memref.load %arg2[%c53] : memref<192xf32, #tpu.memory_space<smem>>
    %537 = vector.broadcast %536 : f32 to vector<16x32xf32>
    %538 = arith.mulf %413, %537 : vector<16x32xf32>
    %539 = arith.addf %535, %538 : vector<16x32xf32>
    %c144 = arith.constant 144 : index
    %540 = memref.load %arg2[%c144] : memref<192xf32, #tpu.memory_space<smem>>
    %541 = vector.broadcast %540 : f32 to vector<16x32xf32>
    %542 = arith.mulf %409, %541 : vector<16x32xf32>
    %543 = arith.addf %399, %542 : vector<16x32xf32>
    %c145 = arith.constant 145 : index
    %544 = memref.load %arg2[%c145] : memref<192xf32, #tpu.memory_space<smem>>
    %545 = vector.broadcast %544 : f32 to vector<16x32xf32>
    %546 = arith.mulf %411, %545 : vector<16x32xf32>
    %547 = arith.addf %543, %546 : vector<16x32xf32>
    %c146 = arith.constant 146 : index
    %548 = memref.load %arg2[%c146] : memref<192xf32, #tpu.memory_space<smem>>
    %549 = vector.broadcast %548 : f32 to vector<16x32xf32>
    %550 = arith.mulf %413, %549 : vector<16x32xf32>
    %551 = arith.addf %547, %550 : vector<16x32xf32>
    %c147 = arith.constant 147 : index
    %552 = memref.load %arg2[%c147] : memref<192xf32, #tpu.memory_space<smem>>
    %553 = vector.broadcast %552 : f32 to vector<16x32xf32>
    %554 = arith.mulf %415, %553 : vector<16x32xf32>
    %555 = arith.addf %551, %554 : vector<16x32xf32>
    %c148 = arith.constant 148 : index
    %556 = memref.load %arg2[%c148] : memref<192xf32, #tpu.memory_space<smem>>
    %557 = vector.broadcast %556 : f32 to vector<16x32xf32>
    %558 = arith.mulf %417, %557 : vector<16x32xf32>
    %559 = arith.addf %555, %558 : vector<16x32xf32>
    %c149 = arith.constant 149 : index
    %560 = memref.load %arg2[%c149] : memref<192xf32, #tpu.memory_space<smem>>
    %561 = vector.broadcast %560 : f32 to vector<16x32xf32>
    %562 = arith.mulf %419, %561 : vector<16x32xf32>
    %563 = arith.addf %559, %562 : vector<16x32xf32>
    %c72 = arith.constant 72 : index
    %564 = memref.load %arg2[%c72] : memref<192xf32, #tpu.memory_space<smem>>
    %565 = vector.broadcast %564 : f32 to vector<16x32xf32>
    %566 = arith.mulf %403, %565 : vector<16x32xf32>
    %567 = arith.addf %400, %566 : vector<16x32xf32>
    %c73 = arith.constant 73 : index
    %568 = memref.load %arg2[%c73] : memref<192xf32, #tpu.memory_space<smem>>
    %569 = vector.broadcast %568 : f32 to vector<16x32xf32>
    %570 = arith.mulf %405, %569 : vector<16x32xf32>
    %571 = arith.addf %567, %570 : vector<16x32xf32>
    %c74 = arith.constant 74 : index
    %572 = memref.load %arg2[%c74] : memref<192xf32, #tpu.memory_space<smem>>
    %573 = vector.broadcast %572 : f32 to vector<16x32xf32>
    %574 = arith.mulf %407, %573 : vector<16x32xf32>
    %575 = arith.addf %571, %574 : vector<16x32xf32>
    %c75 = arith.constant 75 : index
    %576 = memref.load %arg2[%c75] : memref<192xf32, #tpu.memory_space<smem>>
    %577 = vector.broadcast %576 : f32 to vector<16x32xf32>
    %578 = arith.mulf %409, %577 : vector<16x32xf32>
    %579 = arith.addf %575, %578 : vector<16x32xf32>
    %c76 = arith.constant 76 : index
    %580 = memref.load %arg2[%c76] : memref<192xf32, #tpu.memory_space<smem>>
    %581 = vector.broadcast %580 : f32 to vector<16x32xf32>
    %582 = arith.mulf %411, %581 : vector<16x32xf32>
    %583 = arith.addf %579, %582 : vector<16x32xf32>
    %c77 = arith.constant 77 : index
    %584 = memref.load %arg2[%c77] : memref<192xf32, #tpu.memory_space<smem>>
    %585 = vector.broadcast %584 : f32 to vector<16x32xf32>
    %586 = arith.mulf %413, %585 : vector<16x32xf32>
    %587 = arith.addf %583, %586 : vector<16x32xf32>
    %c168 = arith.constant 168 : index
    %588 = memref.load %arg2[%c168] : memref<192xf32, #tpu.memory_space<smem>>
    %589 = vector.broadcast %588 : f32 to vector<16x32xf32>
    %590 = arith.mulf %409, %589 : vector<16x32xf32>
    %591 = arith.addf %401, %590 : vector<16x32xf32>
    %c169 = arith.constant 169 : index
    %592 = memref.load %arg2[%c169] : memref<192xf32, #tpu.memory_space<smem>>
    %593 = vector.broadcast %592 : f32 to vector<16x32xf32>
    %594 = arith.mulf %411, %593 : vector<16x32xf32>
    %595 = arith.addf %591, %594 : vector<16x32xf32>
    %c170 = arith.constant 170 : index
    %596 = memref.load %arg2[%c170] : memref<192xf32, #tpu.memory_space<smem>>
    %597 = vector.broadcast %596 : f32 to vector<16x32xf32>
    %598 = arith.mulf %413, %597 : vector<16x32xf32>
    %599 = arith.addf %595, %598 : vector<16x32xf32>
    %c171 = arith.constant 171 : index
    %600 = memref.load %arg2[%c171] : memref<192xf32, #tpu.memory_space<smem>>
    %601 = vector.broadcast %600 : f32 to vector<16x32xf32>
    %602 = arith.mulf %415, %601 : vector<16x32xf32>
    %603 = arith.addf %599, %602 : vector<16x32xf32>
    %c172 = arith.constant 172 : index
    %604 = memref.load %arg2[%c172] : memref<192xf32, #tpu.memory_space<smem>>
    %605 = vector.broadcast %604 : f32 to vector<16x32xf32>
    %606 = arith.mulf %417, %605 : vector<16x32xf32>
    %607 = arith.addf %603, %606 : vector<16x32xf32>
    %c173 = arith.constant 173 : index
    %608 = memref.load %arg2[%c173] : memref<192xf32, #tpu.memory_space<smem>>
    %609 = vector.broadcast %608 : f32 to vector<16x32xf32>
    %610 = arith.mulf %419, %609 : vector<16x32xf32>
    %611 = arith.addf %607, %610 : vector<16x32xf32>
    %c1_236 = arith.constant 1 : index
    %c0_237 = arith.constant 0 : index
    %c0_238 = arith.constant 0 : index
    %612 = vector.load %arg5[%c1_236, %c0_237, %c0_238] : memref<4x18x34xf32, #tpu.memory_space<vmem>>, vector<1x16x32xf32>
    %613 = vector.shape_cast %612 : vector<1x16x32xf32> to vector<16x32xf32>
    %c1_239 = arith.constant 1 : index
    %c0_240 = arith.constant 0 : index
    %c1_241 = arith.constant 1 : index
    %614 = vector.load %arg5[%c1_239, %c0_240, %c1_241] : memref<4x18x34xf32, #tpu.memory_space<vmem>>, vector<1x16x32xf32>
    %615 = vector.shape_cast %614 : vector<1x16x32xf32> to vector<16x32xf32>
    %c1_242 = arith.constant 1 : index
    %c0_243 = arith.constant 0 : index
    %c2_244 = arith.constant 2 : index
    %616 = vector.load %arg5[%c1_242, %c0_243, %c2_244] : memref<4x18x34xf32, #tpu.memory_space<vmem>>, vector<1x16x32xf32>
    %617 = vector.shape_cast %616 : vector<1x16x32xf32> to vector<16x32xf32>
    %c1_245 = arith.constant 1 : index
    %c1_246 = arith.constant 1 : index
    %c0_247 = arith.constant 0 : index
    %618 = vector.load %arg5[%c1_245, %c1_246, %c0_247] : memref<4x18x34xf32, #tpu.memory_space<vmem>>, vector<1x16x32xf32>
    %619 = vector.shape_cast %618 : vector<1x16x32xf32> to vector<16x32xf32>
    %c1_248 = arith.constant 1 : index
    %c1_249 = arith.constant 1 : index
    %c1_250 = arith.constant 1 : index
    %620 = vector.load %arg5[%c1_248, %c1_249, %c1_250] : memref<4x18x34xf32, #tpu.memory_space<vmem>>, vector<1x16x32xf32>
    %621 = vector.shape_cast %620 : vector<1x16x32xf32> to vector<16x32xf32>
    %c1_251 = arith.constant 1 : index
    %c1_252 = arith.constant 1 : index
    %c2_253 = arith.constant 2 : index
    %622 = vector.load %arg5[%c1_251, %c1_252, %c2_253] : memref<4x18x34xf32, #tpu.memory_space<vmem>>, vector<1x16x32xf32>
    %623 = vector.shape_cast %622 : vector<1x16x32xf32> to vector<16x32xf32>
    %c1_254 = arith.constant 1 : index
    %c2_255 = arith.constant 2 : index
    %c0_256 = arith.constant 0 : index
    %624 = vector.load %arg5[%c1_254, %c2_255, %c0_256] : memref<4x18x34xf32, #tpu.memory_space<vmem>>, vector<1x16x32xf32>
    %625 = vector.shape_cast %624 : vector<1x16x32xf32> to vector<16x32xf32>
    %c1_257 = arith.constant 1 : index
    %c2_258 = arith.constant 2 : index
    %c1_259 = arith.constant 1 : index
    %626 = vector.load %arg5[%c1_257, %c2_258, %c1_259] : memref<4x18x34xf32, #tpu.memory_space<vmem>>, vector<1x16x32xf32>
    %627 = vector.shape_cast %626 : vector<1x16x32xf32> to vector<16x32xf32>
    %c1_260 = arith.constant 1 : index
    %c2_261 = arith.constant 2 : index
    %c2_262 = arith.constant 2 : index
    %628 = vector.load %arg5[%c1_260, %c2_261, %c2_262] : memref<4x18x34xf32, #tpu.memory_space<vmem>>, vector<1x16x32xf32>
    %629 = vector.shape_cast %628 : vector<1x16x32xf32> to vector<16x32xf32>
    %c6 = arith.constant 6 : index
    %630 = memref.load %arg2[%c6] : memref<192xf32, #tpu.memory_space<smem>>
    %631 = vector.broadcast %630 : f32 to vector<16x32xf32>
    %632 = arith.mulf %613, %631 : vector<16x32xf32>
    %633 = arith.addf %443, %632 : vector<16x32xf32>
    %c7_263 = arith.constant 7 : index
    %634 = memref.load %arg2[%c7_263] : memref<192xf32, #tpu.memory_space<smem>>
    %635 = vector.broadcast %634 : f32 to vector<16x32xf32>
    %636 = arith.mulf %615, %635 : vector<16x32xf32>
    %637 = arith.addf %633, %636 : vector<16x32xf32>
    %c8 = arith.constant 8 : index
    %638 = memref.load %arg2[%c8] : memref<192xf32, #tpu.memory_space<smem>>
    %639 = vector.broadcast %638 : f32 to vector<16x32xf32>
    %640 = arith.mulf %617, %639 : vector<16x32xf32>
    %641 = arith.addf %637, %640 : vector<16x32xf32>
    %c9_264 = arith.constant 9 : index
    %642 = memref.load %arg2[%c9_264] : memref<192xf32, #tpu.memory_space<smem>>
    %643 = vector.broadcast %642 : f32 to vector<16x32xf32>
    %644 = arith.mulf %619, %643 : vector<16x32xf32>
    %645 = arith.addf %641, %644 : vector<16x32xf32>
    %c10 = arith.constant 10 : index
    %646 = memref.load %arg2[%c10] : memref<192xf32, #tpu.memory_space<smem>>
    %647 = vector.broadcast %646 : f32 to vector<16x32xf32>
    %648 = arith.mulf %621, %647 : vector<16x32xf32>
    %649 = arith.addf %645, %648 : vector<16x32xf32>
    %c11_265 = arith.constant 11 : index
    %650 = memref.load %arg2[%c11_265] : memref<192xf32, #tpu.memory_space<smem>>
    %651 = vector.broadcast %650 : f32 to vector<16x32xf32>
    %652 = arith.mulf %623, %651 : vector<16x32xf32>
    %653 = arith.addf %649, %652 : vector<16x32xf32>
    %c102 = arith.constant 102 : index
    %654 = memref.load %arg2[%c102] : memref<192xf32, #tpu.memory_space<smem>>
    %655 = vector.broadcast %654 : f32 to vector<16x32xf32>
    %656 = arith.mulf %619, %655 : vector<16x32xf32>
    %657 = arith.addf %467, %656 : vector<16x32xf32>
    %c103 = arith.constant 103 : index
    %658 = memref.load %arg2[%c103] : memref<192xf32, #tpu.memory_space<smem>>
    %659 = vector.broadcast %658 : f32 to vector<16x32xf32>
    %660 = arith.mulf %621, %659 : vector<16x32xf32>
    %661 = arith.addf %657, %660 : vector<16x32xf32>
    %c104 = arith.constant 104 : index
    %662 = memref.load %arg2[%c104] : memref<192xf32, #tpu.memory_space<smem>>
    %663 = vector.broadcast %662 : f32 to vector<16x32xf32>
    %664 = arith.mulf %623, %663 : vector<16x32xf32>
    %665 = arith.addf %661, %664 : vector<16x32xf32>
    %c105 = arith.constant 105 : index
    %666 = memref.load %arg2[%c105] : memref<192xf32, #tpu.memory_space<smem>>
    %667 = vector.broadcast %666 : f32 to vector<16x32xf32>
    %668 = arith.mulf %625, %667 : vector<16x32xf32>
    %669 = arith.addf %665, %668 : vector<16x32xf32>
    %c106 = arith.constant 106 : index
    %670 = memref.load %arg2[%c106] : memref<192xf32, #tpu.memory_space<smem>>
    %671 = vector.broadcast %670 : f32 to vector<16x32xf32>
    %672 = arith.mulf %627, %671 : vector<16x32xf32>
    %673 = arith.addf %669, %672 : vector<16x32xf32>
    %c107 = arith.constant 107 : index
    %674 = memref.load %arg2[%c107] : memref<192xf32, #tpu.memory_space<smem>>
    %675 = vector.broadcast %674 : f32 to vector<16x32xf32>
    %676 = arith.mulf %629, %675 : vector<16x32xf32>
    %677 = arith.addf %673, %676 : vector<16x32xf32>
    %c30 = arith.constant 30 : index
    %678 = memref.load %arg2[%c30] : memref<192xf32, #tpu.memory_space<smem>>
    %679 = vector.broadcast %678 : f32 to vector<16x32xf32>
    %680 = arith.mulf %613, %679 : vector<16x32xf32>
    %681 = arith.addf %491, %680 : vector<16x32xf32>
    %c31_266 = arith.constant 31 : index
    %682 = memref.load %arg2[%c31_266] : memref<192xf32, #tpu.memory_space<smem>>
    %683 = vector.broadcast %682 : f32 to vector<16x32xf32>
    %684 = arith.mulf %615, %683 : vector<16x32xf32>
    %685 = arith.addf %681, %684 : vector<16x32xf32>
    %c32 = arith.constant 32 : index
    %686 = memref.load %arg2[%c32] : memref<192xf32, #tpu.memory_space<smem>>
    %687 = vector.broadcast %686 : f32 to vector<16x32xf32>
    %688 = arith.mulf %617, %687 : vector<16x32xf32>
    %689 = arith.addf %685, %688 : vector<16x32xf32>
    %c33 = arith.constant 33 : index
    %690 = memref.load %arg2[%c33] : memref<192xf32, #tpu.memory_space<smem>>
    %691 = vector.broadcast %690 : f32 to vector<16x32xf32>
    %692 = arith.mulf %619, %691 : vector<16x32xf32>
    %693 = arith.addf %689, %692 : vector<16x32xf32>
    %c34 = arith.constant 34 : index
    %694 = memref.load %arg2[%c34] : memref<192xf32, #tpu.memory_space<smem>>
    %695 = vector.broadcast %694 : f32 to vector<16x32xf32>
    %696 = arith.mulf %621, %695 : vector<16x32xf32>
    %697 = arith.addf %693, %696 : vector<16x32xf32>
    %c35 = arith.constant 35 : index
    %698 = memref.load %arg2[%c35] : memref<192xf32, #tpu.memory_space<smem>>
    %699 = vector.broadcast %698 : f32 to vector<16x32xf32>
    %700 = arith.mulf %623, %699 : vector<16x32xf32>
    %701 = arith.addf %697, %700 : vector<16x32xf32>
    %c126 = arith.constant 126 : index
    %702 = memref.load %arg2[%c126] : memref<192xf32, #tpu.memory_space<smem>>
    %703 = vector.broadcast %702 : f32 to vector<16x32xf32>
    %704 = arith.mulf %619, %703 : vector<16x32xf32>
    %705 = arith.addf %515, %704 : vector<16x32xf32>
    %c127 = arith.constant 127 : index
    %706 = memref.load %arg2[%c127] : memref<192xf32, #tpu.memory_space<smem>>
    %707 = vector.broadcast %706 : f32 to vector<16x32xf32>
    %708 = arith.mulf %621, %707 : vector<16x32xf32>
    %709 = arith.addf %705, %708 : vector<16x32xf32>
    %c128 = arith.constant 128 : index
    %710 = memref.load %arg2[%c128] : memref<192xf32, #tpu.memory_space<smem>>
    %711 = vector.broadcast %710 : f32 to vector<16x32xf32>
    %712 = arith.mulf %623, %711 : vector<16x32xf32>
    %713 = arith.addf %709, %712 : vector<16x32xf32>
    %c129 = arith.constant 129 : index
    %714 = memref.load %arg2[%c129] : memref<192xf32, #tpu.memory_space<smem>>
    %715 = vector.broadcast %714 : f32 to vector<16x32xf32>
    %716 = arith.mulf %625, %715 : vector<16x32xf32>
    %717 = arith.addf %713, %716 : vector<16x32xf32>
    %c130 = arith.constant 130 : index
    %718 = memref.load %arg2[%c130] : memref<192xf32, #tpu.memory_space<smem>>
    %719 = vector.broadcast %718 : f32 to vector<16x32xf32>
    %720 = arith.mulf %627, %719 : vector<16x32xf32>
    %721 = arith.addf %717, %720 : vector<16x32xf32>
    %c131 = arith.constant 131 : index
    %722 = memref.load %arg2[%c131] : memref<192xf32, #tpu.memory_space<smem>>
    %723 = vector.broadcast %722 : f32 to vector<16x32xf32>
    %724 = arith.mulf %629, %723 : vector<16x32xf32>
    %725 = arith.addf %721, %724 : vector<16x32xf32>
    %c54 = arith.constant 54 : index
    %726 = memref.load %arg2[%c54] : memref<192xf32, #tpu.memory_space<smem>>
    %727 = vector.broadcast %726 : f32 to vector<16x32xf32>
    %728 = arith.mulf %613, %727 : vector<16x32xf32>
    %729 = arith.addf %539, %728 : vector<16x32xf32>
    %c55 = arith.constant 55 : index
    %730 = memref.load %arg2[%c55] : memref<192xf32, #tpu.memory_space<smem>>
    %731 = vector.broadcast %730 : f32 to vector<16x32xf32>
    %732 = arith.mulf %615, %731 : vector<16x32xf32>
    %733 = arith.addf %729, %732 : vector<16x32xf32>
    %c56 = arith.constant 56 : index
    %734 = memref.load %arg2[%c56] : memref<192xf32, #tpu.memory_space<smem>>
    %735 = vector.broadcast %734 : f32 to vector<16x32xf32>
    %736 = arith.mulf %617, %735 : vector<16x32xf32>
    %737 = arith.addf %733, %736 : vector<16x32xf32>
    %c57 = arith.constant 57 : index
    %738 = memref.load %arg2[%c57] : memref<192xf32, #tpu.memory_space<smem>>
    %739 = vector.broadcast %738 : f32 to vector<16x32xf32>
    %740 = arith.mulf %619, %739 : vector<16x32xf32>
    %741 = arith.addf %737, %740 : vector<16x32xf32>
    %c58 = arith.constant 58 : index
    %742 = memref.load %arg2[%c58] : memref<192xf32, #tpu.memory_space<smem>>
    %743 = vector.broadcast %742 : f32 to vector<16x32xf32>
    %744 = arith.mulf %621, %743 : vector<16x32xf32>
    %745 = arith.addf %741, %744 : vector<16x32xf32>
    %c59 = arith.constant 59 : index
    %746 = memref.load %arg2[%c59] : memref<192xf32, #tpu.memory_space<smem>>
    %747 = vector.broadcast %746 : f32 to vector<16x32xf32>
    %748 = arith.mulf %623, %747 : vector<16x32xf32>
    %749 = arith.addf %745, %748 : vector<16x32xf32>
    %c150 = arith.constant 150 : index
    %750 = memref.load %arg2[%c150] : memref<192xf32, #tpu.memory_space<smem>>
    %751 = vector.broadcast %750 : f32 to vector<16x32xf32>
    %752 = arith.mulf %619, %751 : vector<16x32xf32>
    %753 = arith.addf %563, %752 : vector<16x32xf32>
    %c151 = arith.constant 151 : index
    %754 = memref.load %arg2[%c151] : memref<192xf32, #tpu.memory_space<smem>>
    %755 = vector.broadcast %754 : f32 to vector<16x32xf32>
    %756 = arith.mulf %621, %755 : vector<16x32xf32>
    %757 = arith.addf %753, %756 : vector<16x32xf32>
    %c152 = arith.constant 152 : index
    %758 = memref.load %arg2[%c152] : memref<192xf32, #tpu.memory_space<smem>>
    %759 = vector.broadcast %758 : f32 to vector<16x32xf32>
    %760 = arith.mulf %623, %759 : vector<16x32xf32>
    %761 = arith.addf %757, %760 : vector<16x32xf32>
    %c153 = arith.constant 153 : index
    %762 = memref.load %arg2[%c153] : memref<192xf32, #tpu.memory_space<smem>>
    %763 = vector.broadcast %762 : f32 to vector<16x32xf32>
    %764 = arith.mulf %625, %763 : vector<16x32xf32>
    %765 = arith.addf %761, %764 : vector<16x32xf32>
    %c154 = arith.constant 154 : index
    %766 = memref.load %arg2[%c154] : memref<192xf32, #tpu.memory_space<smem>>
    %767 = vector.broadcast %766 : f32 to vector<16x32xf32>
    %768 = arith.mulf %627, %767 : vector<16x32xf32>
    %769 = arith.addf %765, %768 : vector<16x32xf32>
    %c155 = arith.constant 155 : index
    %770 = memref.load %arg2[%c155] : memref<192xf32, #tpu.memory_space<smem>>
    %771 = vector.broadcast %770 : f32 to vector<16x32xf32>
    %772 = arith.mulf %629, %771 : vector<16x32xf32>
    %773 = arith.addf %769, %772 : vector<16x32xf32>
    %c78 = arith.constant 78 : index
    %774 = memref.load %arg2[%c78] : memref<192xf32, #tpu.memory_space<smem>>
    %775 = vector.broadcast %774 : f32 to vector<16x32xf32>
    %776 = arith.mulf %613, %775 : vector<16x32xf32>
    %777 = arith.addf %587, %776 : vector<16x32xf32>
    %c79 = arith.constant 79 : index
    %778 = memref.load %arg2[%c79] : memref<192xf32, #tpu.memory_space<smem>>
    %779 = vector.broadcast %778 : f32 to vector<16x32xf32>
    %780 = arith.mulf %615, %779 : vector<16x32xf32>
    %781 = arith.addf %777, %780 : vector<16x32xf32>
    %c80 = arith.constant 80 : index
    %782 = memref.load %arg2[%c80] : memref<192xf32, #tpu.memory_space<smem>>
    %783 = vector.broadcast %782 : f32 to vector<16x32xf32>
    %784 = arith.mulf %617, %783 : vector<16x32xf32>
    %785 = arith.addf %781, %784 : vector<16x32xf32>
    %c81 = arith.constant 81 : index
    %786 = memref.load %arg2[%c81] : memref<192xf32, #tpu.memory_space<smem>>
    %787 = vector.broadcast %786 : f32 to vector<16x32xf32>
    %788 = arith.mulf %619, %787 : vector<16x32xf32>
    %789 = arith.addf %785, %788 : vector<16x32xf32>
    %c82 = arith.constant 82 : index
    %790 = memref.load %arg2[%c82] : memref<192xf32, #tpu.memory_space<smem>>
    %791 = vector.broadcast %790 : f32 to vector<16x32xf32>
    %792 = arith.mulf %621, %791 : vector<16x32xf32>
    %793 = arith.addf %789, %792 : vector<16x32xf32>
    %c83 = arith.constant 83 : index
    %794 = memref.load %arg2[%c83] : memref<192xf32, #tpu.memory_space<smem>>
    %795 = vector.broadcast %794 : f32 to vector<16x32xf32>
    %796 = arith.mulf %623, %795 : vector<16x32xf32>
    %797 = arith.addf %793, %796 : vector<16x32xf32>
    %c174 = arith.constant 174 : index
    %798 = memref.load %arg2[%c174] : memref<192xf32, #tpu.memory_space<smem>>
    %799 = vector.broadcast %798 : f32 to vector<16x32xf32>
    %800 = arith.mulf %619, %799 : vector<16x32xf32>
    %801 = arith.addf %611, %800 : vector<16x32xf32>
    %c175 = arith.constant 175 : index
    %802 = memref.load %arg2[%c175] : memref<192xf32, #tpu.memory_space<smem>>
    %803 = vector.broadcast %802 : f32 to vector<16x32xf32>
    %804 = arith.mulf %621, %803 : vector<16x32xf32>
    %805 = arith.addf %801, %804 : vector<16x32xf32>
    %c176 = arith.constant 176 : index
    %806 = memref.load %arg2[%c176] : memref<192xf32, #tpu.memory_space<smem>>
    %807 = vector.broadcast %806 : f32 to vector<16x32xf32>
    %808 = arith.mulf %623, %807 : vector<16x32xf32>
    %809 = arith.addf %805, %808 : vector<16x32xf32>
    %c177 = arith.constant 177 : index
    %810 = memref.load %arg2[%c177] : memref<192xf32, #tpu.memory_space<smem>>
    %811 = vector.broadcast %810 : f32 to vector<16x32xf32>
    %812 = arith.mulf %625, %811 : vector<16x32xf32>
    %813 = arith.addf %809, %812 : vector<16x32xf32>
    %c178 = arith.constant 178 : index
    %814 = memref.load %arg2[%c178] : memref<192xf32, #tpu.memory_space<smem>>
    %815 = vector.broadcast %814 : f32 to vector<16x32xf32>
    %816 = arith.mulf %627, %815 : vector<16x32xf32>
    %817 = arith.addf %813, %816 : vector<16x32xf32>
    %c179 = arith.constant 179 : index
    %818 = memref.load %arg2[%c179] : memref<192xf32, #tpu.memory_space<smem>>
    %819 = vector.broadcast %818 : f32 to vector<16x32xf32>
    %820 = arith.mulf %629, %819 : vector<16x32xf32>
    %821 = arith.addf %817, %820 : vector<16x32xf32>
    %c2_267 = arith.constant 2 : index
    %c0_268 = arith.constant 0 : index
    %c0_269 = arith.constant 0 : index
    %822 = vector.load %arg5[%c2_267, %c0_268, %c0_269] : memref<4x18x34xf32, #tpu.memory_space<vmem>>, vector<1x16x32xf32>
    %823 = vector.shape_cast %822 : vector<1x16x32xf32> to vector<16x32xf32>
    %c2_270 = arith.constant 2 : index
    %c0_271 = arith.constant 0 : index
    %c1_272 = arith.constant 1 : index
    %824 = vector.load %arg5[%c2_270, %c0_271, %c1_272] : memref<4x18x34xf32, #tpu.memory_space<vmem>>, vector<1x16x32xf32>
    %825 = vector.shape_cast %824 : vector<1x16x32xf32> to vector<16x32xf32>
    %c2_273 = arith.constant 2 : index
    %c0_274 = arith.constant 0 : index
    %c2_275 = arith.constant 2 : index
    %826 = vector.load %arg5[%c2_273, %c0_274, %c2_275] : memref<4x18x34xf32, #tpu.memory_space<vmem>>, vector<1x16x32xf32>
    %827 = vector.shape_cast %826 : vector<1x16x32xf32> to vector<16x32xf32>
    %c2_276 = arith.constant 2 : index
    %c1_277 = arith.constant 1 : index
    %c0_278 = arith.constant 0 : index
    %828 = vector.load %arg5[%c2_276, %c1_277, %c0_278] : memref<4x18x34xf32, #tpu.memory_space<vmem>>, vector<1x16x32xf32>
    %829 = vector.shape_cast %828 : vector<1x16x32xf32> to vector<16x32xf32>
    %c2_279 = arith.constant 2 : index
    %c1_280 = arith.constant 1 : index
    %c1_281 = arith.constant 1 : index
    %830 = vector.load %arg5[%c2_279, %c1_280, %c1_281] : memref<4x18x34xf32, #tpu.memory_space<vmem>>, vector<1x16x32xf32>
    %831 = vector.shape_cast %830 : vector<1x16x32xf32> to vector<16x32xf32>
    %c2_282 = arith.constant 2 : index
    %c1_283 = arith.constant 1 : index
    %c2_284 = arith.constant 2 : index
    %832 = vector.load %arg5[%c2_282, %c1_283, %c2_284] : memref<4x18x34xf32, #tpu.memory_space<vmem>>, vector<1x16x32xf32>
    %833 = vector.shape_cast %832 : vector<1x16x32xf32> to vector<16x32xf32>
    %c2_285 = arith.constant 2 : index
    %c2_286 = arith.constant 2 : index
    %c0_287 = arith.constant 0 : index
    %834 = vector.load %arg5[%c2_285, %c2_286, %c0_287] : memref<4x18x34xf32, #tpu.memory_space<vmem>>, vector<1x16x32xf32>
    %835 = vector.shape_cast %834 : vector<1x16x32xf32> to vector<16x32xf32>
    %c2_288 = arith.constant 2 : index
    %c2_289 = arith.constant 2 : index
    %c1_290 = arith.constant 1 : index
    %836 = vector.load %arg5[%c2_288, %c2_289, %c1_290] : memref<4x18x34xf32, #tpu.memory_space<vmem>>, vector<1x16x32xf32>
    %837 = vector.shape_cast %836 : vector<1x16x32xf32> to vector<16x32xf32>
    %c2_291 = arith.constant 2 : index
    %c2_292 = arith.constant 2 : index
    %c2_293 = arith.constant 2 : index
    %838 = vector.load %arg5[%c2_291, %c2_292, %c2_293] : memref<4x18x34xf32, #tpu.memory_space<vmem>>, vector<1x16x32xf32>
    %839 = vector.shape_cast %838 : vector<1x16x32xf32> to vector<16x32xf32>
    %c12 = arith.constant 12 : index
    %840 = memref.load %arg2[%c12] : memref<192xf32, #tpu.memory_space<smem>>
    %841 = vector.broadcast %840 : f32 to vector<16x32xf32>
    %842 = arith.mulf %823, %841 : vector<16x32xf32>
    %843 = arith.addf %653, %842 : vector<16x32xf32>
    %c13_294 = arith.constant 13 : index
    %844 = memref.load %arg2[%c13_294] : memref<192xf32, #tpu.memory_space<smem>>
    %845 = vector.broadcast %844 : f32 to vector<16x32xf32>
    %846 = arith.mulf %825, %845 : vector<16x32xf32>
    %847 = arith.addf %843, %846 : vector<16x32xf32>
    %c14 = arith.constant 14 : index
    %848 = memref.load %arg2[%c14] : memref<192xf32, #tpu.memory_space<smem>>
    %849 = vector.broadcast %848 : f32 to vector<16x32xf32>
    %850 = arith.mulf %827, %849 : vector<16x32xf32>
    %851 = arith.addf %847, %850 : vector<16x32xf32>
    %c15_295 = arith.constant 15 : index
    %852 = memref.load %arg2[%c15_295] : memref<192xf32, #tpu.memory_space<smem>>
    %853 = vector.broadcast %852 : f32 to vector<16x32xf32>
    %854 = arith.mulf %829, %853 : vector<16x32xf32>
    %855 = arith.addf %851, %854 : vector<16x32xf32>
    %c16 = arith.constant 16 : index
    %856 = memref.load %arg2[%c16] : memref<192xf32, #tpu.memory_space<smem>>
    %857 = vector.broadcast %856 : f32 to vector<16x32xf32>
    %858 = arith.mulf %831, %857 : vector<16x32xf32>
    %859 = arith.addf %855, %858 : vector<16x32xf32>
    %c17_296 = arith.constant 17 : index
    %860 = memref.load %arg2[%c17_296] : memref<192xf32, #tpu.memory_space<smem>>
    %861 = vector.broadcast %860 : f32 to vector<16x32xf32>
    %862 = arith.mulf %833, %861 : vector<16x32xf32>
    %863 = arith.addf %859, %862 : vector<16x32xf32>
    %c108 = arith.constant 108 : index
    %864 = memref.load %arg2[%c108] : memref<192xf32, #tpu.memory_space<smem>>
    %865 = vector.broadcast %864 : f32 to vector<16x32xf32>
    %866 = arith.mulf %829, %865 : vector<16x32xf32>
    %867 = arith.addf %677, %866 : vector<16x32xf32>
    %c109 = arith.constant 109 : index
    %868 = memref.load %arg2[%c109] : memref<192xf32, #tpu.memory_space<smem>>
    %869 = vector.broadcast %868 : f32 to vector<16x32xf32>
    %870 = arith.mulf %831, %869 : vector<16x32xf32>
    %871 = arith.addf %867, %870 : vector<16x32xf32>
    %c110 = arith.constant 110 : index
    %872 = memref.load %arg2[%c110] : memref<192xf32, #tpu.memory_space<smem>>
    %873 = vector.broadcast %872 : f32 to vector<16x32xf32>
    %874 = arith.mulf %833, %873 : vector<16x32xf32>
    %875 = arith.addf %871, %874 : vector<16x32xf32>
    %c111 = arith.constant 111 : index
    %876 = memref.load %arg2[%c111] : memref<192xf32, #tpu.memory_space<smem>>
    %877 = vector.broadcast %876 : f32 to vector<16x32xf32>
    %878 = arith.mulf %835, %877 : vector<16x32xf32>
    %879 = arith.addf %875, %878 : vector<16x32xf32>
    %c112 = arith.constant 112 : index
    %880 = memref.load %arg2[%c112] : memref<192xf32, #tpu.memory_space<smem>>
    %881 = vector.broadcast %880 : f32 to vector<16x32xf32>
    %882 = arith.mulf %837, %881 : vector<16x32xf32>
    %883 = arith.addf %879, %882 : vector<16x32xf32>
    %c113 = arith.constant 113 : index
    %884 = memref.load %arg2[%c113] : memref<192xf32, #tpu.memory_space<smem>>
    %885 = vector.broadcast %884 : f32 to vector<16x32xf32>
    %886 = arith.mulf %839, %885 : vector<16x32xf32>
    %887 = arith.addf %883, %886 : vector<16x32xf32>
    %c36 = arith.constant 36 : index
    %888 = memref.load %arg2[%c36] : memref<192xf32, #tpu.memory_space<smem>>
    %889 = vector.broadcast %888 : f32 to vector<16x32xf32>
    %890 = arith.mulf %823, %889 : vector<16x32xf32>
    %891 = arith.addf %701, %890 : vector<16x32xf32>
    %c37 = arith.constant 37 : index
    %892 = memref.load %arg2[%c37] : memref<192xf32, #tpu.memory_space<smem>>
    %893 = vector.broadcast %892 : f32 to vector<16x32xf32>
    %894 = arith.mulf %825, %893 : vector<16x32xf32>
    %895 = arith.addf %891, %894 : vector<16x32xf32>
    %c38 = arith.constant 38 : index
    %896 = memref.load %arg2[%c38] : memref<192xf32, #tpu.memory_space<smem>>
    %897 = vector.broadcast %896 : f32 to vector<16x32xf32>
    %898 = arith.mulf %827, %897 : vector<16x32xf32>
    %899 = arith.addf %895, %898 : vector<16x32xf32>
    %c39 = arith.constant 39 : index
    %900 = memref.load %arg2[%c39] : memref<192xf32, #tpu.memory_space<smem>>
    %901 = vector.broadcast %900 : f32 to vector<16x32xf32>
    %902 = arith.mulf %829, %901 : vector<16x32xf32>
    %903 = arith.addf %899, %902 : vector<16x32xf32>
    %c40 = arith.constant 40 : index
    %904 = memref.load %arg2[%c40] : memref<192xf32, #tpu.memory_space<smem>>
    %905 = vector.broadcast %904 : f32 to vector<16x32xf32>
    %906 = arith.mulf %831, %905 : vector<16x32xf32>
    %907 = arith.addf %903, %906 : vector<16x32xf32>
    %c41 = arith.constant 41 : index
    %908 = memref.load %arg2[%c41] : memref<192xf32, #tpu.memory_space<smem>>
    %909 = vector.broadcast %908 : f32 to vector<16x32xf32>
    %910 = arith.mulf %833, %909 : vector<16x32xf32>
    %911 = arith.addf %907, %910 : vector<16x32xf32>
    %c132 = arith.constant 132 : index
    %912 = memref.load %arg2[%c132] : memref<192xf32, #tpu.memory_space<smem>>
    %913 = vector.broadcast %912 : f32 to vector<16x32xf32>
    %914 = arith.mulf %829, %913 : vector<16x32xf32>
    %915 = arith.addf %725, %914 : vector<16x32xf32>
    %c133 = arith.constant 133 : index
    %916 = memref.load %arg2[%c133] : memref<192xf32, #tpu.memory_space<smem>>
    %917 = vector.broadcast %916 : f32 to vector<16x32xf32>
    %918 = arith.mulf %831, %917 : vector<16x32xf32>
    %919 = arith.addf %915, %918 : vector<16x32xf32>
    %c134 = arith.constant 134 : index
    %920 = memref.load %arg2[%c134] : memref<192xf32, #tpu.memory_space<smem>>
    %921 = vector.broadcast %920 : f32 to vector<16x32xf32>
    %922 = arith.mulf %833, %921 : vector<16x32xf32>
    %923 = arith.addf %919, %922 : vector<16x32xf32>
    %c135 = arith.constant 135 : index
    %924 = memref.load %arg2[%c135] : memref<192xf32, #tpu.memory_space<smem>>
    %925 = vector.broadcast %924 : f32 to vector<16x32xf32>
    %926 = arith.mulf %835, %925 : vector<16x32xf32>
    %927 = arith.addf %923, %926 : vector<16x32xf32>
    %c136 = arith.constant 136 : index
    %928 = memref.load %arg2[%c136] : memref<192xf32, #tpu.memory_space<smem>>
    %929 = vector.broadcast %928 : f32 to vector<16x32xf32>
    %930 = arith.mulf %837, %929 : vector<16x32xf32>
    %931 = arith.addf %927, %930 : vector<16x32xf32>
    %c137 = arith.constant 137 : index
    %932 = memref.load %arg2[%c137] : memref<192xf32, #tpu.memory_space<smem>>
    %933 = vector.broadcast %932 : f32 to vector<16x32xf32>
    %934 = arith.mulf %839, %933 : vector<16x32xf32>
    %935 = arith.addf %931, %934 : vector<16x32xf32>
    %c60 = arith.constant 60 : index
    %936 = memref.load %arg2[%c60] : memref<192xf32, #tpu.memory_space<smem>>
    %937 = vector.broadcast %936 : f32 to vector<16x32xf32>
    %938 = arith.mulf %823, %937 : vector<16x32xf32>
    %939 = arith.addf %749, %938 : vector<16x32xf32>
    %c61 = arith.constant 61 : index
    %940 = memref.load %arg2[%c61] : memref<192xf32, #tpu.memory_space<smem>>
    %941 = vector.broadcast %940 : f32 to vector<16x32xf32>
    %942 = arith.mulf %825, %941 : vector<16x32xf32>
    %943 = arith.addf %939, %942 : vector<16x32xf32>
    %c62 = arith.constant 62 : index
    %944 = memref.load %arg2[%c62] : memref<192xf32, #tpu.memory_space<smem>>
    %945 = vector.broadcast %944 : f32 to vector<16x32xf32>
    %946 = arith.mulf %827, %945 : vector<16x32xf32>
    %947 = arith.addf %943, %946 : vector<16x32xf32>
    %c63 = arith.constant 63 : index
    %948 = memref.load %arg2[%c63] : memref<192xf32, #tpu.memory_space<smem>>
    %949 = vector.broadcast %948 : f32 to vector<16x32xf32>
    %950 = arith.mulf %829, %949 : vector<16x32xf32>
    %951 = arith.addf %947, %950 : vector<16x32xf32>
    %c64 = arith.constant 64 : index
    %952 = memref.load %arg2[%c64] : memref<192xf32, #tpu.memory_space<smem>>
    %953 = vector.broadcast %952 : f32 to vector<16x32xf32>
    %954 = arith.mulf %831, %953 : vector<16x32xf32>
    %955 = arith.addf %951, %954 : vector<16x32xf32>
    %c65 = arith.constant 65 : index
    %956 = memref.load %arg2[%c65] : memref<192xf32, #tpu.memory_space<smem>>
    %957 = vector.broadcast %956 : f32 to vector<16x32xf32>
    %958 = arith.mulf %833, %957 : vector<16x32xf32>
    %959 = arith.addf %955, %958 : vector<16x32xf32>
    %c156 = arith.constant 156 : index
    %960 = memref.load %arg2[%c156] : memref<192xf32, #tpu.memory_space<smem>>
    %961 = vector.broadcast %960 : f32 to vector<16x32xf32>
    %962 = arith.mulf %829, %961 : vector<16x32xf32>
    %963 = arith.addf %773, %962 : vector<16x32xf32>
    %c157 = arith.constant 157 : index
    %964 = memref.load %arg2[%c157] : memref<192xf32, #tpu.memory_space<smem>>
    %965 = vector.broadcast %964 : f32 to vector<16x32xf32>
    %966 = arith.mulf %831, %965 : vector<16x32xf32>
    %967 = arith.addf %963, %966 : vector<16x32xf32>
    %c158 = arith.constant 158 : index
    %968 = memref.load %arg2[%c158] : memref<192xf32, #tpu.memory_space<smem>>
    %969 = vector.broadcast %968 : f32 to vector<16x32xf32>
    %970 = arith.mulf %833, %969 : vector<16x32xf32>
    %971 = arith.addf %967, %970 : vector<16x32xf32>
    %c159 = arith.constant 159 : index
    %972 = memref.load %arg2[%c159] : memref<192xf32, #tpu.memory_space<smem>>
    %973 = vector.broadcast %972 : f32 to vector<16x32xf32>
    %974 = arith.mulf %835, %973 : vector<16x32xf32>
    %975 = arith.addf %971, %974 : vector<16x32xf32>
    %c160 = arith.constant 160 : index
    %976 = memref.load %arg2[%c160] : memref<192xf32, #tpu.memory_space<smem>>
    %977 = vector.broadcast %976 : f32 to vector<16x32xf32>
    %978 = arith.mulf %837, %977 : vector<16x32xf32>
    %979 = arith.addf %975, %978 : vector<16x32xf32>
    %c161 = arith.constant 161 : index
    %980 = memref.load %arg2[%c161] : memref<192xf32, #tpu.memory_space<smem>>
    %981 = vector.broadcast %980 : f32 to vector<16x32xf32>
    %982 = arith.mulf %839, %981 : vector<16x32xf32>
    %983 = arith.addf %979, %982 : vector<16x32xf32>
    %c84 = arith.constant 84 : index
    %984 = memref.load %arg2[%c84] : memref<192xf32, #tpu.memory_space<smem>>
    %985 = vector.broadcast %984 : f32 to vector<16x32xf32>
    %986 = arith.mulf %823, %985 : vector<16x32xf32>
    %987 = arith.addf %797, %986 : vector<16x32xf32>
    %c85 = arith.constant 85 : index
    %988 = memref.load %arg2[%c85] : memref<192xf32, #tpu.memory_space<smem>>
    %989 = vector.broadcast %988 : f32 to vector<16x32xf32>
    %990 = arith.mulf %825, %989 : vector<16x32xf32>
    %991 = arith.addf %987, %990 : vector<16x32xf32>
    %c86 = arith.constant 86 : index
    %992 = memref.load %arg2[%c86] : memref<192xf32, #tpu.memory_space<smem>>
    %993 = vector.broadcast %992 : f32 to vector<16x32xf32>
    %994 = arith.mulf %827, %993 : vector<16x32xf32>
    %995 = arith.addf %991, %994 : vector<16x32xf32>
    %c87 = arith.constant 87 : index
    %996 = memref.load %arg2[%c87] : memref<192xf32, #tpu.memory_space<smem>>
    %997 = vector.broadcast %996 : f32 to vector<16x32xf32>
    %998 = arith.mulf %829, %997 : vector<16x32xf32>
    %999 = arith.addf %995, %998 : vector<16x32xf32>
    %c88 = arith.constant 88 : index
    %1000 = memref.load %arg2[%c88] : memref<192xf32, #tpu.memory_space<smem>>
    %1001 = vector.broadcast %1000 : f32 to vector<16x32xf32>
    %1002 = arith.mulf %831, %1001 : vector<16x32xf32>
    %1003 = arith.addf %999, %1002 : vector<16x32xf32>
    %c89 = arith.constant 89 : index
    %1004 = memref.load %arg2[%c89] : memref<192xf32, #tpu.memory_space<smem>>
    %1005 = vector.broadcast %1004 : f32 to vector<16x32xf32>
    %1006 = arith.mulf %833, %1005 : vector<16x32xf32>
    %1007 = arith.addf %1003, %1006 : vector<16x32xf32>
    %c180 = arith.constant 180 : index
    %1008 = memref.load %arg2[%c180] : memref<192xf32, #tpu.memory_space<smem>>
    %1009 = vector.broadcast %1008 : f32 to vector<16x32xf32>
    %1010 = arith.mulf %829, %1009 : vector<16x32xf32>
    %1011 = arith.addf %821, %1010 : vector<16x32xf32>
    %c181 = arith.constant 181 : index
    %1012 = memref.load %arg2[%c181] : memref<192xf32, #tpu.memory_space<smem>>
    %1013 = vector.broadcast %1012 : f32 to vector<16x32xf32>
    %1014 = arith.mulf %831, %1013 : vector<16x32xf32>
    %1015 = arith.addf %1011, %1014 : vector<16x32xf32>
    %c182 = arith.constant 182 : index
    %1016 = memref.load %arg2[%c182] : memref<192xf32, #tpu.memory_space<smem>>
    %1017 = vector.broadcast %1016 : f32 to vector<16x32xf32>
    %1018 = arith.mulf %833, %1017 : vector<16x32xf32>
    %1019 = arith.addf %1015, %1018 : vector<16x32xf32>
    %c183 = arith.constant 183 : index
    %1020 = memref.load %arg2[%c183] : memref<192xf32, #tpu.memory_space<smem>>
    %1021 = vector.broadcast %1020 : f32 to vector<16x32xf32>
    %1022 = arith.mulf %835, %1021 : vector<16x32xf32>
    %1023 = arith.addf %1019, %1022 : vector<16x32xf32>
    %c184 = arith.constant 184 : index
    %1024 = memref.load %arg2[%c184] : memref<192xf32, #tpu.memory_space<smem>>
    %1025 = vector.broadcast %1024 : f32 to vector<16x32xf32>
    %1026 = arith.mulf %837, %1025 : vector<16x32xf32>
    %1027 = arith.addf %1023, %1026 : vector<16x32xf32>
    %c185 = arith.constant 185 : index
    %1028 = memref.load %arg2[%c185] : memref<192xf32, #tpu.memory_space<smem>>
    %1029 = vector.broadcast %1028 : f32 to vector<16x32xf32>
    %1030 = arith.mulf %839, %1029 : vector<16x32xf32>
    %1031 = arith.addf %1027, %1030 : vector<16x32xf32>
    %c3_297 = arith.constant 3 : index
    %c0_298 = arith.constant 0 : index
    %c0_299 = arith.constant 0 : index
    %1032 = vector.load %arg5[%c3_297, %c0_298, %c0_299] : memref<4x18x34xf32, #tpu.memory_space<vmem>>, vector<1x16x32xf32>
    %1033 = vector.shape_cast %1032 : vector<1x16x32xf32> to vector<16x32xf32>
    %c3_300 = arith.constant 3 : index
    %c0_301 = arith.constant 0 : index
    %c1_302 = arith.constant 1 : index
    %1034 = vector.load %arg5[%c3_300, %c0_301, %c1_302] : memref<4x18x34xf32, #tpu.memory_space<vmem>>, vector<1x16x32xf32>
    %1035 = vector.shape_cast %1034 : vector<1x16x32xf32> to vector<16x32xf32>
    %c3_303 = arith.constant 3 : index
    %c0_304 = arith.constant 0 : index
    %c2_305 = arith.constant 2 : index
    %1036 = vector.load %arg5[%c3_303, %c0_304, %c2_305] : memref<4x18x34xf32, #tpu.memory_space<vmem>>, vector<1x16x32xf32>
    %1037 = vector.shape_cast %1036 : vector<1x16x32xf32> to vector<16x32xf32>
    %c3_306 = arith.constant 3 : index
    %c1_307 = arith.constant 1 : index
    %c0_308 = arith.constant 0 : index
    %1038 = vector.load %arg5[%c3_306, %c1_307, %c0_308] : memref<4x18x34xf32, #tpu.memory_space<vmem>>, vector<1x16x32xf32>
    %1039 = vector.shape_cast %1038 : vector<1x16x32xf32> to vector<16x32xf32>
    %c3_309 = arith.constant 3 : index
    %c1_310 = arith.constant 1 : index
    %c1_311 = arith.constant 1 : index
    %1040 = vector.load %arg5[%c3_309, %c1_310, %c1_311] : memref<4x18x34xf32, #tpu.memory_space<vmem>>, vector<1x16x32xf32>
    %1041 = vector.shape_cast %1040 : vector<1x16x32xf32> to vector<16x32xf32>
    %c3_312 = arith.constant 3 : index
    %c1_313 = arith.constant 1 : index
    %c2_314 = arith.constant 2 : index
    %1042 = vector.load %arg5[%c3_312, %c1_313, %c2_314] : memref<4x18x34xf32, #tpu.memory_space<vmem>>, vector<1x16x32xf32>
    %1043 = vector.shape_cast %1042 : vector<1x16x32xf32> to vector<16x32xf32>
    %c3_315 = arith.constant 3 : index
    %c2_316 = arith.constant 2 : index
    %c0_317 = arith.constant 0 : index
    %1044 = vector.load %arg5[%c3_315, %c2_316, %c0_317] : memref<4x18x34xf32, #tpu.memory_space<vmem>>, vector<1x16x32xf32>
    %1045 = vector.shape_cast %1044 : vector<1x16x32xf32> to vector<16x32xf32>
    %c3_318 = arith.constant 3 : index
    %c2_319 = arith.constant 2 : index
    %c1_320 = arith.constant 1 : index
    %1046 = vector.load %arg5[%c3_318, %c2_319, %c1_320] : memref<4x18x34xf32, #tpu.memory_space<vmem>>, vector<1x16x32xf32>
    %1047 = vector.shape_cast %1046 : vector<1x16x32xf32> to vector<16x32xf32>
    %c3_321 = arith.constant 3 : index
    %c2_322 = arith.constant 2 : index
    %c2_323 = arith.constant 2 : index
    %1048 = vector.load %arg5[%c3_321, %c2_322, %c2_323] : memref<4x18x34xf32, #tpu.memory_space<vmem>>, vector<1x16x32xf32>
    %1049 = vector.shape_cast %1048 : vector<1x16x32xf32> to vector<16x32xf32>
    %c18 = arith.constant 18 : index
    %1050 = memref.load %arg2[%c18] : memref<192xf32, #tpu.memory_space<smem>>
    %1051 = vector.broadcast %1050 : f32 to vector<16x32xf32>
    %1052 = arith.mulf %1033, %1051 : vector<16x32xf32>
    %1053 = arith.addf %863, %1052 : vector<16x32xf32>
    %c19_324 = arith.constant 19 : index
    %1054 = memref.load %arg2[%c19_324] : memref<192xf32, #tpu.memory_space<smem>>
    %1055 = vector.broadcast %1054 : f32 to vector<16x32xf32>
    %1056 = arith.mulf %1035, %1055 : vector<16x32xf32>
    %1057 = arith.addf %1053, %1056 : vector<16x32xf32>
    %c20 = arith.constant 20 : index
    %1058 = memref.load %arg2[%c20] : memref<192xf32, #tpu.memory_space<smem>>
    %1059 = vector.broadcast %1058 : f32 to vector<16x32xf32>
    %1060 = arith.mulf %1037, %1059 : vector<16x32xf32>
    %1061 = arith.addf %1057, %1060 : vector<16x32xf32>
    %c21_325 = arith.constant 21 : index
    %1062 = memref.load %arg2[%c21_325] : memref<192xf32, #tpu.memory_space<smem>>
    %1063 = vector.broadcast %1062 : f32 to vector<16x32xf32>
    %1064 = arith.mulf %1039, %1063 : vector<16x32xf32>
    %1065 = arith.addf %1061, %1064 : vector<16x32xf32>
    %c22 = arith.constant 22 : index
    %1066 = memref.load %arg2[%c22] : memref<192xf32, #tpu.memory_space<smem>>
    %1067 = vector.broadcast %1066 : f32 to vector<16x32xf32>
    %1068 = arith.mulf %1041, %1067 : vector<16x32xf32>
    %1069 = arith.addf %1065, %1068 : vector<16x32xf32>
    %c23_326 = arith.constant 23 : index
    %1070 = memref.load %arg2[%c23_326] : memref<192xf32, #tpu.memory_space<smem>>
    %1071 = vector.broadcast %1070 : f32 to vector<16x32xf32>
    %1072 = arith.mulf %1043, %1071 : vector<16x32xf32>
    %1073 = arith.addf %1069, %1072 : vector<16x32xf32>
    %c114 = arith.constant 114 : index
    %1074 = memref.load %arg2[%c114] : memref<192xf32, #tpu.memory_space<smem>>
    %1075 = vector.broadcast %1074 : f32 to vector<16x32xf32>
    %1076 = arith.mulf %1039, %1075 : vector<16x32xf32>
    %1077 = arith.addf %887, %1076 : vector<16x32xf32>
    %c115 = arith.constant 115 : index
    %1078 = memref.load %arg2[%c115] : memref<192xf32, #tpu.memory_space<smem>>
    %1079 = vector.broadcast %1078 : f32 to vector<16x32xf32>
    %1080 = arith.mulf %1041, %1079 : vector<16x32xf32>
    %1081 = arith.addf %1077, %1080 : vector<16x32xf32>
    %c116 = arith.constant 116 : index
    %1082 = memref.load %arg2[%c116] : memref<192xf32, #tpu.memory_space<smem>>
    %1083 = vector.broadcast %1082 : f32 to vector<16x32xf32>
    %1084 = arith.mulf %1043, %1083 : vector<16x32xf32>
    %1085 = arith.addf %1081, %1084 : vector<16x32xf32>
    %c117 = arith.constant 117 : index
    %1086 = memref.load %arg2[%c117] : memref<192xf32, #tpu.memory_space<smem>>
    %1087 = vector.broadcast %1086 : f32 to vector<16x32xf32>
    %1088 = arith.mulf %1045, %1087 : vector<16x32xf32>
    %1089 = arith.addf %1085, %1088 : vector<16x32xf32>
    %c118 = arith.constant 118 : index
    %1090 = memref.load %arg2[%c118] : memref<192xf32, #tpu.memory_space<smem>>
    %1091 = vector.broadcast %1090 : f32 to vector<16x32xf32>
    %1092 = arith.mulf %1047, %1091 : vector<16x32xf32>
    %1093 = arith.addf %1089, %1092 : vector<16x32xf32>
    %c119 = arith.constant 119 : index
    %1094 = memref.load %arg2[%c119] : memref<192xf32, #tpu.memory_space<smem>>
    %1095 = vector.broadcast %1094 : f32 to vector<16x32xf32>
    %1096 = arith.mulf %1049, %1095 : vector<16x32xf32>
    %1097 = arith.addf %1093, %1096 : vector<16x32xf32>
    %c42 = arith.constant 42 : index
    %1098 = memref.load %arg2[%c42] : memref<192xf32, #tpu.memory_space<smem>>
    %1099 = vector.broadcast %1098 : f32 to vector<16x32xf32>
    %1100 = arith.mulf %1033, %1099 : vector<16x32xf32>
    %1101 = arith.addf %911, %1100 : vector<16x32xf32>
    %c43 = arith.constant 43 : index
    %1102 = memref.load %arg2[%c43] : memref<192xf32, #tpu.memory_space<smem>>
    %1103 = vector.broadcast %1102 : f32 to vector<16x32xf32>
    %1104 = arith.mulf %1035, %1103 : vector<16x32xf32>
    %1105 = arith.addf %1101, %1104 : vector<16x32xf32>
    %c44 = arith.constant 44 : index
    %1106 = memref.load %arg2[%c44] : memref<192xf32, #tpu.memory_space<smem>>
    %1107 = vector.broadcast %1106 : f32 to vector<16x32xf32>
    %1108 = arith.mulf %1037, %1107 : vector<16x32xf32>
    %1109 = arith.addf %1105, %1108 : vector<16x32xf32>
    %c45 = arith.constant 45 : index
    %1110 = memref.load %arg2[%c45] : memref<192xf32, #tpu.memory_space<smem>>
    %1111 = vector.broadcast %1110 : f32 to vector<16x32xf32>
    %1112 = arith.mulf %1039, %1111 : vector<16x32xf32>
    %1113 = arith.addf %1109, %1112 : vector<16x32xf32>
    %c46 = arith.constant 46 : index
    %1114 = memref.load %arg2[%c46] : memref<192xf32, #tpu.memory_space<smem>>
    %1115 = vector.broadcast %1114 : f32 to vector<16x32xf32>
    %1116 = arith.mulf %1041, %1115 : vector<16x32xf32>
    %1117 = arith.addf %1113, %1116 : vector<16x32xf32>
    %c47 = arith.constant 47 : index
    %1118 = memref.load %arg2[%c47] : memref<192xf32, #tpu.memory_space<smem>>
    %1119 = vector.broadcast %1118 : f32 to vector<16x32xf32>
    %1120 = arith.mulf %1043, %1119 : vector<16x32xf32>
    %1121 = arith.addf %1117, %1120 : vector<16x32xf32>
    %c138 = arith.constant 138 : index
    %1122 = memref.load %arg2[%c138] : memref<192xf32, #tpu.memory_space<smem>>
    %1123 = vector.broadcast %1122 : f32 to vector<16x32xf32>
    %1124 = arith.mulf %1039, %1123 : vector<16x32xf32>
    %1125 = arith.addf %935, %1124 : vector<16x32xf32>
    %c139 = arith.constant 139 : index
    %1126 = memref.load %arg2[%c139] : memref<192xf32, #tpu.memory_space<smem>>
    %1127 = vector.broadcast %1126 : f32 to vector<16x32xf32>
    %1128 = arith.mulf %1041, %1127 : vector<16x32xf32>
    %1129 = arith.addf %1125, %1128 : vector<16x32xf32>
    %c140 = arith.constant 140 : index
    %1130 = memref.load %arg2[%c140] : memref<192xf32, #tpu.memory_space<smem>>
    %1131 = vector.broadcast %1130 : f32 to vector<16x32xf32>
    %1132 = arith.mulf %1043, %1131 : vector<16x32xf32>
    %1133 = arith.addf %1129, %1132 : vector<16x32xf32>
    %c141 = arith.constant 141 : index
    %1134 = memref.load %arg2[%c141] : memref<192xf32, #tpu.memory_space<smem>>
    %1135 = vector.broadcast %1134 : f32 to vector<16x32xf32>
    %1136 = arith.mulf %1045, %1135 : vector<16x32xf32>
    %1137 = arith.addf %1133, %1136 : vector<16x32xf32>
    %c142 = arith.constant 142 : index
    %1138 = memref.load %arg2[%c142] : memref<192xf32, #tpu.memory_space<smem>>
    %1139 = vector.broadcast %1138 : f32 to vector<16x32xf32>
    %1140 = arith.mulf %1047, %1139 : vector<16x32xf32>
    %1141 = arith.addf %1137, %1140 : vector<16x32xf32>
    %c143 = arith.constant 143 : index
    %1142 = memref.load %arg2[%c143] : memref<192xf32, #tpu.memory_space<smem>>
    %1143 = vector.broadcast %1142 : f32 to vector<16x32xf32>
    %1144 = arith.mulf %1049, %1143 : vector<16x32xf32>
    %1145 = arith.addf %1141, %1144 : vector<16x32xf32>
    %c66 = arith.constant 66 : index
    %1146 = memref.load %arg2[%c66] : memref<192xf32, #tpu.memory_space<smem>>
    %1147 = vector.broadcast %1146 : f32 to vector<16x32xf32>
    %1148 = arith.mulf %1033, %1147 : vector<16x32xf32>
    %1149 = arith.addf %959, %1148 : vector<16x32xf32>
    %c67 = arith.constant 67 : index
    %1150 = memref.load %arg2[%c67] : memref<192xf32, #tpu.memory_space<smem>>
    %1151 = vector.broadcast %1150 : f32 to vector<16x32xf32>
    %1152 = arith.mulf %1035, %1151 : vector<16x32xf32>
    %1153 = arith.addf %1149, %1152 : vector<16x32xf32>
    %c68 = arith.constant 68 : index
    %1154 = memref.load %arg2[%c68] : memref<192xf32, #tpu.memory_space<smem>>
    %1155 = vector.broadcast %1154 : f32 to vector<16x32xf32>
    %1156 = arith.mulf %1037, %1155 : vector<16x32xf32>
    %1157 = arith.addf %1153, %1156 : vector<16x32xf32>
    %c69 = arith.constant 69 : index
    %1158 = memref.load %arg2[%c69] : memref<192xf32, #tpu.memory_space<smem>>
    %1159 = vector.broadcast %1158 : f32 to vector<16x32xf32>
    %1160 = arith.mulf %1039, %1159 : vector<16x32xf32>
    %1161 = arith.addf %1157, %1160 : vector<16x32xf32>
    %c70 = arith.constant 70 : index
    %1162 = memref.load %arg2[%c70] : memref<192xf32, #tpu.memory_space<smem>>
    %1163 = vector.broadcast %1162 : f32 to vector<16x32xf32>
    %1164 = arith.mulf %1041, %1163 : vector<16x32xf32>
    %1165 = arith.addf %1161, %1164 : vector<16x32xf32>
    %c71 = arith.constant 71 : index
    %1166 = memref.load %arg2[%c71] : memref<192xf32, #tpu.memory_space<smem>>
    %1167 = vector.broadcast %1166 : f32 to vector<16x32xf32>
    %1168 = arith.mulf %1043, %1167 : vector<16x32xf32>
    %1169 = arith.addf %1165, %1168 : vector<16x32xf32>
    %c162 = arith.constant 162 : index
    %1170 = memref.load %arg2[%c162] : memref<192xf32, #tpu.memory_space<smem>>
    %1171 = vector.broadcast %1170 : f32 to vector<16x32xf32>
    %1172 = arith.mulf %1039, %1171 : vector<16x32xf32>
    %1173 = arith.addf %983, %1172 : vector<16x32xf32>
    %c163 = arith.constant 163 : index
    %1174 = memref.load %arg2[%c163] : memref<192xf32, #tpu.memory_space<smem>>
    %1175 = vector.broadcast %1174 : f32 to vector<16x32xf32>
    %1176 = arith.mulf %1041, %1175 : vector<16x32xf32>
    %1177 = arith.addf %1173, %1176 : vector<16x32xf32>
    %c164 = arith.constant 164 : index
    %1178 = memref.load %arg2[%c164] : memref<192xf32, #tpu.memory_space<smem>>
    %1179 = vector.broadcast %1178 : f32 to vector<16x32xf32>
    %1180 = arith.mulf %1043, %1179 : vector<16x32xf32>
    %1181 = arith.addf %1177, %1180 : vector<16x32xf32>
    %c165 = arith.constant 165 : index
    %1182 = memref.load %arg2[%c165] : memref<192xf32, #tpu.memory_space<smem>>
    %1183 = vector.broadcast %1182 : f32 to vector<16x32xf32>
    %1184 = arith.mulf %1045, %1183 : vector<16x32xf32>
    %1185 = arith.addf %1181, %1184 : vector<16x32xf32>
    %c166 = arith.constant 166 : index
    %1186 = memref.load %arg2[%c166] : memref<192xf32, #tpu.memory_space<smem>>
    %1187 = vector.broadcast %1186 : f32 to vector<16x32xf32>
    %1188 = arith.mulf %1047, %1187 : vector<16x32xf32>
    %1189 = arith.addf %1185, %1188 : vector<16x32xf32>
    %c167 = arith.constant 167 : index
    %1190 = memref.load %arg2[%c167] : memref<192xf32, #tpu.memory_space<smem>>
    %1191 = vector.broadcast %1190 : f32 to vector<16x32xf32>
    %1192 = arith.mulf %1049, %1191 : vector<16x32xf32>
    %1193 = arith.addf %1189, %1192 : vector<16x32xf32>
    %c90 = arith.constant 90 : index
    %1194 = memref.load %arg2[%c90] : memref<192xf32, #tpu.memory_space<smem>>
    %1195 = vector.broadcast %1194 : f32 to vector<16x32xf32>
    %1196 = arith.mulf %1033, %1195 : vector<16x32xf32>
    %1197 = arith.addf %1007, %1196 : vector<16x32xf32>
    %c91 = arith.constant 91 : index
    %1198 = memref.load %arg2[%c91] : memref<192xf32, #tpu.memory_space<smem>>
    %1199 = vector.broadcast %1198 : f32 to vector<16x32xf32>
    %1200 = arith.mulf %1035, %1199 : vector<16x32xf32>
    %1201 = arith.addf %1197, %1200 : vector<16x32xf32>
    %c92 = arith.constant 92 : index
    %1202 = memref.load %arg2[%c92] : memref<192xf32, #tpu.memory_space<smem>>
    %1203 = vector.broadcast %1202 : f32 to vector<16x32xf32>
    %1204 = arith.mulf %1037, %1203 : vector<16x32xf32>
    %1205 = arith.addf %1201, %1204 : vector<16x32xf32>
    %c93 = arith.constant 93 : index
    %1206 = memref.load %arg2[%c93] : memref<192xf32, #tpu.memory_space<smem>>
    %1207 = vector.broadcast %1206 : f32 to vector<16x32xf32>
    %1208 = arith.mulf %1039, %1207 : vector<16x32xf32>
    %1209 = arith.addf %1205, %1208 : vector<16x32xf32>
    %c94 = arith.constant 94 : index
    %1210 = memref.load %arg2[%c94] : memref<192xf32, #tpu.memory_space<smem>>
    %1211 = vector.broadcast %1210 : f32 to vector<16x32xf32>
    %1212 = arith.mulf %1041, %1211 : vector<16x32xf32>
    %1213 = arith.addf %1209, %1212 : vector<16x32xf32>
    %c95 = arith.constant 95 : index
    %1214 = memref.load %arg2[%c95] : memref<192xf32, #tpu.memory_space<smem>>
    %1215 = vector.broadcast %1214 : f32 to vector<16x32xf32>
    %1216 = arith.mulf %1043, %1215 : vector<16x32xf32>
    %1217 = arith.addf %1213, %1216 : vector<16x32xf32>
    %c186 = arith.constant 186 : index
    %1218 = memref.load %arg2[%c186] : memref<192xf32, #tpu.memory_space<smem>>
    %1219 = vector.broadcast %1218 : f32 to vector<16x32xf32>
    %1220 = arith.mulf %1039, %1219 : vector<16x32xf32>
    %1221 = arith.addf %1031, %1220 : vector<16x32xf32>
    %c187 = arith.constant 187 : index
    %1222 = memref.load %arg2[%c187] : memref<192xf32, #tpu.memory_space<smem>>
    %1223 = vector.broadcast %1222 : f32 to vector<16x32xf32>
    %1224 = arith.mulf %1041, %1223 : vector<16x32xf32>
    %1225 = arith.addf %1221, %1224 : vector<16x32xf32>
    %c188 = arith.constant 188 : index
    %1226 = memref.load %arg2[%c188] : memref<192xf32, #tpu.memory_space<smem>>
    %1227 = vector.broadcast %1226 : f32 to vector<16x32xf32>
    %1228 = arith.mulf %1043, %1227 : vector<16x32xf32>
    %1229 = arith.addf %1225, %1228 : vector<16x32xf32>
    %c189 = arith.constant 189 : index
    %1230 = memref.load %arg2[%c189] : memref<192xf32, #tpu.memory_space<smem>>
    %1231 = vector.broadcast %1230 : f32 to vector<16x32xf32>
    %1232 = arith.mulf %1045, %1231 : vector<16x32xf32>
    %1233 = arith.addf %1229, %1232 : vector<16x32xf32>
    %c190 = arith.constant 190 : index
    %1234 = memref.load %arg2[%c190] : memref<192xf32, #tpu.memory_space<smem>>
    %1235 = vector.broadcast %1234 : f32 to vector<16x32xf32>
    %1236 = arith.mulf %1047, %1235 : vector<16x32xf32>
    %1237 = arith.addf %1233, %1236 : vector<16x32xf32>
    %c191 = arith.constant 191 : index
    %1238 = memref.load %arg2[%c191] : memref<192xf32, #tpu.memory_space<smem>>
    %1239 = vector.broadcast %1238 : f32 to vector<16x32xf32>
    %1240 = arith.mulf %1049, %1239 : vector<16x32xf32>
    %1241 = arith.addf %1237, %1240 : vector<16x32xf32>
    %c0_327 = arith.constant 0 : index
    %1242 = memref.load %arg3[%c0_327] : memref<4xf32, #tpu.memory_space<smem>>
    %1243 = vector.broadcast %1242 : f32 to vector<16x32xf32>
    %1244 = arith.addf %1073, %1243 : vector<16x32xf32>
    %c0_328 = arith.constant 0 : index
    %1245 = memref.load %arg3[%c0_328] : memref<4xf32, #tpu.memory_space<smem>>
    %1246 = vector.broadcast %1245 : f32 to vector<16x32xf32>
    %1247 = arith.addf %1097, %1246 : vector<16x32xf32>
    %1248 = vector.extract_strided_slice %1244 {offsets = [0, 0], sizes = [1, 32], strides = [1, 1]} : vector<16x32xf32> to vector<1x32xf32>
    %c0_329 = arith.constant 0 : index
    %c0_330 = arith.constant 0 : index
    %c0_331 = arith.constant 0 : index
    %c0_332 = arith.constant 0 : index
    %1249 = vector.load %arg4[%c0_329, %c0_330, %c0_331, %c0_332] : memref<1x4x32x32xf32, #tpu.memory_space<vmem>>, vector<1x1x1x32xf32>
    %1250 = vector.shape_cast %1249 : vector<1x1x1x32xf32> to vector<1x32xf32>
    %1251 = vector.shape_cast %1248 : vector<1x32xf32> to vector<1x1x1x32xf32>
    tpu.vector_store %arg4[%c0_329, %c0_330, %c0_331, %c0_332], %1251 {strides = array<i32>} : memref<1x4x32x32xf32, #tpu.memory_space<vmem>>, vector<1x1x1x32xf32>,
    %1252 = vector.extract_strided_slice %1247 {offsets = [0, 0], sizes = [1, 32], strides = [1, 1]} : vector<16x32xf32> to vector<1x32xf32>
    %c0_333 = arith.constant 0 : index
    %c0_334 = arith.constant 0 : index
    %c1_335 = arith.constant 1 : index
    %c0_336 = arith.constant 0 : index
    %1253 = vector.load %arg4[%c0_333, %c0_334, %c1_335, %c0_336] : memref<1x4x32x32xf32, #tpu.memory_space<vmem>>, vector<1x1x1x32xf32>
    %1254 = vector.shape_cast %1253 : vector<1x1x1x32xf32> to vector<1x32xf32>
    %1255 = vector.shape_cast %1252 : vector<1x32xf32> to vector<1x1x1x32xf32>
    tpu.vector_store %arg4[%c0_333, %c0_334, %c1_335, %c0_336], %1255 {strides = array<i32>} : memref<1x4x32x32xf32, #tpu.memory_space<vmem>>, vector<1x1x1x32xf32>,
    %1256 = vector.extract_strided_slice %1244 {offsets = [1, 0], sizes = [1, 32], strides = [1, 1]} : vector<16x32xf32> to vector<1x32xf32>
    %c0_337 = arith.constant 0 : index
    %c0_338 = arith.constant 0 : index
    %c2_339 = arith.constant 2 : index
    %c0_340 = arith.constant 0 : index
    %1257 = vector.load %arg4[%c0_337, %c0_338, %c2_339, %c0_340] : memref<1x4x32x32xf32, #tpu.memory_space<vmem>>, vector<1x1x1x32xf32>
    %1258 = vector.shape_cast %1257 : vector<1x1x1x32xf32> to vector<1x32xf32>
    %1259 = vector.shape_cast %1256 : vector<1x32xf32> to vector<1x1x1x32xf32>
    tpu.vector_store %arg4[%c0_337, %c0_338, %c2_339, %c0_340], %1259 {strides = array<i32>} : memref<1x4x32x32xf32, #tpu.memory_space<vmem>>, vector<1x1x1x32xf32>,
    %1260 = vector.extract_strided_slice %1247 {offsets = [1, 0], sizes = [1, 32], strides = [1, 1]} : vector<16x32xf32> to vector<1x32xf32>
    %c0_341 = arith.constant 0 : index
    %c0_342 = arith.constant 0 : index
    %c3_343 = arith.constant 3 : index
    %c0_344 = arith.constant 0 : index
    %1261 = vector.load %arg4[%c0_341, %c0_342, %c3_343, %c0_344] : memref<1x4x32x32xf32, #tpu.memory_space<vmem>>, vector<1x1x1x32xf32>
    %1262 = vector.shape_cast %1261 : vector<1x1x1x32xf32> to vector<1x32xf32>
    %1263 = vector.shape_cast %1260 : vector<1x32xf32> to vector<1x1x1x32xf32>
    tpu.vector_store %arg4[%c0_341, %c0_342, %c3_343, %c0_344], %1263 {strides = array<i32>} : memref<1x4x32x32xf32, #tpu.memory_space<vmem>>, vector<1x1x1x32xf32>,
    %1264 = vector.extract_strided_slice %1244 {offsets = [2, 0], sizes = [1, 32], strides = [1, 1]} : vector<16x32xf32> to vector<1x32xf32>
    %c0_345 = arith.constant 0 : index
    %c0_346 = arith.constant 0 : index
    %c4_347 = arith.constant 4 : index
    %c0_348 = arith.constant 0 : index
    %1265 = vector.load %arg4[%c0_345, %c0_346, %c4_347, %c0_348] : memref<1x4x32x32xf32, #tpu.memory_space<vmem>>, vector<1x1x1x32xf32>
    %1266 = vector.shape_cast %1265 : vector<1x1x1x32xf32> to vector<1x32xf32>
    %1267 = vector.shape_cast %1264 : vector<1x32xf32> to vector<1x1x1x32xf32>
    tpu.vector_store %arg4[%c0_345, %c0_346, %c4_347, %c0_348], %1267 {strides = array<i32>} : memref<1x4x32x32xf32, #tpu.memory_space<vmem>>, vector<1x1x1x32xf32>,
    %1268 = vector.extract_strided_slice %1247 {offsets = [2, 0], sizes = [1, 32], strides = [1, 1]} : vector<16x32xf32> to vector<1x32xf32>
    %c0_349 = arith.constant 0 : index
    %c0_350 = arith.constant 0 : index
    %c5_351 = arith.constant 5 : index
    %c0_352 = arith.constant 0 : index
    %1269 = vector.load %arg4[%c0_349, %c0_350, %c5_351, %c0_352] : memref<1x4x32x32xf32, #tpu.memory_space<vmem>>, vector<1x1x1x32xf32>
    %1270 = vector.shape_cast %1269 : vector<1x1x1x32xf32> to vector<1x32xf32>
    %1271 = vector.shape_cast %1268 : vector<1x32xf32> to vector<1x1x1x32xf32>
    tpu.vector_store %arg4[%c0_349, %c0_350, %c5_351, %c0_352], %1271 {strides = array<i32>} : memref<1x4x32x32xf32, #tpu.memory_space<vmem>>, vector<1x1x1x32xf32>,
    %1272 = vector.extract_strided_slice %1244 {offsets = [3, 0], sizes = [1, 32], strides = [1, 1]} : vector<16x32xf32> to vector<1x32xf32>
    %c0_353 = arith.constant 0 : index
    %c0_354 = arith.constant 0 : index
    %c6_355 = arith.constant 6 : index
    %c0_356 = arith.constant 0 : index
    %1273 = vector.load %arg4[%c0_353, %c0_354, %c6_355, %c0_356] : memref<1x4x32x32xf32, #tpu.memory_space<vmem>>, vector<1x1x1x32xf32>
    %1274 = vector.shape_cast %1273 : vector<1x1x1x32xf32> to vector<1x32xf32>
    %1275 = vector.shape_cast %1272 : vector<1x32xf32> to vector<1x1x1x32xf32>
    tpu.vector_store %arg4[%c0_353, %c0_354, %c6_355, %c0_356], %1275 {strides = array<i32>} : memref<1x4x32x32xf32, #tpu.memory_space<vmem>>, vector<1x1x1x32xf32>,
    %1276 = vector.extract_strided_slice %1247 {offsets = [3, 0], sizes = [1, 32], strides = [1, 1]} : vector<16x32xf32> to vector<1x32xf32>
    %c0_357 = arith.constant 0 : index
    %c0_358 = arith.constant 0 : index
    %c7_359 = arith.constant 7 : index
    %c0_360 = arith.constant 0 : index
    %1277 = vector.load %arg4[%c0_357, %c0_358, %c7_359, %c0_360] : memref<1x4x32x32xf32, #tpu.memory_space<vmem>>, vector<1x1x1x32xf32>
    %1278 = vector.shape_cast %1277 : vector<1x1x1x32xf32> to vector<1x32xf32>
    %1279 = vector.shape_cast %1276 : vector<1x32xf32> to vector<1x1x1x32xf32>
    tpu.vector_store %arg4[%c0_357, %c0_358, %c7_359, %c0_360], %1279 {strides = array<i32>} : memref<1x4x32x32xf32, #tpu.memory_space<vmem>>, vector<1x1x1x32xf32>,
    %1280 = vector.extract_strided_slice %1244 {offsets = [4, 0], sizes = [1, 32], strides = [1, 1]} : vector<16x32xf32> to vector<1x32xf32>
    %c0_361 = arith.constant 0 : index
    %c0_362 = arith.constant 0 : index
    %c8_363 = arith.constant 8 : index
    %c0_364 = arith.constant 0 : index
    %1281 = vector.load %arg4[%c0_361, %c0_362, %c8_363, %c0_364] : memref<1x4x32x32xf32, #tpu.memory_space<vmem>>, vector<1x1x1x32xf32>
    %1282 = vector.shape_cast %1281 : vector<1x1x1x32xf32> to vector<1x32xf32>
    %1283 = vector.shape_cast %1280 : vector<1x32xf32> to vector<1x1x1x32xf32>
    tpu.vector_store %arg4[%c0_361, %c0_362, %c8_363, %c0_364], %1283 {strides = array<i32>} : memref<1x4x32x32xf32, #tpu.memory_space<vmem>>, vector<1x1x1x32xf32>,
    %1284 = vector.extract_strided_slice %1247 {offsets = [4, 0], sizes = [1, 32], strides = [1, 1]} : vector<16x32xf32> to vector<1x32xf32>
    %c0_365 = arith.constant 0 : index
    %c0_366 = arith.constant 0 : index
    %c9_367 = arith.constant 9 : index
    %c0_368 = arith.constant 0 : index
    %1285 = vector.load %arg4[%c0_365, %c0_366, %c9_367, %c0_368] : memref<1x4x32x32xf32, #tpu.memory_space<vmem>>, vector<1x1x1x32xf32>
    %1286 = vector.shape_cast %1285 : vector<1x1x1x32xf32> to vector<1x32xf32>
    %1287 = vector.shape_cast %1284 : vector<1x32xf32> to vector<1x1x1x32xf32>
    tpu.vector_store %arg4[%c0_365, %c0_366, %c9_367, %c0_368], %1287 {strides = array<i32>} : memref<1x4x32x32xf32, #tpu.memory_space<vmem>>, vector<1x1x1x32xf32>,
    %1288 = vector.extract_strided_slice %1244 {offsets = [5, 0], sizes = [1, 32], strides = [1, 1]} : vector<16x32xf32> to vector<1x32xf32>
    %c0_369 = arith.constant 0 : index
    %c0_370 = arith.constant 0 : index
    %c10_371 = arith.constant 10 : index
    %c0_372 = arith.constant 0 : index
    %1289 = vector.load %arg4[%c0_369, %c0_370, %c10_371, %c0_372] : memref<1x4x32x32xf32, #tpu.memory_space<vmem>>, vector<1x1x1x32xf32>
    %1290 = vector.shape_cast %1289 : vector<1x1x1x32xf32> to vector<1x32xf32>
    %1291 = vector.shape_cast %1288 : vector<1x32xf32> to vector<1x1x1x32xf32>
    tpu.vector_store %arg4[%c0_369, %c0_370, %c10_371, %c0_372], %1291 {strides = array<i32>} : memref<1x4x32x32xf32, #tpu.memory_space<vmem>>, vector<1x1x1x32xf32>,
    %1292 = vector.extract_strided_slice %1247 {offsets = [5, 0], sizes = [1, 32], strides = [1, 1]} : vector<16x32xf32> to vector<1x32xf32>
    %c0_373 = arith.constant 0 : index
    %c0_374 = arith.constant 0 : index
    %c11_375 = arith.constant 11 : index
    %c0_376 = arith.constant 0 : index
    %1293 = vector.load %arg4[%c0_373, %c0_374, %c11_375, %c0_376] : memref<1x4x32x32xf32, #tpu.memory_space<vmem>>, vector<1x1x1x32xf32>
    %1294 = vector.shape_cast %1293 : vector<1x1x1x32xf32> to vector<1x32xf32>
    %1295 = vector.shape_cast %1292 : vector<1x32xf32> to vector<1x1x1x32xf32>
    tpu.vector_store %arg4[%c0_373, %c0_374, %c11_375, %c0_376], %1295 {strides = array<i32>} : memref<1x4x32x32xf32, #tpu.memory_space<vmem>>, vector<1x1x1x32xf32>,
    %1296 = vector.extract_strided_slice %1244 {offsets = [6, 0], sizes = [1, 32], strides = [1, 1]} : vector<16x32xf32> to vector<1x32xf32>
    %c0_377 = arith.constant 0 : index
    %c0_378 = arith.constant 0 : index
    %c12_379 = arith.constant 12 : index
    %c0_380 = arith.constant 0 : index
    %1297 = vector.load %arg4[%c0_377, %c0_378, %c12_379, %c0_380] : memref<1x4x32x32xf32, #tpu.memory_space<vmem>>, vector<1x1x1x32xf32>
    %1298 = vector.shape_cast %1297 : vector<1x1x1x32xf32> to vector<1x32xf32>
    %1299 = vector.shape_cast %1296 : vector<1x32xf32> to vector<1x1x1x32xf32>
    tpu.vector_store %arg4[%c0_377, %c0_378, %c12_379, %c0_380], %1299 {strides = array<i32>} : memref<1x4x32x32xf32, #tpu.memory_space<vmem>>, vector<1x1x1x32xf32>,
    %1300 = vector.extract_strided_slice %1247 {offsets = [6, 0], sizes = [1, 32], strides = [1, 1]} : vector<16x32xf32> to vector<1x32xf32>
    %c0_381 = arith.constant 0 : index
    %c0_382 = arith.constant 0 : index
    %c13_383 = arith.constant 13 : index
    %c0_384 = arith.constant 0 : index
    %1301 = vector.load %arg4[%c0_381, %c0_382, %c13_383, %c0_384] : memref<1x4x32x32xf32, #tpu.memory_space<vmem>>, vector<1x1x1x32xf32>
    %1302 = vector.shape_cast %1301 : vector<1x1x1x32xf32> to vector<1x32xf32>
    %1303 = vector.shape_cast %1300 : vector<1x32xf32> to vector<1x1x1x32xf32>
    tpu.vector_store %arg4[%c0_381, %c0_382, %c13_383, %c0_384], %1303 {strides = array<i32>} : memref<1x4x32x32xf32, #tpu.memory_space<vmem>>, vector<1x1x1x32xf32>,
    %1304 = vector.extract_strided_slice %1244 {offsets = [7, 0], sizes = [1, 32], strides = [1, 1]} : vector<16x32xf32> to vector<1x32xf32>
    %c0_385 = arith.constant 0 : index
    %c0_386 = arith.constant 0 : index
    %c14_387 = arith.constant 14 : index
    %c0_388 = arith.constant 0 : index
    %1305 = vector.load %arg4[%c0_385, %c0_386, %c14_387, %c0_388] : memref<1x4x32x32xf32, #tpu.memory_space<vmem>>, vector<1x1x1x32xf32>
    %1306 = vector.shape_cast %1305 : vector<1x1x1x32xf32> to vector<1x32xf32>
    %1307 = vector.shape_cast %1304 : vector<1x32xf32> to vector<1x1x1x32xf32>
    tpu.vector_store %arg4[%c0_385, %c0_386, %c14_387, %c0_388], %1307 {strides = array<i32>} : memref<1x4x32x32xf32, #tpu.memory_space<vmem>>, vector<1x1x1x32xf32>,
    %1308 = vector.extract_strided_slice %1247 {offsets = [7, 0], sizes = [1, 32], strides = [1, 1]} : vector<16x32xf32> to vector<1x32xf32>
    %c0_389 = arith.constant 0 : index
    %c0_390 = arith.constant 0 : index
    %c15_391 = arith.constant 15 : index
    %c0_392 = arith.constant 0 : index
    %1309 = vector.load %arg4[%c0_389, %c0_390, %c15_391, %c0_392] : memref<1x4x32x32xf32, #tpu.memory_space<vmem>>, vector<1x1x1x32xf32>
    %1310 = vector.shape_cast %1309 : vector<1x1x1x32xf32> to vector<1x32xf32>
    %1311 = vector.shape_cast %1308 : vector<1x32xf32> to vector<1x1x1x32xf32>
    tpu.vector_store %arg4[%c0_389, %c0_390, %c15_391, %c0_392], %1311 {strides = array<i32>} : memref<1x4x32x32xf32, #tpu.memory_space<vmem>>, vector<1x1x1x32xf32>,
    %1312 = vector.extract_strided_slice %1244 {offsets = [8, 0], sizes = [1, 32], strides = [1, 1]} : vector<16x32xf32> to vector<1x32xf32>
    %c0_393 = arith.constant 0 : index
    %c0_394 = arith.constant 0 : index
    %c16_395 = arith.constant 16 : index
    %c0_396 = arith.constant 0 : index
    %1313 = vector.load %arg4[%c0_393, %c0_394, %c16_395, %c0_396] : memref<1x4x32x32xf32, #tpu.memory_space<vmem>>, vector<1x1x1x32xf32>
    %1314 = vector.shape_cast %1313 : vector<1x1x1x32xf32> to vector<1x32xf32>
    %1315 = vector.shape_cast %1312 : vector<1x32xf32> to vector<1x1x1x32xf32>
    tpu.vector_store %arg4[%c0_393, %c0_394, %c16_395, %c0_396], %1315 {strides = array<i32>} : memref<1x4x32x32xf32, #tpu.memory_space<vmem>>, vector<1x1x1x32xf32>,
    %1316 = vector.extract_strided_slice %1247 {offsets = [8, 0], sizes = [1, 32], strides = [1, 1]} : vector<16x32xf32> to vector<1x32xf32>
    %c0_397 = arith.constant 0 : index
    %c0_398 = arith.constant 0 : index
    %c17_399 = arith.constant 17 : index
    %c0_400 = arith.constant 0 : index
    %1317 = vector.load %arg4[%c0_397, %c0_398, %c17_399, %c0_400] : memref<1x4x32x32xf32, #tpu.memory_space<vmem>>, vector<1x1x1x32xf32>
    %1318 = vector.shape_cast %1317 : vector<1x1x1x32xf32> to vector<1x32xf32>
    %1319 = vector.shape_cast %1316 : vector<1x32xf32> to vector<1x1x1x32xf32>
    tpu.vector_store %arg4[%c0_397, %c0_398, %c17_399, %c0_400], %1319 {strides = array<i32>} : memref<1x4x32x32xf32, #tpu.memory_space<vmem>>, vector<1x1x1x32xf32>,
    %1320 = vector.extract_strided_slice %1244 {offsets = [9, 0], sizes = [1, 32], strides = [1, 1]} : vector<16x32xf32> to vector<1x32xf32>
    %c0_401 = arith.constant 0 : index
    %c0_402 = arith.constant 0 : index
    %c18_403 = arith.constant 18 : index
    %c0_404 = arith.constant 0 : index
    %1321 = vector.load %arg4[%c0_401, %c0_402, %c18_403, %c0_404] : memref<1x4x32x32xf32, #tpu.memory_space<vmem>>, vector<1x1x1x32xf32>
    %1322 = vector.shape_cast %1321 : vector<1x1x1x32xf32> to vector<1x32xf32>
    %1323 = vector.shape_cast %1320 : vector<1x32xf32> to vector<1x1x1x32xf32>
    tpu.vector_store %arg4[%c0_401, %c0_402, %c18_403, %c0_404], %1323 {strides = array<i32>} : memref<1x4x32x32xf32, #tpu.memory_space<vmem>>, vector<1x1x1x32xf32>,
    %1324 = vector.extract_strided_slice %1247 {offsets = [9, 0], sizes = [1, 32], strides = [1, 1]} : vector<16x32xf32> to vector<1x32xf32>
    %c0_405 = arith.constant 0 : index
    %c0_406 = arith.constant 0 : index
    %c19_407 = arith.constant 19 : index
    %c0_408 = arith.constant 0 : index
    %1325 = vector.load %arg4[%c0_405, %c0_406, %c19_407, %c0_408] : memref<1x4x32x32xf32, #tpu.memory_space<vmem>>, vector<1x1x1x32xf32>
    %1326 = vector.shape_cast %1325 : vector<1x1x1x32xf32> to vector<1x32xf32>
    %1327 = vector.shape_cast %1324 : vector<1x32xf32> to vector<1x1x1x32xf32>
    tpu.vector_store %arg4[%c0_405, %c0_406, %c19_407, %c0_408], %1327 {strides = array<i32>} : memref<1x4x32x32xf32, #tpu.memory_space<vmem>>, vector<1x1x1x32xf32>,
    %1328 = vector.extract_strided_slice %1244 {offsets = [10, 0], sizes = [1, 32], strides = [1, 1]} : vector<16x32xf32> to vector<1x32xf32>
    %c0_409 = arith.constant 0 : index
    %c0_410 = arith.constant 0 : index
    %c20_411 = arith.constant 20 : index
    %c0_412 = arith.constant 0 : index
    %1329 = vector.load %arg4[%c0_409, %c0_410, %c20_411, %c0_412] : memref<1x4x32x32xf32, #tpu.memory_space<vmem>>, vector<1x1x1x32xf32>
    %1330 = vector.shape_cast %1329 : vector<1x1x1x32xf32> to vector<1x32xf32>
    %1331 = vector.shape_cast %1328 : vector<1x32xf32> to vector<1x1x1x32xf32>
    tpu.vector_store %arg4[%c0_409, %c0_410, %c20_411, %c0_412], %1331 {strides = array<i32>} : memref<1x4x32x32xf32, #tpu.memory_space<vmem>>, vector<1x1x1x32xf32>,
    %1332 = vector.extract_strided_slice %1247 {offsets = [10, 0], sizes = [1, 32], strides = [1, 1]} : vector<16x32xf32> to vector<1x32xf32>
    %c0_413 = arith.constant 0 : index
    %c0_414 = arith.constant 0 : index
    %c21_415 = arith.constant 21 : index
    %c0_416 = arith.constant 0 : index
    %1333 = vector.load %arg4[%c0_413, %c0_414, %c21_415, %c0_416] : memref<1x4x32x32xf32, #tpu.memory_space<vmem>>, vector<1x1x1x32xf32>
    %1334 = vector.shape_cast %1333 : vector<1x1x1x32xf32> to vector<1x32xf32>
    %1335 = vector.shape_cast %1332 : vector<1x32xf32> to vector<1x1x1x32xf32>
    tpu.vector_store %arg4[%c0_413, %c0_414, %c21_415, %c0_416], %1335 {strides = array<i32>} : memref<1x4x32x32xf32, #tpu.memory_space<vmem>>, vector<1x1x1x32xf32>,
    %1336 = vector.extract_strided_slice %1244 {offsets = [11, 0], sizes = [1, 32], strides = [1, 1]} : vector<16x32xf32> to vector<1x32xf32>
    %c0_417 = arith.constant 0 : index
    %c0_418 = arith.constant 0 : index
    %c22_419 = arith.constant 22 : index
    %c0_420 = arith.constant 0 : index
    %1337 = vector.load %arg4[%c0_417, %c0_418, %c22_419, %c0_420] : memref<1x4x32x32xf32, #tpu.memory_space<vmem>>, vector<1x1x1x32xf32>
    %1338 = vector.shape_cast %1337 : vector<1x1x1x32xf32> to vector<1x32xf32>
    %1339 = vector.shape_cast %1336 : vector<1x32xf32> to vector<1x1x1x32xf32>
    tpu.vector_store %arg4[%c0_417, %c0_418, %c22_419, %c0_420], %1339 {strides = array<i32>} : memref<1x4x32x32xf32, #tpu.memory_space<vmem>>, vector<1x1x1x32xf32>,
    %1340 = vector.extract_strided_slice %1247 {offsets = [11, 0], sizes = [1, 32], strides = [1, 1]} : vector<16x32xf32> to vector<1x32xf32>
    %c0_421 = arith.constant 0 : index
    %c0_422 = arith.constant 0 : index
    %c23_423 = arith.constant 23 : index
    %c0_424 = arith.constant 0 : index
    %1341 = vector.load %arg4[%c0_421, %c0_422, %c23_423, %c0_424] : memref<1x4x32x32xf32, #tpu.memory_space<vmem>>, vector<1x1x1x32xf32>
    %1342 = vector.shape_cast %1341 : vector<1x1x1x32xf32> to vector<1x32xf32>
    %1343 = vector.shape_cast %1340 : vector<1x32xf32> to vector<1x1x1x32xf32>
    tpu.vector_store %arg4[%c0_421, %c0_422, %c23_423, %c0_424], %1343 {strides = array<i32>} : memref<1x4x32x32xf32, #tpu.memory_space<vmem>>, vector<1x1x1x32xf32>,
    %1344 = vector.extract_strided_slice %1244 {offsets = [12, 0], sizes = [1, 32], strides = [1, 1]} : vector<16x32xf32> to vector<1x32xf32>
    %c0_425 = arith.constant 0 : index
    %c0_426 = arith.constant 0 : index
    %c24_427 = arith.constant 24 : index
    %c0_428 = arith.constant 0 : index
    %1345 = vector.load %arg4[%c0_425, %c0_426, %c24_427, %c0_428] : memref<1x4x32x32xf32, #tpu.memory_space<vmem>>, vector<1x1x1x32xf32>
    %1346 = vector.shape_cast %1345 : vector<1x1x1x32xf32> to vector<1x32xf32>
    %1347 = vector.shape_cast %1344 : vector<1x32xf32> to vector<1x1x1x32xf32>
    tpu.vector_store %arg4[%c0_425, %c0_426, %c24_427, %c0_428], %1347 {strides = array<i32>} : memref<1x4x32x32xf32, #tpu.memory_space<vmem>>, vector<1x1x1x32xf32>,
    %1348 = vector.extract_strided_slice %1247 {offsets = [12, 0], sizes = [1, 32], strides = [1, 1]} : vector<16x32xf32> to vector<1x32xf32>
    %c0_429 = arith.constant 0 : index
    %c0_430 = arith.constant 0 : index
    %c25_431 = arith.constant 25 : index
    %c0_432 = arith.constant 0 : index
    %1349 = vector.load %arg4[%c0_429, %c0_430, %c25_431, %c0_432] : memref<1x4x32x32xf32, #tpu.memory_space<vmem>>, vector<1x1x1x32xf32>
    %1350 = vector.shape_cast %1349 : vector<1x1x1x32xf32> to vector<1x32xf32>
    %1351 = vector.shape_cast %1348 : vector<1x32xf32> to vector<1x1x1x32xf32>
    tpu.vector_store %arg4[%c0_429, %c0_430, %c25_431, %c0_432], %1351 {strides = array<i32>} : memref<1x4x32x32xf32, #tpu.memory_space<vmem>>, vector<1x1x1x32xf32>,
    %1352 = vector.extract_strided_slice %1244 {offsets = [13, 0], sizes = [1, 32], strides = [1, 1]} : vector<16x32xf32> to vector<1x32xf32>
    %c0_433 = arith.constant 0 : index
    %c0_434 = arith.constant 0 : index
    %c26_435 = arith.constant 26 : index
    %c0_436 = arith.constant 0 : index
    %1353 = vector.load %arg4[%c0_433, %c0_434, %c26_435, %c0_436] : memref<1x4x32x32xf32, #tpu.memory_space<vmem>>, vector<1x1x1x32xf32>
    %1354 = vector.shape_cast %1353 : vector<1x1x1x32xf32> to vector<1x32xf32>
    %1355 = vector.shape_cast %1352 : vector<1x32xf32> to vector<1x1x1x32xf32>
    tpu.vector_store %arg4[%c0_433, %c0_434, %c26_435, %c0_436], %1355 {strides = array<i32>} : memref<1x4x32x32xf32, #tpu.memory_space<vmem>>, vector<1x1x1x32xf32>,
    %1356 = vector.extract_strided_slice %1247 {offsets = [13, 0], sizes = [1, 32], strides = [1, 1]} : vector<16x32xf32> to vector<1x32xf32>
    %c0_437 = arith.constant 0 : index
    %c0_438 = arith.constant 0 : index
    %c27_439 = arith.constant 27 : index
    %c0_440 = arith.constant 0 : index
    %1357 = vector.load %arg4[%c0_437, %c0_438, %c27_439, %c0_440] : memref<1x4x32x32xf32, #tpu.memory_space<vmem>>, vector<1x1x1x32xf32>
    %1358 = vector.shape_cast %1357 : vector<1x1x1x32xf32> to vector<1x32xf32>
    %1359 = vector.shape_cast %1356 : vector<1x32xf32> to vector<1x1x1x32xf32>
    tpu.vector_store %arg4[%c0_437, %c0_438, %c27_439, %c0_440], %1359 {strides = array<i32>} : memref<1x4x32x32xf32, #tpu.memory_space<vmem>>, vector<1x1x1x32xf32>,
    %1360 = vector.extract_strided_slice %1244 {offsets = [14, 0], sizes = [1, 32], strides = [1, 1]} : vector<16x32xf32> to vector<1x32xf32>
    %c0_441 = arith.constant 0 : index
    %c0_442 = arith.constant 0 : index
    %c28_443 = arith.constant 28 : index
    %c0_444 = arith.constant 0 : index
    %1361 = vector.load %arg4[%c0_441, %c0_442, %c28_443, %c0_444] : memref<1x4x32x32xf32, #tpu.memory_space<vmem>>, vector<1x1x1x32xf32>
    %1362 = vector.shape_cast %1361 : vector<1x1x1x32xf32> to vector<1x32xf32>
    %1363 = vector.shape_cast %1360 : vector<1x32xf32> to vector<1x1x1x32xf32>
    tpu.vector_store %arg4[%c0_441, %c0_442, %c28_443, %c0_444], %1363 {strides = array<i32>} : memref<1x4x32x32xf32, #tpu.memory_space<vmem>>, vector<1x1x1x32xf32>,
    %1364 = vector.extract_strided_slice %1247 {offsets = [14, 0], sizes = [1, 32], strides = [1, 1]} : vector<16x32xf32> to vector<1x32xf32>
    %c0_445 = arith.constant 0 : index
    %c0_446 = arith.constant 0 : index
    %c29_447 = arith.constant 29 : index
    %c0_448 = arith.constant 0 : index
    %1365 = vector.load %arg4[%c0_445, %c0_446, %c29_447, %c0_448] : memref<1x4x32x32xf32, #tpu.memory_space<vmem>>, vector<1x1x1x32xf32>
    %1366 = vector.shape_cast %1365 : vector<1x1x1x32xf32> to vector<1x32xf32>
    %1367 = vector.shape_cast %1364 : vector<1x32xf32> to vector<1x1x1x32xf32>
    tpu.vector_store %arg4[%c0_445, %c0_446, %c29_447, %c0_448], %1367 {strides = array<i32>} : memref<1x4x32x32xf32, #tpu.memory_space<vmem>>, vector<1x1x1x32xf32>,
    %1368 = vector.extract_strided_slice %1244 {offsets = [15, 0], sizes = [1, 32], strides = [1, 1]} : vector<16x32xf32> to vector<1x32xf32>
    %c0_449 = arith.constant 0 : index
    %c0_450 = arith.constant 0 : index
    %c30_451 = arith.constant 30 : index
    %c0_452 = arith.constant 0 : index
    %1369 = vector.load %arg4[%c0_449, %c0_450, %c30_451, %c0_452] : memref<1x4x32x32xf32, #tpu.memory_space<vmem>>, vector<1x1x1x32xf32>
    %1370 = vector.shape_cast %1369 : vector<1x1x1x32xf32> to vector<1x32xf32>
    %1371 = vector.shape_cast %1368 : vector<1x32xf32> to vector<1x1x1x32xf32>
    tpu.vector_store %arg4[%c0_449, %c0_450, %c30_451, %c0_452], %1371 {strides = array<i32>} : memref<1x4x32x32xf32, #tpu.memory_space<vmem>>, vector<1x1x1x32xf32>,
    %1372 = vector.extract_strided_slice %1247 {offsets = [15, 0], sizes = [1, 32], strides = [1, 1]} : vector<16x32xf32> to vector<1x32xf32>
    %c0_453 = arith.constant 0 : index
    %c0_454 = arith.constant 0 : index
    %c31_455 = arith.constant 31 : index
    %c0_456 = arith.constant 0 : index
    %1373 = vector.load %arg4[%c0_453, %c0_454, %c31_455, %c0_456] : memref<1x4x32x32xf32, #tpu.memory_space<vmem>>, vector<1x1x1x32xf32>
    %1374 = vector.shape_cast %1373 : vector<1x1x1x32xf32> to vector<1x32xf32>
    %1375 = vector.shape_cast %1372 : vector<1x32xf32> to vector<1x1x1x32xf32>
    tpu.vector_store %arg4[%c0_453, %c0_454, %c31_455, %c0_456], %1375 {strides = array<i32>} : memref<1x4x32x32xf32, #tpu.memory_space<vmem>>, vector<1x1x1x32xf32>,
    %c1_457 = arith.constant 1 : index
    %1376 = memref.load %arg3[%c1_457] : memref<4xf32, #tpu.memory_space<smem>>
    %1377 = vector.broadcast %1376 : f32 to vector<16x32xf32>
    %1378 = arith.addf %1121, %1377 : vector<16x32xf32>
    %c1_458 = arith.constant 1 : index
    %1379 = memref.load %arg3[%c1_458] : memref<4xf32, #tpu.memory_space<smem>>
    %1380 = vector.broadcast %1379 : f32 to vector<16x32xf32>
    %1381 = arith.addf %1145, %1380 : vector<16x32xf32>
    %1382 = vector.extract_strided_slice %1378 {offsets = [0, 0], sizes = [1, 32], strides = [1, 1]} : vector<16x32xf32> to vector<1x32xf32>
    %c0_459 = arith.constant 0 : index
    %c1_460 = arith.constant 1 : index
    %c0_461 = arith.constant 0 : index
    %c0_462 = arith.constant 0 : index
    %1383 = vector.load %arg4[%c0_459, %c1_460, %c0_461, %c0_462] : memref<1x4x32x32xf32, #tpu.memory_space<vmem>>, vector<1x1x1x32xf32>
    %1384 = vector.shape_cast %1383 : vector<1x1x1x32xf32> to vector<1x32xf32>
    %1385 = vector.shape_cast %1382 : vector<1x32xf32> to vector<1x1x1x32xf32>
    tpu.vector_store %arg4[%c0_459, %c1_460, %c0_461, %c0_462], %1385 {strides = array<i32>} : memref<1x4x32x32xf32, #tpu.memory_space<vmem>>, vector<1x1x1x32xf32>,
    %1386 = vector.extract_strided_slice %1381 {offsets = [0, 0], sizes = [1, 32], strides = [1, 1]} : vector<16x32xf32> to vector<1x32xf32>
    %c0_463 = arith.constant 0 : index
    %c1_464 = arith.constant 1 : index
    %c1_465 = arith.constant 1 : index
    %c0_466 = arith.constant 0 : index
    %1387 = vector.load %arg4[%c0_463, %c1_464, %c1_465, %c0_466] : memref<1x4x32x32xf32, #tpu.memory_space<vmem>>, vector<1x1x1x32xf32>
    %1388 = vector.shape_cast %1387 : vector<1x1x1x32xf32> to vector<1x32xf32>
    %1389 = vector.shape_cast %1386 : vector<1x32xf32> to vector<1x1x1x32xf32>
    tpu.vector_store %arg4[%c0_463, %c1_464, %c1_465, %c0_466], %1389 {strides = array<i32>} : memref<1x4x32x32xf32, #tpu.memory_space<vmem>>, vector<1x1x1x32xf32>,
    %1390 = vector.extract_strided_slice %1378 {offsets = [1, 0], sizes = [1, 32], strides = [1, 1]} : vector<16x32xf32> to vector<1x32xf32>
    %c0_467 = arith.constant 0 : index
    %c1_468 = arith.constant 1 : index
    %c2_469 = arith.constant 2 : index
    %c0_470 = arith.constant 0 : index
    %1391 = vector.load %arg4[%c0_467, %c1_468, %c2_469, %c0_470] : memref<1x4x32x32xf32, #tpu.memory_space<vmem>>, vector<1x1x1x32xf32>
    %1392 = vector.shape_cast %1391 : vector<1x1x1x32xf32> to vector<1x32xf32>
    %1393 = vector.shape_cast %1390 : vector<1x32xf32> to vector<1x1x1x32xf32>
    tpu.vector_store %arg4[%c0_467, %c1_468, %c2_469, %c0_470], %1393 {strides = array<i32>} : memref<1x4x32x32xf32, #tpu.memory_space<vmem>>, vector<1x1x1x32xf32>,
    %1394 = vector.extract_strided_slice %1381 {offsets = [1, 0], sizes = [1, 32], strides = [1, 1]} : vector<16x32xf32> to vector<1x32xf32>
    %c0_471 = arith.constant 0 : index
    %c1_472 = arith.constant 1 : index
    %c3_473 = arith.constant 3 : index
    %c0_474 = arith.constant 0 : index
    %1395 = vector.load %arg4[%c0_471, %c1_472, %c3_473, %c0_474] : memref<1x4x32x32xf32, #tpu.memory_space<vmem>>, vector<1x1x1x32xf32>
    %1396 = vector.shape_cast %1395 : vector<1x1x1x32xf32> to vector<1x32xf32>
    %1397 = vector.shape_cast %1394 : vector<1x32xf32> to vector<1x1x1x32xf32>
    tpu.vector_store %arg4[%c0_471, %c1_472, %c3_473, %c0_474], %1397 {strides = array<i32>} : memref<1x4x32x32xf32, #tpu.memory_space<vmem>>, vector<1x1x1x32xf32>,
    %1398 = vector.extract_strided_slice %1378 {offsets = [2, 0], sizes = [1, 32], strides = [1, 1]} : vector<16x32xf32> to vector<1x32xf32>
    %c0_475 = arith.constant 0 : index
    %c1_476 = arith.constant 1 : index
    %c4_477 = arith.constant 4 : index
    %c0_478 = arith.constant 0 : index
    %1399 = vector.load %arg4[%c0_475, %c1_476, %c4_477, %c0_478] : memref<1x4x32x32xf32, #tpu.memory_space<vmem>>, vector<1x1x1x32xf32>
    %1400 = vector.shape_cast %1399 : vector<1x1x1x32xf32> to vector<1x32xf32>
    %1401 = vector.shape_cast %1398 : vector<1x32xf32> to vector<1x1x1x32xf32>
    tpu.vector_store %arg4[%c0_475, %c1_476, %c4_477, %c0_478], %1401 {strides = array<i32>} : memref<1x4x32x32xf32, #tpu.memory_space<vmem>>, vector<1x1x1x32xf32>,
    %1402 = vector.extract_strided_slice %1381 {offsets = [2, 0], sizes = [1, 32], strides = [1, 1]} : vector<16x32xf32> to vector<1x32xf32>
    %c0_479 = arith.constant 0 : index
    %c1_480 = arith.constant 1 : index
    %c5_481 = arith.constant 5 : index
    %c0_482 = arith.constant 0 : index
    %1403 = vector.load %arg4[%c0_479, %c1_480, %c5_481, %c0_482] : memref<1x4x32x32xf32, #tpu.memory_space<vmem>>, vector<1x1x1x32xf32>
    %1404 = vector.shape_cast %1403 : vector<1x1x1x32xf32> to vector<1x32xf32>
    %1405 = vector.shape_cast %1402 : vector<1x32xf32> to vector<1x1x1x32xf32>
    tpu.vector_store %arg4[%c0_479, %c1_480, %c5_481, %c0_482], %1405 {strides = array<i32>} : memref<1x4x32x32xf32, #tpu.memory_space<vmem>>, vector<1x1x1x32xf32>,
    %1406 = vector.extract_strided_slice %1378 {offsets = [3, 0], sizes = [1, 32], strides = [1, 1]} : vector<16x32xf32> to vector<1x32xf32>
    %c0_483 = arith.constant 0 : index
    %c1_484 = arith.constant 1 : index
    %c6_485 = arith.constant 6 : index
    %c0_486 = arith.constant 0 : index
    %1407 = vector.load %arg4[%c0_483, %c1_484, %c6_485, %c0_486] : memref<1x4x32x32xf32, #tpu.memory_space<vmem>>, vector<1x1x1x32xf32>
    %1408 = vector.shape_cast %1407 : vector<1x1x1x32xf32> to vector<1x32xf32>
    %1409 = vector.shape_cast %1406 : vector<1x32xf32> to vector<1x1x1x32xf32>
    tpu.vector_store %arg4[%c0_483, %c1_484, %c6_485, %c0_486], %1409 {strides = array<i32>} : memref<1x4x32x32xf32, #tpu.memory_space<vmem>>, vector<1x1x1x32xf32>,
    %1410 = vector.extract_strided_slice %1381 {offsets = [3, 0], sizes = [1, 32], strides = [1, 1]} : vector<16x32xf32> to vector<1x32xf32>
    %c0_487 = arith.constant 0 : index
    %c1_488 = arith.constant 1 : index
    %c7_489 = arith.constant 7 : index
    %c0_490 = arith.constant 0 : index
    %1411 = vector.load %arg4[%c0_487, %c1_488, %c7_489, %c0_490] : memref<1x4x32x32xf32, #tpu.memory_space<vmem>>, vector<1x1x1x32xf32>
    %1412 = vector.shape_cast %1411 : vector<1x1x1x32xf32> to vector<1x32xf32>
    %1413 = vector.shape_cast %1410 : vector<1x32xf32> to vector<1x1x1x32xf32>
    tpu.vector_store %arg4[%c0_487, %c1_488, %c7_489, %c0_490], %1413 {strides = array<i32>} : memref<1x4x32x32xf32, #tpu.memory_space<vmem>>, vector<1x1x1x32xf32>,
    %1414 = vector.extract_strided_slice %1378 {offsets = [4, 0], sizes = [1, 32], strides = [1, 1]} : vector<16x32xf32> to vector<1x32xf32>
    %c0_491 = arith.constant 0 : index
    %c1_492 = arith.constant 1 : index
    %c8_493 = arith.constant 8 : index
    %c0_494 = arith.constant 0 : index
    %1415 = vector.load %arg4[%c0_491, %c1_492, %c8_493, %c0_494] : memref<1x4x32x32xf32, #tpu.memory_space<vmem>>, vector<1x1x1x32xf32>
    %1416 = vector.shape_cast %1415 : vector<1x1x1x32xf32> to vector<1x32xf32>
    %1417 = vector.shape_cast %1414 : vector<1x32xf32> to vector<1x1x1x32xf32>
    tpu.vector_store %arg4[%c0_491, %c1_492, %c8_493, %c0_494], %1417 {strides = array<i32>} : memref<1x4x32x32xf32, #tpu.memory_space<vmem>>, vector<1x1x1x32xf32>,
    %1418 = vector.extract_strided_slice %1381 {offsets = [4, 0], sizes = [1, 32], strides = [1, 1]} : vector<16x32xf32> to vector<1x32xf32>
    %c0_495 = arith.constant 0 : index
    %c1_496 = arith.constant 1 : index
    %c9_497 = arith.constant 9 : index
    %c0_498 = arith.constant 0 : index
    %1419 = vector.load %arg4[%c0_495, %c1_496, %c9_497, %c0_498] : memref<1x4x32x32xf32, #tpu.memory_space<vmem>>, vector<1x1x1x32xf32>
    %1420 = vector.shape_cast %1419 : vector<1x1x1x32xf32> to vector<1x32xf32>
    %1421 = vector.shape_cast %1418 : vector<1x32xf32> to vector<1x1x1x32xf32>
    tpu.vector_store %arg4[%c0_495, %c1_496, %c9_497, %c0_498], %1421 {strides = array<i32>} : memref<1x4x32x32xf32, #tpu.memory_space<vmem>>, vector<1x1x1x32xf32>,
    %1422 = vector.extract_strided_slice %1378 {offsets = [5, 0], sizes = [1, 32], strides = [1, 1]} : vector<16x32xf32> to vector<1x32xf32>
    %c0_499 = arith.constant 0 : index
    %c1_500 = arith.constant 1 : index
    %c10_501 = arith.constant 10 : index
    %c0_502 = arith.constant 0 : index
    %1423 = vector.load %arg4[%c0_499, %c1_500, %c10_501, %c0_502] : memref<1x4x32x32xf32, #tpu.memory_space<vmem>>, vector<1x1x1x32xf32>
    %1424 = vector.shape_cast %1423 : vector<1x1x1x32xf32> to vector<1x32xf32>
    %1425 = vector.shape_cast %1422 : vector<1x32xf32> to vector<1x1x1x32xf32>
    tpu.vector_store %arg4[%c0_499, %c1_500, %c10_501, %c0_502], %1425 {strides = array<i32>} : memref<1x4x32x32xf32, #tpu.memory_space<vmem>>, vector<1x1x1x32xf32>,
    %1426 = vector.extract_strided_slice %1381 {offsets = [5, 0], sizes = [1, 32], strides = [1, 1]} : vector<16x32xf32> to vector<1x32xf32>
    %c0_503 = arith.constant 0 : index
    %c1_504 = arith.constant 1 : index
    %c11_505 = arith.constant 11 : index
    %c0_506 = arith.constant 0 : index
    %1427 = vector.load %arg4[%c0_503, %c1_504, %c11_505, %c0_506] : memref<1x4x32x32xf32, #tpu.memory_space<vmem>>, vector<1x1x1x32xf32>
    %1428 = vector.shape_cast %1427 : vector<1x1x1x32xf32> to vector<1x32xf32>
    %1429 = vector.shape_cast %1426 : vector<1x32xf32> to vector<1x1x1x32xf32>
    tpu.vector_store %arg4[%c0_503, %c1_504, %c11_505, %c0_506], %1429 {strides = array<i32>} : memref<1x4x32x32xf32, #tpu.memory_space<vmem>>, vector<1x1x1x32xf32>,
    %1430 = vector.extract_strided_slice %1378 {offsets = [6, 0], sizes = [1, 32], strides = [1, 1]} : vector<16x32xf32> to vector<1x32xf32>
    %c0_507 = arith.constant 0 : index
    %c1_508 = arith.constant 1 : index
    %c12_509 = arith.constant 12 : index
    %c0_510 = arith.constant 0 : index
    %1431 = vector.load %arg4[%c0_507, %c1_508, %c12_509, %c0_510] : memref<1x4x32x32xf32, #tpu.memory_space<vmem>>, vector<1x1x1x32xf32>
    %1432 = vector.shape_cast %1431 : vector<1x1x1x32xf32> to vector<1x32xf32>
    %1433 = vector.shape_cast %1430 : vector<1x32xf32> to vector<1x1x1x32xf32>
    tpu.vector_store %arg4[%c0_507, %c1_508, %c12_509, %c0_510], %1433 {strides = array<i32>} : memref<1x4x32x32xf32, #tpu.memory_space<vmem>>, vector<1x1x1x32xf32>,
    %1434 = vector.extract_strided_slice %1381 {offsets = [6, 0], sizes = [1, 32], strides = [1, 1]} : vector<16x32xf32> to vector<1x32xf32>
    %c0_511 = arith.constant 0 : index
    %c1_512 = arith.constant 1 : index
    %c13_513 = arith.constant 13 : index
    %c0_514 = arith.constant 0 : index
    %1435 = vector.load %arg4[%c0_511, %c1_512, %c13_513, %c0_514] : memref<1x4x32x32xf32, #tpu.memory_space<vmem>>, vector<1x1x1x32xf32>
    %1436 = vector.shape_cast %1435 : vector<1x1x1x32xf32> to vector<1x32xf32>
    %1437 = vector.shape_cast %1434 : vector<1x32xf32> to vector<1x1x1x32xf32>
    tpu.vector_store %arg4[%c0_511, %c1_512, %c13_513, %c0_514], %1437 {strides = array<i32>} : memref<1x4x32x32xf32, #tpu.memory_space<vmem>>, vector<1x1x1x32xf32>,
    %1438 = vector.extract_strided_slice %1378 {offsets = [7, 0], sizes = [1, 32], strides = [1, 1]} : vector<16x32xf32> to vector<1x32xf32>
    %c0_515 = arith.constant 0 : index
    %c1_516 = arith.constant 1 : index
    %c14_517 = arith.constant 14 : index
    %c0_518 = arith.constant 0 : index
    %1439 = vector.load %arg4[%c0_515, %c1_516, %c14_517, %c0_518] : memref<1x4x32x32xf32, #tpu.memory_space<vmem>>, vector<1x1x1x32xf32>
    %1440 = vector.shape_cast %1439 : vector<1x1x1x32xf32> to vector<1x32xf32>
    %1441 = vector.shape_cast %1438 : vector<1x32xf32> to vector<1x1x1x32xf32>
    tpu.vector_store %arg4[%c0_515, %c1_516, %c14_517, %c0_518], %1441 {strides = array<i32>} : memref<1x4x32x32xf32, #tpu.memory_space<vmem>>, vector<1x1x1x32xf32>,
    %1442 = vector.extract_strided_slice %1381 {offsets = [7, 0], sizes = [1, 32], strides = [1, 1]} : vector<16x32xf32> to vector<1x32xf32>
    %c0_519 = arith.constant 0 : index
    %c1_520 = arith.constant 1 : index
    %c15_521 = arith.constant 15 : index
    %c0_522 = arith.constant 0 : index
    %1443 = vector.load %arg4[%c0_519, %c1_520, %c15_521, %c0_522] : memref<1x4x32x32xf32, #tpu.memory_space<vmem>>, vector<1x1x1x32xf32>
    %1444 = vector.shape_cast %1443 : vector<1x1x1x32xf32> to vector<1x32xf32>
    %1445 = vector.shape_cast %1442 : vector<1x32xf32> to vector<1x1x1x32xf32>
    tpu.vector_store %arg4[%c0_519, %c1_520, %c15_521, %c0_522], %1445 {strides = array<i32>} : memref<1x4x32x32xf32, #tpu.memory_space<vmem>>, vector<1x1x1x32xf32>,
    %1446 = vector.extract_strided_slice %1378 {offsets = [8, 0], sizes = [1, 32], strides = [1, 1]} : vector<16x32xf32> to vector<1x32xf32>
    %c0_523 = arith.constant 0 : index
    %c1_524 = arith.constant 1 : index
    %c16_525 = arith.constant 16 : index
    %c0_526 = arith.constant 0 : index
    %1447 = vector.load %arg4[%c0_523, %c1_524, %c16_525, %c0_526] : memref<1x4x32x32xf32, #tpu.memory_space<vmem>>, vector<1x1x1x32xf32>
    %1448 = vector.shape_cast %1447 : vector<1x1x1x32xf32> to vector<1x32xf32>
    %1449 = vector.shape_cast %1446 : vector<1x32xf32> to vector<1x1x1x32xf32>
    tpu.vector_store %arg4[%c0_523, %c1_524, %c16_525, %c0_526], %1449 {strides = array<i32>} : memref<1x4x32x32xf32, #tpu.memory_space<vmem>>, vector<1x1x1x32xf32>,
    %1450 = vector.extract_strided_slice %1381 {offsets = [8, 0], sizes = [1, 32], strides = [1, 1]} : vector<16x32xf32> to vector<1x32xf32>
    %c0_527 = arith.constant 0 : index
    %c1_528 = arith.constant 1 : index
    %c17_529 = arith.constant 17 : index
    %c0_530 = arith.constant 0 : index
    %1451 = vector.load %arg4[%c0_527, %c1_528, %c17_529, %c0_530] : memref<1x4x32x32xf32, #tpu.memory_space<vmem>>, vector<1x1x1x32xf32>
    %1452 = vector.shape_cast %1451 : vector<1x1x1x32xf32> to vector<1x32xf32>
    %1453 = vector.shape_cast %1450 : vector<1x32xf32> to vector<1x1x1x32xf32>
    tpu.vector_store %arg4[%c0_527, %c1_528, %c17_529, %c0_530], %1453 {strides = array<i32>} : memref<1x4x32x32xf32, #tpu.memory_space<vmem>>, vector<1x1x1x32xf32>,
    %1454 = vector.extract_strided_slice %1378 {offsets = [9, 0], sizes = [1, 32], strides = [1, 1]} : vector<16x32xf32> to vector<1x32xf32>
    %c0_531 = arith.constant 0 : index
    %c1_532 = arith.constant 1 : index
    %c18_533 = arith.constant 18 : index
    %c0_534 = arith.constant 0 : index
    %1455 = vector.load %arg4[%c0_531, %c1_532, %c18_533, %c0_534] : memref<1x4x32x32xf32, #tpu.memory_space<vmem>>, vector<1x1x1x32xf32>
    %1456 = vector.shape_cast %1455 : vector<1x1x1x32xf32> to vector<1x32xf32>
    %1457 = vector.shape_cast %1454 : vector<1x32xf32> to vector<1x1x1x32xf32>
    tpu.vector_store %arg4[%c0_531, %c1_532, %c18_533, %c0_534], %1457 {strides = array<i32>} : memref<1x4x32x32xf32, #tpu.memory_space<vmem>>, vector<1x1x1x32xf32>,
    %1458 = vector.extract_strided_slice %1381 {offsets = [9, 0], sizes = [1, 32], strides = [1, 1]} : vector<16x32xf32> to vector<1x32xf32>
    %c0_535 = arith.constant 0 : index
    %c1_536 = arith.constant 1 : index
    %c19_537 = arith.constant 19 : index
    %c0_538 = arith.constant 0 : index
    %1459 = vector.load %arg4[%c0_535, %c1_536, %c19_537, %c0_538] : memref<1x4x32x32xf32, #tpu.memory_space<vmem>>, vector<1x1x1x32xf32>
    %1460 = vector.shape_cast %1459 : vector<1x1x1x32xf32> to vector<1x32xf32>
    %1461 = vector.shape_cast %1458 : vector<1x32xf32> to vector<1x1x1x32xf32>
    tpu.vector_store %arg4[%c0_535, %c1_536, %c19_537, %c0_538], %1461 {strides = array<i32>} : memref<1x4x32x32xf32, #tpu.memory_space<vmem>>, vector<1x1x1x32xf32>,
    %1462 = vector.extract_strided_slice %1378 {offsets = [10, 0], sizes = [1, 32], strides = [1, 1]} : vector<16x32xf32> to vector<1x32xf32>
    %c0_539 = arith.constant 0 : index
    %c1_540 = arith.constant 1 : index
    %c20_541 = arith.constant 20 : index
    %c0_542 = arith.constant 0 : index
    %1463 = vector.load %arg4[%c0_539, %c1_540, %c20_541, %c0_542] : memref<1x4x32x32xf32, #tpu.memory_space<vmem>>, vector<1x1x1x32xf32>
    %1464 = vector.shape_cast %1463 : vector<1x1x1x32xf32> to vector<1x32xf32>
    %1465 = vector.shape_cast %1462 : vector<1x32xf32> to vector<1x1x1x32xf32>
    tpu.vector_store %arg4[%c0_539, %c1_540, %c20_541, %c0_542], %1465 {strides = array<i32>} : memref<1x4x32x32xf32, #tpu.memory_space<vmem>>, vector<1x1x1x32xf32>,
    %1466 = vector.extract_strided_slice %1381 {offsets = [10, 0], sizes = [1, 32], strides = [1, 1]} : vector<16x32xf32> to vector<1x32xf32>
    %c0_543 = arith.constant 0 : index
    %c1_544 = arith.constant 1 : index
    %c21_545 = arith.constant 21 : index
    %c0_546 = arith.constant 0 : index
    %1467 = vector.load %arg4[%c0_543, %c1_544, %c21_545, %c0_546] : memref<1x4x32x32xf32, #tpu.memory_space<vmem>>, vector<1x1x1x32xf32>
    %1468 = vector.shape_cast %1467 : vector<1x1x1x32xf32> to vector<1x32xf32>
    %1469 = vector.shape_cast %1466 : vector<1x32xf32> to vector<1x1x1x32xf32>
    tpu.vector_store %arg4[%c0_543, %c1_544, %c21_545, %c0_546], %1469 {strides = array<i32>} : memref<1x4x32x32xf32, #tpu.memory_space<vmem>>, vector<1x1x1x32xf32>,
    %1470 = vector.extract_strided_slice %1378 {offsets = [11, 0], sizes = [1, 32], strides = [1, 1]} : vector<16x32xf32> to vector<1x32xf32>
    %c0_547 = arith.constant 0 : index
    %c1_548 = arith.constant 1 : index
    %c22_549 = arith.constant 22 : index
    %c0_550 = arith.constant 0 : index
    %1471 = vector.load %arg4[%c0_547, %c1_548, %c22_549, %c0_550] : memref<1x4x32x32xf32, #tpu.memory_space<vmem>>, vector<1x1x1x32xf32>
    %1472 = vector.shape_cast %1471 : vector<1x1x1x32xf32> to vector<1x32xf32>
    %1473 = vector.shape_cast %1470 : vector<1x32xf32> to vector<1x1x1x32xf32>
    tpu.vector_store %arg4[%c0_547, %c1_548, %c22_549, %c0_550], %1473 {strides = array<i32>} : memref<1x4x32x32xf32, #tpu.memory_space<vmem>>, vector<1x1x1x32xf32>,
    %1474 = vector.extract_strided_slice %1381 {offsets = [11, 0], sizes = [1, 32], strides = [1, 1]} : vector<16x32xf32> to vector<1x32xf32>
    %c0_551 = arith.constant 0 : index
    %c1_552 = arith.constant 1 : index
    %c23_553 = arith.constant 23 : index
    %c0_554 = arith.constant 0 : index
    %1475 = vector.load %arg4[%c0_551, %c1_552, %c23_553, %c0_554] : memref<1x4x32x32xf32, #tpu.memory_space<vmem>>, vector<1x1x1x32xf32>
    %1476 = vector.shape_cast %1475 : vector<1x1x1x32xf32> to vector<1x32xf32>
    %1477 = vector.shape_cast %1474 : vector<1x32xf32> to vector<1x1x1x32xf32>
    tpu.vector_store %arg4[%c0_551, %c1_552, %c23_553, %c0_554], %1477 {strides = array<i32>} : memref<1x4x32x32xf32, #tpu.memory_space<vmem>>, vector<1x1x1x32xf32>,
    %1478 = vector.extract_strided_slice %1378 {offsets = [12, 0], sizes = [1, 32], strides = [1, 1]} : vector<16x32xf32> to vector<1x32xf32>
    %c0_555 = arith.constant 0 : index
    %c1_556 = arith.constant 1 : index
    %c24_557 = arith.constant 24 : index
    %c0_558 = arith.constant 0 : index
    %1479 = vector.load %arg4[%c0_555, %c1_556, %c24_557, %c0_558] : memref<1x4x32x32xf32, #tpu.memory_space<vmem>>, vector<1x1x1x32xf32>
    %1480 = vector.shape_cast %1479 : vector<1x1x1x32xf32> to vector<1x32xf32>
    %1481 = vector.shape_cast %1478 : vector<1x32xf32> to vector<1x1x1x32xf32>
    tpu.vector_store %arg4[%c0_555, %c1_556, %c24_557, %c0_558], %1481 {strides = array<i32>} : memref<1x4x32x32xf32, #tpu.memory_space<vmem>>, vector<1x1x1x32xf32>,
    %1482 = vector.extract_strided_slice %1381 {offsets = [12, 0], sizes = [1, 32], strides = [1, 1]} : vector<16x32xf32> to vector<1x32xf32>
    %c0_559 = arith.constant 0 : index
    %c1_560 = arith.constant 1 : index
    %c25_561 = arith.constant 25 : index
    %c0_562 = arith.constant 0 : index
    %1483 = vector.load %arg4[%c0_559, %c1_560, %c25_561, %c0_562] : memref<1x4x32x32xf32, #tpu.memory_space<vmem>>, vector<1x1x1x32xf32>
    %1484 = vector.shape_cast %1483 : vector<1x1x1x32xf32> to vector<1x32xf32>
    %1485 = vector.shape_cast %1482 : vector<1x32xf32> to vector<1x1x1x32xf32>
    tpu.vector_store %arg4[%c0_559, %c1_560, %c25_561, %c0_562], %1485 {strides = array<i32>} : memref<1x4x32x32xf32, #tpu.memory_space<vmem>>, vector<1x1x1x32xf32>,
    %1486 = vector.extract_strided_slice %1378 {offsets = [13, 0], sizes = [1, 32], strides = [1, 1]} : vector<16x32xf32> to vector<1x32xf32>
    %c0_563 = arith.constant 0 : index
    %c1_564 = arith.constant 1 : index
    %c26_565 = arith.constant 26 : index
    %c0_566 = arith.constant 0 : index
    %1487 = vector.load %arg4[%c0_563, %c1_564, %c26_565, %c0_566] : memref<1x4x32x32xf32, #tpu.memory_space<vmem>>, vector<1x1x1x32xf32>
    %1488 = vector.shape_cast %1487 : vector<1x1x1x32xf32> to vector<1x32xf32>
    %1489 = vector.shape_cast %1486 : vector<1x32xf32> to vector<1x1x1x32xf32>
    tpu.vector_store %arg4[%c0_563, %c1_564, %c26_565, %c0_566], %1489 {strides = array<i32>} : memref<1x4x32x32xf32, #tpu.memory_space<vmem>>, vector<1x1x1x32xf32>,
    %1490 = vector.extract_strided_slice %1381 {offsets = [13, 0], sizes = [1, 32], strides = [1, 1]} : vector<16x32xf32> to vector<1x32xf32>
    %c0_567 = arith.constant 0 : index
    %c1_568 = arith.constant 1 : index
    %c27_569 = arith.constant 27 : index
    %c0_570 = arith.constant 0 : index
    %1491 = vector.load %arg4[%c0_567, %c1_568, %c27_569, %c0_570] : memref<1x4x32x32xf32, #tpu.memory_space<vmem>>, vector<1x1x1x32xf32>
    %1492 = vector.shape_cast %1491 : vector<1x1x1x32xf32> to vector<1x32xf32>
    %1493 = vector.shape_cast %1490 : vector<1x32xf32> to vector<1x1x1x32xf32>
    tpu.vector_store %arg4[%c0_567, %c1_568, %c27_569, %c0_570], %1493 {strides = array<i32>} : memref<1x4x32x32xf32, #tpu.memory_space<vmem>>, vector<1x1x1x32xf32>,
    %1494 = vector.extract_strided_slice %1378 {offsets = [14, 0], sizes = [1, 32], strides = [1, 1]} : vector<16x32xf32> to vector<1x32xf32>
    %c0_571 = arith.constant 0 : index
    %c1_572 = arith.constant 1 : index
    %c28_573 = arith.constant 28 : index
    %c0_574 = arith.constant 0 : index
    %1495 = vector.load %arg4[%c0_571, %c1_572, %c28_573, %c0_574] : memref<1x4x32x32xf32, #tpu.memory_space<vmem>>, vector<1x1x1x32xf32>
    %1496 = vector.shape_cast %1495 : vector<1x1x1x32xf32> to vector<1x32xf32>
    %1497 = vector.shape_cast %1494 : vector<1x32xf32> to vector<1x1x1x32xf32>
    tpu.vector_store %arg4[%c0_571, %c1_572, %c28_573, %c0_574], %1497 {strides = array<i32>} : memref<1x4x32x32xf32, #tpu.memory_space<vmem>>, vector<1x1x1x32xf32>,
    %1498 = vector.extract_strided_slice %1381 {offsets = [14, 0], sizes = [1, 32], strides = [1, 1]} : vector<16x32xf32> to vector<1x32xf32>
    %c0_575 = arith.constant 0 : index
    %c1_576 = arith.constant 1 : index
    %c29_577 = arith.constant 29 : index
    %c0_578 = arith.constant 0 : index
    %1499 = vector.load %arg4[%c0_575, %c1_576, %c29_577, %c0_578] : memref<1x4x32x32xf32, #tpu.memory_space<vmem>>, vector<1x1x1x32xf32>
    %1500 = vector.shape_cast %1499 : vector<1x1x1x32xf32> to vector<1x32xf32>
    %1501 = vector.shape_cast %1498 : vector<1x32xf32> to vector<1x1x1x32xf32>
    tpu.vector_store %arg4[%c0_575, %c1_576, %c29_577, %c0_578], %1501 {strides = array<i32>} : memref<1x4x32x32xf32, #tpu.memory_space<vmem>>, vector<1x1x1x32xf32>,
    %1502 = vector.extract_strided_slice %1378 {offsets = [15, 0], sizes = [1, 32], strides = [1, 1]} : vector<16x32xf32> to vector<1x32xf32>
    %c0_579 = arith.constant 0 : index
    %c1_580 = arith.constant 1 : index
    %c30_581 = arith.constant 30 : index
    %c0_582 = arith.constant 0 : index
    %1503 = vector.load %arg4[%c0_579, %c1_580, %c30_581, %c0_582] : memref<1x4x32x32xf32, #tpu.memory_space<vmem>>, vector<1x1x1x32xf32>
    %1504 = vector.shape_cast %1503 : vector<1x1x1x32xf32> to vector<1x32xf32>
    %1505 = vector.shape_cast %1502 : vector<1x32xf32> to vector<1x1x1x32xf32>
    tpu.vector_store %arg4[%c0_579, %c1_580, %c30_581, %c0_582], %1505 {strides = array<i32>} : memref<1x4x32x32xf32, #tpu.memory_space<vmem>>, vector<1x1x1x32xf32>,
    %1506 = vector.extract_strided_slice %1381 {offsets = [15, 0], sizes = [1, 32], strides = [1, 1]} : vector<16x32xf32> to vector<1x32xf32>
    %c0_583 = arith.constant 0 : index
    %c1_584 = arith.constant 1 : index
    %c31_585 = arith.constant 31 : index
    %c0_586 = arith.constant 0 : index
    %1507 = vector.load %arg4[%c0_583, %c1_584, %c31_585, %c0_586] : memref<1x4x32x32xf32, #tpu.memory_space<vmem>>, vector<1x1x1x32xf32>
    %1508 = vector.shape_cast %1507 : vector<1x1x1x32xf32> to vector<1x32xf32>
    %1509 = vector.shape_cast %1506 : vector<1x32xf32> to vector<1x1x1x32xf32>
    tpu.vector_store %arg4[%c0_583, %c1_584, %c31_585, %c0_586], %1509 {strides = array<i32>} : memref<1x4x32x32xf32, #tpu.memory_space<vmem>>, vector<1x1x1x32xf32>,
    %c2_587 = arith.constant 2 : index
    %1510 = memref.load %arg3[%c2_587] : memref<4xf32, #tpu.memory_space<smem>>
    %1511 = vector.broadcast %1510 : f32 to vector<16x32xf32>
    %1512 = arith.addf %1169, %1511 : vector<16x32xf32>
    %c2_588 = arith.constant 2 : index
    %1513 = memref.load %arg3[%c2_588] : memref<4xf32, #tpu.memory_space<smem>>
    %1514 = vector.broadcast %1513 : f32 to vector<16x32xf32>
    %1515 = arith.addf %1193, %1514 : vector<16x32xf32>
    %1516 = vector.extract_strided_slice %1512 {offsets = [0, 0], sizes = [1, 32], strides = [1, 1]} : vector<16x32xf32> to vector<1x32xf32>
    %c0_589 = arith.constant 0 : index
    %c2_590 = arith.constant 2 : index
    %c0_591 = arith.constant 0 : index
    %c0_592 = arith.constant 0 : index
    %1517 = vector.load %arg4[%c0_589, %c2_590, %c0_591, %c0_592] : memref<1x4x32x32xf32, #tpu.memory_space<vmem>>, vector<1x1x1x32xf32>
    %1518 = vector.shape_cast %1517 : vector<1x1x1x32xf32> to vector<1x32xf32>
    %1519 = vector.shape_cast %1516 : vector<1x32xf32> to vector<1x1x1x32xf32>
    tpu.vector_store %arg4[%c0_589, %c2_590, %c0_591, %c0_592], %1519 {strides = array<i32>} : memref<1x4x32x32xf32, #tpu.memory_space<vmem>>, vector<1x1x1x32xf32>,
    %1520 = vector.extract_strided_slice %1515 {offsets = [0, 0], sizes = [1, 32], strides = [1, 1]} : vector<16x32xf32> to vector<1x32xf32>
    %c0_593 = arith.constant 0 : index
    %c2_594 = arith.constant 2 : index
    %c1_595 = arith.constant 1 : index
    %c0_596 = arith.constant 0 : index
    %1521 = vector.load %arg4[%c0_593, %c2_594, %c1_595, %c0_596] : memref<1x4x32x32xf32, #tpu.memory_space<vmem>>, vector<1x1x1x32xf32>
    %1522 = vector.shape_cast %1521 : vector<1x1x1x32xf32> to vector<1x32xf32>
    %1523 = vector.shape_cast %1520 : vector<1x32xf32> to vector<1x1x1x32xf32>
    tpu.vector_store %arg4[%c0_593, %c2_594, %c1_595, %c0_596], %1523 {strides = array<i32>} : memref<1x4x32x32xf32, #tpu.memory_space<vmem>>, vector<1x1x1x32xf32>,
    %1524 = vector.extract_strided_slice %1512 {offsets = [1, 0], sizes = [1, 32], strides = [1, 1]} : vector<16x32xf32> to vector<1x32xf32>
    %c0_597 = arith.constant 0 : index
    %c2_598 = arith.constant 2 : index
    %c2_599 = arith.constant 2 : index
    %c0_600 = arith.constant 0 : index
    %1525 = vector.load %arg4[%c0_597, %c2_598, %c2_599, %c0_600] : memref<1x4x32x32xf32, #tpu.memory_space<vmem>>, vector<1x1x1x32xf32>
    %1526 = vector.shape_cast %1525 : vector<1x1x1x32xf32> to vector<1x32xf32>
    %1527 = vector.shape_cast %1524 : vector<1x32xf32> to vector<1x1x1x32xf32>
    tpu.vector_store %arg4[%c0_597, %c2_598, %c2_599, %c0_600], %1527 {strides = array<i32>} : memref<1x4x32x32xf32, #tpu.memory_space<vmem>>, vector<1x1x1x32xf32>,
    %1528 = vector.extract_strided_slice %1515 {offsets = [1, 0], sizes = [1, 32], strides = [1, 1]} : vector<16x32xf32> to vector<1x32xf32>
    %c0_601 = arith.constant 0 : index
    %c2_602 = arith.constant 2 : index
    %c3_603 = arith.constant 3 : index
    %c0_604 = arith.constant 0 : index
    %1529 = vector.load %arg4[%c0_601, %c2_602, %c3_603, %c0_604] : memref<1x4x32x32xf32, #tpu.memory_space<vmem>>, vector<1x1x1x32xf32>
    %1530 = vector.shape_cast %1529 : vector<1x1x1x32xf32> to vector<1x32xf32>
    %1531 = vector.shape_cast %1528 : vector<1x32xf32> to vector<1x1x1x32xf32>
    tpu.vector_store %arg4[%c0_601, %c2_602, %c3_603, %c0_604], %1531 {strides = array<i32>} : memref<1x4x32x32xf32, #tpu.memory_space<vmem>>, vector<1x1x1x32xf32>,
    %1532 = vector.extract_strided_slice %1512 {offsets = [2, 0], sizes = [1, 32], strides = [1, 1]} : vector<16x32xf32> to vector<1x32xf32>
    %c0_605 = arith.constant 0 : index
    %c2_606 = arith.constant 2 : index
    %c4_607 = arith.constant 4 : index
    %c0_608 = arith.constant 0 : index
    %1533 = vector.load %arg4[%c0_605, %c2_606, %c4_607, %c0_608] : memref<1x4x32x32xf32, #tpu.memory_space<vmem>>, vector<1x1x1x32xf32>
    %1534 = vector.shape_cast %1533 : vector<1x1x1x32xf32> to vector<1x32xf32>
    %1535 = vector.shape_cast %1532 : vector<1x32xf32> to vector<1x1x1x32xf32>
    tpu.vector_store %arg4[%c0_605, %c2_606, %c4_607, %c0_608], %1535 {strides = array<i32>} : memref<1x4x32x32xf32, #tpu.memory_space<vmem>>, vector<1x1x1x32xf32>,
    %1536 = vector.extract_strided_slice %1515 {offsets = [2, 0], sizes = [1, 32], strides = [1, 1]} : vector<16x32xf32> to vector<1x32xf32>
    %c0_609 = arith.constant 0 : index
    %c2_610 = arith.constant 2 : index
    %c5_611 = arith.constant 5 : index
    %c0_612 = arith.constant 0 : index
    %1537 = vector.load %arg4[%c0_609, %c2_610, %c5_611, %c0_612] : memref<1x4x32x32xf32, #tpu.memory_space<vmem>>, vector<1x1x1x32xf32>
    %1538 = vector.shape_cast %1537 : vector<1x1x1x32xf32> to vector<1x32xf32>
    %1539 = vector.shape_cast %1536 : vector<1x32xf32> to vector<1x1x1x32xf32>
    tpu.vector_store %arg4[%c0_609, %c2_610, %c5_611, %c0_612], %1539 {strides = array<i32>} : memref<1x4x32x32xf32, #tpu.memory_space<vmem>>, vector<1x1x1x32xf32>,
    %1540 = vector.extract_strided_slice %1512 {offsets = [3, 0], sizes = [1, 32], strides = [1, 1]} : vector<16x32xf32> to vector<1x32xf32>
    %c0_613 = arith.constant 0 : index
    %c2_614 = arith.constant 2 : index
    %c6_615 = arith.constant 6 : index
    %c0_616 = arith.constant 0 : index
    %1541 = vector.load %arg4[%c0_613, %c2_614, %c6_615, %c0_616] : memref<1x4x32x32xf32, #tpu.memory_space<vmem>>, vector<1x1x1x32xf32>
    %1542 = vector.shape_cast %1541 : vector<1x1x1x32xf32> to vector<1x32xf32>
    %1543 = vector.shape_cast %1540 : vector<1x32xf32> to vector<1x1x1x32xf32>
    tpu.vector_store %arg4[%c0_613, %c2_614, %c6_615, %c0_616], %1543 {strides = array<i32>} : memref<1x4x32x32xf32, #tpu.memory_space<vmem>>, vector<1x1x1x32xf32>,
    %1544 = vector.extract_strided_slice %1515 {offsets = [3, 0], sizes = [1, 32], strides = [1, 1]} : vector<16x32xf32> to vector<1x32xf32>
    %c0_617 = arith.constant 0 : index
    %c2_618 = arith.constant 2 : index
    %c7_619 = arith.constant 7 : index
    %c0_620 = arith.constant 0 : index
    %1545 = vector.load %arg4[%c0_617, %c2_618, %c7_619, %c0_620] : memref<1x4x32x32xf32, #tpu.memory_space<vmem>>, vector<1x1x1x32xf32>
    %1546 = vector.shape_cast %1545 : vector<1x1x1x32xf32> to vector<1x32xf32>
    %1547 = vector.shape_cast %1544 : vector<1x32xf32> to vector<1x1x1x32xf32>
    tpu.vector_store %arg4[%c0_617, %c2_618, %c7_619, %c0_620], %1547 {strides = array<i32>} : memref<1x4x32x32xf32, #tpu.memory_space<vmem>>, vector<1x1x1x32xf32>,
    %1548 = vector.extract_strided_slice %1512 {offsets = [4, 0], sizes = [1, 32], strides = [1, 1]} : vector<16x32xf32> to vector<1x32xf32>
    %c0_621 = arith.constant 0 : index
    %c2_622 = arith.constant 2 : index
    %c8_623 = arith.constant 8 : index
    %c0_624 = arith.constant 0 : index
    %1549 = vector.load %arg4[%c0_621, %c2_622, %c8_623, %c0_624] : memref<1x4x32x32xf32, #tpu.memory_space<vmem>>, vector<1x1x1x32xf32>
    %1550 = vector.shape_cast %1549 : vector<1x1x1x32xf32> to vector<1x32xf32>
    %1551 = vector.shape_cast %1548 : vector<1x32xf32> to vector<1x1x1x32xf32>
    tpu.vector_store %arg4[%c0_621, %c2_622, %c8_623, %c0_624], %1551 {strides = array<i32>} : memref<1x4x32x32xf32, #tpu.memory_space<vmem>>, vector<1x1x1x32xf32>,
    %1552 = vector.extract_strided_slice %1515 {offsets = [4, 0], sizes = [1, 32], strides = [1, 1]} : vector<16x32xf32> to vector<1x32xf32>
    %c0_625 = arith.constant 0 : index
    %c2_626 = arith.constant 2 : index
    %c9_627 = arith.constant 9 : index
    %c0_628 = arith.constant 0 : index
    %1553 = vector.load %arg4[%c0_625, %c2_626, %c9_627, %c0_628] : memref<1x4x32x32xf32, #tpu.memory_space<vmem>>, vector<1x1x1x32xf32>
    %1554 = vector.shape_cast %1553 : vector<1x1x1x32xf32> to vector<1x32xf32>
    %1555 = vector.shape_cast %1552 : vector<1x32xf32> to vector<1x1x1x32xf32>
    tpu.vector_store %arg4[%c0_625, %c2_626, %c9_627, %c0_628], %1555 {strides = array<i32>} : memref<1x4x32x32xf32, #tpu.memory_space<vmem>>, vector<1x1x1x32xf32>,
    %1556 = vector.extract_strided_slice %1512 {offsets = [5, 0], sizes = [1, 32], strides = [1, 1]} : vector<16x32xf32> to vector<1x32xf32>
    %c0_629 = arith.constant 0 : index
    %c2_630 = arith.constant 2 : index
    %c10_631 = arith.constant 10 : index
    %c0_632 = arith.constant 0 : index
    %1557 = vector.load %arg4[%c0_629, %c2_630, %c10_631, %c0_632] : memref<1x4x32x32xf32, #tpu.memory_space<vmem>>, vector<1x1x1x32xf32>
    %1558 = vector.shape_cast %1557 : vector<1x1x1x32xf32> to vector<1x32xf32>
    %1559 = vector.shape_cast %1556 : vector<1x32xf32> to vector<1x1x1x32xf32>
    tpu.vector_store %arg4[%c0_629, %c2_630, %c10_631, %c0_632], %1559 {strides = array<i32>} : memref<1x4x32x32xf32, #tpu.memory_space<vmem>>, vector<1x1x1x32xf32>,
    %1560 = vector.extract_strided_slice %1515 {offsets = [5, 0], sizes = [1, 32], strides = [1, 1]} : vector<16x32xf32> to vector<1x32xf32>
    %c0_633 = arith.constant 0 : index
    %c2_634 = arith.constant 2 : index
    %c11_635 = arith.constant 11 : index
    %c0_636 = arith.constant 0 : index
    %1561 = vector.load %arg4[%c0_633, %c2_634, %c11_635, %c0_636] : memref<1x4x32x32xf32, #tpu.memory_space<vmem>>, vector<1x1x1x32xf32>
    %1562 = vector.shape_cast %1561 : vector<1x1x1x32xf32> to vector<1x32xf32>
    %1563 = vector.shape_cast %1560 : vector<1x32xf32> to vector<1x1x1x32xf32>
    tpu.vector_store %arg4[%c0_633, %c2_634, %c11_635, %c0_636], %1563 {strides = array<i32>} : memref<1x4x32x32xf32, #tpu.memory_space<vmem>>, vector<1x1x1x32xf32>,
    %1564 = vector.extract_strided_slice %1512 {offsets = [6, 0], sizes = [1, 32], strides = [1, 1]} : vector<16x32xf32> to vector<1x32xf32>
    %c0_637 = arith.constant 0 : index
    %c2_638 = arith.constant 2 : index
    %c12_639 = arith.constant 12 : index
    %c0_640 = arith.constant 0 : index
    %1565 = vector.load %arg4[%c0_637, %c2_638, %c12_639, %c0_640] : memref<1x4x32x32xf32, #tpu.memory_space<vmem>>, vector<1x1x1x32xf32>
    %1566 = vector.shape_cast %1565 : vector<1x1x1x32xf32> to vector<1x32xf32>
    %1567 = vector.shape_cast %1564 : vector<1x32xf32> to vector<1x1x1x32xf32>
    tpu.vector_store %arg4[%c0_637, %c2_638, %c12_639, %c0_640], %1567 {strides = array<i32>} : memref<1x4x32x32xf32, #tpu.memory_space<vmem>>, vector<1x1x1x32xf32>,
    %1568 = vector.extract_strided_slice %1515 {offsets = [6, 0], sizes = [1, 32], strides = [1, 1]} : vector<16x32xf32> to vector<1x32xf32>
    %c0_641 = arith.constant 0 : index
    %c2_642 = arith.constant 2 : index
    %c13_643 = arith.constant 13 : index
    %c0_644 = arith.constant 0 : index
    %1569 = vector.load %arg4[%c0_641, %c2_642, %c13_643, %c0_644] : memref<1x4x32x32xf32, #tpu.memory_space<vmem>>, vector<1x1x1x32xf32>
    %1570 = vector.shape_cast %1569 : vector<1x1x1x32xf32> to vector<1x32xf32>
    %1571 = vector.shape_cast %1568 : vector<1x32xf32> to vector<1x1x1x32xf32>
    tpu.vector_store %arg4[%c0_641, %c2_642, %c13_643, %c0_644], %1571 {strides = array<i32>} : memref<1x4x32x32xf32, #tpu.memory_space<vmem>>, vector<1x1x1x32xf32>,
    %1572 = vector.extract_strided_slice %1512 {offsets = [7, 0], sizes = [1, 32], strides = [1, 1]} : vector<16x32xf32> to vector<1x32xf32>
    %c0_645 = arith.constant 0 : index
    %c2_646 = arith.constant 2 : index
    %c14_647 = arith.constant 14 : index
    %c0_648 = arith.constant 0 : index
    %1573 = vector.load %arg4[%c0_645, %c2_646, %c14_647, %c0_648] : memref<1x4x32x32xf32, #tpu.memory_space<vmem>>, vector<1x1x1x32xf32>
    %1574 = vector.shape_cast %1573 : vector<1x1x1x32xf32> to vector<1x32xf32>
    %1575 = vector.shape_cast %1572 : vector<1x32xf32> to vector<1x1x1x32xf32>
    tpu.vector_store %arg4[%c0_645, %c2_646, %c14_647, %c0_648], %1575 {strides = array<i32>} : memref<1x4x32x32xf32, #tpu.memory_space<vmem>>, vector<1x1x1x32xf32>,
    %1576 = vector.extract_strided_slice %1515 {offsets = [7, 0], sizes = [1, 32], strides = [1, 1]} : vector<16x32xf32> to vector<1x32xf32>
    %c0_649 = arith.constant 0 : index
    %c2_650 = arith.constant 2 : index
    %c15_651 = arith.constant 15 : index
    %c0_652 = arith.constant 0 : index
    %1577 = vector.load %arg4[%c0_649, %c2_650, %c15_651, %c0_652] : memref<1x4x32x32xf32, #tpu.memory_space<vmem>>, vector<1x1x1x32xf32>
    %1578 = vector.shape_cast %1577 : vector<1x1x1x32xf32> to vector<1x32xf32>
    %1579 = vector.shape_cast %1576 : vector<1x32xf32> to vector<1x1x1x32xf32>
    tpu.vector_store %arg4[%c0_649, %c2_650, %c15_651, %c0_652], %1579 {strides = array<i32>} : memref<1x4x32x32xf32, #tpu.memory_space<vmem>>, vector<1x1x1x32xf32>,
    %1580 = vector.extract_strided_slice %1512 {offsets = [8, 0], sizes = [1, 32], strides = [1, 1]} : vector<16x32xf32> to vector<1x32xf32>
    %c0_653 = arith.constant 0 : index
    %c2_654 = arith.constant 2 : index
    %c16_655 = arith.constant 16 : index
    %c0_656 = arith.constant 0 : index
    %1581 = vector.load %arg4[%c0_653, %c2_654, %c16_655, %c0_656] : memref<1x4x32x32xf32, #tpu.memory_space<vmem>>, vector<1x1x1x32xf32>
    %1582 = vector.shape_cast %1581 : vector<1x1x1x32xf32> to vector<1x32xf32>
    %1583 = vector.shape_cast %1580 : vector<1x32xf32> to vector<1x1x1x32xf32>
    tpu.vector_store %arg4[%c0_653, %c2_654, %c16_655, %c0_656], %1583 {strides = array<i32>} : memref<1x4x32x32xf32, #tpu.memory_space<vmem>>, vector<1x1x1x32xf32>,
    %1584 = vector.extract_strided_slice %1515 {offsets = [8, 0], sizes = [1, 32], strides = [1, 1]} : vector<16x32xf32> to vector<1x32xf32>
    %c0_657 = arith.constant 0 : index
    %c2_658 = arith.constant 2 : index
    %c17_659 = arith.constant 17 : index
    %c0_660 = arith.constant 0 : index
    %1585 = vector.load %arg4[%c0_657, %c2_658, %c17_659, %c0_660] : memref<1x4x32x32xf32, #tpu.memory_space<vmem>>, vector<1x1x1x32xf32>
    %1586 = vector.shape_cast %1585 : vector<1x1x1x32xf32> to vector<1x32xf32>
    %1587 = vector.shape_cast %1584 : vector<1x32xf32> to vector<1x1x1x32xf32>
    tpu.vector_store %arg4[%c0_657, %c2_658, %c17_659, %c0_660], %1587 {strides = array<i32>} : memref<1x4x32x32xf32, #tpu.memory_space<vmem>>, vector<1x1x1x32xf32>,
    %1588 = vector.extract_strided_slice %1512 {offsets = [9, 0], sizes = [1, 32], strides = [1, 1]} : vector<16x32xf32> to vector<1x32xf32>
    %c0_661 = arith.constant 0 : index
    %c2_662 = arith.constant 2 : index
    %c18_663 = arith.constant 18 : index
    %c0_664 = arith.constant 0 : index
    %1589 = vector.load %arg4[%c0_661, %c2_662, %c18_663, %c0_664] : memref<1x4x32x32xf32, #tpu.memory_space<vmem>>, vector<1x1x1x32xf32>
    %1590 = vector.shape_cast %1589 : vector<1x1x1x32xf32> to vector<1x32xf32>
    %1591 = vector.shape_cast %1588 : vector<1x32xf32> to vector<1x1x1x32xf32>
    tpu.vector_store %arg4[%c0_661, %c2_662, %c18_663, %c0_664], %1591 {strides = array<i32>} : memref<1x4x32x32xf32, #tpu.memory_space<vmem>>, vector<1x1x1x32xf32>,
    %1592 = vector.extract_strided_slice %1515 {offsets = [9, 0], sizes = [1, 32], strides = [1, 1]} : vector<16x32xf32> to vector<1x32xf32>
    %c0_665 = arith.constant 0 : index
    %c2_666 = arith.constant 2 : index
    %c19_667 = arith.constant 19 : index
    %c0_668 = arith.constant 0 : index
    %1593 = vector.load %arg4[%c0_665, %c2_666, %c19_667, %c0_668] : memref<1x4x32x32xf32, #tpu.memory_space<vmem>>, vector<1x1x1x32xf32>
    %1594 = vector.shape_cast %1593 : vector<1x1x1x32xf32> to vector<1x32xf32>
    %1595 = vector.shape_cast %1592 : vector<1x32xf32> to vector<1x1x1x32xf32>
    tpu.vector_store %arg4[%c0_665, %c2_666, %c19_667, %c0_668], %1595 {strides = array<i32>} : memref<1x4x32x32xf32, #tpu.memory_space<vmem>>, vector<1x1x1x32xf32>,
    %1596 = vector.extract_strided_slice %1512 {offsets = [10, 0], sizes = [1, 32], strides = [1, 1]} : vector<16x32xf32> to vector<1x32xf32>
    %c0_669 = arith.constant 0 : index
    %c2_670 = arith.constant 2 : index
    %c20_671 = arith.constant 20 : index
    %c0_672 = arith.constant 0 : index
    %1597 = vector.load %arg4[%c0_669, %c2_670, %c20_671, %c0_672] : memref<1x4x32x32xf32, #tpu.memory_space<vmem>>, vector<1x1x1x32xf32>
    %1598 = vector.shape_cast %1597 : vector<1x1x1x32xf32> to vector<1x32xf32>
    %1599 = vector.shape_cast %1596 : vector<1x32xf32> to vector<1x1x1x32xf32>
    tpu.vector_store %arg4[%c0_669, %c2_670, %c20_671, %c0_672], %1599 {strides = array<i32>} : memref<1x4x32x32xf32, #tpu.memory_space<vmem>>, vector<1x1x1x32xf32>,
    %1600 = vector.extract_strided_slice %1515 {offsets = [10, 0], sizes = [1, 32], strides = [1, 1]} : vector<16x32xf32> to vector<1x32xf32>
    %c0_673 = arith.constant 0 : index
    %c2_674 = arith.constant 2 : index
    %c21_675 = arith.constant 21 : index
    %c0_676 = arith.constant 0 : index
    %1601 = vector.load %arg4[%c0_673, %c2_674, %c21_675, %c0_676] : memref<1x4x32x32xf32, #tpu.memory_space<vmem>>, vector<1x1x1x32xf32>
    %1602 = vector.shape_cast %1601 : vector<1x1x1x32xf32> to vector<1x32xf32>
    %1603 = vector.shape_cast %1600 : vector<1x32xf32> to vector<1x1x1x32xf32>
    tpu.vector_store %arg4[%c0_673, %c2_674, %c21_675, %c0_676], %1603 {strides = array<i32>} : memref<1x4x32x32xf32, #tpu.memory_space<vmem>>, vector<1x1x1x32xf32>,
    %1604 = vector.extract_strided_slice %1512 {offsets = [11, 0], sizes = [1, 32], strides = [1, 1]} : vector<16x32xf32> to vector<1x32xf32>
    %c0_677 = arith.constant 0 : index
    %c2_678 = arith.constant 2 : index
    %c22_679 = arith.constant 22 : index
    %c0_680 = arith.constant 0 : index
    %1605 = vector.load %arg4[%c0_677, %c2_678, %c22_679, %c0_680] : memref<1x4x32x32xf32, #tpu.memory_space<vmem>>, vector<1x1x1x32xf32>
    %1606 = vector.shape_cast %1605 : vector<1x1x1x32xf32> to vector<1x32xf32>
    %1607 = vector.shape_cast %1604 : vector<1x32xf32> to vector<1x1x1x32xf32>
    tpu.vector_store %arg4[%c0_677, %c2_678, %c22_679, %c0_680], %1607 {strides = array<i32>} : memref<1x4x32x32xf32, #tpu.memory_space<vmem>>, vector<1x1x1x32xf32>,
    %1608 = vector.extract_strided_slice %1515 {offsets = [11, 0], sizes = [1, 32], strides = [1, 1]} : vector<16x32xf32> to vector<1x32xf32>
    %c0_681 = arith.constant 0 : index
    %c2_682 = arith.constant 2 : index
    %c23_683 = arith.constant 23 : index
    %c0_684 = arith.constant 0 : index
    %1609 = vector.load %arg4[%c0_681, %c2_682, %c23_683, %c0_684] : memref<1x4x32x32xf32, #tpu.memory_space<vmem>>, vector<1x1x1x32xf32>
    %1610 = vector.shape_cast %1609 : vector<1x1x1x32xf32> to vector<1x32xf32>
    %1611 = vector.shape_cast %1608 : vector<1x32xf32> to vector<1x1x1x32xf32>
    tpu.vector_store %arg4[%c0_681, %c2_682, %c23_683, %c0_684], %1611 {strides = array<i32>} : memref<1x4x32x32xf32, #tpu.memory_space<vmem>>, vector<1x1x1x32xf32>,
    %1612 = vector.extract_strided_slice %1512 {offsets = [12, 0], sizes = [1, 32], strides = [1, 1]} : vector<16x32xf32> to vector<1x32xf32>
    %c0_685 = arith.constant 0 : index
    %c2_686 = arith.constant 2 : index
    %c24_687 = arith.constant 24 : index
    %c0_688 = arith.constant 0 : index
    %1613 = vector.load %arg4[%c0_685, %c2_686, %c24_687, %c0_688] : memref<1x4x32x32xf32, #tpu.memory_space<vmem>>, vector<1x1x1x32xf32>
    %1614 = vector.shape_cast %1613 : vector<1x1x1x32xf32> to vector<1x32xf32>
    %1615 = vector.shape_cast %1612 : vector<1x32xf32> to vector<1x1x1x32xf32>
    tpu.vector_store %arg4[%c0_685, %c2_686, %c24_687, %c0_688], %1615 {strides = array<i32>} : memref<1x4x32x32xf32, #tpu.memory_space<vmem>>, vector<1x1x1x32xf32>,
    %1616 = vector.extract_strided_slice %1515 {offsets = [12, 0], sizes = [1, 32], strides = [1, 1]} : vector<16x32xf32> to vector<1x32xf32>
    %c0_689 = arith.constant 0 : index
    %c2_690 = arith.constant 2 : index
    %c25_691 = arith.constant 25 : index
    %c0_692 = arith.constant 0 : index
    %1617 = vector.load %arg4[%c0_689, %c2_690, %c25_691, %c0_692] : memref<1x4x32x32xf32, #tpu.memory_space<vmem>>, vector<1x1x1x32xf32>
    %1618 = vector.shape_cast %1617 : vector<1x1x1x32xf32> to vector<1x32xf32>
    %1619 = vector.shape_cast %1616 : vector<1x32xf32> to vector<1x1x1x32xf32>
    tpu.vector_store %arg4[%c0_689, %c2_690, %c25_691, %c0_692], %1619 {strides = array<i32>} : memref<1x4x32x32xf32, #tpu.memory_space<vmem>>, vector<1x1x1x32xf32>,
    %1620 = vector.extract_strided_slice %1512 {offsets = [13, 0], sizes = [1, 32], strides = [1, 1]} : vector<16x32xf32> to vector<1x32xf32>
    %c0_693 = arith.constant 0 : index
    %c2_694 = arith.constant 2 : index
    %c26_695 = arith.constant 26 : index
    %c0_696 = arith.constant 0 : index
    %1621 = vector.load %arg4[%c0_693, %c2_694, %c26_695, %c0_696] : memref<1x4x32x32xf32, #tpu.memory_space<vmem>>, vector<1x1x1x32xf32>
    %1622 = vector.shape_cast %1621 : vector<1x1x1x32xf32> to vector<1x32xf32>
    %1623 = vector.shape_cast %1620 : vector<1x32xf32> to vector<1x1x1x32xf32>
    tpu.vector_store %arg4[%c0_693, %c2_694, %c26_695, %c0_696], %1623 {strides = array<i32>} : memref<1x4x32x32xf32, #tpu.memory_space<vmem>>, vector<1x1x1x32xf32>,
    %1624 = vector.extract_strided_slice %1515 {offsets = [13, 0], sizes = [1, 32], strides = [1, 1]} : vector<16x32xf32> to vector<1x32xf32>
    %c0_697 = arith.constant 0 : index
    %c2_698 = arith.constant 2 : index
    %c27_699 = arith.constant 27 : index
    %c0_700 = arith.constant 0 : index
    %1625 = vector.load %arg4[%c0_697, %c2_698, %c27_699, %c0_700] : memref<1x4x32x32xf32, #tpu.memory_space<vmem>>, vector<1x1x1x32xf32>
    %1626 = vector.shape_cast %1625 : vector<1x1x1x32xf32> to vector<1x32xf32>
    %1627 = vector.shape_cast %1624 : vector<1x32xf32> to vector<1x1x1x32xf32>
    tpu.vector_store %arg4[%c0_697, %c2_698, %c27_699, %c0_700], %1627 {strides = array<i32>} : memref<1x4x32x32xf32, #tpu.memory_space<vmem>>, vector<1x1x1x32xf32>,
    %1628 = vector.extract_strided_slice %1512 {offsets = [14, 0], sizes = [1, 32], strides = [1, 1]} : vector<16x32xf32> to vector<1x32xf32>
    %c0_701 = arith.constant 0 : index
    %c2_702 = arith.constant 2 : index
    %c28_703 = arith.constant 28 : index
    %c0_704 = arith.constant 0 : index
    %1629 = vector.load %arg4[%c0_701, %c2_702, %c28_703, %c0_704] : memref<1x4x32x32xf32, #tpu.memory_space<vmem>>, vector<1x1x1x32xf32>
    %1630 = vector.shape_cast %1629 : vector<1x1x1x32xf32> to vector<1x32xf32>
    %1631 = vector.shape_cast %1628 : vector<1x32xf32> to vector<1x1x1x32xf32>
    tpu.vector_store %arg4[%c0_701, %c2_702, %c28_703, %c0_704], %1631 {strides = array<i32>} : memref<1x4x32x32xf32, #tpu.memory_space<vmem>>, vector<1x1x1x32xf32>,
    %1632 = vector.extract_strided_slice %1515 {offsets = [14, 0], sizes = [1, 32], strides = [1, 1]} : vector<16x32xf32> to vector<1x32xf32>
    %c0_705 = arith.constant 0 : index
    %c2_706 = arith.constant 2 : index
    %c29_707 = arith.constant 29 : index
    %c0_708 = arith.constant 0 : index
    %1633 = vector.load %arg4[%c0_705, %c2_706, %c29_707, %c0_708] : memref<1x4x32x32xf32, #tpu.memory_space<vmem>>, vector<1x1x1x32xf32>
    %1634 = vector.shape_cast %1633 : vector<1x1x1x32xf32> to vector<1x32xf32>
    %1635 = vector.shape_cast %1632 : vector<1x32xf32> to vector<1x1x1x32xf32>
    tpu.vector_store %arg4[%c0_705, %c2_706, %c29_707, %c0_708], %1635 {strides = array<i32>} : memref<1x4x32x32xf32, #tpu.memory_space<vmem>>, vector<1x1x1x32xf32>,
    %1636 = vector.extract_strided_slice %1512 {offsets = [15, 0], sizes = [1, 32], strides = [1, 1]} : vector<16x32xf32> to vector<1x32xf32>
    %c0_709 = arith.constant 0 : index
    %c2_710 = arith.constant 2 : index
    %c30_711 = arith.constant 30 : index
    %c0_712 = arith.constant 0 : index
    %1637 = vector.load %arg4[%c0_709, %c2_710, %c30_711, %c0_712] : memref<1x4x32x32xf32, #tpu.memory_space<vmem>>, vector<1x1x1x32xf32>
    %1638 = vector.shape_cast %1637 : vector<1x1x1x32xf32> to vector<1x32xf32>
    %1639 = vector.shape_cast %1636 : vector<1x32xf32> to vector<1x1x1x32xf32>
    tpu.vector_store %arg4[%c0_709, %c2_710, %c30_711, %c0_712], %1639 {strides = array<i32>} : memref<1x4x32x32xf32, #tpu.memory_space<vmem>>, vector<1x1x1x32xf32>,
    %1640 = vector.extract_strided_slice %1515 {offsets = [15, 0], sizes = [1, 32], strides = [1, 1]} : vector<16x32xf32> to vector<1x32xf32>
    %c0_713 = arith.constant 0 : index
    %c2_714 = arith.constant 2 : index
    %c31_715 = arith.constant 31 : index
    %c0_716 = arith.constant 0 : index
    %1641 = vector.load %arg4[%c0_713, %c2_714, %c31_715, %c0_716] : memref<1x4x32x32xf32, #tpu.memory_space<vmem>>, vector<1x1x1x32xf32>
    %1642 = vector.shape_cast %1641 : vector<1x1x1x32xf32> to vector<1x32xf32>
    %1643 = vector.shape_cast %1640 : vector<1x32xf32> to vector<1x1x1x32xf32>
    tpu.vector_store %arg4[%c0_713, %c2_714, %c31_715, %c0_716], %1643 {strides = array<i32>} : memref<1x4x32x32xf32, #tpu.memory_space<vmem>>, vector<1x1x1x32xf32>,
    %c3_717 = arith.constant 3 : index
    %1644 = memref.load %arg3[%c3_717] : memref<4xf32, #tpu.memory_space<smem>>
    %1645 = vector.broadcast %1644 : f32 to vector<16x32xf32>
    %1646 = arith.addf %1217, %1645 : vector<16x32xf32>
    %c3_718 = arith.constant 3 : index
    %1647 = memref.load %arg3[%c3_718] : memref<4xf32, #tpu.memory_space<smem>>
    %1648 = vector.broadcast %1647 : f32 to vector<16x32xf32>
    %1649 = arith.addf %1241, %1648 : vector<16x32xf32>
    %1650 = vector.extract_strided_slice %1646 {offsets = [0, 0], sizes = [1, 32], strides = [1, 1]} : vector<16x32xf32> to vector<1x32xf32>
    %c0_719 = arith.constant 0 : index
    %c3_720 = arith.constant 3 : index
    %c0_721 = arith.constant 0 : index
    %c0_722 = arith.constant 0 : index
    %1651 = vector.load %arg4[%c0_719, %c3_720, %c0_721, %c0_722] : memref<1x4x32x32xf32, #tpu.memory_space<vmem>>, vector<1x1x1x32xf32>
    %1652 = vector.shape_cast %1651 : vector<1x1x1x32xf32> to vector<1x32xf32>
    %1653 = vector.shape_cast %1650 : vector<1x32xf32> to vector<1x1x1x32xf32>
    tpu.vector_store %arg4[%c0_719, %c3_720, %c0_721, %c0_722], %1653 {strides = array<i32>} : memref<1x4x32x32xf32, #tpu.memory_space<vmem>>, vector<1x1x1x32xf32>,
    %1654 = vector.extract_strided_slice %1649 {offsets = [0, 0], sizes = [1, 32], strides = [1, 1]} : vector<16x32xf32> to vector<1x32xf32>
    %c0_723 = arith.constant 0 : index
    %c3_724 = arith.constant 3 : index
    %c1_725 = arith.constant 1 : index
    %c0_726 = arith.constant 0 : index
    %1655 = vector.load %arg4[%c0_723, %c3_724, %c1_725, %c0_726] : memref<1x4x32x32xf32, #tpu.memory_space<vmem>>, vector<1x1x1x32xf32>
    %1656 = vector.shape_cast %1655 : vector<1x1x1x32xf32> to vector<1x32xf32>
    %1657 = vector.shape_cast %1654 : vector<1x32xf32> to vector<1x1x1x32xf32>
    tpu.vector_store %arg4[%c0_723, %c3_724, %c1_725, %c0_726], %1657 {strides = array<i32>} : memref<1x4x32x32xf32, #tpu.memory_space<vmem>>, vector<1x1x1x32xf32>,
    %1658 = vector.extract_strided_slice %1646 {offsets = [1, 0], sizes = [1, 32], strides = [1, 1]} : vector<16x32xf32> to vector<1x32xf32>
    %c0_727 = arith.constant 0 : index
    %c3_728 = arith.constant 3 : index
    %c2_729 = arith.constant 2 : index
    %c0_730 = arith.constant 0 : index
    %1659 = vector.load %arg4[%c0_727, %c3_728, %c2_729, %c0_730] : memref<1x4x32x32xf32, #tpu.memory_space<vmem>>, vector<1x1x1x32xf32>
    %1660 = vector.shape_cast %1659 : vector<1x1x1x32xf32> to vector<1x32xf32>
    %1661 = vector.shape_cast %1658 : vector<1x32xf32> to vector<1x1x1x32xf32>
    tpu.vector_store %arg4[%c0_727, %c3_728, %c2_729, %c0_730], %1661 {strides = array<i32>} : memref<1x4x32x32xf32, #tpu.memory_space<vmem>>, vector<1x1x1x32xf32>,
    %1662 = vector.extract_strided_slice %1649 {offsets = [1, 0], sizes = [1, 32], strides = [1, 1]} : vector<16x32xf32> to vector<1x32xf32>
    %c0_731 = arith.constant 0 : index
    %c3_732 = arith.constant 3 : index
    %c3_733 = arith.constant 3 : index
    %c0_734 = arith.constant 0 : index
    %1663 = vector.load %arg4[%c0_731, %c3_732, %c3_733, %c0_734] : memref<1x4x32x32xf32, #tpu.memory_space<vmem>>, vector<1x1x1x32xf32>
    %1664 = vector.shape_cast %1663 : vector<1x1x1x32xf32> to vector<1x32xf32>
    %1665 = vector.shape_cast %1662 : vector<1x32xf32> to vector<1x1x1x32xf32>
    tpu.vector_store %arg4[%c0_731, %c3_732, %c3_733, %c0_734], %1665 {strides = array<i32>} : memref<1x4x32x32xf32, #tpu.memory_space<vmem>>, vector<1x1x1x32xf32>,
    %1666 = vector.extract_strided_slice %1646 {offsets = [2, 0], sizes = [1, 32], strides = [1, 1]} : vector<16x32xf32> to vector<1x32xf32>
    %c0_735 = arith.constant 0 : index
    %c3_736 = arith.constant 3 : index
    %c4_737 = arith.constant 4 : index
    %c0_738 = arith.constant 0 : index
    %1667 = vector.load %arg4[%c0_735, %c3_736, %c4_737, %c0_738] : memref<1x4x32x32xf32, #tpu.memory_space<vmem>>, vector<1x1x1x32xf32>
    %1668 = vector.shape_cast %1667 : vector<1x1x1x32xf32> to vector<1x32xf32>
    %1669 = vector.shape_cast %1666 : vector<1x32xf32> to vector<1x1x1x32xf32>
    tpu.vector_store %arg4[%c0_735, %c3_736, %c4_737, %c0_738], %1669 {strides = array<i32>} : memref<1x4x32x32xf32, #tpu.memory_space<vmem>>, vector<1x1x1x32xf32>,
    %1670 = vector.extract_strided_slice %1649 {offsets = [2, 0], sizes = [1, 32], strides = [1, 1]} : vector<16x32xf32> to vector<1x32xf32>
    %c0_739 = arith.constant 0 : index
    %c3_740 = arith.constant 3 : index
    %c5_741 = arith.constant 5 : index
    %c0_742 = arith.constant 0 : index
    %1671 = vector.load %arg4[%c0_739, %c3_740, %c5_741, %c0_742] : memref<1x4x32x32xf32, #tpu.memory_space<vmem>>, vector<1x1x1x32xf32>
    %1672 = vector.shape_cast %1671 : vector<1x1x1x32xf32> to vector<1x32xf32>
    %1673 = vector.shape_cast %1670 : vector<1x32xf32> to vector<1x1x1x32xf32>
    tpu.vector_store %arg4[%c0_739, %c3_740, %c5_741, %c0_742], %1673 {strides = array<i32>} : memref<1x4x32x32xf32, #tpu.memory_space<vmem>>, vector<1x1x1x32xf32>,
    %1674 = vector.extract_strided_slice %1646 {offsets = [3, 0], sizes = [1, 32], strides = [1, 1]} : vector<16x32xf32> to vector<1x32xf32>
    %c0_743 = arith.constant 0 : index
    %c3_744 = arith.constant 3 : index
    %c6_745 = arith.constant 6 : index
    %c0_746 = arith.constant 0 : index
    %1675 = vector.load %arg4[%c0_743, %c3_744, %c6_745, %c0_746] : memref<1x4x32x32xf32, #tpu.memory_space<vmem>>, vector<1x1x1x32xf32>
    %1676 = vector.shape_cast %1675 : vector<1x1x1x32xf32> to vector<1x32xf32>
    %1677 = vector.shape_cast %1674 : vector<1x32xf32> to vector<1x1x1x32xf32>
    tpu.vector_store %arg4[%c0_743, %c3_744, %c6_745, %c0_746], %1677 {strides = array<i32>} : memref<1x4x32x32xf32, #tpu.memory_space<vmem>>, vector<1x1x1x32xf32>,
    %1678 = vector.extract_strided_slice %1649 {offsets = [3, 0], sizes = [1, 32], strides = [1, 1]} : vector<16x32xf32> to vector<1x32xf32>
    %c0_747 = arith.constant 0 : index
    %c3_748 = arith.constant 3 : index
    %c7_749 = arith.constant 7 : index
    %c0_750 = arith.constant 0 : index
    %1679 = vector.load %arg4[%c0_747, %c3_748, %c7_749, %c0_750] : memref<1x4x32x32xf32, #tpu.memory_space<vmem>>, vector<1x1x1x32xf32>
    %1680 = vector.shape_cast %1679 : vector<1x1x1x32xf32> to vector<1x32xf32>
    %1681 = vector.shape_cast %1678 : vector<1x32xf32> to vector<1x1x1x32xf32>
    tpu.vector_store %arg4[%c0_747, %c3_748, %c7_749, %c0_750], %1681 {strides = array<i32>} : memref<1x4x32x32xf32, #tpu.memory_space<vmem>>, vector<1x1x1x32xf32>,
    %1682 = vector.extract_strided_slice %1646 {offsets = [4, 0], sizes = [1, 32], strides = [1, 1]} : vector<16x32xf32> to vector<1x32xf32>
    %c0_751 = arith.constant 0 : index
    %c3_752 = arith.constant 3 : index
    %c8_753 = arith.constant 8 : index
    %c0_754 = arith.constant 0 : index
    %1683 = vector.load %arg4[%c0_751, %c3_752, %c8_753, %c0_754] : memref<1x4x32x32xf32, #tpu.memory_space<vmem>>, vector<1x1x1x32xf32>
    %1684 = vector.shape_cast %1683 : vector<1x1x1x32xf32> to vector<1x32xf32>
    %1685 = vector.shape_cast %1682 : vector<1x32xf32> to vector<1x1x1x32xf32>
    tpu.vector_store %arg4[%c0_751, %c3_752, %c8_753, %c0_754], %1685 {strides = array<i32>} : memref<1x4x32x32xf32, #tpu.memory_space<vmem>>, vector<1x1x1x32xf32>,
    %1686 = vector.extract_strided_slice %1649 {offsets = [4, 0], sizes = [1, 32], strides = [1, 1]} : vector<16x32xf32> to vector<1x32xf32>
    %c0_755 = arith.constant 0 : index
    %c3_756 = arith.constant 3 : index
    %c9_757 = arith.constant 9 : index
    %c0_758 = arith.constant 0 : index
    %1687 = vector.load %arg4[%c0_755, %c3_756, %c9_757, %c0_758] : memref<1x4x32x32xf32, #tpu.memory_space<vmem>>, vector<1x1x1x32xf32>
    %1688 = vector.shape_cast %1687 : vector<1x1x1x32xf32> to vector<1x32xf32>
    %1689 = vector.shape_cast %1686 : vector<1x32xf32> to vector<1x1x1x32xf32>
    tpu.vector_store %arg4[%c0_755, %c3_756, %c9_757, %c0_758], %1689 {strides = array<i32>} : memref<1x4x32x32xf32, #tpu.memory_space<vmem>>, vector<1x1x1x32xf32>,
    %1690 = vector.extract_strided_slice %1646 {offsets = [5, 0], sizes = [1, 32], strides = [1, 1]} : vector<16x32xf32> to vector<1x32xf32>
    %c0_759 = arith.constant 0 : index
    %c3_760 = arith.constant 3 : index
    %c10_761 = arith.constant 10 : index
    %c0_762 = arith.constant 0 : index
    %1691 = vector.load %arg4[%c0_759, %c3_760, %c10_761, %c0_762] : memref<1x4x32x32xf32, #tpu.memory_space<vmem>>, vector<1x1x1x32xf32>
    %1692 = vector.shape_cast %1691 : vector<1x1x1x32xf32> to vector<1x32xf32>
    %1693 = vector.shape_cast %1690 : vector<1x32xf32> to vector<1x1x1x32xf32>
    tpu.vector_store %arg4[%c0_759, %c3_760, %c10_761, %c0_762], %1693 {strides = array<i32>} : memref<1x4x32x32xf32, #tpu.memory_space<vmem>>, vector<1x1x1x32xf32>,
    %1694 = vector.extract_strided_slice %1649 {offsets = [5, 0], sizes = [1, 32], strides = [1, 1]} : vector<16x32xf32> to vector<1x32xf32>
    %c0_763 = arith.constant 0 : index
    %c3_764 = arith.constant 3 : index
    %c11_765 = arith.constant 11 : index
    %c0_766 = arith.constant 0 : index
    %1695 = vector.load %arg4[%c0_763, %c3_764, %c11_765, %c0_766] : memref<1x4x32x32xf32, #tpu.memory_space<vmem>>, vector<1x1x1x32xf32>
    %1696 = vector.shape_cast %1695 : vector<1x1x1x32xf32> to vector<1x32xf32>
    %1697 = vector.shape_cast %1694 : vector<1x32xf32> to vector<1x1x1x32xf32>
    tpu.vector_store %arg4[%c0_763, %c3_764, %c11_765, %c0_766], %1697 {strides = array<i32>} : memref<1x4x32x32xf32, #tpu.memory_space<vmem>>, vector<1x1x1x32xf32>,
    %1698 = vector.extract_strided_slice %1646 {offsets = [6, 0], sizes = [1, 32], strides = [1, 1]} : vector<16x32xf32> to vector<1x32xf32>
    %c0_767 = arith.constant 0 : index
    %c3_768 = arith.constant 3 : index
    %c12_769 = arith.constant 12 : index
    %c0_770 = arith.constant 0 : index
    %1699 = vector.load %arg4[%c0_767, %c3_768, %c12_769, %c0_770] : memref<1x4x32x32xf32, #tpu.memory_space<vmem>>, vector<1x1x1x32xf32>
    %1700 = vector.shape_cast %1699 : vector<1x1x1x32xf32> to vector<1x32xf32>
    %1701 = vector.shape_cast %1698 : vector<1x32xf32> to vector<1x1x1x32xf32>
    tpu.vector_store %arg4[%c0_767, %c3_768, %c12_769, %c0_770], %1701 {strides = array<i32>} : memref<1x4x32x32xf32, #tpu.memory_space<vmem>>, vector<1x1x1x32xf32>,
    %1702 = vector.extract_strided_slice %1649 {offsets = [6, 0], sizes = [1, 32], strides = [1, 1]} : vector<16x32xf32> to vector<1x32xf32>
    %c0_771 = arith.constant 0 : index
    %c3_772 = arith.constant 3 : index
    %c13_773 = arith.constant 13 : index
    %c0_774 = arith.constant 0 : index
    %1703 = vector.load %arg4[%c0_771, %c3_772, %c13_773, %c0_774] : memref<1x4x32x32xf32, #tpu.memory_space<vmem>>, vector<1x1x1x32xf32>
    %1704 = vector.shape_cast %1703 : vector<1x1x1x32xf32> to vector<1x32xf32>
    %1705 = vector.shape_cast %1702 : vector<1x32xf32> to vector<1x1x1x32xf32>
    tpu.vector_store %arg4[%c0_771, %c3_772, %c13_773, %c0_774], %1705 {strides = array<i32>} : memref<1x4x32x32xf32, #tpu.memory_space<vmem>>, vector<1x1x1x32xf32>,
    %1706 = vector.extract_strided_slice %1646 {offsets = [7, 0], sizes = [1, 32], strides = [1, 1]} : vector<16x32xf32> to vector<1x32xf32>
    %c0_775 = arith.constant 0 : index
    %c3_776 = arith.constant 3 : index
    %c14_777 = arith.constant 14 : index
    %c0_778 = arith.constant 0 : index
    %1707 = vector.load %arg4[%c0_775, %c3_776, %c14_777, %c0_778] : memref<1x4x32x32xf32, #tpu.memory_space<vmem>>, vector<1x1x1x32xf32>
    %1708 = vector.shape_cast %1707 : vector<1x1x1x32xf32> to vector<1x32xf32>
    %1709 = vector.shape_cast %1706 : vector<1x32xf32> to vector<1x1x1x32xf32>
    tpu.vector_store %arg4[%c0_775, %c3_776, %c14_777, %c0_778], %1709 {strides = array<i32>} : memref<1x4x32x32xf32, #tpu.memory_space<vmem>>, vector<1x1x1x32xf32>,
    %1710 = vector.extract_strided_slice %1649 {offsets = [7, 0], sizes = [1, 32], strides = [1, 1]} : vector<16x32xf32> to vector<1x32xf32>
    %c0_779 = arith.constant 0 : index
    %c3_780 = arith.constant 3 : index
    %c15_781 = arith.constant 15 : index
    %c0_782 = arith.constant 0 : index
    %1711 = vector.load %arg4[%c0_779, %c3_780, %c15_781, %c0_782] : memref<1x4x32x32xf32, #tpu.memory_space<vmem>>, vector<1x1x1x32xf32>
    %1712 = vector.shape_cast %1711 : vector<1x1x1x32xf32> to vector<1x32xf32>
    %1713 = vector.shape_cast %1710 : vector<1x32xf32> to vector<1x1x1x32xf32>
    tpu.vector_store %arg4[%c0_779, %c3_780, %c15_781, %c0_782], %1713 {strides = array<i32>} : memref<1x4x32x32xf32, #tpu.memory_space<vmem>>, vector<1x1x1x32xf32>,
    %1714 = vector.extract_strided_slice %1646 {offsets = [8, 0], sizes = [1, 32], strides = [1, 1]} : vector<16x32xf32> to vector<1x32xf32>
    %c0_783 = arith.constant 0 : index
    %c3_784 = arith.constant 3 : index
    %c16_785 = arith.constant 16 : index
    %c0_786 = arith.constant 0 : index
    %1715 = vector.load %arg4[%c0_783, %c3_784, %c16_785, %c0_786] : memref<1x4x32x32xf32, #tpu.memory_space<vmem>>, vector<1x1x1x32xf32>
    %1716 = vector.shape_cast %1715 : vector<1x1x1x32xf32> to vector<1x32xf32>
    %1717 = vector.shape_cast %1714 : vector<1x32xf32> to vector<1x1x1x32xf32>
    tpu.vector_store %arg4[%c0_783, %c3_784, %c16_785, %c0_786], %1717 {strides = array<i32>} : memref<1x4x32x32xf32, #tpu.memory_space<vmem>>, vector<1x1x1x32xf32>,
    %1718 = vector.extract_strided_slice %1649 {offsets = [8, 0], sizes = [1, 32], strides = [1, 1]} : vector<16x32xf32> to vector<1x32xf32>
    %c0_787 = arith.constant 0 : index
    %c3_788 = arith.constant 3 : index
    %c17_789 = arith.constant 17 : index
    %c0_790 = arith.constant 0 : index
    %1719 = vector.load %arg4[%c0_787, %c3_788, %c17_789, %c0_790] : memref<1x4x32x32xf32, #tpu.memory_space<vmem>>, vector<1x1x1x32xf32>
    %1720 = vector.shape_cast %1719 : vector<1x1x1x32xf32> to vector<1x32xf32>
    %1721 = vector.shape_cast %1718 : vector<1x32xf32> to vector<1x1x1x32xf32>
    tpu.vector_store %arg4[%c0_787, %c3_788, %c17_789, %c0_790], %1721 {strides = array<i32>} : memref<1x4x32x32xf32, #tpu.memory_space<vmem>>, vector<1x1x1x32xf32>,
    %1722 = vector.extract_strided_slice %1646 {offsets = [9, 0], sizes = [1, 32], strides = [1, 1]} : vector<16x32xf32> to vector<1x32xf32>
    %c0_791 = arith.constant 0 : index
    %c3_792 = arith.constant 3 : index
    %c18_793 = arith.constant 18 : index
    %c0_794 = arith.constant 0 : index
    %1723 = vector.load %arg4[%c0_791, %c3_792, %c18_793, %c0_794] : memref<1x4x32x32xf32, #tpu.memory_space<vmem>>, vector<1x1x1x32xf32>
    %1724 = vector.shape_cast %1723 : vector<1x1x1x32xf32> to vector<1x32xf32>
    %1725 = vector.shape_cast %1722 : vector<1x32xf32> to vector<1x1x1x32xf32>
    tpu.vector_store %arg4[%c0_791, %c3_792, %c18_793, %c0_794], %1725 {strides = array<i32>} : memref<1x4x32x32xf32, #tpu.memory_space<vmem>>, vector<1x1x1x32xf32>,
    %1726 = vector.extract_strided_slice %1649 {offsets = [9, 0], sizes = [1, 32], strides = [1, 1]} : vector<16x32xf32> to vector<1x32xf32>
    %c0_795 = arith.constant 0 : index
    %c3_796 = arith.constant 3 : index
    %c19_797 = arith.constant 19 : index
    %c0_798 = arith.constant 0 : index
    %1727 = vector.load %arg4[%c0_795, %c3_796, %c19_797, %c0_798] : memref<1x4x32x32xf32, #tpu.memory_space<vmem>>, vector<1x1x1x32xf32>
    %1728 = vector.shape_cast %1727 : vector<1x1x1x32xf32> to vector<1x32xf32>
    %1729 = vector.shape_cast %1726 : vector<1x32xf32> to vector<1x1x1x32xf32>
    tpu.vector_store %arg4[%c0_795, %c3_796, %c19_797, %c0_798], %1729 {strides = array<i32>} : memref<1x4x32x32xf32, #tpu.memory_space<vmem>>, vector<1x1x1x32xf32>,
    %1730 = vector.extract_strided_slice %1646 {offsets = [10, 0], sizes = [1, 32], strides = [1, 1]} : vector<16x32xf32> to vector<1x32xf32>
    %c0_799 = arith.constant 0 : index
    %c3_800 = arith.constant 3 : index
    %c20_801 = arith.constant 20 : index
    %c0_802 = arith.constant 0 : index
    %1731 = vector.load %arg4[%c0_799, %c3_800, %c20_801, %c0_802] : memref<1x4x32x32xf32, #tpu.memory_space<vmem>>, vector<1x1x1x32xf32>
    %1732 = vector.shape_cast %1731 : vector<1x1x1x32xf32> to vector<1x32xf32>
    %1733 = vector.shape_cast %1730 : vector<1x32xf32> to vector<1x1x1x32xf32>
    tpu.vector_store %arg4[%c0_799, %c3_800, %c20_801, %c0_802], %1733 {strides = array<i32>} : memref<1x4x32x32xf32, #tpu.memory_space<vmem>>, vector<1x1x1x32xf32>,
    %1734 = vector.extract_strided_slice %1649 {offsets = [10, 0], sizes = [1, 32], strides = [1, 1]} : vector<16x32xf32> to vector<1x32xf32>
    %c0_803 = arith.constant 0 : index
    %c3_804 = arith.constant 3 : index
    %c21_805 = arith.constant 21 : index
    %c0_806 = arith.constant 0 : index
    %1735 = vector.load %arg4[%c0_803, %c3_804, %c21_805, %c0_806] : memref<1x4x32x32xf32, #tpu.memory_space<vmem>>, vector<1x1x1x32xf32>
    %1736 = vector.shape_cast %1735 : vector<1x1x1x32xf32> to vector<1x32xf32>
    %1737 = vector.shape_cast %1734 : vector<1x32xf32> to vector<1x1x1x32xf32>
    tpu.vector_store %arg4[%c0_803, %c3_804, %c21_805, %c0_806], %1737 {strides = array<i32>} : memref<1x4x32x32xf32, #tpu.memory_space<vmem>>, vector<1x1x1x32xf32>,
    %1738 = vector.extract_strided_slice %1646 {offsets = [11, 0], sizes = [1, 32], strides = [1, 1]} : vector<16x32xf32> to vector<1x32xf32>
    %c0_807 = arith.constant 0 : index
    %c3_808 = arith.constant 3 : index
    %c22_809 = arith.constant 22 : index
    %c0_810 = arith.constant 0 : index
    %1739 = vector.load %arg4[%c0_807, %c3_808, %c22_809, %c0_810] : memref<1x4x32x32xf32, #tpu.memory_space<vmem>>, vector<1x1x1x32xf32>
    %1740 = vector.shape_cast %1739 : vector<1x1x1x32xf32> to vector<1x32xf32>
    %1741 = vector.shape_cast %1738 : vector<1x32xf32> to vector<1x1x1x32xf32>
    tpu.vector_store %arg4[%c0_807, %c3_808, %c22_809, %c0_810], %1741 {strides = array<i32>} : memref<1x4x32x32xf32, #tpu.memory_space<vmem>>, vector<1x1x1x32xf32>,
    %1742 = vector.extract_strided_slice %1649 {offsets = [11, 0], sizes = [1, 32], strides = [1, 1]} : vector<16x32xf32> to vector<1x32xf32>
    %c0_811 = arith.constant 0 : index
    %c3_812 = arith.constant 3 : index
    %c23_813 = arith.constant 23 : index
    %c0_814 = arith.constant 0 : index
    %1743 = vector.load %arg4[%c0_811, %c3_812, %c23_813, %c0_814] : memref<1x4x32x32xf32, #tpu.memory_space<vmem>>, vector<1x1x1x32xf32>
    %1744 = vector.shape_cast %1743 : vector<1x1x1x32xf32> to vector<1x32xf32>
    %1745 = vector.shape_cast %1742 : vector<1x32xf32> to vector<1x1x1x32xf32>
    tpu.vector_store %arg4[%c0_811, %c3_812, %c23_813, %c0_814], %1745 {strides = array<i32>} : memref<1x4x32x32xf32, #tpu.memory_space<vmem>>, vector<1x1x1x32xf32>,
    %1746 = vector.extract_strided_slice %1646 {offsets = [12, 0], sizes = [1, 32], strides = [1, 1]} : vector<16x32xf32> to vector<1x32xf32>
    %c0_815 = arith.constant 0 : index
    %c3_816 = arith.constant 3 : index
    %c24_817 = arith.constant 24 : index
    %c0_818 = arith.constant 0 : index
    %1747 = vector.load %arg4[%c0_815, %c3_816, %c24_817, %c0_818] : memref<1x4x32x32xf32, #tpu.memory_space<vmem>>, vector<1x1x1x32xf32>
    %1748 = vector.shape_cast %1747 : vector<1x1x1x32xf32> to vector<1x32xf32>
    %1749 = vector.shape_cast %1746 : vector<1x32xf32> to vector<1x1x1x32xf32>
    tpu.vector_store %arg4[%c0_815, %c3_816, %c24_817, %c0_818], %1749 {strides = array<i32>} : memref<1x4x32x32xf32, #tpu.memory_space<vmem>>, vector<1x1x1x32xf32>,
    %1750 = vector.extract_strided_slice %1649 {offsets = [12, 0], sizes = [1, 32], strides = [1, 1]} : vector<16x32xf32> to vector<1x32xf32>
    %c0_819 = arith.constant 0 : index
    %c3_820 = arith.constant 3 : index
    %c25_821 = arith.constant 25 : index
    %c0_822 = arith.constant 0 : index
    %1751 = vector.load %arg4[%c0_819, %c3_820, %c25_821, %c0_822] : memref<1x4x32x32xf32, #tpu.memory_space<vmem>>, vector<1x1x1x32xf32>
    %1752 = vector.shape_cast %1751 : vector<1x1x1x32xf32> to vector<1x32xf32>
    %1753 = vector.shape_cast %1750 : vector<1x32xf32> to vector<1x1x1x32xf32>
    tpu.vector_store %arg4[%c0_819, %c3_820, %c25_821, %c0_822], %1753 {strides = array<i32>} : memref<1x4x32x32xf32, #tpu.memory_space<vmem>>, vector<1x1x1x32xf32>,
    %1754 = vector.extract_strided_slice %1646 {offsets = [13, 0], sizes = [1, 32], strides = [1, 1]} : vector<16x32xf32> to vector<1x32xf32>
    %c0_823 = arith.constant 0 : index
    %c3_824 = arith.constant 3 : index
    %c26_825 = arith.constant 26 : index
    %c0_826 = arith.constant 0 : index
    %1755 = vector.load %arg4[%c0_823, %c3_824, %c26_825, %c0_826] : memref<1x4x32x32xf32, #tpu.memory_space<vmem>>, vector<1x1x1x32xf32>
    %1756 = vector.shape_cast %1755 : vector<1x1x1x32xf32> to vector<1x32xf32>
    %1757 = vector.shape_cast %1754 : vector<1x32xf32> to vector<1x1x1x32xf32>
    tpu.vector_store %arg4[%c0_823, %c3_824, %c26_825, %c0_826], %1757 {strides = array<i32>} : memref<1x4x32x32xf32, #tpu.memory_space<vmem>>, vector<1x1x1x32xf32>,
    %1758 = vector.extract_strided_slice %1649 {offsets = [13, 0], sizes = [1, 32], strides = [1, 1]} : vector<16x32xf32> to vector<1x32xf32>
    %c0_827 = arith.constant 0 : index
    %c3_828 = arith.constant 3 : index
    %c27_829 = arith.constant 27 : index
    %c0_830 = arith.constant 0 : index
    %1759 = vector.load %arg4[%c0_827, %c3_828, %c27_829, %c0_830] : memref<1x4x32x32xf32, #tpu.memory_space<vmem>>, vector<1x1x1x32xf32>
    %1760 = vector.shape_cast %1759 : vector<1x1x1x32xf32> to vector<1x32xf32>
    %1761 = vector.shape_cast %1758 : vector<1x32xf32> to vector<1x1x1x32xf32>
    tpu.vector_store %arg4[%c0_827, %c3_828, %c27_829, %c0_830], %1761 {strides = array<i32>} : memref<1x4x32x32xf32, #tpu.memory_space<vmem>>, vector<1x1x1x32xf32>,
    %1762 = vector.extract_strided_slice %1646 {offsets = [14, 0], sizes = [1, 32], strides = [1, 1]} : vector<16x32xf32> to vector<1x32xf32>
    %c0_831 = arith.constant 0 : index
    %c3_832 = arith.constant 3 : index
    %c28_833 = arith.constant 28 : index
    %c0_834 = arith.constant 0 : index
    %1763 = vector.load %arg4[%c0_831, %c3_832, %c28_833, %c0_834] : memref<1x4x32x32xf32, #tpu.memory_space<vmem>>, vector<1x1x1x32xf32>
    %1764 = vector.shape_cast %1763 : vector<1x1x1x32xf32> to vector<1x32xf32>
    %1765 = vector.shape_cast %1762 : vector<1x32xf32> to vector<1x1x1x32xf32>
    tpu.vector_store %arg4[%c0_831, %c3_832, %c28_833, %c0_834], %1765 {strides = array<i32>} : memref<1x4x32x32xf32, #tpu.memory_space<vmem>>, vector<1x1x1x32xf32>,
    %1766 = vector.extract_strided_slice %1649 {offsets = [14, 0], sizes = [1, 32], strides = [1, 1]} : vector<16x32xf32> to vector<1x32xf32>
    %c0_835 = arith.constant 0 : index
    %c3_836 = arith.constant 3 : index
    %c29_837 = arith.constant 29 : index
    %c0_838 = arith.constant 0 : index
    %1767 = vector.load %arg4[%c0_835, %c3_836, %c29_837, %c0_838] : memref<1x4x32x32xf32, #tpu.memory_space<vmem>>, vector<1x1x1x32xf32>
    %1768 = vector.shape_cast %1767 : vector<1x1x1x32xf32> to vector<1x32xf32>
    %1769 = vector.shape_cast %1766 : vector<1x32xf32> to vector<1x1x1x32xf32>
    tpu.vector_store %arg4[%c0_835, %c3_836, %c29_837, %c0_838], %1769 {strides = array<i32>} : memref<1x4x32x32xf32, #tpu.memory_space<vmem>>, vector<1x1x1x32xf32>,
    %1770 = vector.extract_strided_slice %1646 {offsets = [15, 0], sizes = [1, 32], strides = [1, 1]} : vector<16x32xf32> to vector<1x32xf32>
    %c0_839 = arith.constant 0 : index
    %c3_840 = arith.constant 3 : index
    %c30_841 = arith.constant 30 : index
    %c0_842 = arith.constant 0 : index
    %1771 = vector.load %arg4[%c0_839, %c3_840, %c30_841, %c0_842] : memref<1x4x32x32xf32, #tpu.memory_space<vmem>>, vector<1x1x1x32xf32>
    %1772 = vector.shape_cast %1771 : vector<1x1x1x32xf32> to vector<1x32xf32>
    %1773 = vector.shape_cast %1770 : vector<1x32xf32> to vector<1x1x1x32xf32>
    tpu.vector_store %arg4[%c0_839, %c3_840, %c30_841, %c0_842], %1773 {strides = array<i32>} : memref<1x4x32x32xf32, #tpu.memory_space<vmem>>, vector<1x1x1x32xf32>,
    %1774 = vector.extract_strided_slice %1649 {offsets = [15, 0], sizes = [1, 32], strides = [1, 1]} : vector<16x32xf32> to vector<1x32xf32>
    %c0_843 = arith.constant 0 : index
    %c3_844 = arith.constant 3 : index
    %c31_845 = arith.constant 31 : index
    %c0_846 = arith.constant 0 : index
    %1775 = vector.load %arg4[%c0_843, %c3_844, %c31_845, %c0_846] : memref<1x4x32x32xf32, #tpu.memory_space<vmem>>, vector<1x1x1x32xf32>
    %1776 = vector.shape_cast %1775 : vector<1x1x1x32xf32> to vector<1x32xf32>
    %1777 = vector.shape_cast %1774 : vector<1x32xf32> to vector<1x1x1x32xf32>
    tpu.vector_store %arg4[%c0_843, %c3_844, %c31_845, %c0_846], %1777 {strides = array<i32>} : memref<1x4x32x32xf32, #tpu.memory_space<vmem>>, vector<1x1x1x32xf32>,
    return
  }
  func.func @transform_0(%arg0: i32) -> (i32, i32, i32, i32) {
    %c0_i32 = arith.constant 0 : i32
    %c0_i32_0 = arith.constant 0 : i32
    %c0_i32_1 = arith.constant 0 : i32
    %c0_i32_2 = arith.constant 0 : i32
    return %arg0, %c0_i32, %c0_i32_0, %c0_i32_1 : i32, i32, i32, i32
  }
  func.func @transform_1(%arg0: i32) -> i32 {
    %c0_i32 = arith.constant 0 : i32
    %c0_i32_0 = arith.constant 0 : i32
    return %c0_i32 : i32
  }
  func.func @transform_2(%arg0: i32) -> i32 {
    %c0_i32 = arith.constant 0 : i32
    %c0_i32_0 = arith.constant 0 : i32
    return %c0_i32 : i32
  }
  func.func @transform_3(%arg0: i32) -> (i32, i32, i32, i32) {
    %c0_i32 = arith.constant 0 : i32
    %c0_i32_0 = arith.constant 0 : i32
    %c0_i32_1 = arith.constant 0 : i32
    %c0_i32_2 = arith.constant 0 : i32
    return %arg0, %c0_i32, %c0_i32_0, %c0_i32_1 : i32, i32, i32, i32
  }
}

</mosaic_0001>

<bundles_post_ra>
// kernel: tpu_custom_call.1
= control target key start
LH: loop header
LB: loop body
LE: loop exit
PB: predicated region body
PF: predicated region fallthrough
CT: control target
= control target key end

     0   :  { %s7618_s0 = inlined_call_operand.hbm [shape: f32[2,4,16,16], index: 0, kind: input, shape index: {}]   ;;  %s7619_s1 = inlined_call_operand.vmem [shape: f32[192], index: 1, kind: input, shape index: {}]   ;;  %s7620_s2 = inlined_call_operand.vmem [shape: f32[4], index: 2, kind: input, shape index: {}]   ;;  %s7621_s3 = inlined_call_operand.hbm [shape: f32[2,4,32,32], index: 3, kind: output, shape index: {}]  }
   0x1   :  { %7903 = sst [smem:[#allocation154_spill]] %s7618_s0 }
   0x2   :  { %7904 = sst [smem:[#allocation155_spill]] %s7619_s1 }
   0x3   :  { %7905 = sst [smem:[#allocation156_spill]] %s7620_s2 }
   0x4   :  { %7906 = sst [smem:[#allocation157_spill]] %s7621_s3 }
   0x5   :  { %8 = vsyncpa [#allocation4], 0 }
   0x6   :  { %10 = vsyncpa [#allocation4 + $0x1], 0 }
   0x7   :  { %11 = vsyncpa [#allocation6], 0 }
   0x8   :  { %12 = vsyncpa [#allocation9], 0 }
   0x9   :  { %13 = vsyncpa [#allocation5], 0 }
   0xa   :  { %15 = vsyncpa [#allocation5 + $0x1], 0  ;;  %s4077_s12 = smov 0   ;;  %s4079_s13 = smov 0  }
   0xb   :  { %s4081_s14 = smov 0   ;;  %s4083_s15 = smov 0  }
   0xc LB: > { %7907 = sst [smem:[#allocation15_spill]] %s4016_s12  ;;  %s4098_s16 = sadd.s32 4294967295, %s4028_s15   ;;  %s4028_s15 = sphi %s4083_s15, %s8536_s15   ;;  %s4024_s14 = sphi %s4081_s14, %s8539_s14   ;;  %s4020_s13 = sphi %s4079_s13, %s8538_s13   ;;  %s4016_s12 = sphi %s4077_s12, %s8537_s12  }
   0xd   : > { %7908 = sst [smem:[#allocation16_spill]] %s4020_s13  ;;  %s3380_s17 = sadd.s32 4294967294, %s4028_s15  }
   0xe   : > { %7909 = sst [smem:[#allocation17_spill]] %s4024_s14  ;;  %s4102_s18 = sadd.s32 1, %s4028_s15  }
   0xf   : > { %7910 = sst [smem:[#allocation18_spill]] %s4028_s15  ;;  %s28_s19 = sadd.s32 1, %s4024_s14 }
  0x10   : > { %7911 = sst [smem:[#allocation19_spill]] %s4098_s16  ;;  %s25_s20 = ssub.s32 %s4028_s15, %s4102_s18 }
  0x11   : > { %7912 = sst [smem:[#allocation20_spill]] %s4102_s18  ;;  %p35_p0 = scmp.ne.s32.totalorder %s4024_s14, %s4020_s13 }
  0x12   : > { %p26_p1 = scmp.eq.s32.totalorder %s25_s20, 0  ;;  %p36_p2 = scmp.eq.s32.totalorder %s4028_s15, 0 }
  0x13   : > { %p41_p3 = scmp.ne.s32.totalorder %s4020_s13, %s4016_s12  ;;  %p7622_p4 = scmp.eq.s32.totalorder %s4098_s16, 0 }
  0x14   : > { %s4114_s21 = scalar_select %p26_p1, %s4024_s14, %s28_s19  }
  0x15   : > { %p4116_p5 = por %p36_p2, %p35_p0  ;;  %p4122_p6 = por %p7622_p4, %p41_p3 }
  0x16   : > { %7913 = sst [smem:[#allocation21_spill]] %s4114_s21  ;;  %p107_p7 = scmp.eq.s32.totalorder %s4098_s16, 1 }
  0x17   : > { %s7915_s23 = scalar_select %p4122_p6, 1, 0 }
  0x18   : > { %p113_p8 = scmp.eq.s32.totalorder %s3380_s17, 1  ;;  %p3381_p9 = scmp.ge.s32.totalorder %s4028_s15, 1 }
  0x19   : > { %p120_p10 = scmp.lt.s32.totalorder %s4028_s15, 3  ;;  %p4129_p11 = por %p107_p7, %p35_p0 }
  0x1a   : > { %p4133_p12 = por %p113_p8, %p41_p3  ;;  %s7921_s1 = sld [smem:[#allocation155_spill]] }
  0x1b   : > { %s7916_s24 = scalar_select %p4129_p11, 1, 0 }
  0x1c   : > { %s7918_s25 = scalar_select %p4133_p12, 1, 0 }
  0x1d   : > { %7917 = sst [smem:[#allocation22_spill]] %s7916_s24  ;;  %p4137_p13 = pnand %p3381_p9, %p120_p10 }
  0x1e   : > { %7919 = sst [smem:[#allocation23_spill]] %s7918_s25  ;;  %p3725_p2 = scmp.lt.s32.totalorder %s4028_s15, 2 }
  0x1f   : > { %s7920_s26 = scalar_select %p4137_p13, 1, 0 }
  0x20   : > { %s133_s29 = sshll.u32 %s7921_s1, 4  ;;  %p3708_p1 = pneg %p4137_p13  ;;  %s134_s29 = int_to_ptr.vmem [resolvable:$true] %s133_s29 }
  0x21   : > { %s7923_s2 = sld [smem:[#allocation156_spill]]  ;;  %p4159_p3 = pnand %p3725_p2, %p4116_p5 }
  0x22   : > { %p4150_p7 = pnand %p3708_p1, %p7622_p4  ;;  %s3894_s8 = scalar_lea.vmem %s134_s29, 32 }
  0x23   : > { %s7924_s7 = scalar_select %p4159_p3, 1, 0 }
  0x24   : > { %p3895_p8 = scmp.ne.s32.totalorder %s134_s29, %s3894_s8  ;;  %p3896_p9 = pneg %p4150_p7 }
  0x25   : > { %p3902_p0 = scmp.lt.s32.totalorder %s134_s29, %s134_s29  ;;  %p3903_p4 = scmp.lt.s32.totalorder %s3894_s8, %s3894_s8 }
  0x26   : > { %p3897_p10 = pnand %p3896_p9, %p3895_p8 }
  0x27   : > { %s144_s6 = sshll.u32 %s7923_s2, 4  ;;  %p3904_p12 = por %p3903_p4, %p3902_p0  ;;  %s145_s6 = int_to_ptr.vmem [resolvable:$true] %s144_s6 }
  0x28   : > { %p3898_p1 = pneg %p3897_p10 }
  0x2a   : > { %p3905_p11 = pnand %p3904_p12, %p3898_p1 }
  0x2c   : > { %3908 = shalt.err (!%p3905_p11)
}
  0x2d   : > { %s4030_s9 = smov [#allocation7]   ;;  %s155_s10 = sand.u32 1, %s4024_s14  }
  0x2e   : > { %3711 = dma.vmem_to_smem (!%p4150_p7), %s134_s29, 32, %s4030_s9, [#allocation6]  }
  0x2f   : > { %s3909_s11 = scalar_lea.vmem %s145_s6, 16  ;;  %p3917_p8 = scmp.lt.s32.totalorder %s145_s6, %s145_s6 }
  0x30   : > { %p3910_p5 = scmp.ne.s32.totalorder %s145_s6, %s3909_s11  ;;  %p3918_p10 = scmp.lt.s32.totalorder %s3909_s11, %s3909_s11 }
  0x32   : > { %p3912_p2 = pnand %p3910_p5, %p3896_p9  ;;  %p3919_p13 = por %p3918_p10, %p3917_p8 }
  0x34   : > { %p3913_p6 = pneg %p3912_p2 }
  0x36   : > { %p3920_p3 = pnand %p3919_p13, %p3913_p6 }
  0x38   : > { %3923 = shalt.err (!%p3920_p3)
}
  0x39   : > { %s4031_s17 = smov [#allocation8]   ;;  %s3385_s19 = sshll.u32 %s155_s10, 6 }
  0x3a   : > { %3714 = dma.vmem_to_smem (!%p4150_p7), %s145_s6, 16, %s4031_s17, [#allocation9]  }
  0x3b   : > { %s3694_s20 = sshll.u32 %s4028_s15, 10  ;;  %s7925_s0 = sld [smem:[#allocation154_spill]] }
  0x3c   : > { %s159_s29 = scalar_lea.vmem [#allocation3], %s3385_s19  ;;  %s4184_s30 = scalar_lea.sflag [#allocation4], %s155_s10 }
  0x3d   : > { %s166_s4 = sshll.u32 %s159_s29, 4  ;;  %p7926_p6 = scmp.ne.s32.totalorder %s7924_s7, 0  ;;  %s4182_s4 = int_to_ptr.vmem [resolvable:$true] %s166_s4 }
  0x3f   : > { %p3926_p11 = pneg %p7926_p6 }
  0x41   : > { %s4180_s28 = scalar_lea.hbm %s7925_s0, %s3694_s20  ;;  %s3929_s9 = scalar_lea.hbm %s7925_s0, 2048 }
  0x42   : > { %s3924_s5 = scalar_lea.hbm %s4180_s28, 1024  ;;  %p3930_p0 = scmp.lt.u32.totalorder %s4180_s28, %s7925_s0 }
  0x43   : > { %p3925_p4 = scmp.ne.s32.totalorder %s4180_s28, %s3924_s5  ;;  %p3931_p7 = scmp.lt.u32.totalorder %s3929_s9, %s3924_s5 }
  0x44   : > { %p3933_p9 = scmp.lt.u32.totalorder %s3924_s5, %s4180_s28 }
  0x45   : > { %p3927_p12 = pnand %p3926_p11, %p3925_p4  ;;  %p3932_p3 = por %p3931_p7, %p3930_p0 }
  0x47   : > { %p3928_p13 = pneg %p3927_p12  ;;  %p3934_p1 = por %p3933_p9, %p3932_p3 }
  0x49   : > { %p3935_p5 = pnand %p3934_p1, %p3928_p13 }
  0x4b   : > { %3938 = shalt.err (!%p3935_p5)
}
  0x4c   : > { %s3939_s10 = scalar_lea.vmem %s4182_s4, 1024  ;;  %s4032_s19 = smov [#allocation3]  }
  0x4d   : > { %p3940_p2 = scmp.ne.s32.totalorder %s4182_s4, %s3939_s10  ;;  %s3944_s20 = sshll.u32 %s4032_s19, 4  ;;  %s3945_s20 = int_to_ptr.vmem [resolvable:$false] %s3944_s20 }
  0x4e   : > { %s3946_s22 = scalar_lea.vmem %s3945_s20, 2048  ;;  %p3947_p4 = scmp.lt.s32.totalorder %s4182_s4, %s3945_s20 }
  0x4f   : > { %p3942_p8 = pnand %p3940_p2, %p3926_p11  ;;  %p3948_p12 = scmp.lt.s32.totalorder %s3946_s22, %s3939_s10 }
  0x51   : > { %p3943_p10 = pneg %p3942_p8  ;;  %p3949_p0 = por %p3948_p12, %p3947_p4 }
  0x53   : > { %p3950_p7 = pnand %p3949_p0, %p3943_p10 }
  0x55   : > { %3953 = shalt.err (!%p3950_p7)
}
  0x56   : > { %s4033_s27 = smov 128   ;;  %s4034_s29 = smov 8  }
  0x57   : > { %3718 = dma.hbm_to_vmem [thread:$0]  (!%p7926_p6), %s4180_s28, 1024, %s4182_s4, %s4184_s30, %s4033_s27, %s4033_s27, %s4034_s29  }
  0x58   : > { %p7927_p11 = scmp.ne.s32.totalorder %s7920_s26, 0 }
  0x5a   : > { %178 = sbr.rel (%p7927_p11) target bundleno = 1178 (0x49a), region = 32 }
  0x61   : > { %s4215_s5 = sand.u32 1, %s4020_s13   ;;  %p7929_p13 = scmp.ne.s32.totalorder %s7915_s23, 0 }
  0x62   : > { %7928 = sst [smem:[#allocation24_spill]] %s4215_s5  ;;  %s3389_s6 = sshll.u32 %s4215_s5, 6 }
  0x63   : > { %s181_s8 = scalar_lea.sflag [#allocation4], %s4215_s5  ;;  %s4219_s9 = scalar_lea.vmem [#allocation3], %s3389_s6 }
  0x64   : > { %3999 = dma.done.wait (%p7929_p13), %s181_s8, 1024  }
  0x65   : > { %4001 = vsyncadd (%p7929_p13), %s181_s8, 4294966272  ;;  %p7930_p6 = scmp.eq.s32.totalorder %s4098_s16, 0 }
  0x67   : > { %4003 = dma.done.wait (%p7930_p6), [#allocation6], 32   ;;  %p7931_p3 = pmov %p7930_p6 }
  0x69   : > { %4005 = vsyncadd (%p7931_p3), [#allocation6], 4294967264  ;;  %p7932_p9 = pmov %p7931_p3 }
  0x6a   : > { %p7933_p1 = pmov %p7931_p3 }
  0x6b   : > { %4007 = dma.done.wait (%p7932_p9), [#allocation9], 16  }
  0x6c   : > { %4009 = vsyncadd (%p7933_p1), [#allocation9], 4294967280 }
  0x6d   : > { %197 = sfence }
  0x6e   : > { %v4234_v0 = vld [vmem:[%s4219_s9 + $0x10] sm:$0xff]  ;;  %v4237_v1 = vld [vmem:[%s4219_s9] sm:$0xff]  ;;  %v4035_v2 = vmov 1   ;;  %v4244_v3 = vld [vmem:[%s4219_s9 + $0x28] sm:$0xff]  ;;  %v4036_v5 = vmov 4   ;;  %v4037_v6 = vmov 2  }
  0x6f   : > { %3802 = vset.pattern.permute.xlu0 %v4035_v2  ;;  %3786 = vset.pattern.permute.xlu1 %v4035_v2  ;;  %v4247_v4 = vld [vmem:[%s4219_s9 + $0x8] sm:$0xff]  ;;  %v4038_v7 = vmov 3   ;;  %v4039_v8 = vmov 7   ;;  %v7712_v9 = vmov 10   ;;  %v4041_v10 = vmov 5   ;;  %v4283_v16 = vld [vmem:[%s4219_s9 + $0x20] sm:$0xff] }
  0x70   : > { %427 = vperm.xlu0 %3802, %v4234_v0   ;;  %246 = vperm.xlu1 %3786, %v4237_v1   ;;  %v4042_v11 = vmov 6   ;;  %v7694_v12 = vmov 13   ;;  %vm216_vm0 = vcmask 277504   ;;  %v4044_v13 = vmov 0   ;;  %v4289_v18 = vld [vmem:[%s4219_s9 + $0x38] sm:$0xff]  ;;  %v4304_v21 = vld [vmem:[%s4219_s9 + $0x30] sm:$0xff] }
  0x71   : > { %v4045_v14 = vmov 0.0   ;;  %v4046_v15 = vmov 8   ;;  %vm219_vm1 = vcmask 271360   ;;  %v7724_v17 = vmov 9   ;;  %v4298_v19 = vld [vmem:[%s4219_s9 + $0x18] sm:$0xff]  ;;  %s4577_s23 = sld [smem:[#allocation7 + $0x2]] }
  0x72   : > { %217 = vst.msk [vmem:[#allocation2] sm:$0xff] %vm216_vm0, %v4045_v14  ;;  %218 = vst.msk [vmem:[#allocation2 + $0x8] sm:$0xff] %vm216_vm0, %v4045_v14  ;;  %v7707_v20 = vmov 11   ;;  %v7705_v22 = vmov 12   ;;  %v7648_v23 = vmov 14   ;;  %v7647_v24 = vmov 15  }
  0x73   : > { %221 = vst.msk [vmem:[#allocation2 + $0x18] sm:$0xff] %vm216_vm0, %v4045_v14  ;;  %222 = vst.msk [vmem:[#allocation2 + $0x20] sm:$0xff] %vm216_vm0, %v4045_v14  ;;  %vm242_vm2 = vcmask 23560   ;;  %vm253_vm3 = vcmask 39960   ;;  %vm264_vm4 = vcmask 56360   ;;  %vm275_vm5 = vcmask 72760  }
  0x74   : > { %597 = vperm.xlu0 %3802, %v4244_v3   ;;  %250 = vperm.xlu1 %3786, %v4247_v4   ;;  %224 = vst.msk [vmem:[#allocation2 + $0x30] sm:$0xff] %vm216_vm0, %v4045_v14  ;;  %225 = vst.msk [vmem:[#allocation2 + $0x38] sm:$0xff] %vm216_vm0, %v4045_v14  ;;  %vm286_vm6 = vcmask 89160   ;;  %vm297_vm7 = vcmask 105560   ;;  %vm308_vm8 = vcmask 121960   ;;  %vm319_vm9 = vcmask 138360  }
  0x75   : > { %227 = vst.msk [vmem:[#allocation2 + $0x48] sm:$0xff] %vm216_vm0, %v4045_v14  ;;  %228 = vst.msk [vmem:[#allocation2 + $0x50] sm:$0xff] %vm216_vm0, %v4045_v14  ;;  %vm330_vm10 = vcmask 154760   ;;  %vm341_vm11 = vcmask 171160   ;;  %vm352_vm12 = vcmask 187560   ;;  %vm363_vm13 = vcmask 203960  }
  0x76   : > { %220 = vst.msk [vmem:[#allocation2 + $0x10] sm:$0x3] %vm219_vm1, %v4045_v14  ;;  %223 = vst.msk [vmem:[#allocation2 + $0x28] sm:$0x3] %vm219_vm1, %v4045_v14  ;;  %vm374_vm14 = vcmask 220360   ;;  %vm385_vm15 = vcmask 236760  }
  0x77   : > { %226 = vst.msk [vmem:[#allocation2 + $0x40] sm:$0x3] %vm219_vm1, %v4045_v14  ;;  %229 = vst.msk [vmem:[#allocation2 + $0x58] sm:$0x3] %vm219_vm1, %v4045_v14  ;;  %vm396_vm0 = vcmask 253160   ;;  %vm407_vm1 = vcmask 269560  }
  0x78   : > { %3820 = vset.pattern.permute.xlu0 %v4036_v5  ;;  %3787 = vset.pattern.permute.xlu1 %v4037_v6  ;;  %7934 = sst [smem:[#allocation25_spill]] %s4577_s23  ;;  %s4585_s26 = sld [smem:[#allocation7 + $0x4]] }
  0x79   : > { %457 = vperm.xlu0 %3820, %v4234_v0   ;;  %261 = vperm.xlu1 %3787, %v4247_v4   ;;  %s4593_s7 = sld [smem:[#allocation7 + $0x5]]  ;;  %s4608_s28 = sld [smem:[#allocation7 + $0x61]] }
  0x7a   : > { %s4610_s4 = sld [smem:[#allocation7 + $0x62]]  ;;  %s7627_s30 = smov 126  }
  0x7b   : > { %s4613_s11 = sld [smem:[#allocation7 + $0x31]]  ;;  %s4615_s17 = sld [smem:[#allocation7 + $0x32]] }
  0x7c   : > { %s4617_s10 = sld [smem:[#allocation7 + $0x34]]  ;;  %s4623_s19 = sld [smem:[#allocation7 + $0x35]] }
  0x7d   : > { %627 = vperm.xlu0 %3820, %v4244_v3   ;;  %3788 = vset.pattern.permute.xlu1 %v4038_v7  ;;  %s4625_s20 = sld [smem:[#allocation7 + $0x91]]  ;;  %s4630_s22 = sld [smem:[#allocation7 + $0x92]] }
  0x7e   : > { %268 = vperm.xlu1 %3788, %v4237_v1   ;;  %7935 = sst [smem:[#allocation26_spill]] %s4585_s26  ;;  %s4632_s27 = sld [smem:[#allocation7 + $0x49]] }
  0x7f   : > { %7936 = sst [smem:[#allocation27_spill]] %s4593_s7  ;;  %s7629_s29 = smov 127  }
  0x80   : > { %7937 = sst [smem:[#allocation28_spill]] %s4608_s28  ;;  %s4636_s6 = sld [smem:[#allocation7 + $0x4a]] }
  0x81   : > { %3824 = vset.pattern.permute.xlu0 %v4039_v8  ;;  %7938 = sst [smem:[#allocation29_spill]] %s4610_s4  ;;  %s4638_s8 = sld [smem:[#allocation7 + $0x4c]] }
  0x82   : > { %487 = vperm.xlu0 %3824, %v4234_v0   ;;  %3789 = vset.pattern.permute.xlu1 %v4036_v5  ;;  %s4642_s0 = sld [smem:[#allocation7 + $0xa9]]  ;;  %s4647_s1 = sld [smem:[#allocation7 + $0x64]] }
  0x83   : > { %279 = vperm.xlu1 %3789, %v4237_v1   ;;  %s4649_s2 = sld [smem:[#allocation7 + $0xaa]]  ;;  %s4655_s21 = sld [smem:[#allocation7 + $0x94]] }
  0x84   : > { %7939 = sst [smem:[#allocation30_spill]] %s4632_s27  ;;  %s7947_s14 = smov 126  }
  0x85   : > { %s4660_s13 = sld [smem:[#allocation7 + $0x95]]  ;;  %s4662_s18 = sld [smem:[#allocation7 + $0xac]] }
  0x86   : > { %657 = vperm.xlu0 %3824, %v4244_v3   ;;  %7940 = sst [smem:[#allocation31_spill]] %s4636_s6  ;;  %s4669_s15 = sld [smem:[#allocation7 + $0xad]] }
  0x87   : > { %283 = vperm.xlu1 %3789, %v4247_v4   ;;  %7941 = sst [smem:[#allocation32_spill]] %s4638_s8  ;;  %s7950_s25 = smov 127  }
  0x88   : > { %7943 = sst [smem:[#allocation34_spill]] %s4642_s0  ;;  %s4695_s12 = sld [smem:[#allocation7 + $0x19]] }
  0x89   : > { %7944 = sst [smem:[#allocation35_spill]] %s4647_s1  ;;  %s4756_s3 = sld [smem:[#allocation7]] }
  0x8a   : > { %3828 = vset.pattern.permute.xlu0 %v7712_v9  ;;  %7945 = sst [smem:[#allocation36_spill]] %s4649_s2  ;;  %s4758_s24 = sld [smem:[#allocation7 + $0x1a]] }
  0x8b   : > { %517 = vperm.xlu0 %3828, %v4234_v0   ;;  %3790 = vset.pattern.permute.xlu1 %v4041_v10  ;;  %7948 = sst [smem:[#allocation38_spill]] %s4662_s18  ;;  %s4792_s16 = sld [smem:[#allocation7 + $0x3]] }
  0x8c   : > { %294 = vperm.xlu1 %3790, %v4247_v4   ;;  %7949 = sst [smem:[#allocation39_spill]] %s4669_s15 }
  0x8d   : > { %s4799_s5 = sld [smem:[#allocation7 + $0x60]] }
  0x8e   : > { %7951 = sst [smem:[#allocation40_spill]] %s4695_s12 }
  0x8f   : > { %687 = vperm.xlu0 %3828, %v4244_v3   ;;  %7952 = sst [smem:[#allocation41_spill]] %s4756_s3 }
  0x90   : > { %3791 = vset.pattern.permute.xlu1 %v4042_v11  ;;  %7953 = sst [smem:[#allocation42_spill]] %s4758_s24 }
  0x91   : > { %301 = vperm.xlu1 %3791, %v4237_v1   ;;  %7954 = sst [smem:[#allocation43_spill]] %s4792_s16 }
  0x93   : > { %3832 = vset.pattern.permute.xlu0 %v7694_v12  ;;  %7955 = sst [smem:[#allocation44_spill]] %s4799_s5 }
  0x94   : > { %547 = vperm.xlu0 %3832, %v4234_v0  }
  0x95   : > { %3792 = vset.pattern.permute.xlu1 %v4039_v8 }
  0x96   : > { %312 = vperm.xlu1 %3792, %v4237_v1  }
  0x98   : > { %717 = vperm.xlu0 %3832, %v4244_v3  }
  0x9a   : > { %316 = vperm.xlu1 %3792, %v4247_v4  }
  0x9c   : > { %3836 = vset.pattern.permute.xlu0 %v4044_v13 }
  0x9d   : > { %234 = vperm.xlu0 %3836, %v4237_v1  }
  0x9e   : > { %3793 = vset.pattern.permute.xlu1 %v4046_v15 }
  0x9f   : > { %327 = vperm.xlu1 %3793, %v4247_v4  }
  0xa1   : > { %239 = vperm.xlu0 %3836, %v4247_v4  }
  0xa3   : > { %3794 = vset.pattern.permute.xlu1 %v7724_v17 }
  0xa4   : > { %334 = vperm.xlu1 %3794, %v4237_v1  }
  0xa5   : > { %581 = vperm.xlu0 %3836, %v4283_v16  }
  0xa8   : > { %3795 = vset.pattern.permute.xlu1 %v7712_v9 }
  0xa9   : > { %752 = vperm.xlu0 %3836, %v4289_v18   ;;  %345 = vperm.xlu1 %3795, %v4237_v1  }
  0xad   : > { %3840 = vset.pattern.permute.xlu0 %v4037_v6  ;;  %349 = vperm.xlu1 %3795, %v4247_v4  }
  0xae   : > { %257 = vperm.xlu0 %3840, %v4237_v1  }
  0xb1   : > { %3796 = vset.pattern.permute.xlu1 %v7707_v20 }
  0xb2   : > { %441 = vperm.xlu0 %3840, %v4298_v19   ;;  %360 = vperm.xlu1 %3796, %v4247_v4  }
  0xb6   : > { %769 = vperm.xlu0 %3840, %v4304_v21   ;;  %3797 = vset.pattern.permute.xlu1 %v7705_v22 }
  0xb7   : > { %367 = vperm.xlu1 %3797, %v4237_v1  }
  0xba   : > { %3842 = vset.pattern.permute.xlu0 %v4038_v7 }
  0xbb   : > { %272 = vperm.xlu0 %3842, %v4247_v4   ;;  %3798 = vset.pattern.permute.xlu1 %v7694_v12 }
  0xbc   : > { %378 = vperm.xlu1 %3798, %v4237_v1  }
  0xbf   : > { %613 = vperm.xlu0 %3842, %v4283_v16  }
  0xc0   : > { %382 = vperm.xlu1 %3798, %v4247_v4  }
  0xc3   : > { %783 = vperm.xlu0 %3842, %v4289_v18  }
  0xc4   : > { %3799 = vset.pattern.permute.xlu1 %v7648_v23 }
  0xc5   : > { %393 = vperm.xlu1 %3799, %v4247_v4  }
  0xc7   : > { %3845 = vset.pattern.permute.xlu0 %v4041_v10 }
  0xc8   : > { %290 = vperm.xlu0 %3845, %v4237_v1  }
  0xc9   : > { %3800 = vset.pattern.permute.xlu1 %v7647_v24 }
  0xca   : > { %400 = vperm.xlu1 %3800, %v4237_v1  }
  0xcc   : > { %471 = vperm.xlu0 %3845, %v4298_v19  }
  0xce   : > { %3801 = vset.pattern.permute.xlu1 %v4044_v13 }
  0xcf   : > { %415 = vperm.xlu1 %3801, %v4234_v0  }
  0xd0   : > { %799 = vperm.xlu0 %3845, %v4304_v21  }
  0xd3   : > { %420 = vperm.xlu1 %3801, %v4298_v19  }
  0xd4   : > { %3847 = vset.pattern.permute.xlu0 %v4042_v11 }
  0xd5   : > { %305 = vperm.xlu0 %3847, %v4247_v4  }
  0xd7   : > { %3803 = vset.pattern.permute.xlu1 %v4035_v2 }
  0xd8   : > { %431 = vperm.xlu1 %3803, %v4298_v19  }
  0xd9   : > { %643 = vperm.xlu0 %3847, %v4283_v16  }
  0xdc   : > { %3804 = vset.pattern.permute.xlu1 %v4037_v6 }
  0xdd   : > { %813 = vperm.xlu0 %3847, %v4289_v18   ;;  %437 = vperm.xlu1 %3804, %v4234_v0  }
  0xe1   : > { %3850 = vset.pattern.permute.xlu0 %v4046_v15  ;;  %3805 = vset.pattern.permute.xlu1 %v4038_v7 }
  0xe2   : > { %323 = vperm.xlu0 %3850, %v4237_v1   ;;  %447 = vperm.xlu1 %3805, %v4234_v0  }
  0xe6   : > { %501 = vperm.xlu0 %3850, %v4298_v19   ;;  %451 = vperm.xlu1 %3805, %v4298_v19  }
  0xea   : > { %829 = vperm.xlu0 %3850, %v4304_v21   ;;  %3806 = vset.pattern.permute.xlu1 %v4036_v5 }
  0xeb   : > { %461 = vperm.xlu1 %3806, %v4298_v19  }
  0xee   : > { %3852 = vset.pattern.permute.xlu0 %v7724_v17 }
  0xef   : > { %338 = vperm.xlu0 %3852, %v4247_v4   ;;  %3807 = vset.pattern.permute.xlu1 %v4041_v10  ;;  %v247_v25 = vpop.permute.xlu1 %246  ;;  %v4347_v26 = vpop.permute.xlu0 %427 }
  0xf0   : > { %467 = vperm.xlu1 %3807, %v4234_v0  }
  0xf3   : > { %673 = vperm.xlu0 %3852, %v4283_v16   ;;  %v251_v27 = vpop.permute.xlu1 %250  ;;  %v4351_v28 = vpop.permute.xlu0 %597 }
  0xf4   : > { %3808 = vset.pattern.permute.xlu1 %v4042_v11 }
  0xf5   : > { %477 = vperm.xlu1 %3808, %v4234_v0  }
  0xf7   : > { %843 = vperm.xlu0 %3852, %v4289_v18  }
  0xf8   : > { %v262_v29 = vpop.permute.xlu1 %261  ;;  %v4356_v30 = vpop.permute.xlu0 %457 }
  0xf9   : > { %481 = vperm.xlu1 %3808, %v4298_v19  }
  0xfb   : > { %3855 = vset.pattern.permute.xlu0 %v7707_v20 }
  0xfc   : > { %356 = vperm.xlu0 %3855, %v4237_v1   ;;  %v4361_v31 = vpop.permute.xlu0 %627 }
  0xfd   : > { %3809 = vset.pattern.permute.xlu1 %v4039_v8  ;;  %v4364_v32 = vpop.permute.xlu1 %268 }
  0xfe   : > { %491 = vperm.xlu1 %3809, %v4298_v19  }
 0x100   : > { %531 = vperm.xlu0 %3855, %v4298_v19  }
 0x101   : > { %v4368_v33 = vpop.permute.xlu0 %487 }
 0x102   : > { %3810 = vset.pattern.permute.xlu1 %v4046_v15  ;;  %v4371_v34 = vpop.permute.xlu1 %279 }
 0x103   : > { %497 = vperm.xlu1 %3810, %v4234_v0  }
 0x104   : > { %859 = vperm.xlu0 %3855, %v4304_v21  }
 0x105   : > { %v4375_v35 = vpop.permute.xlu0 %657 }
 0x106   : > { %v4377_v36 = vpop.permute.xlu1 %283 }
 0x107   : > { %3811 = vset.pattern.permute.xlu1 %v7724_v17 }
 0x108   : > { %3857 = vset.pattern.permute.xlu0 %v7705_v22  ;;  %507 = vperm.xlu1 %3811, %v4234_v0  }
 0x109   : > { %371 = vperm.xlu0 %3857, %v4247_v4  }
 0x10a   : > { %v4383_v37 = vpop.permute.xlu0 %517 }
 0x10b   : > { %v4385_v38 = vpop.permute.xlu1 %294 }
 0x10c   : > { %511 = vperm.xlu1 %3811, %v4298_v19  }
 0x10d   : > { %703 = vperm.xlu0 %3857, %v4283_v16  }
 0x10e   : > { %v4389_v39 = vpop.permute.xlu0 %687 }
 0x110   : > { %3812 = vset.pattern.permute.xlu1 %v7712_v9  ;;  %v4392_v40 = vpop.permute.xlu1 %301 }
 0x111   : > { %873 = vperm.xlu0 %3857, %v4289_v18   ;;  %521 = vperm.xlu1 %3812, %v4298_v19  }
 0x113   : > { %v4396_v41 = vpop.permute.xlu0 %547 }
 0x115   : > { %3860 = vset.pattern.permute.xlu0 %v7648_v23  ;;  %3813 = vset.pattern.permute.xlu1 %v7707_v20  ;;  %v4400_v42 = vpop.permute.xlu1 %312 }
 0x116   : > { %389 = vperm.xlu0 %3860, %v4237_v1   ;;  %527 = vperm.xlu1 %3813, %v4234_v0  }
 0x117   : > { %v4404_v43 = vpop.permute.xlu0 %717 }
 0x119   : > { %v4406_v44 = vpop.permute.xlu1 %316 }
 0x11a   : > { %561 = vperm.xlu0 %3860, %v4298_v19   ;;  %3814 = vset.pattern.permute.xlu1 %v7705_v22 }
 0x11b   : > { %537 = vperm.xlu1 %3814, %v4234_v0  }
 0x11c   : > { %v235_v45 = vpop.permute.xlu0 %234 }
 0x11d   : > { %243 = vst.msk [vmem:[#allocation2 + $0x1] sm:$0xff] %vm242_vm2, %v235_v45 }
 0x11e   : > { %889 = vperm.xlu0 %3860, %v4304_v21   ;;  %v4413_v46 = vpop.permute.xlu1 %327  ;;  %254 = vst.msk [vmem:[#allocation2 + $0x1] sm:$0xff] %vm253_vm3, %v247_v25 }
 0x11f   : > { %541 = vperm.xlu1 %3814, %v4298_v19  }
 0x120   : > { %v240_v47 = vpop.permute.xlu0 %239 }
 0x121   : > { %244 = vst.msk [vmem:[#allocation2 + $0x9] sm:$0xff] %vm242_vm2, %v240_v47 }
 0x122   : > { %255 = vst.msk [vmem:[#allocation2 + $0x9] sm:$0xff] %vm253_vm3, %v251_v27  ;;  %3862 = vset.pattern.permute.xlu0 %v7647_v24 }
 0x123   : > { %404 = vperm.xlu0 %3862, %v4247_v4   ;;  %3815 = vset.pattern.permute.xlu1 %v7694_v12  ;;  %v4422_v48 = vpop.permute.xlu1 %334  ;;  %266 = vst.msk [vmem:[#allocation2 + $0x9] sm:$0xff] %vm264_vm4, %v262_v29 }
 0x124   : > { %551 = vperm.xlu1 %3815, %v4298_v19   ;;  %v582_v49 = vpop.permute.xlu0 %581 }
 0x125   : > { %590 = vst.msk [vmem:[#allocation2 + $0x31] sm:$0xff] %vm242_vm2, %v582_v49 }
 0x127   : > { %733 = vperm.xlu0 %3862, %v4283_v16  }
 0x128   : > { %3816 = vset.pattern.permute.xlu1 %v7648_v23  ;;  %v4429_v50 = vpop.permute.xlu1 %345  ;;  %v753_v51 = vpop.permute.xlu0 %752 }
 0x129   : > { %757 = vst.msk [vmem:[#allocation2 + $0x51] sm:$0xff] %vm242_vm2, %v753_v51  ;;  %557 = vperm.xlu1 %3816, %v4234_v0  }
 0x12b   : > { %903 = vperm.xlu0 %3862, %v4289_v18  }
 0x12c   : > { %v4434_v52 = vpop.permute.xlu1 %349 }
 0x12d   : > { %v258_v53 = vpop.permute.xlu0 %257  ;;  %3817 = vset.pattern.permute.xlu1 %v7647_v24 }
 0x12e   : > { %265 = vst.msk [vmem:[#allocation2 + $0x1] sm:$0xff] %vm264_vm4, %v258_v53  ;;  %567 = vperm.xlu1 %3817, %v4234_v0  }
 0x12f   : > { %276 = vst.msk [vmem:[#allocation2 + $0x1] sm:$0xff] %vm275_vm5, %v4364_v32 }
 0x130   : > { %287 = vst.msk [vmem:[#allocation2 + $0x1] sm:$0xff] %vm286_vm6, %v4371_v34 }
 0x131   : > { %v4443_v54 = vpop.permute.xlu1 %360  ;;  %v442_v55 = vpop.permute.xlu0 %441 }
 0x132   : > { %571 = vperm.xlu1 %3817, %v4298_v19  }
 0x135   : > { %v4446_v56 = vpop.permute.xlu0 %769 }
 0x136   : > { %3818 = vset.pattern.permute.xlu1 %v4044_v13  ;;  %v4449_v57 = vpop.permute.xlu1 %367 }
 0x137   : > { %586 = vperm.xlu1 %3818, %v4244_v3  }
 0x13a   : > { %v273_v58 = vpop.permute.xlu0 %272 }
 0x13b   : > { %277 = vst.msk [vmem:[#allocation2 + $0x9] sm:$0xff] %vm275_vm5, %v273_v58  ;;  %3819 = vset.pattern.permute.xlu1 %v4035_v2  ;;  %v4454_v59 = vpop.permute.xlu1 %378 }
 0x13c   : > { %288 = vst.msk [vmem:[#allocation2 + $0x9] sm:$0xff] %vm286_vm6, %v4377_v36  ;;  %593 = vperm.xlu1 %3819, %v4283_v16  }
 0x13d   : > { %299 = vst.msk [vmem:[#allocation2 + $0x9] sm:$0xff] %vm297_vm7, %v4385_v38 }
 0x13e   : > { %v4461_v60 = vpop.permute.xlu0 %613 }
 0x13f   : > { %v4463_v61 = vpop.permute.xlu1 %382 }
 0x140   : > { %3821 = vset.pattern.permute.xlu1 %v4037_v6 }
 0x141   : > { %603 = vperm.xlu1 %3821, %v4283_v16  }
 0x142   : > { %v4467_v62 = vpop.permute.xlu0 %783 }
 0x144   : > { %v4469_v63 = vpop.permute.xlu1 %393 }
 0x145   : > { %607 = vperm.xlu1 %3821, %v4244_v3  }
 0x147   : > { %v291_v0 = vpop.permute.xlu0 %290 }
 0x148   : > { %298 = vst.msk [vmem:[#allocation2 + $0x1] sm:$0xff] %vm297_vm7, %v291_v0 }
 0x149   : > { %309 = vst.msk [vmem:[#allocation2 + $0x1] sm:$0xff] %vm308_vm8, %v4392_v40  ;;  %3822 = vset.pattern.permute.xlu1 %v4038_v7  ;;  %v4476_v1 = vpop.permute.xlu1 %400 }
 0x14a   : > { %617 = vperm.xlu1 %3822, %v4244_v3   ;;  %320 = vst.msk [vmem:[#allocation2 + $0x1] sm:$0xff] %vm319_vm9, %v4400_v42 }
 0x14b   : > { %v472_v4 = vpop.permute.xlu0 %471 }
 0x14e   : > { %3823 = vset.pattern.permute.xlu1 %v4036_v5  ;;  %v416_v14 = vpop.permute.xlu1 %415 }
 0x14f   : > { %424 = vst.msk [vmem:[#allocation2 + $0x19] sm:$0xff] %vm242_vm2, %v416_v14  ;;  %623 = vperm.xlu1 %3823, %v4283_v16   ;;  %v4484_v19 = vpop.permute.xlu0 %799  ;;  %v7646_v14 = vstv %s4577_s23  ;;  %s4903_s23 = sld [smem:[#allocation7 + $0x7c]] }
 0x150   : > { %434 = vst.msk [vmem:[#allocation2 + $0x19] sm:$0xff] %vm253_vm3, %v4347_v26 }
 0x152   : > { %v421_v25 = vpop.permute.xlu1 %420 }
 0x153   : > { %425 = vst.msk [vmem:[#allocation2 + $0x21] sm:$0xff] %vm242_vm2, %v421_v25  ;;  %3825 = vset.pattern.permute.xlu1 %v4041_v10 }
 0x154   : > { %v306_v27 = vpop.permute.xlu0 %305  ;;  %633 = vperm.xlu1 %3825, %v4283_v16  }
 0x155   : > { %310 = vst.msk [vmem:[#allocation2 + $0x9] sm:$0xff] %vm308_vm8, %v306_v27 }
 0x156   : > { %321 = vst.msk [vmem:[#allocation2 + $0x9] sm:$0xff] %vm319_vm9, %v4406_v44 }
 0x157   : > { %v432_v29 = vpop.permute.xlu1 %431  ;;  %332 = vst.msk [vmem:[#allocation2 + $0x9] sm:$0xff] %vm330_vm10, %v4413_v46 }
 0x158   : > { %435 = vst.msk [vmem:[#allocation2 + $0x21] sm:$0xff] %vm253_vm3, %v432_v29  ;;  %637 = vperm.xlu1 %3825, %v4244_v3   ;;  %v4498_v26 = vpop.permute.xlu0 %643 }
 0x159   : > { %445 = vst.msk [vmem:[#allocation2 + $0x21] sm:$0xff] %vm264_vm4, %v442_v55 }
 0x15c   : > { %3826 = vset.pattern.permute.xlu1 %v4042_v11  ;;  %v438_v32 = vpop.permute.xlu1 %437  ;;  %v4502_v34 = vpop.permute.xlu0 %813 }
 0x15d   : > { %444 = vst.msk [vmem:[#allocation2 + $0x19] sm:$0xff] %vm264_vm4, %v438_v32  ;;  %647 = vperm.xlu1 %3826, %v4244_v3  }
 0x161   : > { %v324_v36 = vpop.permute.xlu0 %323  ;;  %3827 = vset.pattern.permute.xlu1 %v4039_v8  ;;  %v448_v38 = vpop.permute.xlu1 %447 }
 0x162   : > { %331 = vst.msk [vmem:[#allocation2 + $0x1] sm:$0xff] %vm330_vm10, %v324_v36  ;;  %653 = vperm.xlu1 %3827, %v4283_v16   ;;  %v7641_v36 = vstv %s4593_s7  ;;  %s4872_s7 = sld [smem:[#allocation7 + $0x9a]] }
 0x163   : > { %454 = vst.msk [vmem:[#allocation2 + $0x19] sm:$0xff] %vm275_vm5, %v448_v38 }
 0x164   : > { %342 = vst.msk [vmem:[#allocation2 + $0x1] sm:$0xff] %vm341_vm11, %v4422_v48 }
 0x165   : > { %464 = vst.msk [vmem:[#allocation2 + $0x19] sm:$0xff] %vm286_vm6, %v4356_v30  ;;  %v452_v40 = vpop.permute.xlu1 %451  ;;  %v502_v42 = vpop.permute.xlu0 %501 }
 0x166   : > { %353 = vst.msk [vmem:[#allocation2 + $0x1] sm:$0xff] %vm352_vm12, %v4429_v50  ;;  %3829 = vset.pattern.permute.xlu1 %v4046_v15 }
 0x167   : > { %455 = vst.msk [vmem:[#allocation2 + $0x21] sm:$0xff] %vm275_vm5, %v452_v40  ;;  %663 = vperm.xlu1 %3829, %v4283_v16  }
 0x168   : > { %7968 = sst [smem:[#allocation57_spill]] %s4872_s7 }
 0x169   : > { %v4519_v44 = vpop.permute.xlu0 %829 }
 0x16a   : > { %v462_v45 = vpop.permute.xlu1 %461 }
 0x16b   : > { %465 = vst.msk [vmem:[#allocation2 + $0x21] sm:$0xff] %vm286_vm6, %v462_v45  ;;  %667 = vperm.xlu1 %3829, %v4244_v3   ;;  %v7638_v45 = vstv %s4610_s4  ;;  %s4814_s4 = sld [smem:[#allocation7 + $0x18]] }
 0x16c   : > { %475 = vst.msk [vmem:[#allocation2 + $0x21] sm:$0xff] %vm297_vm7, %v472_v4 }
 0x16e   : > { %v339_v30 = vpop.permute.xlu0 %338 }
 0x16f   : > { %343 = vst.msk [vmem:[#allocation2 + $0x9] sm:$0xff] %vm341_vm11, %v339_v30  ;;  %3830 = vset.pattern.permute.xlu1 %v7724_v17  ;;  %v468_v46 = vpop.permute.xlu1 %467  ;;  %v7709_v30 = vstv %s4613_s11 }
 0x170   : > { %354 = vst.msk [vmem:[#allocation2 + $0x9] sm:$0xff] %vm352_vm12, %v4434_v52  ;;  %677 = vperm.xlu1 %3830, %v4244_v3  }
 0x171   : > { %474 = vst.msk [vmem:[#allocation2 + $0x19] sm:$0xff] %vm297_vm7, %v468_v46  ;;  %7958 = sst [smem:[#allocation47_spill]] %s4814_s4 }
 0x172   : > { %365 = vst.msk [vmem:[#allocation2 + $0x9] sm:$0xff] %vm363_vm13, %v4443_v54  ;;  %v4532_v47 = vpop.permute.xlu0 %673 }
 0x174   : > { %3831 = vset.pattern.permute.xlu1 %v7712_v9  ;;  %v478_v48 = vpop.permute.xlu1 %477 }
 0x175   : > { %484 = vst.msk [vmem:[#allocation2 + $0x19] sm:$0xff] %vm308_vm8, %v478_v48  ;;  %683 = vperm.xlu1 %3831, %v4283_v16   ;;  %v7708_v48 = vstv %s4615_s17 }
 0x176   : > { %494 = vst.msk [vmem:[#allocation2 + $0x19] sm:$0xff] %vm319_vm9, %v4368_v33  ;;  %v4539_v49 = vpop.permute.xlu0 %843 }
 0x178   : > { %v482_v50 = vpop.permute.xlu1 %481 }
 0x179   : > { %485 = vst.msk [vmem:[#allocation2 + $0x21] sm:$0xff] %vm308_vm8, %v482_v50  ;;  %3833 = vset.pattern.permute.xlu1 %v7707_v20  ;;  %v7706_v50 = vstv %s4617_s10 }
 0x17a   : > { %693 = vperm.xlu1 %3833, %v4283_v16  }
 0x17b   : > { %v357_v51 = vpop.permute.xlu0 %356 }
 0x17c   : > { %364 = vst.msk [vmem:[#allocation2 + $0x1] sm:$0xff] %vm363_vm13, %v357_v51  ;;  %v7700_v51 = vstv %s4623_s19 }
 0x17d   : > { %375 = vst.msk [vmem:[#allocation2 + $0x1] sm:$0xff] %vm374_vm14, %v4449_v57  ;;  %v492_v52 = vpop.permute.xlu1 %491 }
 0x17e   : > { %495 = vst.msk [vmem:[#allocation2 + $0x21] sm:$0xff] %vm319_vm9, %v492_v52  ;;  %697 = vperm.xlu1 %3833, %v4244_v3  }
 0x17f   : > { %386 = vst.msk [vmem:[#allocation2 + $0x1] sm:$0xff] %vm385_vm15, %v4454_v59  ;;  %v532_v33 = vpop.permute.xlu0 %531 }
 0x180   : > { %505 = vst.msk [vmem:[#allocation2 + $0x21] sm:$0xff] %vm330_vm10, %v502_v42  ;;  %v7639_v42 = vstv %s4608_s28  ;;  %s4828_s28 = sld [smem:[#allocation7 + $0x1d]] }
 0x182   : > { %3834 = vset.pattern.permute.xlu1 %v7705_v22  ;;  %v498_v53 = vpop.permute.xlu1 %497 }
 0x183   : > { %504 = vst.msk [vmem:[#allocation2 + $0x19] sm:$0xff] %vm330_vm10, %v498_v53  ;;  %707 = vperm.xlu1 %3834, %v4244_v3   ;;  %v4555_v54 = vpop.permute.xlu0 %859  ;;  %v7650_v53 = vstv %s4632_s27  ;;  %s4945_s27 = sld [smem:[#allocation7 + $0xb3]] }
 0x186   : > { %7961 = sst [smem:[#allocation50_spill]] %s4828_s28 }
 0x187   : > { %3835 = vset.pattern.permute.xlu1 %v7694_v12  ;;  %v508_v55 = vpop.permute.xlu1 %507 }
 0x188   : > { %514 = vst.msk [vmem:[#allocation2 + $0x19] sm:$0xff] %vm341_vm11, %v508_v55  ;;  %v372_v57 = vpop.permute.xlu0 %371  ;;  %713 = vperm.xlu1 %3835, %v4283_v16   ;;  %v7652_v55 = vstv %s4636_s6  ;;  %s4939_s6 = sld [smem:[#allocation7 + $0xb2]] }
 0x189   : > { %524 = vst.msk [vmem:[#allocation2 + $0x19] sm:$0xff] %vm352_vm12, %v4383_v37  ;;  %7976 = sst [smem:[#allocation65_spill]] %s4945_s27 }
 0x18a   : > { %376 = vst.msk [vmem:[#allocation2 + $0x9] sm:$0xff] %vm374_vm14, %v372_v57 }
 0x18b   : > { %387 = vst.msk [vmem:[#allocation2 + $0x9] sm:$0xff] %vm385_vm15, %v4463_v61  ;;  %v512_v58 = vpop.permute.xlu1 %511 }
 0x18c   : > { %398 = vst.msk [vmem:[#allocation2 + $0x9] sm:$0xff] %vm396_vm0, %v4469_v63  ;;  %3837 = vset.pattern.permute.xlu1 %v7648_v23  ;;  %v4569_v59 = vpop.permute.xlu0 %703 }
 0x18d   : > { %515 = vst.msk [vmem:[#allocation2 + $0x21] sm:$0xff] %vm341_vm11, %v512_v58  ;;  %723 = vperm.xlu1 %3837, %v4283_v16  }
 0x18e   : > { %7974 = sst [smem:[#allocation63_spill]] %s4939_s6 }
 0x190   : > { %v522_v0 = vpop.permute.xlu1 %521  ;;  %v4572_v4 = vpop.permute.xlu0 %873 }
 0x191   : > { %525 = vst.msk [vmem:[#allocation2 + $0x21] sm:$0xff] %vm352_vm12, %v522_v0  ;;  %727 = vperm.xlu1 %3837, %v4244_v3   ;;  %v7640_v0 = vstv %s4647_s1  ;;  %s4809_s1 = sld [smem:[#allocation7 + $0x1c]] }
 0x192   : > { %535 = vst.msk [vmem:[#allocation2 + $0x21] sm:$0xff] %vm363_vm13, %v532_v33  ;;  %v7686_v33 = vstv %s4625_s20 }
 0x195   : > { %v390_v37 = vpop.permute.xlu0 %389  ;;  %3838 = vset.pattern.permute.xlu1 %v7647_v24  ;;  %v528_v61 = vpop.permute.xlu1 %527 }
 0x196   : > { %397 = vst.msk [vmem:[#allocation2 + $0x1] sm:$0xff] %vm396_vm0, %v390_v37  ;;  %737 = vperm.xlu1 %3838, %v4244_v3   ;;  %v7674_v37 = vstv %s4638_s8  ;;  %s4937_s8 = sld [smem:[#allocation7 + $0xaf]] }
 0x197   : > { %534 = vst.msk [vmem:[#allocation2 + $0x19] sm:$0xff] %vm363_vm13, %v528_v61  ;;  %7956 = sst [smem:[#allocation45_spill]] %s4809_s1 }
 0x198   : > { %408 = vst.msk [vmem:[#allocation2 + $0x1] sm:$0xff] %vm407_vm1, %v4476_v1 }
 0x199   : > { %v562_v16 = vpop.permute.xlu0 %561 }
 0x19a   : > { %3839 = vset.pattern.permute.xlu1 %v4044_v13  ;;  %v538_v63 = vpop.permute.xlu1 %537 }
 0x19b   : > { %544 = vst.msk [vmem:[#allocation2 + $0x19] sm:$0xff] %vm374_vm14, %v538_v63  ;;  %747 = vperm.xlu1 %3839, %v4304_v21  }
 0x19c   : > { %554 = vst.msk [vmem:[#allocation2 + $0x19] sm:$0xff] %vm385_vm15, %v4396_v41  ;;  %v7642_v41 = vstv %s4585_s26  ;;  %s4884_s26 = sld [smem:[#allocation7 + $0x9b]]  ;;  %7973 = sst [smem:[#allocation62_spill]] %s4937_s8 }
 0x19d   : > { %v4595_v3 = vpop.permute.xlu0 %889 }
 0x19e   : > { %v542_v25 = vpop.permute.xlu1 %541 }
 0x19f   : > { %v4597_v1 = vld [vmem:[#allocation2] sm:$0xff]  ;;  %545 = vst.msk [vmem:[#allocation2 + $0x21] sm:$0xff] %vm374_vm14, %v542_v25  ;;  %3841 = vset.pattern.permute.xlu1 %v4035_v2  ;;  %v7651_v25 = vstv %s4655_s21 }
 0x1a0   : > { %v936_v13 = vmul.f32 %v7646_v14, %v4597_v1  ;;  %v4604_v27 = vld [vmem:[#allocation2 + $0x1] sm:$0xff]  ;;  %759 = vperm.xlu1 %3841, %v4304_v21   ;;  %v7669_v14 = vstv %s4669_s15  ;;  %s4811_s15 = sld [smem:[#allocation7 + $0x63]] }
 0x1a1   : > { %v956_v32 = vmul.f32 %v7642_v41, %v4604_v27  ;;  %v970_v38 = vmul.f32 %v7641_v36, %v4604_v27  ;;  %v1004_v58 = vmul.f32 %v7638_v45, %v4604_v27 }
 0x1a2   : > { %940 = vrot.lane.b32.xlu0 %v936_v13, %s7627_s30  ;;  %v405_v2 = vpop.permute.xlu0 %404  ;;  %s4640_s30 = sld [smem:[#allocation7 + $0x4d]]  ;;  %v7670_v13 = vstv %s4642_s0  ;;  %s4852_s0 = sld [smem:[#allocation7 + $0x38]]  ;;  %v7728_v9 = vstv %s4884_s26 }
 0x1a3   : > { %409 = vst.msk [vmem:[#allocation2 + $0x9] sm:$0xff] %vm407_vm1, %v405_v2  ;;  %v552_v29 = vpop.permute.xlu1 %551  ;;  %v7658_v2 = vstv %s4649_s2  ;;  %s4839_s2 = sld [smem:[#allocation7 + $0x79]] }
 0x1a4   : > { %555 = vst.msk [vmem:[#allocation2 + $0x21] sm:$0xff] %vm385_vm15, %v552_v29  ;;  %763 = vperm.xlu1 %3841, %v4289_v18  }
 0x1a5   : > { %565 = vst.msk [vmem:[#allocation2 + $0x21] sm:$0xff] %vm396_vm0, %v562_v16 }
 0x1a6   : > { %960 = vrot.lane.b32.xlu0 %v956_v32, %s7629_s29  ;;  %s4653_s29 = sld [smem:[#allocation7 + $0x65]]  ;;  %7957 = sst [smem:[#allocation46_spill]] %s4811_s15 }
 0x1a8   : > { %7942 = sst [smem:[#allocation33_spill]] %s4640_s30  ;;  %3843 = vset.pattern.permute.xlu1 %v4037_v6  ;;  %v558_v40 = vpop.permute.xlu1 %557  ;;  %v990_v6 = vmul.f32 %v7639_v42, %v4604_v27  ;;  %v7654_v61 = vstv %s4640_s30  ;;  %s4882_s30 = sld [smem:[#allocation7 + $0x98]] }
 0x1a9   : > { %564 = vst.msk [vmem:[#allocation2 + $0x19] sm:$0xff] %vm396_vm0, %v558_v40  ;;  %773 = vperm.xlu1 %3843, %v4289_v18   ;;  %v7657_v40 = vstv %s4662_s18  ;;  %s4816_s18 = sld [smem:[#allocation7 + $0x1b]]  ;;  %7964 = sst [smem:[#allocation53_spill]] %s4852_s0 }
 0x1aa   : > { %974 = vrot.lane.b32.xlu0 %v970_v38, %s7947_s14  ;;  %v4676_v52 = vld [vmem:[#allocation2 + $0x8] sm:$0xff]  ;;  %v7649_v38 = vstv %s4660_s13 }
 0x1ab   : > { %v4684_v57 = vld [vmem:[#allocation2 + $0x2] sm:$0xff]  ;;  %v4692_v16 = vld [vmem:[#allocation2 + $0xa] sm:$0xff]  ;;  %v4754_v41 = vmul.f32 %v7650_v53, %v4676_v52  ;;  %v4764_v24 = vmul.f32 %v7652_v55, %v4676_v52 }
 0x1ac   : > { %7946 = sst [smem:[#allocation37_spill]] %s4653_s29  ;;  %v7664_v63 = vstv %s4653_s29  ;;  %v4700_v29 = vld [vmem:[#allocation2 + $0x9] sm:$0xff]  ;;  %v4749_v36 = vmul.f32 %v7649_v38, %v4692_v16  ;;  %v4790_v55 = vmul.f32 %v7657_v40, %v4692_v16  ;;  %s4822_s29 = sld [smem:[#allocation7 + $0x78]] }
 0x1ad   : > { %3844 = vset.pattern.permute.xlu1 %v4038_v7  ;;  %v568_v46 = vpop.permute.xlu1 %567  ;;  %v7684_v7 = vstv %s4630_s22  ;;  %v4723_v45 = vmul.f32 %v7706_v50, %v4700_v29  ;;  %v4728_v42 = vmul.f32 %v7700_v51, %v4700_v29  ;;  %v4769_v23 = vmul.f32 %v7674_v37, %v4700_v29 }
 0x1ae   : > { %994 = vrot.lane.b32.xlu0 %v990_v6, %s7950_s25  ;;  %574 = vst.msk [vmem:[#allocation2 + $0x19] sm:$0xff] %vm407_vm1, %v568_v46  ;;  %779 = vperm.xlu1 %3844, %v4304_v21   ;;  %v4708_v6 = vmul.f32 %v7709_v30, %v4676_v52  ;;  %v4713_v46 = vmul.f32 %v7708_v48, %v4676_v52  ;;  %v7690_v37 = vstv %s4809_s1  ;;  %7969 = sst [smem:[#allocation58_spill]] %s4882_s30  ;;  %v7725_v48 = vstv %s4872_s7  ;;  %s5021_s7 = sld [smem:[#allocation7 + $0x1e]] }
 0x1af   : > { %v4774_v38 = vmul.f32 %v7654_v61, %v4700_v29  ;;  %v4780_v53 = vmul.f32 %v7670_v13, %v4700_v29  ;;  %v4797_v61 = vmul.f32 %v7669_v14, %v4692_v16  ;;  %v1038_v40 = vmul.f32 %v7664_v63, %v4684_v57  ;;  %7959 = sst [smem:[#allocation48_spill]] %s4816_s18  ;;  %s4925_s1 = sld [smem:[#allocation7 + $0x53]] }
 0x1b0   : > { %v7673_v63 = vstv %s4756_s3  ;;  %s4850_s3 = sld [smem:[#allocation7 + $0x37]] }
 0x1b1   : > { %v572_v32 = vpop.permute.xlu1 %571 }
 0x1b2   : > { %1008 = vrot.lane.b32.xlu0 %v1004_v58, %s7947_s14  ;;  %575 = vst.msk [vmem:[#allocation2 + $0x21] sm:$0xff] %vm407_vm1, %v572_v32  ;;  %3846 = vset.pattern.permute.xlu1 %v4036_v5  ;;  %v1024_v58 = vmul.f32 %v7640_v0, %v4684_v57  ;;  %v4733_v32 = vmul.f32 %v7686_v33, %v4700_v29  ;;  %7960 = sst [smem:[#allocation49_spill]] %s4822_s29 }
 0x1b3   : > { %789 = vperm.xlu1 %3846, %v4304_v21   ;;  %v4739_v5 = vmul.f32 %v7684_v7, %v4700_v29  ;;  %v4744_v0 = vmul.f32 %v7651_v25, %v4692_v16  ;;  %v4785_v25 = vmul.f32 %v7658_v2, %v4700_v29  ;;  %v7667_v2 = vstv %s4695_s12  ;;  %s4836_s12 = sld [smem:[#allocation7 + $0x7b]] }
 0x1b4   : > { %v7697_v7 = vstv %s4822_s29  ;;  %s4923_s29 = sld [smem:[#allocation7 + $0x52]] }
 0x1b5   : > { %7972 = sst [smem:[#allocation61_spill]] %s4925_s1 }
 0x1b6   : > { %1028 = vrot.lane.b32.xlu0 %v1024_v58, %s7950_s25  ;;  %v587_v58 = vpop.permute.xlu1 %586  ;;  %7963 = sst [smem:[#allocation52_spill]] %s4850_s3 }
 0x1b7   : > { %591 = vst.msk [vmem:[#allocation2 + $0x39] sm:$0xff] %vm242_vm2, %v587_v58  ;;  %793 = vperm.xlu1 %3846, %v4289_v18  }
 0x1b8   : > { %601 = vst.msk [vmem:[#allocation2 + $0x39] sm:$0xff] %vm253_vm3, %v4351_v28  ;;  %v1058_v28 = vmul.f32 %v7667_v2, %v4597_v1  ;;  %v7675_v2 = vstv %s4792_s16  ;;  %s4862_s16 = sld [smem:[#allocation7 + $0x3a]] }
 0x1b9   : > { %7962 = sst [smem:[#allocation51_spill]] %s4836_s12  ;;  %v4845_v14 = vmul.f32 %v7675_v2, %v4700_v29  ;;  %v7685_v2 = vstv %s4811_s15  ;;  %s4901_s15 = sld [smem:[#allocation7 + $0x7a]]  ;;  %v4920_v12 = vld [vmem:[#allocation2 + $0x21] sm:$0xff] }
 0x1ba   : > { %1042 = vrot.lane.b32.xlu0 %v1038_v40, %s7947_s14  ;;  %v7678_v40 = vstv %s4758_s24  ;;  %s4864_s24 = sld [smem:[#allocation7 + $0x3b]]  ;;  %7971 = sst [smem:[#allocation60_spill]] %s4923_s29  ;;  %v4957_v22 = vld [vmem:[#allocation2 + $0x22] sm:$0xff] }
 0x1bb   : > { %3848 = vset.pattern.permute.xlu1 %v4041_v10  ;;  %v594_v58 = vpop.permute.xlu1 %593  ;;  %v4833_v10 = vmul.f32 %v7673_v63, %v4676_v52  ;;  %v1072_v13 = vmul.f32 %v7678_v40, %v4597_v1  ;;  %v7689_v40 = vstv %s4814_s4  ;;  %s4918_s4 = sld [smem:[#allocation7 + $0x50]] }
 0x1bc   : > { %600 = vst.msk [vmem:[#allocation2 + $0x31] sm:$0xff] %vm253_vm3, %v594_v58  ;;  %803 = vperm.xlu1 %3848, %v4289_v18   ;;  %v7681_v58 = vstv %s4799_s5  ;;  %s4870_s5 = sld [smem:[#allocation7 + $0x97]] }
 0x1be   : > { %1062 = vrot.lane.b32.xlu0 %v1058_v28, %s7950_s25  ;;  %v4857_v28 = vmul.f32 %v7681_v58, %v4700_v29  ;;  %7965 = sst [smem:[#allocation54_spill]] %s4862_s16  ;;  %v7691_v58 = vstv %s4816_s18  ;;  %v7716_v51 = vstv %s4862_s16  ;;  %s4986_s16 = sld [smem:[#allocation7 + $0x69]] }
 0x1bf   : > { %s4916_s18 = sld [smem:[#allocation7 + $0x4f]]  ;;  %v4965_v30 = vmul.f32 %v7716_v51, %v4920_v12 }
 0x1c0   : > { %3849 = vset.pattern.permute.xlu1 %v4042_v11  ;;  %v604_v63 = vpop.permute.xlu1 %603  ;;  %7966 = sst [smem:[#allocation55_spill]] %s4864_s24  ;;  %v4877_v11 = vmul.f32 %v7685_v2, %v4692_v16  ;;  %v4898_v2 = vmul.f32 %v7691_v58, %v4700_v29  ;;  %v7703_v58 = vstv %s4836_s12  ;;  %v7717_v20 = vstv %s4864_s24  ;;  %s4999_s24 = sld [smem:[#allocation7 + $0x7d]] }
 0x1c1   : > { %610 = vst.msk [vmem:[#allocation2 + $0x31] sm:$0xff] %vm264_vm4, %v604_v63  ;;  %809 = vperm.xlu1 %3849, %v4304_v21   ;;  %v4889_v63 = vmul.f32 %v7689_v40, %v4676_v52  ;;  %v4908_v40 = vmul.f32 %v7697_v7, %v4700_v29  ;;  %7970 = sst [smem:[#allocation59_spill]] %s4918_s4  ;;  %v7710_v7 = vstv %s4852_s0  ;;  %s4943_s12 = sld [smem:[#allocation7 + $0xb0]]  ;;  %7979 = vst [vmem:[#allocation68_spill] sm:$0xff] %v4965_v30 }
 0x1c2   : > { %1076 = vrot.lane.b32.xlu0 %v1072_v13, %s7947_s14  ;;  %7967 = sst [smem:[#allocation56_spill]] %s4870_s5  ;;  %620 = vst.msk [vmem:[#allocation2 + $0x31] sm:$0xff] %vm275_vm5, %v4461_v60  ;;  %v1092_v13 = vmul.f32 %v7690_v37, %v4604_v27  ;;  %v7704_v60 = vstv %s4828_s28  ;;  %v4910_v37 = vld [vmem:[#allocation2 + $0x20] sm:$0xff]  ;;  %s4972_s0 = sld [smem:[#allocation7 + $0x6]] }
 0x1c3   : > { %s5001_s28 = sld [smem:[#allocation7 + $0x66]] }
 0x1c4   : > { %v608_v33 = vpop.permute.xlu1 %607  ;;  %7983 = sst [smem:[#allocation72_spill]] %s4986_s16 }
 0x1c5   : > { %611 = vst.msk [vmem:[#allocation2 + $0x39] sm:$0xff] %vm264_vm4, %v608_v33  ;;  %3851 = vset.pattern.permute.xlu1 %v4039_v8  ;;  %v4930_v8 = vmul.f32 %v7703_v58, %v4692_v16  ;;  %v1106_v33 = vmul.f32 %v7704_v60, %v4604_v27  ;;  %v4955_v60 = vmul.f32 %v7710_v7, %v4910_v37  ;;  %v7720_v7 = vstv %s4870_s5  ;;  %s5023_s5 = sld [smem:[#allocation7 + $0x21]] }
 0x1c6   : > { %1096 = vrot.lane.b32.xlu0 %v1092_v13, %s7950_s25  ;;  %819 = vperm.xlu1 %3851, %v4304_v21   ;;  %v7711_v13 = vstv %s4850_s3  ;;  %v7721_v21 = vstv %s4839_s2  ;;  %s4974_s3 = sld [smem:[#allocation7 + $0x9]] }
 0x1c7   : > { %7975 = sst [smem:[#allocation64_spill]] %s4943_s12  ;;  %v4950_v58 = vmul.f32 %v7711_v13, %v4910_v37  ;;  %7978 = vst [vmem:[#allocation67_spill] sm:$0xff] %v4955_v60  ;;  %v7723_v13 = vstv %s4882_s30 }
 0x1c8   : > { %7980 = sst [smem:[#allocation69_spill]] %s4972_s0  ;;  %v4996_v51 = vmul.f32 %v7723_v13, %v4920_v12  ;;  %s5011_s30 = sld [smem:[#allocation7 + $0x81]]  ;;  %v5016_v13 = vmul.f32 %v7728_v9, %v4957_v22  ;;  %v5037_v9 = vld [vmem:[%s4219_s9 + $0x38] sm:$0xff] }
 0x1c9   : > { %7977 = vst [vmem:[#allocation66_spill] sm:$0xff] %v4950_v58  ;;  %v618_v50 = vpop.permute.xlu1 %617 }
 0x1ca   : > { %1110 = vrot.lane.b32.xlu0 %v1106_v33, %s7947_s14  ;;  %621 = vst.msk [vmem:[#allocation2 + $0x39] sm:$0xff] %vm275_vm5, %v618_v50  ;;  %823 = vperm.xlu1 %3851, %v4289_v18   ;;  %v4979_v33 = vmul.f32 %v7717_v20, %v4920_v12  ;;  %v1126_v18 = vmul.f32 %v7721_v21, %v4604_v27  ;;  %7985 = vst [vmem:[#allocation74_spill] sm:$0xff] %v4996_v51  ;;  %v7731_v21 = vstv %s4918_s4  ;;  %s5045_s4 = sld [smem:[#allocation7 + $0x7e]] }
 0x1cb   : > { %631 = vst.msk [vmem:[#allocation2 + $0x39] sm:$0xff] %vm286_vm6, %v4361_v31  ;;  %v4991_v50 = vmul.f32 %v7720_v7, %v4920_v12  ;;  %v5006_v31 = vmul.f32 %v7725_v48, %v4957_v22  ;;  %v7729_v7 = vstv %s4916_s18  ;;  %7988 = vst [vmem:[#allocation77_spill] sm:$0xff] %v5016_v13  ;;  %7989 = sst [smem:[#allocation78_spill]] %s5023_s5  ;;  %v7992_v48 = vstv %s4901_s15 }
 0x1cc   : > { %7981 = sst [smem:[#allocation70_spill]] %s4974_s3  ;;  %7982 = vst [vmem:[#allocation71_spill] sm:$0xff] %v4979_v33  ;;  %v5028_v20 = vmul.f32 %v7729_v7, %v4910_v37  ;;  %v7732_v13 = vstv %s4925_s1  ;;  %s5349_s1 = sld [smem:[#allocation7 + $0x56]] }
 0x1cd   : > { %7984 = vst [vmem:[#allocation73_spill] sm:$0xff] %v4991_v50  ;;  %7986 = vst [vmem:[#allocation75_spill] sm:$0xff] %v5006_v31  ;;  %v5058_v51 = vmul.f32 %v7732_v13, %v4920_v12  ;;  %v7998_v31 = vstv %s4939_s6  ;;  %v7735_v50 = vstv %s5001_s28  ;;  %s8072_s6 = sld [smem:[#allocation42_spill]] }
 0x1ce   : > { %1130 = vrot.lane.b32.xlu0 %v1126_v18, %s7950_s25  ;;  %7987 = sst [smem:[#allocation76_spill]] %s5011_s30  ;;  %3853 = vset.pattern.permute.xlu1 %v4046_v15  ;;  %v624_v17 = vpop.permute.xlu1 %623  ;;  %7990 = vst [vmem:[#allocation79_spill] sm:$0xff] %v5028_v20  ;;  %v5033_v15 = vmul.f32 %v7731_v21, %v4910_v37  ;;  %v1140_v18 = vmul.f32 %v7992_v48, %v4604_v27  ;;  %v7993_v21 = vstv %s4923_s29  ;;  %v7734_v20 = vstv %s4943_s12  ;;  %s8073_s12 = sld [smem:[#allocation46_spill]] }
 0x1cf   : > { %630 = vst.msk [vmem:[#allocation2 + $0x31] sm:$0xff] %vm286_vm6, %v624_v17  ;;  %833 = vperm.xlu1 %3853, %v5037_v9   ;;  %v7733_v17 = vstv %s4937_s8  ;;  %7995 = vst [vmem:[#allocation82_spill] sm:$0xff] %v5058_v51  ;;  %v5076_v13 = vmul.f32 %v7998_v31, %v4957_v22  ;;  %v8000_v51 = vmov 9   ;;  %s5347_s8 = sld [smem:[#allocation7 + $0x55]]  ;;  %s5363_s29 = sld [smem:[#allocation7 + $0x59]] }
 0x1d0   : > { %7991 = vst [vmem:[#allocation80_spill] sm:$0xff] %v5033_v15  ;;  %v5050_v15 = vmul.f32 %v7993_v21, %v4920_v12  ;;  %v5064_v48 = vmul.f32 %v7733_v17, %v4920_v12  ;;  %v5069_v21 = vmul.f32 %v7734_v20, %v4920_v12  ;;  %v8001_v17 = vstv %s4903_s23 }
 0x1d1   : > { %7999 = vst [vmem:[#allocation85_spill] sm:$0xff] %v5076_v13  ;;  %v8002_v20 = vstv %s4945_s27  ;;  %v8005_v13 = vstv %s4974_s3  ;;  %s5331_s27 = sld [smem:[#allocation7 + $0xa0]]  ;;  %s5333_s3 = sld [smem:[#allocation7 + $0xa1]] }
 0x1d2   : > { %7994 = vst [vmem:[#allocation81_spill] sm:$0xff] %v5050_v15  ;;  %1144 = vrot.lane.b32.xlu0 %v1140_v18, %s7947_s14  ;;  %7996 = vst [vmem:[#allocation83_spill] sm:$0xff] %v5064_v48  ;;  %v1160_v48 = vmul.f32 %v8001_v17, %v4684_v57  ;;  %v5086_v7 = vmul.f32 %v8002_v20, %v4957_v22  ;;  %v8004_v15 = vstv %s4972_s0  ;;  %v7736_v17 = vstv %s5023_s5  ;;  %s5312_s5 = sld [smem:[#allocation7 + $0x3e]]  ;;  %s5338_s0 = sld [smem:[#allocation7 + $0x9d]] }
 0x1d3   : > { %7997 = vst [vmem:[#allocation84_spill] sm:$0xff] %v5069_v21  ;;  %3854 = vset.pattern.permute.xlu1 %v8000_v51  ;;  %v634_v18 = vpop.permute.xlu1 %633  ;;  %v5091_v31 = vmul.f32 %v8004_v15, %v4910_v37  ;;  %v5095_v51 = vld [vmem:[%s4219_s9 + $0x30] sm:$0xff]  ;;  %v5103_v20 = vmul.f32 %v8005_v13, %v4920_v12  ;;  %v8007_v21 = vstv %s4986_s16  ;;  %v8011_v15 = vmov 10   ;;  %s8024_s9 = sld [smem:[#allocation30_spill]]  ;;  %s5319_s16 = sld [smem:[#allocation7 + $0x41]] }
 0x1d4   : > { %8003 = vst [vmem:[#allocation86_spill] sm:$0xff] %v5086_v7  ;;  %640 = vst.msk [vmem:[#allocation2 + $0x31] sm:$0xff] %vm297_vm7, %v634_v18  ;;  %839 = vperm.xlu1 %3854, %v5095_v51   ;;  %v5112_v18 = vmul.f32 %v7735_v50, %v4920_v12  ;;  %v7737_v7 = vstv %s5021_s7  ;;  %v5119_v33 = vmul.f32 %v8007_v21, %v4957_v22 }
 0x1d5   : > { %8006 = vst [vmem:[#allocation87_spill] sm:$0xff] %v5103_v20  ;;  %650 = vst.msk [vmem:[#allocation2 + $0x31] sm:$0xff] %vm308_vm8, %v4498_v26  ;;  %v8009_v20 = vstv %s4999_s24  ;;  %v7751_v26 = vstv %s5045_s4  ;;  %v5133_v50 = vmul.f32 %v7736_v17, %v4920_v12 }
 0x1d6   : > { %1164 = vrot.lane.b32.xlu0 %v1160_v48, %s7950_s25  ;;  %8008 = vst [vmem:[#allocation88_spill] sm:$0xff] %v5119_v33  ;;  %v1174_v30 = vmul.f32 %v8009_v20, %v4684_v57  ;;  %v5128_v48 = vmul.f32 %v7737_v7, %v4910_v37  ;;  %v5140_v21 = vmul.f32 %v7751_v26, %v4920_v12  ;;  %v8013_v20 = vstv %s5011_s30  ;;  %s5310_s30 = sld [smem:[#allocation7 + $0x3d]] }
 0x1d7   : > { %v638_v13 = vpop.permute.xlu1 %637  ;;  %8010 = vst [vmem:[#allocation89_spill] sm:$0xff] %v5133_v50  ;;  %v5145_v33 = vmul.f32 %v8013_v20, %v4957_v22  ;;  %v8015_v37 = vstv %s4613_s11  ;;  %v8016_v12 = vstv %s4615_s17  ;;  %v8020_v20 = vstv %s4623_s19  ;;  %s3399_s11 = sld [smem:[#allocation7 + $0x1]]  ;;  %s8027_s17 = sld [smem:[#allocation31_spill]] }
 0x1d8   : > { %641 = vst.msk [vmem:[#allocation2 + $0x39] sm:$0xff] %vm297_vm7, %v638_v13  ;;  %3856 = vset.pattern.permute.xlu1 %v8011_v15  ;;  %8012 = vst [vmem:[#allocation90_spill] sm:$0xff] %v5140_v21  ;;  %v1194_v17 = vmul.f32 %v8015_v37, %v4597_v1  ;;  %v1208_v22 = vmul.f32 %v8016_v12, %v4597_v1  ;;  %v8017_v15 = vmov 11   ;;  %v1242_v37 = vmul.f32 %v8020_v20, %v4604_v27  ;;  %s8034_s19 = sld [smem:[#allocation33_spill]] }
 0x1d9   : > { %8014 = vst [vmem:[#allocation91_spill] sm:$0xff] %v5145_v33  ;;  %849 = vperm.xlu1 %3856, %v5095_v51   ;;  %v8026_v20 = vmov 14   ;;  %8065 = sst [smem:[#allocation33_spill]] %s5312_s5  ;;  %v7763_v60 = vstv %s5319_s16 }
 0x1da   : > { %1178 = vrot.lane.b32.xlu0 %v1174_v30, %s7947_s14 }
 0x1dc   : > { %v648_v7 = vpop.permute.xlu1 %647 }
 0x1dd   : > { %651 = vst.msk [vmem:[#allocation2 + $0x39] sm:$0xff] %vm308_vm8, %v648_v7  ;;  %853 = vperm.xlu1 %3856, %v5037_v9   ;;  %v8018_v7 = vstv %s4617_s10  ;;  %s8031_s10 = sld [smem:[#allocation25_spill]] }
 0x1de   : > { %1198 = vrot.lane.b32.xlu0 %v1194_v17, %s7950_s25  ;;  %661 = vst.msk [vmem:[#allocation2 + $0x39] sm:$0xff] %vm319_vm9, %v4375_v35  ;;  %v1228_v13 = vmul.f32 %v8018_v7, %v4604_v27  ;;  %v8019_v35 = vmov 12  }
 0x1e1   : > { %3858 = vset.pattern.permute.xlu1 %v8017_v15  ;;  %v654_v30 = vpop.permute.xlu1 %653  ;;  %v8022_v15 = vstv %s4625_s20  ;;  %s8036_s20 = sld [smem:[#allocation27_spill]] }
 0x1e2   : > { %1212 = vrot.lane.b32.xlu0 %v1208_v22, %s7947_s14  ;;  %660 = vst.msk [vmem:[#allocation2 + $0x31] sm:$0xff] %vm319_vm9, %v654_v30  ;;  %863 = vperm.xlu1 %3858, %v5037_v9   ;;  %v8021_v22 = vmov 13   ;;  %v1262_v30 = vmul.f32 %v8022_v15, %v4604_v27 }
 0x1e6   : > { %1232 = vrot.lane.b32.xlu0 %v1228_v13, %s7950_s25  ;;  %3859 = vset.pattern.permute.xlu1 %v8019_v35  ;;  %v664_v17 = vpop.permute.xlu1 %663  ;;  %v8023_v13 = vstv %s4630_s22  ;;  %s8037_s22 = sld [smem:[#allocation34_spill]] }
 0x1e7   : > { %670 = vst.msk [vmem:[#allocation2 + $0x31] sm:$0xff] %vm330_vm10, %v664_v17  ;;  %869 = vperm.xlu1 %3859, %v5095_v51   ;;  %v1276_v35 = vmul.f32 %v8023_v13, %v4604_v27  ;;  %8067 = sst [smem:[#allocation34_spill]] %s5319_s16 }
 0x1e8   : > { %680 = vst.msk [vmem:[#allocation2 + $0x31] sm:$0xff] %vm341_vm11, %v4532_v47  ;;  %v8025_v47 = vstv %s4655_s21  ;;  %s8030_s21 = sld [smem:[#allocation32_spill]]  ;;  %s8170_s16 = sld [smem:[#allocation58_spill]] }
 0x1e9   : > { %v1296_v17 = vmul.f32 %v8025_v47, %v4684_v57 }
 0x1ea   : > { %1246 = vrot.lane.b32.xlu0 %v1242_v37, %s7947_s14  ;;  %v668_v12 = vpop.permute.xlu1 %667 }
 0x1eb   : > { %671 = vst.msk [vmem:[#allocation2 + $0x39] sm:$0xff] %vm330_vm10, %v668_v12  ;;  %3861 = vset.pattern.permute.xlu1 %v8021_v22  ;;  %v8028_v12 = vstv %s4660_s13  ;;  %v8029_v22 = vmov 15   ;;  %s8033_s13 = sld [smem:[#allocation26_spill]] }
 0x1ec   : > { %879 = vperm.xlu1 %3861, %v5095_v51   ;;  %8064 = sst [smem:[#allocation26_spill]] %s5310_s30 }
 0x1ee   : > { %1266 = vrot.lane.b32.xlu0 %v1262_v30, %s7950_s25  ;;  %v921_v30 = vstv %s3399_s11  ;;  %s8042_s11 = sld [smem:[#allocation28_spill]] }
 0x1ef   : > { %v678_v7 = vpop.permute.xlu1 %677  ;;  %v922_v13 = vmul.f32 %v921_v30, %v4597_v1  ;;  %8071 = sst [smem:[#allocation28_spill]] %s5333_s3 }
 0x1f0   : > { %681 = vst.msk [vmem:[#allocation2 + $0x39] sm:$0xff] %vm341_vm11, %v678_v7  ;;  %883 = vperm.xlu1 %3861, %v5037_v9  }
 0x1f1   : > { %691 = vst.msk [vmem:[#allocation2 + $0x39] sm:$0xff] %vm352_vm12, %v4389_v39  ;;  %v1310_v39 = vmul.f32 %v8028_v12, %v4684_v57  ;;  %v8039_v12 = vstv %s8031_s10  ;;  %s8050_s10 = sld [smem:[#allocation39_spill]] }
 0x1f2   : > { %1280 = vrot.lane.b32.xlu0 %v1276_v35, %s7947_s14  ;;  %8077 = sst [smem:[#allocation39_spill]] %s5347_s8 }
 0x1f4   : > { %3863 = vset.pattern.permute.xlu1 %v8026_v20  ;;  %v684_v37 = vpop.permute.xlu1 %683  ;;  %v8038_v20 = vstv %s8030_s21  ;;  %s8047_s21 = sld [smem:[#allocation29_spill]] }
 0x1f5   : > { %690 = vst.msk [vmem:[#allocation2 + $0x31] sm:$0xff] %vm352_vm12, %v684_v37  ;;  %893 = vperm.xlu1 %3863, %v5037_v9   ;;  %v8032_v9 = vstv %s8024_s9  ;;  %v1364_v37 = vmul.f32 %v8038_v20, %v4604_v27  ;;  %s8041_s9 = sld [smem:[#allocation36_spill]] }
 0x1f6   : > { %1300 = vrot.lane.b32.xlu0 %v1296_v17, %s7950_s25  ;;  %v1330_v7 = vmul.f32 %v8032_v9, %v4597_v1  ;;  %v923_v17 = vmul.f32 %v921_v30, %v4676_v52  ;;  %v8043_v9 = vstv %s8034_s19  ;;  %s5259_s19 = sld [smem:[#allocation7 + $0x7]]  ;;  %8070 = sst [smem:[#allocation36_spill]] %s5331_s27 }
 0x1f9   : > { %3864 = vset.pattern.permute.xlu1 %v8029_v22  ;;  %v694_v15 = vpop.permute.xlu1 %693  ;;  %v8040_v22 = vstv %s8033_s13  ;;  %s8051_s13 = sld [smem:[#allocation35_spill]] }
 0x1fa   : > { %1314 = vrot.lane.b32.xlu0 %v1310_v39, %s7947_s14  ;;  %700 = vst.msk [vmem:[#allocation2 + $0x31] sm:$0xff] %vm363_vm13, %v694_v15  ;;  %899 = vperm.xlu1 %3864, %v5095_v51   ;;  %v8035_v51 = vstv %s8027_s17  ;;  %v937_v39 = vmul.f32 %v8039_v12, %v4676_v52  ;;  %v957_v15 = vmul.f32 %v8040_v22, %v4700_v29  ;;  %s8046_s17 = sld [smem:[#allocation38_spill]]  ;;  %v8049_v12 = vstv %s8042_s11  ;;  %s5298_s11 = sld [smem:[#allocation7 + $0xb]] }
 0x1fb   : > { %710 = vst.msk [vmem:[#allocation2 + $0x31] sm:$0xff] %vm374_vm14, %v4569_v59  ;;  %v1344_v47 = vmul.f32 %v8035_v51, %v4597_v1  ;;  %v8045_v51 = vstv %s8037_s22  ;;  %v8048_v20 = vstv %s8041_s9  ;;  %s8056_s22 = sld [smem:[#allocation37_spill]]  ;;  %s5288_s9 = sld [smem:[#allocation7 + $0xa]] }
 0x1fc   : > { %8052 = sst [smem:[#allocation30_spill]] %s5259_s19 }
 0x1fd   : > { %v698_v35 = vpop.permute.xlu1 %697  ;;  %8074 = sst [smem:[#allocation38_spill]] %s5338_s0 }
 0x1fe   : > { %1334 = vrot.lane.b32.xlu0 %v1330_v7, %s7950_s25  ;;  %701 = vst.msk [vmem:[#allocation2 + $0x39] sm:$0xff] %vm363_vm13, %v698_v35  ;;  %926 = vrot.lane.b32.xlu1 %v922_v13, %s7950_s25  ;;  %v1378_v7 = vmul.f32 %v8043_v9, %v4604_v27  ;;  %v734_v13 = vpop.permute.xlu0 %733  ;;  %8078 = sst [smem:[#allocation35_spill]] %s5349_s1 }
 0x201   : > { %8059 = sst [smem:[#allocation32_spill]] %s5288_s9 }
 0x202   : > { %1348 = vrot.lane.b32.xlu0 %v1344_v47, %s7947_s14  ;;  %v708_v59 = vpop.permute.xlu1 %707  ;;  %928 = vrot.lane.b32.xlu1 %v923_v17, %s7950_s25  ;;  %v1398_v47 = vmul.f32 %v8045_v51, %v4604_v27  ;;  %v8057_v51 = vstv %s8050_s10  ;;  %s5304_s10 = sld [smem:[#allocation7 + $0x67]] }
 0x203   : > { %711 = vst.msk [vmem:[#allocation2 + $0x39] sm:$0xff] %vm374_vm14, %v708_v59  ;;  %v5251_v59 = vpop.permute.xlu0 %903 }
 0x204   : > { %721 = vst.msk [vmem:[#allocation2 + $0x39] sm:$0xff] %vm385_vm15, %v4404_v43  ;;  %v8044_v43 = vstv %s8036_s20  ;;  %s5272_s20 = sld [smem:[#allocation7 + $0x8]] }
 0x205   : > { %v971_v35 = vmul.f32 %v8044_v43, %v4700_v29 }
 0x206   : > { %1368 = vrot.lane.b32.xlu0 %v1364_v37, %s7950_s25  ;;  %942 = vrot.lane.b32.xlu1 %v937_v39, %s7947_s14  ;;  %v1412_v37 = vmul.f32 %v8048_v20, %v4604_v27  ;;  %v991_v39 = vmul.f32 %v8049_v12, %v4700_v29  ;;  %v8058_v20 = vstv %s8051_s13  ;;  %v7747_v12 = vstv %s5259_s19  ;;  %s5307_s13 = sld [smem:[#allocation7 + $0x68]] }
 0x207   : > { %v714_v30 = vpop.permute.xlu1 %713  ;;  %s5372_s19 = sld [smem:[#allocation7 + $0xb8]] }
 0x208   : > { %720 = vst.msk [vmem:[#allocation2 + $0x31] sm:$0xff] %vm385_vm15, %v714_v30  ;;  %v8053_v30 = vstv %s8046_s17  ;;  %s8061_s17 = sld [smem:[#allocation44_spill]]  ;;  %8063 = sst [smem:[#allocation25_spill]] %s5304_s10  ;;  %v8090_v33 = vstv %s5304_s10 }
 0x209   : > { %v1432_v9 = vmul.f32 %v8053_v30, %v4684_v57  ;;  %8083 = sst [smem:[#allocation44_spill]] %s5363_s29  ;;  %s5416_s10 = sld [smem:[#allocation7 + $0xc]] }
 0x20a   : > { %1382 = vrot.lane.b32.xlu0 %v1378_v7, %s7947_s14  ;;  %962 = vrot.lane.b32.xlu1 %v957_v15, %s7950_s25  ;;  %v8054_v7 = vstv %s8047_s21  ;;  %8055 = sst [smem:[#allocation31_spill]] %s5272_s20  ;;  %s8062_s21 = sld [smem:[#allocation40_spill]] }
 0x20c   : > { %v724_v17 = vpop.permute.xlu1 %723 }
 0x20d   : > { %730 = vst.msk [vmem:[#allocation2 + $0x31] sm:$0xff] %vm396_vm0, %v724_v17  ;;  %v5282_v17 = vld [vmem:[#allocation2 + $0x18] sm:$0xff]  ;;  %8086 = sst [smem:[#allocation42_spill]] %s5372_s19 }
 0x20e   : > { %1402 = vrot.lane.b32.xlu0 %v1398_v47, %s7950_s25  ;;  %740 = vst.msk [vmem:[#allocation2 + $0x31] sm:$0xff] %vm407_vm1, %v734_v13  ;;  %976 = vrot.lane.b32.xlu1 %v971_v35, %s7947_s14  ;;  %v1005_v13 = vmul.f32 %v8054_v7, %v4700_v29  ;;  %v1446_v47 = vmul.f32 %v8057_v51, %v4684_v57 }
 0x20f   : > { %v1472_v30 = vmul.f32 %v7747_v12, %v5282_v17  ;;  %v7756_v12 = vstv %s5298_s11  ;;  %8093 = sst [smem:[#allocation93_spill]] %s5416_s10 }
 0x210   : > { %v728_v22 = vpop.permute.xlu1 %727 }
 0x211   : > { %731 = vst.msk [vmem:[#allocation2 + $0x39] sm:$0xff] %vm396_vm0, %v728_v22 }
 0x212   : > { %1416 = vrot.lane.b32.xlu0 %v1412_v37, %s7947_s14  ;;  %996 = vrot.lane.b32.xlu1 %v991_v39, %s7950_s25  ;;  %v1025_v37 = vmul.f32 %v8058_v20, %v4692_v16  ;;  %v5321_v20 = vld [vmem:[#allocation2 + $0x19] sm:$0xff] }
 0x214   : > { %v5264_v15 = vpop.permute.xlu0 %940 }
 0x215   : > { %v738_v43 = vpop.permute.xlu1 %737 }
 0x216   : > { %1436 = vrot.lane.b32.xlu0 %v1432_v9, %s7950_s25  ;;  %741 = vst.msk [vmem:[#allocation2 + $0x39] sm:$0xff] %vm407_vm1, %v738_v43  ;;  %1010 = vrot.lane.b32.xlu1 %v1005_v13, %s7947_s14  ;;  %v8060_v9 = vstv %s8056_s22  ;;  %v7746_v13 = vstv %s5272_s20  ;;  %s5317_s22 = sld [smem:[#allocation7 + $0x40]]  ;;  %s8079_s20 = sld [smem:[#allocation50_spill]] }
 0x217   : > { %v1039_v7 = vmul.f32 %v8060_v9, %v4692_v16 }
 0x218   : > { %v5277_v35 = vpop.permute.xlu0 %960 }
 0x21a   : > { %1450 = vrot.lane.b32.xlu0 %v1446_v47, %s7947_s14  ;;  %v748_v39 = vpop.permute.xlu1 %747  ;;  %1030 = vrot.lane.b32.xlu1 %v1025_v37, %s7950_s25  ;;  %v1486_v47 = vmul.f32 %v7746_v13, %v5282_v17  ;;  %v8068_v37 = vstv %s8061_s17  ;;  %s5340_s17 = sld [smem:[#allocation7 + $0x9e]] }
 0x21b   : > { %756 = vst.msk [vmem:[#allocation2 + $0x49] sm:$0xff] %vm242_vm2, %v748_v39  ;;  %v984_v39 = vmul.f32 %v8068_v37, %v4604_v27  ;;  %vm3114_vm2 = vcmask 253952  }
 0x21c   : > { %v5293_v22 = vpop.permute.xlu0 %974  ;;  %8066 = sst [smem:[#allocation27_spill]] %s5317_s22  ;;  %v8094_v21 = vstv %s5317_s22  ;;  %s5434_s22 = sld [smem:[#allocation7 + $0xf]] }
 0x21e   : > { %1476 = vrot.lane.b32.xlu0 %v1472_v30, %s7950_s25  ;;  %1044 = vrot.lane.b32.xlu1 %v1039_v7, %s7947_s14  ;;  %v8069_v30 = vstv %s8062_s21  ;;  %v7752_v7 = vstv %s5288_s9  ;;  %s8076_s21 = sld [smem:[#allocation45_spill]]  ;;  %s5361_s9 = sld [smem:[#allocation7 + $0x58]] }
 0x21f   : > { %v760_v43 = vpop.permute.xlu1 %759  ;;  %v1059_v9 = vmul.f32 %v8069_v30, %v4676_v52  ;;  %v1506_v13 = vmul.f32 %v7752_v7, %v5321_v20 }
 0x220   : > { %v995_v51 = vpop.permute.xlu0 %994  ;;  %766 = vst.msk [vmem:[#allocation2 + $0x49] sm:$0xff] %vm253_vm3, %v760_v43  ;;  %8075 = sst [smem:[#allocation29_spill]] %s5340_s17 }
 0x221   : > { %776 = vst.msk [vmem:[#allocation2 + $0x49] sm:$0xff] %vm264_vm4, %v4446_v56  ;;  %v1000_v43 = vadd.f32 %v995_v51, %v984_v39  ;;  %v5351_v56 = vld [vmem:[#allocation2 + $0x38] sm:$0xff] }
 0x222   : > { %1490 = vrot.lane.b32.xlu0 %v1486_v47, %s7947_s14  ;;  %1064 = vrot.lane.b32.xlu1 %v1059_v9, %s7950_s25  ;;  %v8080_v47 = vstv %s8072_s6  ;;  %v8081_v9 = vstv %s8073_s12  ;;  %s5370_s6 = sld [smem:[#allocation7 + $0xb5]]  ;;  %s5384_s12 = sld [smem:[#allocation7 + $0xb6]] }
 0x223   : > { %v764_v37 = vpop.permute.xlu1 %763  ;;  %v1073_v39 = vmul.f32 %v8080_v47, %v4676_v52  ;;  %v1018_v26 = vmul.f32 %v8081_v9, %v4684_v57  ;;  %v5374_v52 = vld [vmem:[#allocation2 + $0x39] sm:$0xff]  ;;  %v8087_v9 = vstv %s8079_s20  ;;  %s5400_s20 = sld [smem:[#allocation7 + $0x6a]]  ;;  %8098 = sst [smem:[#allocation96_spill]] %s5434_s22 }
 0x224   : > { %v1009_v30 = vpop.permute.xlu0 %1008  ;;  %767 = vst.msk [vmem:[#allocation2 + $0x51] sm:$0xff] %vm253_vm3, %v764_v37  ;;  %8082 = sst [smem:[#allocation37_spill]] %s5361_s9  ;;  %v8084_v37 = vstv %s8076_s21  ;;  %s5386_s21 = sld [smem:[#allocation7 + $0xb9]]  ;;  %v5421_v58 = vmul.f32 %v8094_v21, %v5374_v52  ;;  %vm3117_vm3 = vcmask 254977  }
 0x225   : > { %v1014_v51 = vadd.f32 %v1009_v30, %v1000_v43  ;;  %v1093_v43 = vmul.f32 %v8084_v37, %v4700_v29  ;;  %v1107_v37 = vmul.f32 %v8087_v9, %v4700_v29  ;;  %v7758_v30 = vstv %s5310_s30  ;;  %v5398_v9 = vld [vmem:[#allocation2 + $0x3a] sm:$0xff]  ;;  %s5412_s30 = sld [smem:[#allocation7 + $0x6b]] }
 0x226   : > { %1510 = vrot.lane.b32.xlu0 %v1506_v13, %s7950_s25  ;;  %1078 = vrot.lane.b32.xlu1 %v1073_v39, %s7947_s14  ;;  %v1520_v13 = vmul.f32 %v7756_v12, %v5321_v20  ;;  %v1540_v39 = vmul.f32 %v8090_v33, %v5321_v20  ;;  %v5396_v12 = vmul.f32 %v7758_v30, %v5351_v56  ;;  %v7764_v30 = vstv %s5338_s0  ;;  %s5466_s0 = sld [smem:[#allocation7 + $0x87]] }
 0x227   : > { %v1020_v47 = vadd.f32 %v1018_v26, %v1014_v51  ;;  %v7760_v26 = vstv %s5312_s5  ;;  %8095 = vst [vmem:[#allocation94_spill] sm:$0xff] %v5421_v58  ;;  %s5436_s5 = sld [smem:[#allocation7 + $0x6f]]  ;;  %v5441_v21 = vmul.f32 %v7764_v30, %v5374_v52  ;;  %v8106_v30 = vstv %s5333_s3  ;;  %s8111_s3 = sld [smem:[#allocation47_spill]] }
 0x228   : > { %8085 = sst [smem:[#allocation40_spill]] %s5370_s6  ;;  %v1029_v7 = vpop.permute.xlu0 %1028  ;;  %v774_v50 = vpop.permute.xlu1 %773  ;;  %v5408_v33 = vmul.f32 %v7760_v26, %v5351_v56  ;;  %v5426_v26 = vmul.f32 %v7763_v60, %v5374_v52 }
 0x229   : > { %8088 = sst [smem:[#allocation46_spill]] %s5384_s12  ;;  %777 = vst.msk [vmem:[#allocation2 + $0x51] sm:$0xff] %vm264_vm4, %v774_v50  ;;  %v1034_v50 = vadd.f32 %v1029_v7, %v1020_v47  ;;  %8100 = vst [vmem:[#allocation98_spill] sm:$0xff] %v5441_v21  ;;  %v8101_v7 = vstv %s5340_s17  ;;  %v5460_v21 = vmul.f32 %v8106_v30, %v5398_v9  ;;  %s5464_s17 = sld [smem:[#allocation7 + $0x24]]  ;;  %v5514_v30 = vld [vmem:[#allocation2 + $0x1a] sm:$0xff]  ;;  %vm3120_vm4 = vcmask 256002  }
 0x22a   : > { %8089 = sst [smem:[#allocation45_spill]] %s5386_s21  ;;  %8091 = vst [vmem:[#allocation92_spill] sm:$0xff] %v5408_v33  ;;  %1524 = vrot.lane.b32.xlu0 %v1520_v13, %s7947_s14  ;;  %8096 = vst [vmem:[#allocation95_spill] sm:$0xff] %v5426_v26  ;;  %1098 = vrot.lane.b32.xlu1 %v1093_v43, %s7950_s25  ;;  %v8097_v13 = vstv %s5001_s28  ;;  %v5446_v47 = vmul.f32 %v8101_v7, %v5374_v52  ;;  %v7769_v43 = vstv %s5347_s8  ;;  %s5450_s28 = sld [smem:[#allocation7 + $0x6c]] }
 0x22b   : > { %8092 = sst [smem:[#allocation50_spill]] %s5412_s30  ;;  %787 = vst.msk [vmem:[#allocation2 + $0x51] sm:$0xff] %vm275_vm5, %v4467_v62  ;;  %v1534_v51 = vmul.f32 %v8097_v13, %v5321_v20  ;;  %v8104_v13 = vstv %s5331_s27  ;;  %8107 = vst [vmem:[#allocation102_spill] sm:$0xff] %v5460_v21  ;;  %v7772_v7 = vstv %s5361_s9  ;;  %v5471_v60 = vmul.f32 %v7769_v43, %v5351_v56  ;;  %s5476_s27 = sld [smem:[#allocation7 + $0x27]] }
 0x22c   : > { %8102 = vst [vmem:[#allocation99_spill] sm:$0xff] %v5446_v47  ;;  %v1043_v62 = vpop.permute.xlu0 %1042  ;;  %v5455_v26 = vmul.f32 %v8104_v13, %v5398_v9  ;;  %8109 = sst [smem:[#allocation104_spill]] %s5466_s0  ;;  %v5486_v43 = vmul.f32 %v7772_v7, %v5374_v52  ;;  %s8116_s8 = sld [smem:[#allocation48_spill]] }
 0x22d   : > { %8099 = sst [smem:[#allocation97_spill]] %s5436_s5  ;;  %v1048_v58 = vadd.f32 %v1043_v62, %v1034_v50  ;;  %8110 = vst [vmem:[#allocation105_spill] sm:$0xff] %v5471_v60  ;;  %v780_v13 = vpop.permute.xlu1 %779  ;;  %v8113_v62 = vstv %s5349_s1  ;;  %v7774_v50 = vstv %s5384_s12  ;;  %s5494_s1 = sld [smem:[#allocation7 + $0x84]]  ;;  %v8124_v60 = vstv %s8111_s3 }
 0x22e   : > { %8105 = vst [vmem:[#allocation101_spill] sm:$0xff] %v5455_v26  ;;  %1544 = vrot.lane.b32.xlu0 %v1540_v39, %s7950_s25  ;;  %v5481_v47 = vmul.f32 %v8113_v62, %v5351_v56  ;;  %8115 = vst [vmem:[#allocation107_spill] sm:$0xff] %v5486_v43  ;;  %1112 = vrot.lane.b32.xlu1 %v1107_v37, %s7947_s14  ;;  %v8118_v62 = vstv %s5363_s29  ;;  %v8121_v37 = vstv %s5370_s6  ;;  %s5523_s6 = sld [smem:[#allocation7 + $0x1f]]  ;;  %s5610_s3 = sld [smem:[#allocation7 + $0x22]] }
 0x22f   : > { %8108 = sst [smem:[#allocation103_spill]] %s5464_s17  ;;  %786 = vst.msk [vmem:[#allocation2 + $0x49] sm:$0xff] %vm275_vm5, %v780_v13  ;;  %v5490_v39 = vadd.f32 %v1534_v51, %v1048_v58  ;;  %v8120_v13 = vstv %s5307_s13  ;;  %v5507_v58 = vmul.f32 %v8121_v37, %v5374_v52  ;;  %v5512_v51 = vmul.f32 %v7774_v50, %v5374_v52  ;;  %s8161_s12 = sld [smem:[#allocation54_spill]] }
 0x230   : > { %8103 = sst [smem:[#allocation100_spill]] %s5450_s28  ;;  %8114 = vst [vmem:[#allocation106_spill] sm:$0xff] %v5481_v47  ;;  %v5499_v47 = vmul.f32 %v8118_v62, %v5374_v52  ;;  %v1063_v7 = vpop.permute.xlu0 %1062  ;;  %v1554_v43 = vmul.f32 %v8120_v13, %v5321_v20  ;;  %v1052_v62 = vmul.f32 %v8124_v60, %v4597_v1  ;;  %v8127_v37 = vstv %s5372_s19  ;;  %s8159_s19 = sld [smem:[#allocation53_spill]] }
 0x231   : > { %8112 = sst [smem:[#allocation47_spill]] %s5476_s27  ;;  %8122 = vst [vmem:[#allocation109_spill] sm:$0xff] %v5507_v58  ;;  %8123 = vst [vmem:[#allocation110_spill] sm:$0xff] %v5512_v51  ;;  %v5528_v58 = vmul.f32 %v8127_v37, %v5398_v9  ;;  %v7775_v60 = vstv %s5416_s10  ;;  %v7776_v37 = vstv %s5434_s22  ;;  %s5728_s22 = sld [smem:[#allocation7 + $0x93]]  ;;  %vm3123_vm5 = vcmask 257027  }
 0x232   : > { %8119 = vst [vmem:[#allocation108_spill] sm:$0xff] %v5499_v47  ;;  %v8125_v47 = vstv %s4839_s2  ;;  %1558 = vrot.lane.b32.xlu0 %v1554_v43, %s7947_s14  ;;  %v8128_v50 = vstv %s8116_s8  ;;  %v1068_v26 = vadd.f32 %v1063_v7, %v1052_v62  ;;  %v790_v33 = vpop.permute.xlu1 %789  ;;  %v8131_v62 = vstv %s4901_s15  ;;  %s5564_s2 = sld [smem:[#allocation7 + $0x20]]  ;;  %s8141_s15 = sld [smem:[#allocation49_spill]] }
 0x233   : > { %8117 = sst [smem:[#allocation48_spill]] %s5494_s1  ;;  %v1127_v21 = vmul.f32 %v8125_v47, %v4700_v29  ;;  %v1086_v51 = vmul.f32 %v8128_v50, %v4604_v27  ;;  %v8129_v47 = vstv %s5386_s21  ;;  %v5547_v27 = vmul.f32 %v7775_v60, %v5351_v56  ;;  %796 = vst.msk [vmem:[#allocation2 + $0x49] sm:$0xff] %vm286_vm6, %v790_v33  ;;  %s8145_s8 = sld [smem:[#allocation51_spill]] }
 0x234   : > { %8126 = sst [smem:[#allocation111_spill]] %s5523_s6  ;;  %v5539_v13 = vmul.f32 %v8129_v47, %v5398_v9  ;;  %v1077_v50 = vpop.permute.xlu0 %1076  ;;  %v8130_v47 = vstv %s5400_s20  ;;  %v1141_v1 = vmul.f32 %v8131_v62, %v4700_v29  ;;  %v5560_v43 = vmul.f32 %v7776_v37, %v5374_v52  ;;  %806 = vst.msk [vmem:[#allocation2 + $0x49] sm:$0xff] %vm297_vm7, %v4484_v19  ;;  %s5719_s21 = sld [smem:[#allocation7 + $0x90]] }
 0x235   : > { %1132 = vrot.lane.b32.xlu1 %v1127_v21, %s7950_s25  ;;  %v1574_v7 = vmul.f32 %v8130_v47, %v5514_v30  ;;  %v7777_v21 = vstv %s5450_s28  ;;  %v1082_v60 = vadd.f32 %v1077_v50, %v1068_v26  ;;  %v7779_v33 = vstv %s5464_s17  ;;  %8140 = sst [smem:[#allocation116_spill]] %s5610_s3  ;;  %s8192_s17 = sld [smem:[#allocation60_spill]] }
 0x236   : > { %8132 = vst [vmem:[#allocation112_spill] sm:$0xff] %v5560_v43  ;;  %v5571_v29 = vmul.f32 %v7777_v21, %v5374_v52  ;;  %v7778_v62 = vstv %s5476_s27  ;;  %v8134_v37 = vstv %s5436_s5  ;;  %v5583_v26 = vmul.f32 %v7779_v33, %v5351_v56  ;;  %v794_v50 = vpop.permute.xlu1 %793  ;;  %s5681_s27 = sld [smem:[#allocation7 + $0x83]]  ;;  %s8156_s5 = sld [smem:[#allocation52_spill]] }
 0x237   : > { %1578 = vrot.lane.b32.xlu0 %v1574_v7, %s7950_s25  ;;  %v5578_v19 = vmul.f32 %v8134_v37, %v5398_v9  ;;  %v1088_v47 = vadd.f32 %v1086_v51, %v1082_v60  ;;  %v7780_v43 = vstv %s5494_s1  ;;  %v5590_v21 = vmul.f32 %v7778_v62, %v5374_v52  ;;  %797 = vst.msk [vmem:[#allocation2 + $0x51] sm:$0xff] %vm286_vm6, %v794_v50  ;;  %8158 = sst [smem:[#allocation123_spill]] %s5728_s22  ;;  %s8164_s29 = sld [smem:[#allocation55_spill]] }
 0x238   : > { %8133 = sst [smem:[#allocation113_spill]] %s5564_s2  ;;  %v1097_v7 = vpop.permute.xlu0 %1096  ;;  %v8136_v37 = vstv %s5412_s30  ;;  %v5599_v56 = vmul.f32 %v7780_v43, %v5374_v52  ;;  %v8137_v51 = vstv %s5466_s0  ;;  %v8139_v60 = vstv %s4903_s23  ;;  %s5622_s23 = sld [smem:[#allocation7 + $0x23]] }
 0x239   : > { %8135 = vst [vmem:[#allocation114_spill] sm:$0xff] %v5578_v19  ;;  %1146 = vrot.lane.b32.xlu1 %v1141_v1, %s7947_s14  ;;  %v1588_v19 = vmul.f32 %v8136_v37, %v5514_v30  ;;  %v5604_v1 = vmul.f32 %v8137_v51, %v5398_v9  ;;  %v1161_v62 = vmul.f32 %v8139_v60, %v4692_v16  ;;  %v7837_v33 = vstv %s5523_s6  ;;  %s5672_s0 = sld [smem:[#allocation7 + $0x33]]  ;;  %s5772_s9 = sld [smem:[#allocation7 + $0x48]] }
 0x23a   : > { %v1102_v50 = vadd.f32 %v1097_v7, %v1088_v47  ;;  %v1608_v43 = vmul.f32 %v7837_v33, %v5282_v17  ;;  %v8142_v51 = vstv %s4999_s24  ;;  %v8144_v47 = vstv %s5021_s7  ;;  %s5642_s24 = sld [smem:[#allocation7 + $0x7f]]  ;;  %s5655_s7 = sld [smem:[#allocation7 + $0x80]] }
 0x23b   : > { %8138 = vst [vmem:[#allocation115_spill] sm:$0xff] %v5604_v1  ;;  %1592 = vrot.lane.b32.xlu0 %v1588_v19, %s7947_s14  ;;  %v804_v37 = vpop.permute.xlu1 %803  ;;  %v1175_v60 = vmul.f32 %v8142_v51, %v4692_v16  ;;  %v7781_v1 = vstv %s5564_s2  ;;  %v1602_v19 = vmul.f32 %v8144_v47, %v5282_v17  ;;  %8157 = sst [smem:[#allocation52_spill]] %s5719_s21  ;;  %s8186_s1 = sld [smem:[#allocation43_spill]]  ;;  %vm3126_vm6 = vcmask 258052  }
 0x23c   : > { %v1111_v52 = vpop.permute.xlu0 %1110  ;;  %807 = vst.msk [vmem:[#allocation2 + $0x51] sm:$0xff] %vm297_vm7, %v804_v37  ;;  %v1622_v16 = vmul.f32 %v7781_v1, %v5282_v17  ;;  %v8146_v37 = vstv %s8141_s15  ;;  %s5658_s15 = sld [smem:[#allocation7 + $0x30]]  ;;  %8153 = sst [smem:[#allocation121_spill]] %s5681_s27  ;;  %vm3129_vm7 = vcmask 259077  }
 0x23d   : > { %1166 = vrot.lane.b32.xlu1 %v1161_v62, %s7950_s25  ;;  %v1116_v9 = vadd.f32 %v1111_v52, %v1102_v50  ;;  %817 = vst.msk [vmem:[#allocation2 + $0x51] sm:$0xff] %vm308_vm8, %v4502_v34  ;;  %v5636_v50 = vld [vmem:[#allocation2 + $0x1] sm:$0xff]  ;;  %v7836_v34 = vstv %s5610_s3  ;;  %s5891_s28 = sld [smem:[#allocation7 + $0x5b]]  ;;  %s5909_s3 = sld [smem:[#allocation7 + $0xa4]] }
 0x23e   : > { %8143 = sst [smem:[#allocation49_spill]] %s5622_s23  ;;  %v1120_v52 = vmul.f32 %v5636_v50, %v8146_v37  ;;  %v7833_v1 = vstv %s5622_s23  ;;  %s5893_s23 = sld [smem:[#allocation7 + $0xbb]] }
 0x23f   : > { %1612 = vrot.lane.b32.xlu0 %v1608_v43, %s7950_s25  ;;  %v5631_v62 = vadd.f32 %v1602_v19, %v1116_v9  ;;  %v8148_v19 = vstv %s8145_s8  ;;  %s5669_s8 = sld [smem:[#allocation7 + $0x82]]  ;;  %8152 = sst [smem:[#allocation120_spill]] %s5672_s0 }
 0x240   : > { %v1131_v7 = vpop.permute.xlu0 %1130  ;;  %v810_v51 = vpop.permute.xlu1 %809  ;;  %8147 = sst [smem:[#allocation51_spill]] %s5642_s24  ;;  %v1154_v37 = vmul.f32 %v8148_v19, %v4684_v57  ;;  %s8212_s2 = sld [smem:[#allocation25_spill]] }
 0x241   : > { %1180 = vrot.lane.b32.xlu1 %v1175_v60, %s7947_s14  ;;  %816 = vst.msk [vmem:[#allocation2 + $0x49] sm:$0xff] %vm308_vm8, %v810_v51  ;;  %v1136_v43 = vadd.f32 %v1131_v7, %v1120_v52  ;;  %v1642_v60 = vmul.f32 %v7836_v34, %v5321_v20  ;;  %8149 = sst [smem:[#allocation117_spill]] %s5655_s7  ;;  %v1656_v7 = vmul.f32 %v7833_v1, %v5321_v20  ;;  %s5920_s6 = sld [smem:[#allocation7 + $0xbc]]  ;;  %vm3132_vm8 = vcmask 260102  }
 0x242   : > { %8150 = sst [smem:[#allocation118_spill]] %s5658_s15  ;;  %s6032_s10 = sld [smem:[#allocation7 + $0x75]] }
 0x243   : > { %1626 = vrot.lane.b32.xlu0 %v1622_v16, %s7947_s14  ;;  %v7832_v16 = vstv %s5642_s24  ;;  %8167 = sst [smem:[#allocation54_spill]] %s5772_s9  ;;  %s8197_s24 = sld [smem:[#allocation61_spill]] }
 0x244   : > { %v1145_v9 = vpop.permute.xlu0 %1144  ;;  %8200 = sst [smem:[#allocation61_spill]] %s5893_s23  ;;  %s6034_s30 = sld [smem:[#allocation7 + $0x2a]] }
 0x245   : > { %1200 = vrot.lane.b32.xlu1 %v4708_v6, %s7950_s25  ;;  %v1150_v47 = vadd.f32 %v1145_v9, %v1136_v43  ;;  %v820_v51 = vpop.permute.xlu1 %819  ;;  %8151 = sst [smem:[#allocation119_spill]] %s5669_s8  ;;  %v1676_v43 = vmul.f32 %v7832_v16, %v5321_v20 }
 0x246   : > { %826 = vst.msk [vmem:[#allocation2 + $0x49] sm:$0xff] %vm319_vm9, %v820_v51 }
 0x247   : > { %1646 = vrot.lane.b32.xlu0 %v1642_v60, %s7950_s25  ;;  %v1156_v6 = vadd.f32 %v1154_v37, %v1150_v47  ;;  %836 = vst.msk [vmem:[#allocation2 + $0x49] sm:$0xff] %vm330_vm10, %v4519_v44  ;;  %v7831_v60 = vstv %s5655_s7  ;;  %v8154_v47 = vstv %s5045_s4  ;;  %v7828_v37 = vstv %s5658_s15  ;;  %s5706_s4 = sld [smem:[#allocation7 + $0x36]]  ;;  %s5879_s7 = sld [smem:[#allocation7 + $0xa3]] }
 0x248   : > { %v1165_v57 = vpop.permute.xlu0 %1164  ;;  %v1670_v19 = vmul.f32 %v8154_v47, %v5321_v20  ;;  %s5867_s15 = sld [smem:[#allocation7 + $0x8e]]  ;;  %8238 = sst [smem:[#allocation134_spill]] %s6032_s10 }
 0x249   : > { %1214 = vrot.lane.b32.xlu1 %v4713_v46, %s7947_s14  ;;  %v824_v52 = vpop.permute.xlu1 %823  ;;  %v1170_v46 = vadd.f32 %v1165_v57, %v1156_v6  ;;  %v1690_v57 = vmul.f32 %v7831_v60, %v5321_v20 }
 0x24a   : > { %827 = vst.msk [vmem:[#allocation2 + $0x51] sm:$0xff] %vm319_vm9, %v824_v52  ;;  %vm3135_vm9 = vcmask 261127  }
 0x24b   : > { %1660 = vrot.lane.b32.xlu0 %v1656_v7, %s7947_s14  ;;  %v5698_v7 = vld [vmem:[#allocation2] sm:$0xff] }
 0x24c   : > { %v1179_v44 = vpop.permute.xlu0 %1178  ;;  %v1188_v52 = vmul.f32 %v5698_v7, %v7828_v37 }
 0x24d   : > { %1234 = vrot.lane.b32.xlu1 %v4723_v45, %s7950_s25  ;;  %v1184_v9 = vadd.f32 %v1179_v44, %v1170_v46  ;;  %v7827_v46 = vstv %s5672_s0  ;;  %8155 = sst [smem:[#allocation122_spill]] %s5706_s4  ;;  %s5860_s0 = sld [smem:[#allocation7 + $0x8b]] }
 0x24e   : > { %v834_v51 = vpop.permute.xlu1 %833  ;;  %8190 = sst [smem:[#allocation127_spill]] %s5867_s15 }
 0x24f   : > { %1680 = vrot.lane.b32.xlu0 %v1676_v43, %s7950_s25  ;;  %v5690_v45 = vadd.f32 %v1670_v19, %v1184_v9  ;;  %837 = vst.msk [vmem:[#allocation2 + $0x51] sm:$0xff] %vm330_vm10, %v834_v51  ;;  %v1222_v19 = vmul.f32 %v5636_v50, %v7827_v46  ;;  %v7829_v51 = vstv %s5681_s27  ;;  %s8193_s27 = sld [smem:[#allocation31_spill]]  ;;  %8195 = sst [smem:[#allocation60_spill]] %s5879_s7 }
 0x250   : > { %v1199_v6 = vpop.permute.xlu0 %1198  ;;  %847 = vst.msk [vmem:[#allocation2 + $0x51] sm:$0xff] %vm341_vm11, %v4539_v49  ;;  %8199 = sst [smem:[#allocation31_spill]] %s5891_s28 }
 0x251   : > { %1248 = vrot.lane.b32.xlu1 %v4728_v42, %s7947_s14  ;;  %v7830_v42 = vstv %s5669_s8  ;;  %v1204_v44 = vadd.f32 %v1199_v6, %v1188_v52  ;;  %s5877_s8 = sld [smem:[#allocation7 + $0x43]] }
 0x252   : > { %v1710_v49 = vmul.f32 %v7830_v42, %v5514_v30 }
 0x253   : > { %1694 = vrot.lane.b32.xlu0 %v1690_v57, %s7947_s14  ;;  %v840_v43 = vpop.permute.xlu1 %839  ;;  %v1724_v57 = vmul.f32 %v7829_v51, %v5514_v30  ;;  %8187 = sst [smem:[#allocation43_spill]] %s5860_s0  ;;  %v7843_v60 = vstv %s5860_s0  ;;  %s8345_s0 = sld [smem:[#allocation34_spill]] }
 0x254   : > { %v1213_v9 = vpop.permute.xlu0 %1212  ;;  %846 = vst.msk [vmem:[#allocation2 + $0x49] sm:$0xff] %vm341_vm11, %v840_v43 }
 0x255   : > { %1268 = vrot.lane.b32.xlu1 %v4733_v32, %s7950_s25  ;;  %v1218_v47 = vadd.f32 %v1213_v9, %v1204_v44  ;;  %v7821_v44 = vstv %s5706_s4  ;;  %v8160_v9 = vstv %s8156_s5  ;;  %s5756_s5 = sld [smem:[#allocation7 + $0x96]]  ;;  %s5858_s4 = sld [smem:[#allocation7 + $0x2c]] }
 0x257   : > { %1714 = vrot.lane.b32.xlu0 %v1710_v49, %s7950_s25  ;;  %v1224_v32 = vadd.f32 %v1222_v19, %v1218_v47  ;;  %v1744_v49 = vmul.f32 %v8160_v9, %v5282_v17  ;;  %v7819_v9 = vstv %s5728_s22  ;;  %s5834_s22 = sld [smem:[#allocation7 + $0x2f]] }
 0x258   : > { %v1233_v6 = vpop.permute.xlu0 %1232  ;;  %v850_v52 = vpop.permute.xlu1 %849 }
 0x259   : > { %1282 = vrot.lane.b32.xlu1 %v4739_v5, %s7947_s14  ;;  %856 = vst.msk [vmem:[#allocation2 + $0x49] sm:$0xff] %vm352_vm12, %v850_v52  ;;  %v1238_v43 = vadd.f32 %v1233_v6, %v1224_v32  ;;  %v7820_v32 = vstv %s5719_s21  ;;  %v8162_v6 = vstv %s8159_s19  ;;  %s8166_s19 = sld [smem:[#allocation56_spill]]  ;;  %s5839_s21 = sld [smem:[#allocation7 + $0xd]] }
 0x25a   : > { %866 = vst.msk [vmem:[#allocation2 + $0x49] sm:$0xff] %vm363_vm13, %v4555_v54  ;;  %v1758_v52 = vmul.f32 %v8162_v6, %v5282_v17  ;;  %v5766_v6 = vld [vmem:[#allocation2 + $0x2] sm:$0xff] }
 0x25b   : > { %1728 = vrot.lane.b32.xlu0 %v1724_v57, %s7947_s14  ;;  %v1738_v57 = vmul.f32 %v7821_v44, %v5282_v17  ;;  %8163 = sst [smem:[#allocation53_spill]] %s5756_s5 }
 0x25c   : > { %v1247_v5 = vpop.permute.xlu0 %1246  ;;  %v854_v19 = vpop.permute.xlu1 %853 }
 0x25d   : > { %1302 = vrot.lane.b32.xlu1 %v4744_v0, %s7950_s25  ;;  %v1252_v47 = vadd.f32 %v1247_v5, %v1238_v43  ;;  %857 = vst.msk [vmem:[#allocation2 + $0x51] sm:$0xff] %vm352_vm12, %v854_v19  ;;  %v1256_v43 = vmul.f32 %v5636_v50, %v7820_v32  ;;  %8181 = sst [smem:[#allocation125_spill]] %s5834_s22 }
 0x25f   : > { %1748 = vrot.lane.b32.xlu0 %v1744_v49, %s7950_s25  ;;  %v5746_v54 = vadd.f32 %v1738_v57, %v1252_v47  ;;  %v8165_v47 = vstv %s8161_s12  ;;  %s5781_s12 = sld [smem:[#allocation7 + $0x4b]] }
 0x260   : > { %v1267_v0 = vpop.permute.xlu0 %1266  ;;  %v1778_v19 = vmul.f32 %v8165_v47, %v5321_v20 }
 0x261   : > { %1316 = vrot.lane.b32.xlu1 %v4749_v36, %s7947_s14  ;;  %v864_v5 = vpop.permute.xlu1 %863  ;;  %v1272_v49 = vadd.f32 %v1267_v0, %v1256_v43  ;;  %v1290_v0 = vmul.f32 %v5766_v6, %v7819_v9  ;;  %v8168_v43 = vstv %s8164_s29  ;;  %s8172_s29 = sld [smem:[#allocation57_spill]] }
 0x262   : > { %867 = vst.msk [vmem:[#allocation2 + $0x51] sm:$0xff] %vm363_vm13, %v864_v5  ;;  %v1792_v5 = vmul.f32 %v8168_v43, %v5321_v20 }
 0x263   : > { %1762 = vrot.lane.b32.xlu0 %v1758_v52, %s7947_s14  ;;  %877 = vst.msk [vmem:[#allocation2 + $0x51] sm:$0xff] %vm374_vm14, %v4572_v4 }
 0x264   : > { %v1281_v36 = vpop.permute.xlu0 %1280 }
 0x265   : > { %1336 = vrot.lane.b32.xlu1 %v4754_v41, %s7950_s25  ;;  %v1286_v57 = vadd.f32 %v1281_v36, %v1272_v49  ;;  %8169 = sst [smem:[#allocation55_spill]] %s5781_s12  ;;  %v7817_v49 = vstv %s5756_s5  ;;  %s5826_s5 = sld [smem:[#allocation7 + $0xae]] }
 0x266   : > { %v870_v41 = vpop.permute.xlu1 %869 }
 0x267   : > { %1782 = vrot.lane.b32.xlu0 %v1778_v19, %s7950_s25  ;;  %v1292_v4 = vadd.f32 %v1290_v0, %v1286_v57  ;;  %876 = vst.msk [vmem:[#allocation2 + $0x49] sm:$0xff] %vm374_vm14, %v870_v41  ;;  %v8171_v19 = vstv %s8166_s19  ;;  %v1806_v41 = vmul.f32 %v7817_v49, %v5321_v20  ;;  %s5810_s19 = sld [smem:[#allocation7 + $0x4e]] }
 0x268   : > { %v1301_v52 = vpop.permute.xlu0 %1300  ;;  %v1812_v57 = vmul.f32 %v8171_v19, %v5321_v20  ;;  %v8175_v19 = vstv %s8172_s29  ;;  %s8179_s29 = sld [smem:[#allocation41_spill]] }
 0x269   : > { %1350 = vrot.lane.b32.xlu1 %v4764_v24, %s7947_s14  ;;  %v1306_v36 = vadd.f32 %v1301_v52, %v1292_v4 }
 0x26b   : > { %1796 = vrot.lane.b32.xlu0 %v1792_v5, %s7947_s14  ;;  %v880_v24 = vpop.permute.xlu1 %879  ;;  %v8173_v5 = vstv %s8170_s16  ;;  %s5820_s16 = sld [smem:[#allocation7 + $0xa8]] }
 0x26c   : > { %v1315_v47 = vpop.permute.xlu0 %1314  ;;  %886 = vst.msk [vmem:[#allocation2 + $0x49] sm:$0xff] %vm385_vm15, %v880_v24  ;;  %v7810_v24 = vstv %s5781_s12  ;;  %8178 = sst [smem:[#allocation124_spill]] %s5826_s5  ;;  %s5832_s12 = sld [smem:[#allocation7 + $0x2e]] }
 0x26d   : > { %1370 = vrot.lane.b32.xlu1 %v4769_v23, %s7950_s25  ;;  %v1320_v0 = vadd.f32 %v1315_v47, %v1306_v36  ;;  %896 = vst.msk [vmem:[#allocation2 + $0x49] sm:$0xff] %vm396_vm0, %v4595_v3  ;;  %v7812_v23 = vstv %s5772_s9  ;;  %v1826_v36 = vmul.f32 %v8173_v5, %v5321_v20  ;;  %8174 = sst [smem:[#allocation56_spill]] %s5810_s19  ;;  %s5824_s9 = sld [smem:[#allocation7 + $0xab]]  ;;  %v8182_v5 = vstv %s4884_s26 }
 0x26e   : > { %v1324_v3 = vmul.f32 %v5698_v7, %v7812_v23  ;;  %s5849_s26 = sld [smem:[#allocation7 + $0x2b]]  ;;  %v8203_v23 = vstv %s8193_s27  ;;  %s8210_s27 = sld [smem:[#allocation64_spill]] }
 0x26f   : > { %1816 = vrot.lane.b32.xlu0 %v1812_v57, %s7950_s25  ;;  %v5799_v4 = vadd.f32 %v1806_v41, %v1320_v0  ;;  %v884_v52 = vpop.permute.xlu1 %883  ;;  %v1846_v57 = vmul.f32 %v8175_v19, %v5514_v30  ;;  %8213 = sst [smem:[#allocation64_spill]] %s5920_s6 }
 0x270   : > { %v1335_v43 = vpop.permute.xlu0 %1334  ;;  %887 = vst.msk [vmem:[#allocation2 + $0x51] sm:$0xff] %vm385_vm15, %v884_v52  ;;  %v1358_v52 = vmul.f32 %v5636_v50, %v7810_v24 }
 0x271   : > { %1384 = vrot.lane.b32.xlu1 %v4774_v38, %s7947_s14  ;;  %v1340_v47 = vadd.f32 %v1335_v43, %v1324_v3  ;;  %8176 = sst [smem:[#allocation58_spill]] %s5820_s16 }
 0x272   : > { %8180 = sst [smem:[#allocation41_spill]] %s5832_s12 }
 0x273   : > { %1830 = vrot.lane.b32.xlu0 %v1826_v36, %s7947_s14  ;;  %8177 = sst [smem:[#allocation57_spill]] %s5824_s9  ;;  %v1860_v36 = vmul.f32 %v8182_v5, %v5514_v30  ;;  %v7838_v5 = vstv %s5826_s5  ;;  %s6046_s5 = sld [smem:[#allocation7 + $0x2d]] }
 0x274   : > { %v1349_v38 = vpop.permute.xlu0 %1348  ;;  %v894_v41 = vpop.permute.xlu1 %893  ;;  %8184 = sst [smem:[#allocation126_spill]] %s5849_s26 }
 0x275   : > { %1404 = vrot.lane.b32.xlu1 %v4780_v53, %s7950_s25  ;;  %v1354_v0 = vadd.f32 %v1349_v38, %v1340_v47  ;;  %897 = vst.msk [vmem:[#allocation2 + $0x51] sm:$0xff] %vm396_vm0, %v894_v41  ;;  %v8183_v38 = vstv %s4916_s18  ;;  %s8188_s18 = sld [smem:[#allocation59_spill]] }
 0x276   : > { %907 = vst.msk [vmem:[#allocation2 + $0x51] sm:$0xff] %vm407_vm1, %v5251_v59  ;;  %v7809_v59 = vstv %s5810_s19  ;;  %v1880_v19 = vmul.f32 %v8183_v38, %v5282_v17  ;;  %s8191_s19 = sld [smem:[#allocation30_spill]]  ;;  %v8196_v38 = vstv %s8186_s1  ;;  %s8204_s1 = sld [smem:[#allocation32_spill]] }
 0x277   : > { %1850 = vrot.lane.b32.xlu0 %v1846_v57, %s7950_s25  ;;  %v1360_v53 = vadd.f32 %v1358_v52, %v1354_v0  ;;  %v8185_v0 = vstv %s8179_s29  ;;  %v7811_v52 = vstv %s5820_s16  ;;  %s5865_s29 = sld [smem:[#allocation7 + $0x8c]]  ;;  %8194 = sst [smem:[#allocation30_spill]] %s5877_s8 }
 0x278   : > { %v1369_v43 = vpop.permute.xlu0 %1368  ;;  %v916_v41 = vmul.f32 %v5698_v7, %v8185_v0  ;;  %v1392_v0 = vmul.f32 %v5636_v50, %v7811_v52  ;;  %s5907_s16 = sld [smem:[#allocation7 + $0x44]] }
 0x279   : > { %1418 = vrot.lane.b32.xlu1 %v4785_v25, %s7947_s14  ;;  %v900_v3 = vpop.permute.xlu1 %899  ;;  %v1374_v25 = vadd.f32 %v1369_v43, %v1360_v53  ;;  %v1874_v53 = vmul.f32 %v7809_v59, %v5282_v17  ;;  %v7818_v43 = vstv %s5824_s9  ;;  %v5896_v59 = vld [vmem:[#allocation2 + $0x20] sm:$0xff]  ;;  %s5945_s9 = sld [smem:[#allocation7 + $0xa6]]  ;;  %8239 = sst [smem:[#allocation135_spill]] %s6046_s5 }
 0x27a   : > { %906 = vst.msk [vmem:[#allocation2 + $0x49] sm:$0xff] %vm407_vm1, %v900_v3 }
 0x27b   : > { %1864 = vrot.lane.b32.xlu0 %v1860_v36, %s7947_s14 }
 0x27c   : > { %v1383_v47 = vpop.permute.xlu0 %1382 }
 0x27d   : > { %1438 = vrot.lane.b32.xlu1 %v4790_v55, %s7950_s25  ;;  %v1388_v57 = vadd.f32 %v1383_v47, %v1374_v25  ;;  %v927_v55 = vpop.permute.xlu1 %926  ;;  %8189 = sst [smem:[#allocation59_spill]] %s5865_s29  ;;  %v5869_v7 = vld [vmem:[#allocation2 + $0x51] sm:$0xff]  ;;  %v7826_v25 = vstv %s5832_s12  ;;  %v7824_v47 = vstv %s5834_s22  ;;  %s5943_s12 = sld [smem:[#allocation7 + $0x46]]  ;;  %v7844_v16 = vstv %s5865_s29 }
 0x27e   : > { %v932_v36 = vadd.f32 %v927_v55, %v916_v41  ;;  %8206 = sst [smem:[#allocation32_spill]] %s5907_s16  ;;  %s8220_s22 = sld [smem:[#allocation70_spill]] }
 0x27f   : > { %1884 = vrot.lane.b32.xlu0 %v1880_v19, %s7950_s25  ;;  %v5873_v3 = vadd.f32 %v1874_v53, %v1388_v57  ;;  %v950_v19 = vmul.f32 %v5636_v50, %v8196_v38  ;;  %v8201_v38 = vstv %s8191_s19  ;;  %v8202_v50 = vstv %s8192_s17  ;;  %s8209_s17 = sld [smem:[#allocation69_spill]]  ;;  %s5918_s19 = sld [smem:[#allocation7 + $0x5c]] }
 0x280   : > { %v1403_v41 = vpop.permute.xlu0 %1402  ;;  %v946_v55 = vadd.f32 %v5264_v15, %v932_v36  ;;  %v1473_v24 = vmul.f32 %v5896_v59, %v8201_v38  ;;  %v1914_v52 = vmul.f32 %v8202_v50, %v5321_v20  ;;  %v1426_v36 = vmul.f32 %v5766_v6, %v7818_v43  ;;  %s8335_s29 = sld [smem:[#allocation33_spill]] }
 0x281   : > { %1452 = vrot.lane.b32.xlu1 %v4797_v61, %s7947_s14  ;;  %v8198_v61 = vstv %s8188_s18  ;;  %s8205_s18 = sld [smem:[#allocation62_spill]]  ;;  %v929_v15 = vpop.permute.xlu1 %928  ;;  %v8208_v38 = vstv %s8197_s24  ;;  %v1408_v6 = vadd.f32 %v1403_v41, %v1392_v0  ;;  %s8214_s24 = sld [smem:[#allocation63_spill]]  ;;  %v8215_v43 = vstv %s8204_s1 }
 0x282   : > { %v1894_v57 = vmul.f32 %v8198_v61, %v5282_v17  ;;  %v1487_v61 = vmul.f32 %v5896_v59, %v8203_v23  ;;  %8207 = sst [smem:[#allocation62_spill]] %s5909_s3  ;;  %v1928_v50 = vmul.f32 %v8208_v38, %v5321_v20  ;;  %v5925_v23 = vmul.f32 %v7826_v25, %v5869_v7  ;;  %v5933_v38 = vld [vmem:[#allocation2 + $0x21] sm:$0xff]  ;;  %s8222_s1 = sld [smem:[#allocation65_spill]] }
 0x283   : > { %v952_v49 = vadd.f32 %v950_v19, %v946_v55  ;;  %v1507_v9 = vmul.f32 %v5933_v38, %v8215_v43  ;;  %8217 = sst [smem:[#allocation25_spill]] %s5943_s12  ;;  %v8219_v19 = vstv %s5298_s11  ;;  %v8223_v43 = vstv %s8210_s27  ;;  %s5967_s11 = sld [smem:[#allocation7 + $0xbe]] }
 0x284   : > { %1898 = vrot.lane.b32.xlu0 %v1894_v57, %s7947_s14  ;;  %v5930_v57 = vmul.f32 %v7824_v47, %v5869_v7  ;;  %8218 = sst [smem:[#allocation63_spill]] %s5945_s9  ;;  %v1417_v47 = vpop.permute.xlu0 %1416  ;;  %v5958_v55 = vmul.f32 %v8223_v43, %v5321_v20  ;;  %s6005_s27 = sld [smem:[#allocation7 + $0xa7]] }
 0x285   : > { %8211 = sst [smem:[#allocation69_spill]] %s5918_s19  ;;  %1478 = vrot.lane.b32.xlu1 %v1473_v24, %s7950_s25  ;;  %v5950_v24 = vmul.f32 %v5933_v38, %v8219_v19  ;;  %v8221_v0 = vstv %s8209_s17  ;;  %v933_v19 = vadd.f32 %v929_v15, %v4833_v10  ;;  %v1422_v46 = vadd.f32 %v1417_v47, %v1408_v6  ;;  %s5976_s17 = sld [smem:[#allocation7 + $0x8f]]  ;;  %v943_v43 = vpop.permute.xlu1 %942  ;;  %v5996_v6 = vld [vmem:[#allocation2 + $0x22] sm:$0xff] }
 0x286   : > { %v1466_v41 = vmul.f32 %v8221_v0, %v5282_v17  ;;  %v966_v37 = vadd.f32 %v5277_v35, %v952_v49  ;;  %v8231_v35 = vstv %s8220_s22  ;;  %s6010_s22 = sld [smem:[#allocation7 + $0x5f]]  ;;  %v8244_v1 = vstv %s5918_s19  ;;  %s6420_s19 = sld [smem:[#allocation7 + $0x88]] }
 0x287   : > { %v8216_v32 = vstv %s8205_s18  ;;  %s5965_s18 = sld [smem:[#allocation7 + $0x5e]]  ;;  %v8227_v17 = vstv %s8214_s24  ;;  %v5989_v49 = vmul.f32 %v8231_v35, %v5321_v20  ;;  %v1428_v35 = vadd.f32 %v1426_v36, %v1422_v46  ;;  %s6021_s24 = sld [smem:[#allocation7 + $0xbf]] }
 0x288   : > { %v5941_v44 = vmul.f32 %v8216_v32, %v5321_v20  ;;  %v8224_v32 = vstv %s8212_s2  ;;  %v5974_v0 = vmul.f32 %v8227_v17, %v5514_v30  ;;  %s5978_s2 = sld [smem:[#allocation7 + $0x47]]  ;;  %1918 = vrot.lane.b32.xlu0 %v1914_v52, %s7950_s25  ;;  %v8232_v47 = vstv %s8222_s1  ;;  %v1437_v42 = vpop.permute.xlu0 %1436  ;;  %s6023_s1 = sld [smem:[#allocation7 + $0x72]] }
 0x289   : > { %v5963_v25 = vmul.f32 %v5933_v38, %v8224_v32  ;;  %8226 = sst [smem:[#allocation65_spill]] %s5967_s11  ;;  %v8230_v32 = vstv %s5307_s13  ;;  %v5994_v15 = vmul.f32 %v8232_v47, %v5514_v30  ;;  %v8233_v52 = vstv %s5400_s20  ;;  %1492 = vrot.lane.b32.xlu1 %v1487_v61, %s7947_s14  ;;  %s6016_s20 = sld [smem:[#allocation7 + $0x15]] }
 0x28a   : > { %v5984_v10 = vmul.f32 %v5933_v38, %v8230_v32  ;;  %v6001_v17 = vmul.f32 %v5996_v6, %v8233_v52  ;;  %s6003_s13 = sld [smem:[#allocation7 + $0x12]]  ;;  %8234 = sst [smem:[#allocation130_spill]] %s6005_s27  ;;  %v947_v32 = vadd.f32 %v943_v43, %v933_v19  ;;  %v980_v51 = vadd.f32 %v5293_v22, %v966_v37  ;;  %v963_v37 = vpop.permute.xlu1 %962  ;;  %v6036_v43 = vld [vmem:[#allocation2 + $0x50] sm:$0xff] }
 0x28b   : > { %8228 = sst [smem:[#allocation128_spill]] %s5976_s17  ;;  %v7841_v47 = vstv %s5849_s26  ;;  %v7842_v52 = vstv %s5858_s4  ;;  %v7847_v46 = vstv %s5877_s8  ;;  %v7846_v22 = vstv %s5879_s7  ;;  %s6078_s26 = sld [smem:[#allocation7 + $0x8a]] }
 0x28c   : > { %8235 = sst [smem:[#allocation131_spill]] %s6010_s22  ;;  %v953_v19 = vadd.f32 %v4845_v14, %v947_v32  ;;  %v1468_v61 = vadd.f32 %v1466_v41, %v980_v51  ;;  %1932 = vrot.lane.b32.xlu0 %v1928_v50, %s7947_s14  ;;  %v1942_v36 = vmul.f32 %v7838_v5, %v5321_v20  ;;  %v7848_v14 = vstv %s5891_s28  ;;  %v1451_v20 = vpop.permute.xlu0 %1450  ;;  %v6048_v51 = vld [vmem:[#allocation2 + $0x48] sm:$0xff]  ;;  %s6106_s8 = sld [smem:[#allocation7 + $0x8d]] }
 0x28d   : > { %8225 = sst [smem:[#allocation70_spill]] %s5965_s18  ;;  %v1442_v32 = vadd.f32 %v1437_v42, %v1428_v35  ;;  %1512 = vrot.lane.b32.xlu1 %v1507_v9, %s7950_s25  ;;  %v7850_v50 = vstv %s5909_s3  ;;  %v6050_v42 = vld [vmem:[#allocation2 + $0x49] sm:$0xff]  ;;  %v6061_v5 = vmul.f32 %v7841_v47, %v6036_v43  ;;  %s8320_s3 = sld [smem:[#allocation122_spill]] }
 0x28e   : > { %8229 = sst [smem:[#allocation129_spill]] %s5978_s2  ;;  %v967_v9 = vadd.f32 %v963_v37, %v953_v19  ;;  %v977_v41 = vpop.permute.xlu1 %976  ;;  %v6066_v19 = vmul.f32 %v7842_v52, %v6036_v43  ;;  %v8243_v52 = vstv %s5907_s16  ;;  %s6139_s16 = sld [smem:[#allocation7 + $0xe]] }
 0x28f   : > { %8236 = sst [smem:[#allocation132_spill]] %s6016_s20  ;;  %v1456_v35 = vadd.f32 %v1451_v20, %v1442_v32  ;;  %v6076_v20 = vmul.f32 %v7843_v60, %v5869_v7  ;;  %s8323_s28 = sld [smem:[#allocation52_spill]] }
 0x290   : > { %8237 = sst [smem:[#allocation133_spill]] %s6021_s24  ;;  %1952 = vrot.lane.b32.xlu0 %v5941_v44, %s7950_s25  ;;  %v981_v37 = vadd.f32 %v977_v41, %v967_v9  ;;  %v1477_v47 = vpop.permute.xlu0 %1476  ;;  %v6084_v41 = vmul.f32 %v7844_v16, %v5869_v7  ;;  %v2563_v9 = vld [vmem:[#allocation2 + $0x52] sm:$0xff]  ;;  %v6104_v16 = vmul.f32 %v7848_v14, %v6048_v51  ;;  %v6120_v14 = vmul.f32 %v8243_v52, %v6048_v51  ;;  %s8327_s7 = sld [smem:[#allocation123_spill]] }
 0x291   : > { %1526 = vrot.lane.b32.xlu1 %v5950_v24, %s7947_s14  ;;  %v6070_v44 = vadd.f32 %v1942_v36, %v1456_v35  ;;  %8240 = sst [smem:[#allocation136_spill]] %s6078_s26  ;;  %v6089_v24 = vmul.f32 %v7847_v46, %v6048_v51  ;;  %v6094_v36 = vmul.f32 %v7846_v22, %v6050_v42  ;;  %v1482_v60 = vadd.f32 %v1477_v47, %v1468_v61 }
 0x292   : > { %v6097_v35 = vadd.f32 %v5091_v31, %v981_v37  ;;  %8241 = sst [smem:[#allocation137_spill]] %s6106_s8  ;;  %v997_v22 = vpop.permute.xlu1 %996  ;;  %v8242_v31 = vstv %s5893_s23  ;;  %v6132_v46 = vmul.f32 %v8244_v1, %v6048_v51  ;;  %v8248_v52 = vstv %s5867_s15  ;;  %s6423_s23 = sld [smem:[#allocation7 + $0x39]] }
 0x293   : > { %v6115_v37 = vmul.f32 %v8242_v31, %v6050_v42  ;;  %v8246_v31 = vstv %s5920_s6  ;;  %v6144_v61 = vmul.f32 %v8248_v52, %v2563_v9  ;;  %v8252_v1 = vstv %s5945_s9  ;;  %s6359_s9 = sld [smem:[#allocation7 + $0x28]]  ;;  %s6383_s6 = sld [smem:[#allocation7 + $0x85]] }
 0x294   : > { %1966 = vrot.lane.b32.xlu0 %v5958_v55, %s7947_s14  ;;  %v6127_v55 = vmul.f32 %v7850_v50, %v6050_v42  ;;  %8245 = vst [vmem:[#allocation138_spill] sm:$0xff] %v6132_v46  ;;  %v6137_v32 = vmul.f32 %v8246_v31, %v6050_v42  ;;  %v1491_v47 = vpop.permute.xlu0 %1490  ;;  %v8250_v50 = vstv %s5943_s12  ;;  %v6153_v34 = vmul.f32 %v8252_v1, %v2563_v9  ;;  %s8310_s12 = sld [smem:[#allocation118_spill]]  ;;  %s6479_s15 = sld [smem:[#allocation7 + $0x99]] }
 0x295   : > { %1546 = vrot.lane.b32.xlu1 %v5963_v25, %s7950_s25  ;;  %8249 = vst [vmem:[#allocation140_spill] sm:$0xff] %v6144_v61  ;;  %v6149_v53 = vmul.f32 %v8250_v50, %v5869_v7  ;;  %v1001_v31 = vadd.f32 %v997_v22, %v4857_v28  ;;  %v1496_v33 = vadd.f32 %v1491_v47, %v1482_v60  ;;  %v8256_v52 = vstv %s5967_s11  ;;  %s8299_s11 = sld [smem:[#allocation117_spill]] }
 0x296   : > { %8247 = vst [vmem:[#allocation139_spill] sm:$0xff] %v6137_v32  ;;  %8253 = vst [vmem:[#allocation142_spill] sm:$0xff] %v6153_v34  ;;  %v8254_v32 = vstv %s5965_s18  ;;  %v6163_v61 = vmul.f32 %v8256_v52, %v2563_v9  ;;  %v1011_v50 = vpop.permute.xlu1 %1010  ;;  %v8258_v1 = vstv %s5976_s17  ;;  %v8260_v28 = vstv %s5978_s2  ;;  %s8293_s2 = sld [smem:[#allocation49_spill]]  ;;  %s8296_s17 = sld [smem:[#allocation51_spill]] }
 0x297   : > { %8251 = vst [vmem:[#allocation141_spill] sm:$0xff] %v6149_v53  ;;  %v6159_v25 = vmul.f32 %v8254_v32, %v5869_v7  ;;  %v6169_v34 = vmul.f32 %v8258_v1, %v2563_v9  ;;  %v6174_v60 = vmul.f32 %v8260_v28, %v5869_v7  ;;  %v8262_v22 = vstv %s6005_s27  ;;  %s6285_s27 = sld [smem:[#allocation7 + $0x6e]]  ;;  %v6470_v53 = vld [vmem:[#allocation2 + $0xa] sm:$0xff] }
 0x298   : > { %8257 = vst [vmem:[#allocation144_spill] sm:$0xff] %v6163_v61  ;;  %1986 = vrot.lane.b32.xlu0 %v5974_v0, %s7950_s25  ;;  %v6178_v32 = vmul.f32 %v8262_v22, %v2563_v9  ;;  %v8264_v47 = vstv %s6010_s22  ;;  %v1015_v61 = vadd.f32 %v1011_v50, %v1001_v31  ;;  %v1502_v0 = vadd.f32 %v5989_v49, %v1496_v33  ;;  %v6212_v50 = vld [vmem:[#allocation2 + $0x30] sm:$0xff]  ;;  %s8274_s22 = sld [smem:[#allocation50_spill]]  ;;  %s6347_s18 = sld [smem:[#allocation7 + $0x26]] }
 0x299   : > { %8255 = vst [vmem:[#allocation143_spill] sm:$0xff] %v6159_v25  ;;  %8259 = vst [vmem:[#allocation145_spill] sm:$0xff] %v6169_v34  ;;  %v6183_v52 = vmul.f32 %v8264_v47, %v5869_v7  ;;  %1560 = vrot.lane.b32.xlu1 %v5984_v10, %s7947_s14  ;;  %v8266_v28 = vstv %s6021_s24  ;;  %v1511_v34 = vpop.permute.xlu0 %1510  ;;  %v8268_v22 = vstv %s6003_s13  ;;  %v8269_v47 = vstv %s6016_s20  ;;  %s6215_s24 = sld [smem:[#allocation7 + $0x10]] }
 0x29a   : > { %8261 = vst [vmem:[#allocation146_spill] sm:$0xff] %v6174_v60  ;;  %8263 = vst [vmem:[#allocation147_spill] sm:$0xff] %v6178_v32  ;;  %v6191_v60 = vmul.f32 %v8266_v28, %v2563_v9  ;;  %v6196_v32 = vmul.f32 %v8268_v22, %v6036_v43  ;;  %v8271_v31 = vstv %s6023_s1  ;;  %v8272_v33 = vstv %s6032_s10  ;;  %s8276_s20 = sld [smem:[#allocation93_spill]]  ;;  %s6241_s10 = sld [smem:[#allocation7 + $0x11]] }
 0x29b   : > { %8265 = vst [vmem:[#allocation148_spill] sm:$0xff] %v6183_v52  ;;  %v6201_v52 = vmul.f32 %v8269_v47, %v5869_v7  ;;  %v6206_v10 = vmul.f32 %v8271_v31, %v5869_v7  ;;  %v6210_v49 = vmul.f32 %v8272_v33, %v2563_v9  ;;  %v1021_v28 = vadd.f32 %v4877_v11, %v1015_v61  ;;  %v1031_v33 = vpop.permute.xlu1 %1030  ;;  %8334 = sst [smem:[#allocation93_spill]] %s6479_s15 }
 0x29c   : > { %8267 = vst [vmem:[#allocation149_spill] sm:$0xff] %v6191_v60  ;;  %v8275_v47 = vstv %s6034_s30  ;;  %v8277_v31 = vstv %s6046_s5  ;;  %2000 = vrot.lane.b32.xlu0 %v5994_v15, %s7947_s14  ;;  %v1516_v61 = vadd.f32 %v1511_v34, %v1502_v0  ;;  %s8281_s5 = sld [smem:[#allocation111_spill]]  ;;  %v8282_v15 = vstv %s6106_s8  ;;  %s8287_s8 = sld [smem:[#allocation113_spill]] }
 0x29d   : > { %8270 = vst [vmem:[#allocation150_spill] sm:$0xff] %v6201_v52  ;;  %8273 = vst [vmem:[#allocation151_spill] sm:$0xff] %v6210_v49  ;;  %v6221_v1 = vmul.f32 %v8275_v47, %v6036_v43  ;;  %v6226_v52 = vmul.f32 %v8277_v31, %v5869_v7  ;;  %v8279_v49 = vstv %s6078_s26  ;;  %1580 = vrot.lane.b32.xlu1 %v6001_v17, %s7950_s25  ;;  %v1525_v22 = vpop.permute.xlu0 %1524  ;;  %v8280_v43 = vstv %s5839_s21  ;;  %s8339_s26 = sld [smem:[#allocation27_spill]] }
 0x29e   : > { %v6233_v11 = vmul.f32 %v8279_v49, %v5869_v7  ;;  %v2022_v47 = vmul.f32 %v8280_v43, %v6212_v50  ;;  %v1035_v60 = vadd.f32 %v1031_v33, %v1021_v28  ;;  %v1530_v7 = vadd.f32 %v1525_v22, %v1516_v61  ;;  %v6260_v33 = vld [vmem:[#allocation2 + $0x31] sm:$0xff] }
 0x29f   : > { %8278 = vst [vmem:[#allocation152_spill] sm:$0xff] %v6226_v52  ;;  %v6245_v52 = vmul.f32 %v8282_v15, %v2563_v9  ;;  %v8284_v49 = vstv %s8274_s22  ;;  %v1045_v25 = vpop.permute.xlu1 %1044  ;;  %v8286_v28 = vstv %s6139_s16  ;;  %s8288_s22 = sld [smem:[#allocation72_spill]] }
 0x2a0   : > { %v1589_v34 = vmul.f32 %v5996_v6, %v8284_v49  ;;  %v8285_v17 = vstv %s8276_s20  ;;  %2026 = vrot.lane.b32.xlu0 %v2022_v47, %s7950_s25  ;;  %v1049_v43 = vadd.f32 %v1045_v25, %v1035_v60  ;;  %v2036_v22 = vmul.f32 %v8286_v28, %v6212_v50  ;;  %s6266_s20 = sld [smem:[#allocation7 + $0x6d]] }
 0x2a1   : > { %8283 = vst [vmem:[#allocation153_spill] sm:$0xff] %v6245_v52  ;;  %v2016_v0 = vmul.f32 %v8285_v17, %v6212_v50  ;;  %v1545_v9 = vpop.permute.xlu0 %1544  ;;  %v7878_v47 = vstv %s6215_s24  ;;  %v7872_v17 = vstv %s6241_s10 }
 0x2a2   : > { %1594 = vrot.lane.b32.xlu1 %v1589_v34, %s7947_s14  ;;  %v8289_v61 = vstv %s8281_s5  ;;  %v6269_v25 = vadd.f32 %v5112_v18, %v1049_v43  ;;  %s8290_s5 = sld [smem:[#allocation116_spill]]  ;;  %v2056_v34 = vmul.f32 %v7878_v47, %v6260_v33  ;;  %v8291_v18 = vstv %s8287_s8  ;;  %s8294_s8 = sld [smem:[#allocation100_spill]] }
 0x2a3   : > { %v6255_v31 = vadd.f32 %v2016_v0, %v1530_v7  ;;  %v1609_v15 = vmul.f32 %v5896_v59, %v8289_v61  ;;  %v1065_v60 = vpop.permute.xlu1 %1064  ;;  %v1550_v7 = vadd.f32 %v1545_v9, %v5490_v39  ;;  %v1623_v43 = vmul.f32 %v5896_v59, %v8291_v18 }
 0x2a4   : > { %2040 = vrot.lane.b32.xlu0 %v2036_v22, %s7947_s14  ;;  %v1069_v0 = vadd.f32 %v1065_v60, %v4889_v63  ;;  %v2070_v60 = vmul.f32 %v7872_v17, %v6260_v33 }
 0x2a5   : > { %v1559_v49 = vpop.permute.xlu0 %1558  ;;  %v8292_v22 = vstv %s8288_s22  ;;  %s6297_s22 = sld [smem:[#allocation7 + $0x70]] }
 0x2a6   : > { %1614 = vrot.lane.b32.xlu1 %v1609_v15, %s7950_s25  ;;  %v1564_v28 = vadd.f32 %v1559_v49, %v1550_v7  ;;  %v1568_v61 = vmul.f32 %v8292_v22, %v5514_v30  ;;  %v7861_v18 = vstv %s6266_s20  ;;  %v8297_v22 = vstv %s8293_s2  ;;  %s8300_s2 = sld [smem:[#allocation78_spill]] }
 0x2a7   : > { %v1079_v39 = vpop.permute.xlu1 %1078 }
 0x2a8   : > { %2060 = vrot.lane.b32.xlu0 %v2056_v34, %s7950_s25  ;;  %v1083_v9 = vadd.f32 %v1079_v39, %v1069_v0  ;;  %v1570_v15 = vadd.f32 %v1568_v61, %v1564_v28  ;;  %v8295_v30 = vstv %s8290_s5  ;;  %s6308_s5 = sld [smem:[#allocation7 + $0x71]] }
 0x2a9   : > { %v1579_v63 = vpop.permute.xlu0 %1578  ;;  %v1643_v49 = vmul.f32 %v5933_v38, %v8295_v30 }
 0x2aa   : > { %1628 = vrot.lane.b32.xlu1 %v1623_v43, %s7947_s14  ;;  %v1089_v7 = vadd.f32 %v4898_v2, %v1083_v9  ;;  %v1584_v0 = vadd.f32 %v1579_v63, %v1570_v15  ;;  %v2090_v43 = vmul.f32 %v7861_v18, %v6260_v33  ;;  %v1657_v2 = vmul.f32 %v5933_v38, %v8297_v22 }
 0x2ab   : > { %v1099_v34 = vpop.permute.xlu1 %1098  ;;  %v7864_v9 = vstv %s6285_s27 }
 0x2ac   : > { %2074 = vrot.lane.b32.xlu0 %v2070_v60, %s7947_s14  ;;  %v1103_v61 = vadd.f32 %v1099_v34, %v1089_v7  ;;  %v8298_v60 = vstv %s8294_s8  ;;  %v2104_v7 = vmul.f32 %v7864_v9, %v6260_v33  ;;  %v6320_v34 = vld [vmem:[#allocation2 + $0x32] sm:$0xff]  ;;  %s6326_s8 = sld [smem:[#allocation7 + $0x25]] }
 0x2ad   : > { %v1593_v28 = vpop.permute.xlu0 %1592  ;;  %v2084_v15 = vmul.f32 %v8298_v60, %v6260_v33 }
 0x2ae   : > { %1648 = vrot.lane.b32.xlu1 %v1643_v49, %s7950_s25  ;;  %v1598_v39 = vadd.f32 %v1593_v28, %v1584_v0  ;;  %v8301_v0 = vstv %s8296_s17  ;;  %s8303_s17 = sld [smem:[#allocation119_spill]] }
 0x2af   : > { %v1113_v63 = vpop.permute.xlu1 %1112  ;;  %v1677_v28 = vmul.f32 %v5933_v38, %v8301_v0  ;;  %v6341_v0 = vld [vmem:[#allocation2 + $0x19] sm:$0xff] }
 0x2b0   : > { %2094 = vrot.lane.b32.xlu0 %v2090_v43, %s7950_s25  ;;  %v1117_v30 = vadd.f32 %v1113_v63, %v1103_v61  ;;  %v6315_v49 = vadd.f32 %v2084_v15, %v1598_v39  ;;  %v7863_v43 = vstv %s6297_s22  ;;  %v8302_v15 = vstv %s8299_s11  ;;  %s8305_s11 = sld [smem:[#allocation121_spill]] }
 0x2b1   : > { %v1613_v18 = vpop.permute.xlu0 %1612  ;;  %v2124_v60 = vmul.f32 %v7863_v43, %v6320_v34  ;;  %v1691_v63 = vmul.f32 %v5933_v38, %v8302_v15 }
 0x2b2   : > { %1662 = vrot.lane.b32.xlu1 %v1657_v2, %s7947_s14  ;;  %v6329_v22 = vadd.f32 %v5128_v48, %v1117_v30  ;;  %v1618_v61 = vadd.f32 %v1613_v18, %v5631_v62  ;;  %v7868_v18 = vstv %s6308_s5  ;;  %v7867_v9 = vstv %s6326_s8 }
 0x2b3   : > { %v1133_v2 = vpop.permute.xlu1 %1132 }
 0x2b4   : > { %2108 = vrot.lane.b32.xlu0 %v2104_v7, %s7947_s14  ;;  %v1137_v48 = vadd.f32 %v1133_v2, %v4908_v40  ;;  %v8304_v7 = vstv %s8300_s2  ;;  %v2138_v2 = vmul.f32 %v7868_v18, %v6320_v34  ;;  %s8306_s2 = sld [smem:[#allocation103_spill]] }
 0x2b5   : > { %v1627_v39 = vpop.permute.xlu0 %1626  ;;  %v1636_v62 = vmul.f32 %v6341_v0, %v8304_v7 }
 0x2b6   : > { %1682 = vrot.lane.b32.xlu1 %v1677_v28, %s7950_s25  ;;  %v1632_v30 = vadd.f32 %v1627_v39, %v1618_v61  ;;  %v8307_v39 = vstv %s8303_s17  ;;  %s6370_s17 = sld [smem:[#allocation7 + $0x29]] }
 0x2b7   : > { %v1147_v28 = vpop.permute.xlu1 %1146  ;;  %v1711_v7 = vmul.f32 %v5996_v6, %v8307_v39  ;;  %v7870_v39 = vstv %s6347_s18 }
 0x2b8   : > { %2128 = vrot.lane.b32.xlu0 %v2124_v60, %s7950_s25  ;;  %v1151_v43 = vadd.f32 %v1147_v28, %v1137_v48  ;;  %v1638_v15 = vadd.f32 %v1636_v62, %v1632_v30  ;;  %v2158_v30 = vmul.f32 %v7867_v9, %v6212_v50  ;;  %v8308_v62 = vstv %s8305_s11  ;;  %s8311_s11 = sld [smem:[#allocation76_spill]] }
 0x2b9   : > { %v1647_v40 = vpop.permute.xlu0 %1646 }
 0x2ba   : > { %1696 = vrot.lane.b32.xlu1 %v1691_v63, %s7947_s14  ;;  %v1157_v61 = vadd.f32 %v4930_v8, %v1151_v43  ;;  %v1652_v48 = vadd.f32 %v1647_v40, %v1638_v15  ;;  %v1725_v8 = vmul.f32 %v5996_v6, %v8308_v62  ;;  %v2172_v6 = vmul.f32 %v7870_v39, %v6212_v50  ;;  %v6390_v62 = vld [vmem:[#allocation2 + $0x8] sm:$0xff] }
 0x2bb   : > { %v1167_v60 = vpop.permute.xlu1 %1166  ;;  %v8317_v39 = vld [vmem:[#allocation67_spill] sm:$0xff] }
 0x2bc   : > { %2142 = vrot.lane.b32.xlu0 %v2138_v2, %s7947_s14  ;;  %v1171_v43 = vadd.f32 %v1167_v60, %v1157_v61  ;;  %v8309_v2 = vstv %s8306_s2  ;;  %v7871_v61 = vstv %s6359_s9  ;;  %v8312_v60 = vld [vmem:[#allocation90_spill] sm:$0xff]  ;;  %s8315_s2 = sld [smem:[#allocation120_spill]] }
 0x2bd   : > { %v1661_v63 = vpop.permute.xlu0 %1660  ;;  %v2152_v15 = vmul.f32 %v8309_v2, %v6212_v50 }
 0x2be   : > { %1716 = vrot.lane.b32.xlu1 %v1711_v7, %s7950_s25  ;;  %v1666_v28 = vadd.f32 %v1661_v63, %v1652_v48 }
 0x2bf   : > { %v1181_v40 = vpop.permute.xlu1 %1180 }
 0x2c0   : > { %2162 = vrot.lane.b32.xlu0 %v2158_v30, %s7950_s25  ;;  %v1185_v7 = vadd.f32 %v1181_v40, %v1171_v43  ;;  %v6377_v9 = vadd.f32 %v2152_v15, %v1666_v28  ;;  %v8314_v28 = vld [vmem:[#allocation66_spill] sm:$0xff]  ;;  %v2192_v15 = vmul.f32 %v7871_v61, %v6260_v33 }
 0x2c1   : > { %v1681_v18 = vpop.permute.xlu0 %1680 }
 0x2c2   : > { %1730 = vrot.lane.b32.xlu1 %v1725_v8, %s7947_s14  ;;  %v6386_v48 = vadd.f32 %v8312_v60, %v1185_v7  ;;  %v1686_v30 = vadd.f32 %v1681_v18, %v5690_v45  ;;  %v8313_v8 = vstv %s8310_s12  ;;  %v8316_v45 = vstv %s8311_s11  ;;  %s6406_s12 = sld [smem:[#allocation7 + $0x86]]  ;;  %s8319_s11 = sld [smem:[#allocation48_spill]] }
 0x2c3   : > { %v1201_v63 = vpop.permute.xlu1 %1200  ;;  %v1189_v43 = vmul.f32 %v6390_v62, %v8313_v8  ;;  %v7876_v60 = vstv %s6370_s17 }
 0x2c4   : > { %2176 = vrot.lane.b32.xlu0 %v2172_v6, %s7947_s14  ;;  %v6400_v6 = vld [vmem:[#allocation2 + $0x1a] sm:$0xff] }
 0x2c5   : > { %v1695_v2 = vpop.permute.xlu0 %1694  ;;  %v1205_v40 = vadd.f32 %v1201_v63, %v1189_v43  ;;  %v1704_v18 = vmul.f32 %v6400_v6, %v8316_v45  ;;  %v6411_v63 = vld [vmem:[#allocation2 + $0x9] sm:$0xff]  ;;  %v2206_v45 = vmul.f32 %v7876_v60, %v6260_v33 }
 0x2c6   : > { %1750 = vrot.lane.b32.xlu1 %v8314_v28, %s7950_s25  ;;  %v1700_v7 = vadd.f32 %v1695_v2, %v1686_v30  ;;  %v8318_v30 = vstv %s8315_s2  ;;  %s6431_s2 = sld [smem:[#allocation7 + $0x89]] }
 0x2c7   : > { %v1215_v8 = vpop.permute.xlu1 %1214  ;;  %v1223_v43 = vmul.f32 %v6411_v63, %v8318_v30 }
 0x2c8   : > { %2196 = vrot.lane.b32.xlu0 %v2192_v15, %s7950_s25  ;;  %v1219_v28 = vadd.f32 %v1215_v8, %v1205_v40  ;;  %v1706_v61 = vadd.f32 %v1704_v18, %v1700_v7  ;;  %v7879_v15 = vstv %s6383_s6  ;;  %v8321_v7 = vld [vmem:[#allocation68_spill] sm:$0xff] }
 0x2c9   : > { %v1715_v2 = vpop.permute.xlu0 %1714  ;;  %v2226_v8 = vmul.f32 %v7879_v15, %v6260_v33 }
 0x2ca   : > { %1764 = vrot.lane.b32.xlu1 %v8317_v39, %s7947_s14  ;;  %v1225_v17 = vadd.f32 %v1223_v43, %v1219_v28  ;;  %v1720_v39 = vadd.f32 %v1715_v2, %v1706_v61  ;;  %v7881_v43 = vstv %s6406_s12 }
 0x2cb   : > { %v1235_v40 = vpop.permute.xlu1 %1234 }
 0x2cc   : > { %2210 = vrot.lane.b32.xlu0 %v2206_v45, %s7947_s14  ;;  %v1239_v28 = vadd.f32 %v1235_v40, %v1225_v17  ;;  %v8322_v45 = vstv %s8319_s11  ;;  %v8325_v17 = vstv %s8320_s3  ;;  %s6452_s11 = sld [smem:[#allocation7 + $0x3c]]  ;;  %v7886_v52 = vstv %s6431_s2  ;;  %s8333_s3 = sld [smem:[#allocation53_spill]] }
 0x2cd   : > { %v1729_v18 = vpop.permute.xlu0 %1728  ;;  %v2220_v60 = vmul.f32 %v8322_v45, %v6260_v33  ;;  %v1739_v40 = vmul.f32 %v5896_v59, %v8325_v17  ;;  %v7882_v45 = vstv %s6420_s19 }
 0x2ce   : > { %1784 = vrot.lane.b32.xlu1 %v8321_v7, %s7950_s25  ;;  %v1734_v30 = vadd.f32 %v1729_v18, %v1720_v39  ;;  %v8324_v7 = vld [vmem:[#allocation71_spill] sm:$0xff]  ;;  %v2240_v18 = vmul.f32 %v7881_v43, %v6260_v33 }
 0x2cf   : > { %v1249_v61 = vpop.permute.xlu1 %1248 }
 0x2d0   : > { %2230 = vrot.lane.b32.xlu0 %v2226_v8, %s7950_s25  ;;  %v1253_v2 = vadd.f32 %v1249_v61, %v1239_v28  ;;  %v6439_v47 = vadd.f32 %v2220_v60, %v1734_v30  ;;  %v7885_v28 = vstv %s6423_s23  ;;  %v8328_v30 = vstv %s8323_s28  ;;  %s8330_s28 = sld [smem:[#allocation26_spill]] }
 0x2d1   : > { %v1749_v39 = vpop.permute.xlu0 %1748  ;;  %v1257_v61 = vmul.f32 %v6411_v63, %v8328_v30  ;;  %v1772_v43 = vmul.f32 %v6341_v0, %v7885_v28  ;;  %v8331_v30 = vld [vmem:[#allocation74_spill] sm:$0xff] }
 0x2d2   : > { %1798 = vrot.lane.b32.xlu1 %v8324_v7, %s7947_s14  ;;  %v6448_v15 = vadd.f32 %v1739_v40, %v1253_v2  ;;  %8326 = sst [smem:[#allocation50_spill]] %s6452_s11  ;;  %v1754_v60 = vadd.f32 %v1749_v39, %v5746_v54  ;;  %v8329_v7 = vld [vmem:[#allocation73_spill] sm:$0xff]  ;;  %v2260_v2 = vmul.f32 %v7882_v45, %v6320_v34  ;;  %v8332_v45 = vstv %s8327_s7  ;;  %s8338_s7 = sld [smem:[#allocation54_spill]] }
 0x2d3   : > { %v1269_v8 = vpop.permute.xlu1 %1268 }
 0x2d4   : > { %2244 = vrot.lane.b32.xlu0 %v2240_v18, %s7947_s14  ;;  %v1273_v40 = vadd.f32 %v1269_v8, %v1257_v61  ;;  %v1291_v8 = vmul.f32 %v6470_v53, %v8332_v45  ;;  %v2274_v61 = vmul.f32 %v7886_v52, %v6320_v34 }
 0x2d5   : > { %v1763_v17 = vpop.permute.xlu0 %1762 }
 0x2d6   : > { %1818 = vrot.lane.b32.xlu1 %v8329_v7, %s7950_s25  ;;  %v1768_v18 = vadd.f32 %v1763_v17, %v1754_v60  ;;  %v8337_v45 = vstv %s8330_s28  ;;  %s8343_s28 = sld [smem:[#allocation55_spill]] }
 0x2d7   : > { %v1283_v54 = vpop.permute.xlu1 %1282 }
 0x2d8   : > { %2264 = vrot.lane.b32.xlu0 %v2260_v2, %s7950_s25  ;;  %v1287_v39 = vadd.f32 %v1283_v54, %v1273_v40  ;;  %v1774_v7 = vadd.f32 %v1772_v43, %v1768_v18  ;;  %v7890_v40 = vstv %s6452_s11  ;;  %v8336_v18 = vld [vmem:[#allocation75_spill] sm:$0xff]  ;;  %s6505_s11 = sld [smem:[#allocation7 + $0x9c]] }
 0x2d9   : > { %v1783_v60 = vpop.permute.xlu0 %1782 }
 0x2da   : > { %1832 = vrot.lane.b32.xlu1 %v8331_v30, %s7947_s14  ;;  %v1293_v17 = vadd.f32 %v1291_v8, %v1287_v39  ;;  %v1788_v43 = vadd.f32 %v1783_v60, %v1774_v7  ;;  %v2294_v30 = vmul.f32 %v8337_v45, %v6212_v50  ;;  %v2288_v39 = vmul.f32 %v7890_v40, %v6212_v50  ;;  %v8340_v7 = vld [vmem:[#allocation77_spill] sm:$0xff] }
 0x2db   : > { %v1303_v2 = vpop.permute.xlu1 %1302 }
 0x2dc   : > { %2278 = vrot.lane.b32.xlu0 %v2274_v61, %s7947_s14  ;;  %v1307_v28 = vadd.f32 %v1303_v2, %v1293_v17  ;;  %v8342_v2 = vstv %s8335_s29  ;;  %s8349_s29 = sld [smem:[#allocation38_spill]] }
 0x2dd   : > { %v1797_v54 = vpop.permute.xlu0 %1796 }
 0x2de   : > { %1852 = vrot.lane.b32.xlu1 %v8336_v18, %s7950_s25  ;;  %v1802_v52 = vadd.f32 %v1797_v54, %v1788_v43  ;;  %v8341_v18 = vstv %s8333_s3  ;;  %v2308_v43 = vmul.f32 %v8342_v2, %v6212_v50  ;;  %8344 = sst [smem:[#allocation111_spill]] %s6505_s11  ;;  %s6529_s3 = sld [smem:[#allocation7 + $0x51]] }
 0x2df   : > { %v1317_v8 = vpop.permute.xlu1 %1316  ;;  %v1807_v45 = vmul.f32 %v5933_v38, %v8341_v18 }
 0x2e0   : > { %2298 = vrot.lane.b32.xlu0 %v2294_v30, %s7950_s25  ;;  %v1321_v61 = vadd.f32 %v1317_v8, %v1307_v28  ;;  %v6493_v60 = vadd.f32 %v2288_v39, %v1802_v52  ;;  %v1839_v28 = vstv %s6479_s15  ;;  %v8346_v39 = vstv %s8338_s7  ;;  %s8354_s7 = sld [smem:[#allocation29_spill]]  ;;  %s8363_s15 = sld [smem:[#allocation28_spill]] }
 0x2e1   : > { %v1817_v17 = vpop.permute.xlu0 %1816  ;;  %v1325_v8 = vmul.f32 %v6390_v62, %v8346_v39  ;;  %v1840_v40 = vmul.f32 %v6400_v6, %v1839_v28  ;;  %v8350_v62 = vld [vmem:[#allocation80_spill] sm:$0xff] }
 0x2e2   : > { %1866 = vrot.lane.b32.xlu1 %v8340_v7, %s7947_s14  ;;  %v6501_v54 = vadd.f32 %v1807_v45, %v1321_v61  ;;  %v1822_v52 = vadd.f32 %v1817_v17, %v5799_v4  ;;  %v8347_v7 = vld [vmem:[#allocation79_spill] sm:$0xff]  ;;  %v8348_v61 = vstv %s8339_s26  ;;  %s8353_s26 = sld [smem:[#allocation56_spill]] }
 0x2e3   : > { %v1337_v30 = vpop.permute.xlu1 %1336  ;;  %v2328_v45 = vmul.f32 %v8348_v61, %v6260_v33 }
 0x2e4   : > { %2312 = vrot.lane.b32.xlu0 %v2308_v43, %s7947_s14  ;;  %v1341_v2 = vadd.f32 %v1337_v30, %v1325_v8  ;;  %v8352_v30 = vstv %s8345_s0  ;;  %s8357_s0 = sld [smem:[#allocation58_spill]] }
 0x2e5   : > { %v1831_v18 = vpop.permute.xlu0 %1830 }
 0x2e6   : > { %1886 = vrot.lane.b32.xlu1 %v8347_v7, %s7950_s25  ;;  %v1836_v43 = vadd.f32 %v1831_v18, %v1822_v52  ;;  %v8351_v7 = vstv %s8343_s28  ;;  %v2342_v52 = vmul.f32 %v8352_v30, %v6260_v33  ;;  %s8358_s28 = sld [smem:[#allocation36_spill]] }
 0x2e7   : > { %v1351_v4 = vpop.permute.xlu1 %1350  ;;  %v1359_v46 = vmul.f32 %v6411_v63, %v8351_v7 }
 0x2e8   : > { %2332 = vrot.lane.b32.xlu0 %v2328_v45, %s7950_s25  ;;  %v1355_v17 = vadd.f32 %v1351_v4, %v1341_v2  ;;  %v1842_v39 = vadd.f32 %v1840_v40, %v1836_v43  ;;  %v7893_v45 = vstv %s6505_s11  ;;  %v8355_v4 = vld [vmem:[#allocation81_spill] sm:$0xff]  ;;  %v8356_v43 = vstv %s8349_s29  ;;  %s8362_s29 = sld [smem:[#allocation57_spill]]  ;;  %s6555_s11 = sld [smem:[#allocation7 + $0x54]] }
 0x2e9   : > { %v1851_v61 = vpop.permute.xlu0 %1850 }
 0x2ea   : > { %1900 = vrot.lane.b32.xlu1 %v8350_v62, %s7947_s14  ;;  %v1361_v8 = vadd.f32 %v1359_v46, %v1355_v17  ;;  %v1856_v2 = vadd.f32 %v1851_v61, %v1842_v39  ;;  %v2362_v62 = vmul.f32 %v8356_v43, %v6260_v33  ;;  %v2356_v46 = vmul.f32 %v7893_v45, %v6260_v33  ;;  %v8359_v39 = vld [vmem:[#allocation82_spill] sm:$0xff] }
 0x2eb   : > { %v1371_v18 = vpop.permute.xlu1 %1370 }
 0x2ec   : > { %2346 = vrot.lane.b32.xlu0 %v2342_v52, %s7947_s14  ;;  %v1375_v7 = vadd.f32 %v1371_v18, %v1361_v8  ;;  %v8361_v18 = vstv %s8354_s7  ;;  %s8371_s7 = sld [smem:[#allocation124_spill]] }
 0x2ed   : > { %v1865_v40 = vpop.permute.xlu0 %1864 }
 0x2ee   : > { %1920 = vrot.lane.b32.xlu1 %v8355_v4, %s7950_s25  ;;  %v1870_v30 = vadd.f32 %v1865_v40, %v1856_v2  ;;  %v8360_v4 = vstv %s8353_s26  ;;  %v2376_v2 = vmul.f32 %v8361_v18, %v6260_v33  ;;  %s8367_s26 = sld [smem:[#allocation39_spill]] }
 0x2ef   : > { %v1385_v17 = vpop.permute.xlu1 %1384  ;;  %v1875_v43 = vmul.f32 %v5896_v59, %v8360_v4  ;;  %v8365_v59 = vld [vmem:[#allocation83_spill] sm:$0xff] }
 0x2f0   : > { %2366 = vrot.lane.b32.xlu0 %v2362_v62, %s7950_s25  ;;  %v1389_v52 = vadd.f32 %v1385_v17, %v1375_v7  ;;  %v6543_v61 = vadd.f32 %v2356_v46, %v1870_v30  ;;  %v1907_v7 = vstv %s6529_s3  ;;  %v8364_v46 = vstv %s8357_s0  ;;  %s6579_s0 = sld [smem:[#allocation7 + $0xb1]] }
 0x2f1   : > { %v1885_v8 = vpop.permute.xlu0 %1884  ;;  %v1393_v17 = vmul.f32 %v6411_v63, %v8364_v46  ;;  %v8368_v63 = vld [vmem:[#allocation84_spill] sm:$0xff]  ;;  %s8465_s3 = sld [smem:[#allocation64_spill]] }
 0x2f2   : > { %1934 = vrot.lane.b32.xlu1 %v8359_v39, %s7947_s14  ;;  %v6551_v40 = vadd.f32 %v1875_v43, %v1389_v52  ;;  %v1890_v30 = vadd.f32 %v1885_v8, %v5873_v3  ;;  %v8366_v52 = vstv %s8358_s28  ;;  %s8372_s28 = sld [smem:[#allocation35_spill]] }
 0x2f3   : > { %v1405_v62 = vpop.permute.xlu1 %1404  ;;  %v2396_v4 = vmul.f32 %v8366_v52, %v6320_v34 }
 0x2f4   : > { %2380 = vrot.lane.b32.xlu0 %v2376_v2, %s7947_s14  ;;  %v1409_v43 = vadd.f32 %v1405_v62, %v1393_v17  ;;  %v1908_v2 = vmul.f32 %v6341_v0, %v1907_v7  ;;  %v8370_v62 = vstv %s8363_s15  ;;  %s8376_s15 = sld [smem:[#allocation37_spill]] }
 0x2f6   : > { %1954 = vrot.lane.b32.xlu1 %v8365_v59, %s7950_s25  ;;  %v1899_v39 = vpop.permute.xlu0 %1898  ;;  %v8369_v59 = vstv %s8362_s29  ;;  %s8380_s29 = sld [smem:[#allocation44_spill]] }
 0x2f7   : > { %v1904_v18 = vadd.f32 %v1899_v39, %v1890_v30  ;;  %v1419_v3 = vpop.permute.xlu1 %1418  ;;  %v1427_v45 = vmul.f32 %v6470_v53, %v8369_v59  ;;  %v2410_v30 = vmul.f32 %v8370_v62, %v6320_v34  ;;  %v2423_v39 = vstv %s6555_s11  ;;  %s6978_s11 = sld [smem:[#allocation7 + $0x5a]] }
 0x2f8   : > { %2400 = vrot.lane.b32.xlu0 %v2396_v4, %s7950_s25  ;;  %v1423_v8 = vadd.f32 %v1419_v3, %v1409_v43  ;;  %v8373_v43 = vld [vmem:[#allocation85_spill] sm:$0xff]  ;;  %v8374_v53 = vstv %s8367_s26  ;;  %v8377_v62 = vstv %s8371_s7  ;;  %s6610_s26 = sld [smem:[#allocation7 + $0xb4]]  ;;  %s8391_s7 = sld [smem:[#allocation96_spill]] }
 0x2f9   : > { %v1910_v46 = vadd.f32 %v1908_v2, %v1904_v18  ;;  %v2430_v2 = vmul.f32 %v8374_v53, %v6212_v50 }
 0x2fa   : > { %1968 = vrot.lane.b32.xlu1 %v8368_v63, %s7947_s14  ;;  %v1919_v52 = vpop.permute.xlu0 %1918  ;;  %v1429_v17 = vadd.f32 %v1427_v45, %v1423_v8  ;;  %v2424_v8 = vmul.f32 %v2423_v39, %v6212_v50 }
 0x2fb   : > { %v1439_v0 = vpop.permute.xlu1 %1438  ;;  %v1924_v4 = vadd.f32 %v1919_v52, %v1910_v46  ;;  %v8375_v46 = vld [vmem:[#allocation86_spill] sm:$0xff] }
 0x2fc   : > { %2414 = vrot.lane.b32.xlu0 %v2410_v30, %s7947_s14  ;;  %v1443_v3 = vadd.f32 %v1439_v0, %v1429_v17  ;;  %v1943_v30 = vmul.f32 %v5933_v38, %v8377_v62  ;;  %v8378_v0 = vstv %s8372_s28  ;;  %v8382_v62 = vstv %s6139_s16  ;;  %s8387_s16 = sld [smem:[#allocation46_spill]]  ;;  %s8394_s28 = sld [smem:[#allocation45_spill]] }
 0x2fe   : > { %1988 = vrot.lane.b32.xlu1 %v8373_v43, %s7950_s25  ;;  %v1933_v18 = vpop.permute.xlu0 %1932  ;;  %v6601_v43 = vld [vmem:[#allocation2 + $0x38] sm:$0xff] }
 0x2ff   : > { %v1938_v45 = vadd.f32 %v1933_v18, %v1924_v4  ;;  %v1453_v63 = vpop.permute.xlu1 %1452  ;;  %v2444_v4 = vmul.f32 %v8378_v0, %v6212_v50  ;;  %v8379_v18 = vstv %s5839_s21  ;;  %s8383_s21 = sld [smem:[#allocation40_spill]] }
 0x300   : > { %2434 = vrot.lane.b32.xlu0 %v2430_v2, %s7950_s25  ;;  %v1457_v59 = vadd.f32 %v1453_v63, %v1443_v3  ;;  %v2023_v53 = vmul.f32 %v6601_v43, %v8379_v18 }
 0x301   : > { %v6593_v52 = vadd.f32 %v2424_v8, %v1938_v45  ;;  %v7894_v45 = vstv %s6579_s0  ;;  %v8381_v8 = vstv %s8376_s15  ;;  %s8433_s15 = sld [smem:[#allocation59_spill]] }
 0x302   : > { %2002 = vrot.lane.b32.xlu1 %v8375_v46, %s7947_s14  ;;  %v1953_v17 = vpop.permute.xlu0 %1952  ;;  %v6606_v2 = vadd.f32 %v1943_v30, %v1457_v59  ;;  %v2464_v63 = vmul.f32 %v8381_v8, %v6260_v33  ;;  %v2037_v30 = vmul.f32 %v6601_v43, %v8382_v62  ;;  %v1976_v0 = vmul.f32 %v6400_v6, %v7894_v45 }
 0x303   : > { %v1479_v3 = vpop.permute.xlu1 %1478  ;;  %v1958_v38 = vadd.f32 %v1953_v17, %v6070_v44  ;;  %v8386_v8 = vstv %s6215_s24  ;;  %s8390_s24 = sld [smem:[#allocation42_spill]] }
 0x304   : > { %2448 = vrot.lane.b32.xlu0 %v2444_v4, %s7947_s14  ;;  %v1483_v46 = vadd.f32 %v1479_v3, %v6097_v35  ;;  %v8384_v35 = vstv %s8380_s29  ;;  %v8385_v3 = vld [vmem:[#allocation87_spill] sm:$0xff]  ;;  %s6850_s29 = sld [smem:[#allocation7 + $0x3f]] }
 0x306   : > { %2028 = vrot.lane.b32.xlu1 %v2023_v53, %s7950_s25  ;;  %v1967_v50 = vpop.permute.xlu0 %1966  ;;  %v2478_v53 = vmul.f32 %v8384_v35, %v6260_v33  ;;  %v8389_v35 = vstv %s6241_s10  ;;  %s6657_s10 = sld [smem:[#allocation7 + $0x13]] }
 0x307   : > { %v1972_v59 = vadd.f32 %v1967_v50, %v1958_v38  ;;  %v1493_v44 = vpop.permute.xlu1 %1492  ;;  %v6630_v50 = vld [vmem:[#allocation2 + $0x39] sm:$0xff] }
 0x308   : > { %2468 = vrot.lane.b32.xlu0 %v2464_v63, %s7950_s25  ;;  %v1497_v17 = vadd.f32 %v1493_v44, %v1483_v46  ;;  %v2057_v6 = vmul.f32 %v6630_v50, %v8386_v8  ;;  %v2491_v46 = vstv %s6610_s26  ;;  %s8479_s26 = sld [smem:[#allocation128_spill]] }
 0x309   : > { %v1978_v4 = vadd.f32 %v1976_v0, %v1972_v59  ;;  %v2492_v8 = vmul.f32 %v2491_v46, %v6260_v33 }
 0x30a   : > { %2042 = vrot.lane.b32.xlu1 %v2037_v30, %s7947_s14  ;;  %v1987_v18 = vpop.permute.xlu0 %1986  ;;  %v1503_v38 = vadd.f32 %v8385_v3, %v1497_v17  ;;  %v8388_v30 = vstv %s8383_s21  ;;  %v2071_v3 = vmul.f32 %v6630_v50, %v8389_v35  ;;  %s6998_s21 = sld [smem:[#allocation7 + $0xb7]] }
 0x30b   : > { %v1513_v63 = vpop.permute.xlu1 %1512  ;;  %v1992_v62 = vadd.f32 %v1987_v18, %v1978_v4  ;;  %v2498_v0 = vmul.f32 %v8388_v30, %v6260_v33 }
 0x30c   : > { %2482 = vrot.lane.b32.xlu0 %v2478_v53, %s7947_s14  ;;  %v1517_v44 = vadd.f32 %v1513_v63, %v1503_v38  ;;  %v8392_v38 = vstv %s8387_s16  ;;  %v8393_v63 = vstv %s6266_s20  ;;  %s6675_s20 = sld [smem:[#allocation7 + $0x14]]  ;;  %s6876_s16 = sld [smem:[#allocation7 + $0x42]] }
 0x30e   : > { %2062 = vrot.lane.b32.xlu1 %v2057_v6, %s7950_s25  ;;  %v2001_v59 = vpop.permute.xlu0 %2000  ;;  %v2512_v6 = vmul.f32 %v8392_v38, %v6260_v33 }
 0x30f   : > { %v2006_v17 = vadd.f32 %v2001_v59, %v1992_v62  ;;  %v1527_v53 = vpop.permute.xlu1 %1526  ;;  %v2091_v62 = vmul.f32 %v6630_v50, %v8393_v63 }
 0x310   : > { %2502 = vrot.lane.b32.xlu0 %v2498_v0, %s7950_s25  ;;  %v1531_v45 = vadd.f32 %v1527_v53, %v1517_v44  ;;  %v8396_v53 = vstv %s6285_s27  ;;  %s6691_s27 = sld [smem:[#allocation7 + $0x16]] }
 0x311   : > { %v6649_v4 = vadd.f32 %v2492_v8, %v2006_v17  ;;  %v8395_v17 = vstv %s8390_s24  ;;  %s8443_s24 = sld [smem:[#allocation30_spill]] }
 0x312   : > { %2076 = vrot.lane.b32.xlu1 %v2071_v3, %s7947_s14  ;;  %v2027_v18 = vpop.permute.xlu0 %2026  ;;  %v6660_v59 = vadd.f32 %v5547_v27, %v1531_v45  ;;  %v2532_v35 = vmul.f32 %v8395_v17, %v6320_v34  ;;  %v2105_v27 = vmul.f32 %v6630_v50, %v8396_v53  ;;  %v8397_v45 = vstv %s8391_s7  ;;  %s8446_s7 = sld [smem:[#allocation60_spill]] }
 0x313   : > { %v1547_v30 = vpop.permute.xlu1 %1546  ;;  %v2032_v0 = vadd.f32 %v2027_v18, %v6255_v31  ;;  %v2050_v38 = vmul.f32 %v8397_v45, %v6260_v33  ;;  %v8400_v17 = vstv %s6297_s22  ;;  %v2571_v53 = vstv %s6657_s10  ;;  %s6705_s22 = sld [smem:[#allocation7 + $0x17]]  ;;  %s8482_s10 = sld [smem:[#allocation129_spill]] }
 0x314   : > { %2516 = vrot.lane.b32.xlu0 %v2512_v6, %s7947_s14  ;;  %v1551_v3 = vadd.f32 %v1547_v30, %v6269_v25  ;;  %v8398_v25 = vstv %s8394_s28  ;;  %v8399_v30 = vld [vmem:[#allocation88_spill] sm:$0xff]  ;;  %s8448_s28 = sld [smem:[#allocation111_spill]] }
 0x316   : > { %2096 = vrot.lane.b32.xlu1 %v2091_v62, %s7950_s25  ;;  %v2041_v44 = vpop.permute.xlu0 %2040  ;;  %v2546_v62 = vmul.f32 %v8398_v25, %v6320_v34 }
 0x317   : > { %v2046_v8 = vadd.f32 %v2041_v44, %v2032_v0  ;;  %v1561_v31 = vpop.permute.xlu1 %1560  ;;  %v6683_v44 = vld [vmem:[#allocation2 + $0x3a] sm:$0xff] }
 0x318   : > { %2536 = vrot.lane.b32.xlu0 %v2532_v35, %s7950_s25  ;;  %v1565_v18 = vadd.f32 %v1561_v31, %v1551_v3  ;;  %v2125_v35 = vmul.f32 %v6683_v44, %v8400_v17 }
 0x319   : > { %v2052_v6 = vadd.f32 %v2050_v38, %v2046_v8  ;;  %v8401_v38 = vstv %s6308_s5  ;;  %s8403_s5 = sld [smem:[#allocation97_spill]] }
 0x31a   : > { %2110 = vrot.lane.b32.xlu1 %v2105_v27, %s7947_s14  ;;  %v2061_v63 = vpop.permute.xlu0 %2060  ;;  %v1571_v0 = vadd.f32 %v8399_v30, %v1565_v18  ;;  %v2572_v27 = vmul.f32 %v2571_v53, %v6048_v51  ;;  %v2139_v31 = vmul.f32 %v6683_v44, %v8401_v38  ;;  %v7902_v30 = vstv %s6675_s20 }
 0x31b   : > { %v1581_v3 = vpop.permute.xlu1 %1580  ;;  %v2066_v45 = vadd.f32 %v2061_v63, %v2052_v6 }
 0x31c   : > { %2550 = vrot.lane.b32.xlu0 %v2546_v62, %s7947_s14  ;;  %v1585_v18 = vadd.f32 %v1581_v3, %v1571_v0  ;;  %v8402_v62 = vstv %s6003_s13  ;;  %v2586_v3 = vmul.f32 %v7902_v30, %v6048_v51  ;;  %s6722_s13 = sld [smem:[#allocation7 + $0x73]] }
 0x31d   : > { %v2566_v6 = vmul.f32 %v8402_v62, %v6048_v51 }
 0x31e   : > { %2130 = vrot.lane.b32.xlu1 %v2125_v35, %s7950_s25  ;;  %v2075_v8 = vpop.permute.xlu0 %2074 }
 0x31f   : > { %v2080_v25 = vadd.f32 %v2075_v8, %v2066_v45  ;;  %v1595_v63 = vpop.permute.xlu1 %1594  ;;  %v8404_v45 = vstv %s6326_s8  ;;  %s6737_s8 = sld [smem:[#allocation7 + $0x74]] }
 0x320   : > { %2576 = vrot.lane.b32.xlu0 %v2572_v27, %s7950_s25  ;;  %v1599_v17 = vadd.f32 %v1595_v63, %v1585_v18  ;;  %v2159_v8 = vmul.f32 %v6601_v43, %v8404_v45  ;;  %v7900_v18 = vstv %s6691_s27 }
 0x321   : > { %v6707_v35 = vadd.f32 %v2566_v6, %v2080_v25  ;;  %v2606_v51 = vmul.f32 %v7900_v18, %v6050_v42  ;;  %v8405_v6 = vstv %s6347_s18  ;;  %s6749_s18 = sld [smem:[#allocation7 + $0x76]]  ;;  %v8419_v18 = vstv %s6431_s2  ;;  %s8432_s2 = sld [smem:[#allocation50_spill]] }
 0x322   : > { %2144 = vrot.lane.b32.xlu1 %v2139_v31, %s7947_s14  ;;  %v2095_v0 = vpop.permute.xlu0 %2094  ;;  %v6716_v27 = vadd.f32 %v5571_v29, %v1599_v17  ;;  %v2173_v63 = vmul.f32 %v6601_v43, %v8405_v6  ;;  %v8406_v17 = vstv %s8403_s5  ;;  %v8408_v6 = vstv %s6359_s9  ;;  %s6763_s9 = sld [smem:[#allocation7 + $0x77]] }
 0x323   : > { %v1615_v38 = vpop.permute.xlu1 %1614  ;;  %v2100_v31 = vadd.f32 %v2095_v0, %v6315_v49  ;;  %v2118_v49 = vmul.f32 %v8406_v17, %v6320_v34  ;;  %s6901_s5 = sld [smem:[#allocation7 + $0x9f]] }
 0x324   : > { %2590 = vrot.lane.b32.xlu0 %v2586_v3, %s7947_s14  ;;  %v1619_v29 = vadd.f32 %v1615_v38, %v6329_v22 }
 0x326   : > { %2164 = vrot.lane.b32.xlu1 %v2159_v8, %s7950_s25  ;;  %v2109_v25 = vpop.permute.xlu0 %2108  ;;  %v7895_v8 = vstv %s6705_s22 }
 0x327   : > { %v2114_v62 = vadd.f32 %v2109_v25, %v2100_v31  ;;  %v1629_v0 = vpop.permute.xlu1 %1628  ;;  %v2620_v38 = vmul.f32 %v7895_v8, %v6050_v42  ;;  %v8407_v31 = vld [vmem:[#allocation89_spill] sm:$0xff] }
 0x328   : > { %2610 = vrot.lane.b32.xlu0 %v2606_v51, %s7950_s25  ;;  %v1633_v3 = vadd.f32 %v1629_v0, %v1619_v29  ;;  %v2193_v51 = vmul.f32 %v6630_v50, %v8408_v6 }
 0x329   : > { %v2120_v45 = vadd.f32 %v2118_v49, %v2114_v62  ;;  %v7898_v62 = vstv %s6722_s13 }
 0x32a   : > { %2178 = vrot.lane.b32.xlu1 %v2173_v63, %s7947_s14  ;;  %v2129_v22 = vpop.permute.xlu0 %2128  ;;  %v1639_v25 = vadd.f32 %v8407_v31, %v1633_v3  ;;  %v2640_v49 = vmul.f32 %v7898_v62, %v6050_v42  ;;  %v8409_v31 = vstv %s6370_s17  ;;  %s8411_s17 = sld [smem:[#allocation47_spill]] }
 0x32b   : > { %v1649_v29 = vpop.permute.xlu1 %1648  ;;  %v2134_v63 = vadd.f32 %v2129_v22, %v2120_v45  ;;  %v2207_v6 = vmul.f32 %v6630_v50, %v8409_v31 }
 0x32c   : > { %2624 = vrot.lane.b32.xlu0 %v2620_v38, %s7947_s14  ;;  %v1653_v0 = vadd.f32 %v1649_v29, %v1639_v25  ;;  %v8410_v38 = vstv %s6023_s1  ;;  %s8422_s1 = sld [smem:[#allocation104_spill]] }
 0x32d   : > { %v2634_v8 = vmul.f32 %v8410_v38, %v6050_v42 }
 0x32e   : > { %2198 = vrot.lane.b32.xlu1 %v2193_v51, %s7950_s25  ;;  %v2143_v17 = vpop.permute.xlu0 %2142  ;;  %v7896_v51 = vstv %s6737_s8 }
 0x32f   : > { %v2148_v3 = vadd.f32 %v2143_v17, %v2134_v63  ;;  %v1663_v45 = vpop.permute.xlu1 %1662  ;;  %v2654_v63 = vmul.f32 %v7896_v51, %v6050_v42  ;;  %v6770_v17 = vld [vmem:[#allocation2 + $0x4a] sm:$0xff] }
 0x330   : > { %2644 = vrot.lane.b32.xlu0 %v2640_v49, %s7950_s25  ;;  %v1667_v22 = vadd.f32 %v1663_v45, %v1653_v0  ;;  %v8412_v49 = vstv %s6383_s6  ;;  %s8415_s6 = sld [smem:[#allocation126_spill]] }
 0x331   : > { %v6765_v25 = vadd.f32 %v2634_v8, %v2148_v3  ;;  %v2227_v31 = vmul.f32 %v6630_v50, %v8412_v49  ;;  %v7897_v3 = vstv %s6749_s18 }
 0x332   : > { %2212 = vrot.lane.b32.xlu1 %v2207_v6, %s7947_s14  ;;  %v2163_v29 = vpop.permute.xlu0 %2162  ;;  %v6776_v0 = vadd.f32 %v5583_v26, %v1667_v22  ;;  %v2674_v38 = vmul.f32 %v7897_v3, %v6770_v17  ;;  %v8413_v26 = vstv %s6406_s12  ;;  %v7899_v3 = vstv %s6763_s9  ;;  %s8429_s12 = sld [smem:[#allocation136_spill]] }
 0x333   : > { %v1683_v6 = vpop.permute.xlu1 %1682  ;;  %v2168_v8 = vadd.f32 %v2163_v29, %v6377_v9  ;;  %v2241_v22 = vmul.f32 %v6630_v50, %v8413_v26 }
 0x334   : > { %2658 = vrot.lane.b32.xlu0 %v2654_v63, %s7947_s14  ;;  %v1687_v45 = vadd.f32 %v1683_v6, %v6386_v48  ;;  %v8414_v63 = vstv %s8411_s17  ;;  %v2688_v48 = vmul.f32 %v7899_v3, %v6770_v17  ;;  %v8416_v6 = vld [vmem:[#allocation91_spill] sm:$0xff]  ;;  %s8449_s17 = sld [smem:[#allocation31_spill]] }
 0x335   : > { %v2186_v51 = vmul.f32 %v8414_v63, %v6260_v33 }
 0x336   : > { %2232 = vrot.lane.b32.xlu1 %v2227_v31, %s7950_s25  ;;  %v2177_v42 = vpop.permute.xlu0 %2176 }
 0x337   : > { %v2182_v49 = vadd.f32 %v2177_v42, %v2168_v8  ;;  %v1697_v9 = vpop.permute.xlu1 %1696  ;;  %v8417_v42 = vstv %s6420_s19  ;;  %s8421_s19 = sld [smem:[#allocation41_spill]] }
 0x338   : > { %2678 = vrot.lane.b32.xlu0 %v2674_v38, %s7950_s25  ;;  %v1701_v29 = vadd.f32 %v1697_v9, %v1687_v45  ;;  %v2261_v26 = vmul.f32 %v6683_v44, %v8417_v42 }
 0x339   : > { %v2188_v31 = vadd.f32 %v2186_v51, %v2182_v49  ;;  %v6804_v51 = vld [vmem:[#allocation2 + $0x48] sm:$0xff]  ;;  %v8418_v49 = vstv %s8415_s6  ;;  %s8452_s6 = sld [smem:[#allocation61_spill]] }
 0x33a   : > { %2246 = vrot.lane.b32.xlu1 %v2241_v22, %s7947_s14  ;;  %v2197_v62 = vpop.permute.xlu0 %2196  ;;  %v1707_v8 = vadd.f32 %v8416_v6, %v1701_v29  ;;  %v2708_v63 = vmul.f32 %v6804_v51, %v8418_v49  ;;  %v2275_v29 = vmul.f32 %v6683_v44, %v8419_v18  ;;  %v8420_v6 = vstv %s6034_s30  ;;  %s8424_s30 = sld [smem:[#allocation125_spill]] }
 0x33b   : > { %v1717_v38 = vpop.permute.xlu1 %1716  ;;  %v2202_v45 = vadd.f32 %v2197_v62, %v2188_v31  ;;  %v8423_v49 = vstv %s5858_s4  ;;  %s8427_s4 = sld [smem:[#allocation43_spill]] }
 0x33c   : > { %2692 = vrot.lane.b32.xlu0 %v2688_v48, %s7947_s14  ;;  %v1721_v9 = vadd.f32 %v1717_v38, %v1707_v8  ;;  %v2702_v48 = vmul.f32 %v6804_v51, %v8420_v6  ;;  %v2722_v8 = vmul.f32 %v6804_v51, %v8423_v49  ;;  %v8426_v6 = vstv %s8422_s1  ;;  %s6935_s1 = sld [smem:[#allocation7 + $0xa2]] }
 0x33d   : > { %v8430_v49 = vstv %s6423_s23  ;;  %s8437_s23 = sld [smem:[#allocation127_spill]] }
 0x33e   : > { %2266 = vrot.lane.b32.xlu1 %v2261_v26, %s7950_s25  ;;  %v2211_v22 = vpop.permute.xlu0 %2210 }
 0x33f   : > { %v2216_v3 = vadd.f32 %v2211_v22, %v2202_v45  ;;  %v1731_v62 = vpop.permute.xlu1 %1730 }
 0x340   : > { %2712 = vrot.lane.b32.xlu0 %v2708_v63, %s7950_s25  ;;  %v1735_v31 = vadd.f32 %v1731_v62, %v1721_v9  ;;  %v8425_v63 = vstv %s8421_s19  ;;  %s8456_s19 = sld [smem:[#allocation32_spill]] }
 0x341   : > { %v6817_v42 = vadd.f32 %v2702_v48, %v2216_v3  ;;  %v6829_v3 = vld [vmem:[#allocation2 + $0x49] sm:$0xff]  ;;  %v2254_v48 = vmul.f32 %v8426_v6, %v6320_v34  ;;  %v8435_v6 = vstv %s8427_s4  ;;  %s8462_s4 = sld [smem:[#allocation69_spill]] }
 0x342   : > { %2280 = vrot.lane.b32.xlu1 %v2275_v29, %s7947_s14  ;;  %v2231_v26 = vpop.permute.xlu0 %2230  ;;  %v6823_v38 = vadd.f32 %v5599_v56, %v1735_v31  ;;  %v2742_v9 = vmul.f32 %v6829_v3, %v8425_v63  ;;  %v8428_v31 = vld [vmem:[#allocation92_spill] sm:$0xff] }
 0x343   : > { %v1751_v18 = vpop.permute.xlu1 %1750  ;;  %v2236_v45 = vadd.f32 %v2231_v26, %v6439_v47  ;;  %v6841_v26 = vld [vmem:[#allocation2 + $0x21] sm:$0xff] }
 0x344   : > { %2726 = vrot.lane.b32.xlu0 %v2722_v8, %s7947_s14  ;;  %v1755_v29 = vadd.f32 %v1751_v18, %v6448_v15  ;;  %v1773_v8 = vmul.f32 %v6841_v26, %v8430_v49  ;;  %v8431_v18 = vstv %s8424_s30  ;;  %v8436_v49 = vstv %s8429_s12  ;;  %s8459_s30 = sld [smem:[#allocation62_spill]] }
 0x345   : > { %s6951_s12 = sld [smem:[#allocation7 + $0x57]] }
 0x346   : > { %2300 = vrot.lane.b32.xlu1 %v5396_v12, %s7950_s25  ;;  %v2245_v22 = vpop.permute.xlu0 %2244 }
 0x347   : > { %v2250_v56 = vadd.f32 %v2245_v22, %v2236_v45  ;;  %v1765_v47 = vpop.permute.xlu1 %1764  ;;  %v2756_v45 = vmul.f32 %v6829_v3, %v8431_v18 }
 0x348   : > { %2746 = vrot.lane.b32.xlu0 %v2742_v9, %s7950_s25  ;;  %v1769_v62 = vadd.f32 %v1765_v47, %v1755_v29  ;;  %v8434_v29 = vld [vmem:[#allocation94_spill] sm:$0xff] }
 0x349   : > { %v2256_v12 = vadd.f32 %v2254_v48, %v2250_v56  ;;  %v2776_v48 = vmul.f32 %v6829_v3, %v8435_v6 }
 0x34a   : > { %2314 = vrot.lane.b32.xlu1 %v8428_v31, %s7947_s14  ;;  %v2265_v15 = vpop.permute.xlu0 %2264  ;;  %v1775_v22 = vadd.f32 %v1773_v8, %v1769_v62  ;;  %v2770_v62 = vmul.f32 %v6829_v3, %v8436_v49 }
 0x34b   : > { %v1785_v63 = vpop.permute.xlu1 %1784  ;;  %v2270_v9 = vadd.f32 %v2265_v15, %v2256_v12  ;;  %v8438_v12 = vld [vmem:[#allocation95_spill] sm:$0xff] }
 0x34c   : > { %2760 = vrot.lane.b32.xlu0 %v2756_v45, %s7947_s14  ;;  %v1789_v47 = vadd.f32 %v1785_v63, %v1775_v22  ;;  %v8439_v45 = vstv %s8432_s2  ;;  %v8440_v22 = vstv %s8433_s15  ;;  %s8468_s2 = sld [smem:[#allocation25_spill]]  ;;  %s8471_s15 = sld [smem:[#allocation63_spill]] }
 0x34d   : > { %v2790_v63 = vmul.f32 %v6829_v3, %v8440_v22 }
 0x34e   : > { %2334 = vrot.lane.b32.xlu1 %v8434_v29, %s7950_s25  ;;  %v2279_v56 = vpop.permute.xlu0 %2278  ;;  %v2289_v29 = vmul.f32 %v6601_v43, %v8439_v45 }
 0x34f   : > { %v2284_v31 = vadd.f32 %v2279_v56, %v2270_v9  ;;  %v1799_v8 = vpop.permute.xlu1 %1798 }
 0x350   : > { %2780 = vrot.lane.b32.xlu0 %v2776_v48, %s7950_s25  ;;  %v1803_v18 = vadd.f32 %v1799_v8, %v1789_v47  ;;  %v7901_v47 = vstv %s6850_s29 }
 0x351   : > { %v6863_v15 = vadd.f32 %v2770_v62, %v2284_v31  ;;  %v8442_v31 = vld [vmem:[#allocation98_spill] sm:$0xff]  ;;  %v8444_v62 = vstv %s8437_s23  ;;  %s8475_s23 = sld [smem:[#allocation70_spill]] }
 0x352   : > { %2348 = vrot.lane.b32.xlu1 %v8438_v12, %s7947_s14  ;;  %v2299_v6 = vpop.permute.xlu0 %2298  ;;  %v6872_v56 = vadd.f32 %v2289_v29, %v1803_v18  ;;  %v2810_v8 = vmul.f32 %v8444_v62, %v6770_v17  ;;  %v2322_v18 = vmul.f32 %v7901_v47, %v6260_v33  ;;  %v8447_v33 = vstv %s8443_s24  ;;  %s7032_s24 = sld [smem:[#allocation7 + $0xba]] }
 0x353   : > { %v2304_v9 = vadd.f32 %v2299_v6, %v6493_v60  ;;  %v1819_v48 = vpop.permute.xlu1 %1818  ;;  %v8445_v6 = vld [vmem:[#allocation99_spill] sm:$0xff] }
 0x354   : > { %2794 = vrot.lane.b32.xlu0 %v2790_v63, %s7947_s14  ;;  %v1823_v12 = vadd.f32 %v1819_v48, %v6501_v54  ;;  %v6890_v63 = vld [vmem:[#allocation2 + $0x22] sm:$0xff] }
 0x356   : > { %2368 = vrot.lane.b32.xlu1 %v8442_v31, %s7950_s25  ;;  %v2313_v49 = vpop.permute.xlu0 %2312  ;;  %v1841_v31 = vmul.f32 %v6890_v63, %v1839_v28 }
 0x357   : > { %v2318_v60 = vadd.f32 %v2313_v49, %v2304_v9  ;;  %v1833_v45 = vpop.permute.xlu1 %1832  ;;  %v6895_v9 = vld [vmem:[#allocation2 + $0x50] sm:$0xff] }
 0x358   : > { %2814 = vrot.lane.b32.xlu0 %v2810_v8, %s7950_s25  ;;  %v1837_v29 = vadd.f32 %v1833_v45, %v1823_v12  ;;  %v2845_v48 = vmul.f32 %v6895_v9, %v8447_v33  ;;  %v2837_v12 = vstv %s6876_s16  ;;  %v8451_v45 = vstv %s8446_s7  ;;  %s8490_s7 = sld [smem:[#allocation132_spill]]  ;;  %s7235_s16 = sld [smem:[#allocation7 + $0xa5]] }
 0x359   : > { %v2324_v22 = vadd.f32 %v2322_v18, %v2318_v60  ;;  %v8450_v60 = vld [vmem:[#allocation101_spill] sm:$0xff] }
 0x35a   : > { %2382 = vrot.lane.b32.xlu1 %v8445_v6, %s7947_s14  ;;  %v2333_v54 = vpop.permute.xlu0 %2332  ;;  %v1843_v62 = vadd.f32 %v1841_v31, %v1837_v29  ;;  %v6906_v18 = vld [vmem:[#allocation2 + $0x51] sm:$0xff]  ;;  %v2838_v31 = vmul.f32 %v6804_v51, %v2837_v12 }
 0x35b   : > { %v2338_v49 = vadd.f32 %v2333_v54, %v2324_v22  ;;  %v1853_v8 = vpop.permute.xlu1 %1852  ;;  %v2913_v6 = vmul.f32 %v6906_v18, %v8451_v45 }
 0x35c   : > { %2850 = vrot.lane.b32.xlu0 %v2845_v48, %s7950_s25  ;;  %v1857_v22 = vadd.f32 %v1853_v8, %v1843_v62  ;;  %v8453_v48 = vld [vmem:[#allocation102_spill] sm:$0xff]  ;;  %v8455_v62 = vstv %s8449_s17  ;;  %s8504_s17 = sld [smem:[#allocation135_spill]] }
 0x35e   : > { %2402 = vrot.lane.b32.xlu1 %v8450_v60, %s7950_s25  ;;  %v2347_v28 = vpop.permute.xlu0 %2346  ;;  %v8454_v60 = vstv %s8448_s28  ;;  %s3108_s28 = sld [smem:[#allocation8]] }
 0x35f   : > { %v2352_v29 = vadd.f32 %v2347_v28, %v2338_v49  ;;  %v1867_v54 = vpop.permute.xlu1 %1866  ;;  %v2357_v47 = vmul.f32 %v6630_v50, %v8454_v60  ;;  %v2981_v49 = vmul.f32 %v6895_v9, %v8455_v62  ;;  %v8460_v62 = vld [vmem:[#allocation106_spill] sm:$0xff] }
 0x360   : > { %2918 = vrot.lane.b32.xlu0 %v2913_v6, %s7950_s25  ;;  %v1871_v33 = vadd.f32 %v1867_v54, %v1857_v22  ;;  %v2389_v22 = vstv %s6901_s5  ;;  %v8457_v54 = vld [vmem:[#allocation105_spill] sm:$0xff]  ;;  %s7262_s5 = sld [smem:[#allocation7 + $0x5d]] }
 0x361   : > { %v6920_v30 = vadd.f32 %v2838_v31, %v2352_v29  ;;  %v8458_v29 = vstv %s8452_s6  ;;  %s3590_s6 = sld [smem:[#allocation8 + $0x1]] }
 0x362   : > { %2416 = vrot.lane.b32.xlu1 %v8453_v48, %s7947_s14  ;;  %v2367_v45 = vpop.permute.xlu0 %2366  ;;  %v6926_v28 = vadd.f32 %v2357_v47, %v1871_v33  ;;  %v3049_v31 = vmul.f32 %v6906_v18, %v8458_v29  ;;  %v2390_v47 = vmul.f32 %v2389_v22, %v6320_v34 }
 0x363   : > { %v2372_v8 = vadd.f32 %v2367_v45, %v6543_v61  ;;  %v1887_v6 = vpop.permute.xlu1 %1886 }
 0x364   : > { %2986 = vrot.lane.b32.xlu0 %v2981_v49, %s7950_s25  ;;  %v1891_v60 = vadd.f32 %v1887_v6, %v6551_v40  ;;  %v8461_v40 = vstv %s8456_s19  ;;  %s8507_s19 = sld [smem:[#allocation137_spill]] }
 0x366   : > { %2436 = vrot.lane.b32.xlu1 %v8457_v54, %s7950_s25  ;;  %v2381_v48 = vpop.permute.xlu0 %2380  ;;  %v1909_v54 = vmul.f32 %v6841_v26, %v1907_v7  ;;  %v2905_v26 = vstv %s6935_s1  ;;  %s3656_s1 = sld [smem:[#allocation8 + $0x3]] }
 0x367   : > { %v2386_v61 = vadd.f32 %v2381_v48, %v2372_v8  ;;  %v1901_v33 = vpop.permute.xlu1 %1900  ;;  %v2859_v8 = vmul.f32 %v6895_v9, %v8461_v40 }
 0x368   : > { %3054 = vrot.lane.b32.xlu0 %v3049_v31, %s7950_s25  ;;  %v1905_v45 = vadd.f32 %v1901_v33, %v1891_v60  ;;  %v8463_v31 = vld [vmem:[#allocation107_spill] sm:$0xff] }
 0x369   : > { %v2392_v49 = vadd.f32 %v2390_v47, %v2386_v61  ;;  %v8464_v61 = vstv %s8459_s30  ;;  %s8526_s30 = sld [smem:[#allocation19_spill]] }
 0x36a   : > { %2450 = vrot.lane.b32.xlu1 %v8460_v62, %s7947_s14  ;;  %v2401_v29 = vpop.permute.xlu0 %2400  ;;  %v1911_v34 = vadd.f32 %v1909_v54, %v1905_v45  ;;  %v2927_v7 = vmul.f32 %v6906_v18, %v8464_v61  ;;  %v2906_v45 = vmul.f32 %v6829_v3, %v2905_v26  ;;  %v8466_v54 = vld [vmem:[#allocation108_spill] sm:$0xff]  ;;  %v2457_v61 = vstv %s6951_s12 }
 0x36b   : > { %v2406_v6 = vadd.f32 %v2401_v29, %v2392_v49  ;;  %v1921_v48 = vpop.permute.xlu1 %1920  ;;  %v2425_v29 = vmul.f32 %v6601_v43, %v2423_v39  ;;  %v8469_v39 = vld [vmem:[#allocation109_spill] sm:$0xff] }
 0x36c   : > { %2864 = vrot.lane.b32.xlu0 %v2859_v8, %s7947_s14  ;;  %v1925_v47 = vadd.f32 %v1921_v48, %v1911_v34  ;;  %v8467_v34 = vstv %s8462_s4 }
 0x36e   : > { %2470 = vrot.lane.b32.xlu1 %v8463_v31, %s7950_s25  ;;  %v2415_v60 = vpop.permute.xlu0 %2414 }
 0x36f   : > { %v2420_v33 = vadd.f32 %v2415_v60, %v2406_v6  ;;  %v1935_v62 = vpop.permute.xlu1 %1934  ;;  %v2995_v6 = vmul.f32 %v6895_v9, %v8467_v34  ;;  %v8473_v34 = vstv %s6579_s0  ;;  %s8477_s0 = sld [smem:[#allocation65_spill]]  ;;  %s3695_s4 = sshll.u32 %s8526_s30, 11 }
 0x370   : > { %2932 = vrot.lane.b32.xlu0 %v2927_v7, %s7947_s14  ;;  %v1939_v49 = vadd.f32 %v1935_v62, %v1925_v47  ;;  %v8470_v7 = vstv %s8465_s3  ;;  %s8527_s3 = sld [smem:[#allocation22_spill]] }
 0x371   : > { %v6968_v40 = vadd.f32 %v2906_v45, %v2420_v33  ;;  %v3063_v47 = vmul.f32 %v6906_v18, %v8470_v7  ;;  %v3887_v45 = vld [vmem:[#allocation2 + $0x31] sm:$0xff] }
 0x372   : > { %2484 = vrot.lane.b32.xlu1 %v8466_v54, %s7947_s14  ;;  %v2435_v8 = vpop.permute.xlu0 %2434  ;;  %v6974_v31 = vadd.f32 %v2425_v29, %v1939_v49  ;;  %v2458_v62 = vmul.f32 %v3887_v45, %v2457_v61  ;;  %v8472_v29 = vld [vmem:[#allocation110_spill] sm:$0xff] }
 0x373   : > { %v2440_v48 = vadd.f32 %v2435_v8, %v6593_v52  ;;  %v1955_v60 = vpop.permute.xlu1 %1954 }
 0x374   : > { %3000 = vrot.lane.b32.xlu0 %v2995_v6, %s7947_s14  ;;  %v1959_v33 = vadd.f32 %v1955_v60, %v6606_v2  ;;  %v1977_v6 = vmul.f32 %v6890_v63, %v8473_v34  ;;  %v8474_v2 = vstv %s8468_s2  ;;  %v8476_v63 = vstv %s8471_s15  ;;  %s8528_s15 = sld [smem:[#allocation157_spill]] }
 0x376   : > { %2504 = vrot.lane.b32.xlu1 %v8469_v39, %s7950_s25  ;;  %v2449_v43 = vpop.permute.xlu0 %2448  ;;  %p8530_p2 = scmp.ne.s32.totalorder %s8527_s3, 0 }
 0x377   : > { %v2454_v52 = vadd.f32 %v2449_v43, %v2440_v48  ;;  %v1969_v49 = vpop.permute.xlu1 %1968  ;;  %v2878_v48 = vmul.f32 %v6829_v3, %v8474_v2  ;;  %v2573_v2 = vmul.f32 %v6895_v9, %v2571_v53  ;;  %v8481_v53 = vstv %s6675_s20  ;;  %s8486_s20 = sld [smem:[#allocation130_spill]] }
 0x378   : > { %3068 = vrot.lane.b32.xlu0 %v3063_v47, %s7947_s14  ;;  %v1973_v54 = vadd.f32 %v1969_v49, %v1959_v33  ;;  %v2973_v47 = vstv %s6978_s11 }
 0x379   : > { %v2460_v8 = vadd.f32 %v2458_v62, %v2454_v52  ;;  %v2946_v52 = vmul.f32 %v8476_v63, %v6770_v17  ;;  %v2974_v49 = vmul.f32 %v6804_v51, %v2973_v47  ;;  %v2587_v63 = vmul.f32 %v6895_v9, %v8481_v53 }
 0x37a   : > { %2518 = vrot.lane.b32.xlu1 %v8472_v29, %s7947_s14  ;;  %v2469_v39 = vpop.permute.xlu0 %2468  ;;  %v1979_v43 = vadd.f32 %v1977_v6, %v1973_v54  ;;  %v8478_v6 = vstv %s8475_s23  ;;  %s8529_s23 = smov %s8528_s15 }
 0x37b   : > { %v2474_v60 = vadd.f32 %v2469_v39, %v2460_v8  ;;  %v1989_v7 = vpop.permute.xlu1 %1988  ;;  %v3014_v39 = vmul.f32 %v6829_v3, %v8478_v6  ;;  %v8484_v6 = vld [vmem:[#allocation112_spill] sm:$0xff] }
 0x37c   : > { %2882 = vrot.lane.b32.xlu0 %v2878_v48, %s7950_s25  ;;  %v1993_v45 = vadd.f32 %v1989_v7, %v1979_v43  ;;  %v8480_v43 = vstv %s8477_s0 }
 0x37d   : > { %v3082_v7 = vmul.f32 %v8480_v43, %v6770_v17  ;;  %v8487_v43 = vstv %s8482_s10 }
 0x37e   : > { %2538 = vrot.lane.b32.xlu1 %v5528_v58, %s7950_s25  ;;  %v2483_v33 = vpop.permute.xlu0 %2482  ;;  %v2493_v58 = vmul.f32 %v6630_v50, %v2491_v46 }
 0x37f   : > { %v2488_v62 = vadd.f32 %v2483_v33, %v2474_v60  ;;  %v2003_v54 = vpop.permute.xlu1 %2002  ;;  %v2525_v60 = vstv %s6998_s21  ;;  %s7555_s21 = scalar_lea.hbm %s8528_s15, %s3695_s4 }
 0x380   : > { %2950 = vrot.lane.b32.xlu0 %v2946_v52, %s7950_s25  ;;  %v2007_v29 = vadd.f32 %v2003_v54, %v1993_v45  ;;  %v3888_v52 = vld [vmem:[#allocation2 + $0x32] sm:$0xff] }
 0x381   : > { %v7015_v8 = vadd.f32 %v2974_v49, %v2488_v62  ;;  %v2526_v45 = vmul.f32 %v3888_v52, %v2525_v60 }
 0x382   : > { %2552 = vrot.lane.b32.xlu1 %v5539_v13, %s7947_s14  ;;  %v2503_v34 = vpop.permute.xlu0 %2502  ;;  %v7024_v48 = vadd.f32 %v2493_v58, %v2007_v29 }
 0x383   : > { %v2508_v51 = vadd.f32 %v2503_v34, %v6649_v4  ;;  %v2029_v13 = vpop.permute.xlu1 %2028 }
 0x384   : > { %3018 = vrot.lane.b32.xlu0 %v3014_v39, %s7950_s25  ;;  %v2033_v4 = vadd.f32 %v2029_v13, %v6660_v59  ;;  %v8483_v59 = vstv %s8479_s26 }
 0x385   : > { %v2824_v58 = vmul.f32 %v8483_v59, %v6770_v17  ;;  %v8491_v59 = vstv %s8486_s20 }
 0x386   : > { %2578 = vrot.lane.b32.xlu1 %v2573_v2, %s7950_s25  ;;  %v2517_v46 = vpop.permute.xlu0 %2516 }
 0x387   : > { %v2522_v33 = vadd.f32 %v2517_v46, %v2508_v51  ;;  %v2043_v62 = vpop.permute.xlu1 %2042  ;;  %v8485_v51 = vstv %s6691_s27  ;;  %s8489_s27 = sld [smem:[#allocation131_spill]] }
 0x388   : > { %3086 = vrot.lane.b32.xlu0 %v3082_v7, %s7950_s25  ;;  %v2047_v49 = vadd.f32 %v2043_v62, %v2033_v4  ;;  %v2607_v2 = vmul.f32 %v6906_v18, %v8485_v51  ;;  %v2892_v7 = vmul.f32 %v6829_v3, %v8487_v43  ;;  %v3041_v4 = vstv %s7032_s24  ;;  %s4054_s24 = smov [#allocation10]  }
 0x389   : > { %v2528_v54 = vadd.f32 %v2526_v45, %v2522_v33  ;;  %v3042_v45 = vmul.f32 %v6829_v3, %v3041_v4  ;;  %s3958_s10 = sshll.u32 %s4054_s24, 4  ;;  %s3959_s10 = int_to_ptr.vmem [resolvable:$false] %s3958_s10 }
 0x38a   : > { %2592 = vrot.lane.b32.xlu1 %v2587_v63, %s7947_s14  ;;  %v2537_v29 = vpop.permute.xlu0 %2536  ;;  %v2053_v39 = vadd.f32 %v8484_v6, %v2047_v49  ;;  %v8488_v63 = vstv %s6705_s22  ;;  %s8493_s22 = sld [smem:[#allocation133_spill]]  ;;  %s3960_s20 = scalar_lea.vmem %s3959_s10, 4096 }
 0x38b   : > { %v2542_v34 = vadd.f32 %v2537_v29, %v2528_v54  ;;  %v2063_v13 = vpop.permute.xlu1 %2062  ;;  %v2621_v52 = vmul.f32 %v6906_v18, %v8488_v63  ;;  %v8496_v63 = vstv %s8490_s7 }
 0x38c   : > { %2828 = vrot.lane.b32.xlu0 %v2824_v58, %s7947_s14  ;;  %v2067_v33 = vadd.f32 %v2063_v13, %v2053_v39  ;;  %v2960_v58 = vmul.f32 %v8491_v59, %v6770_v17  ;;  %v8499_v59 = vld [vmem:[#allocation114_spill] sm:$0xff] }
 0x38e   : > { %2612 = vrot.lane.b32.xlu1 %v2607_v2, %s7950_s25  ;;  %v2551_v46 = vpop.permute.xlu0 %2550 }
 0x38f   : > { %v2556_v53 = vadd.f32 %v2551_v46, %v2542_v34  ;;  %v2077_v62 = vpop.permute.xlu1 %2076  ;;  %v8492_v34 = vstv %s6722_s13  ;;  %v8494_v46 = vstv %s8489_s27  ;;  %s8497_s13 = sld [smem:[#allocation24_spill]] }
 0x390   : > { %2896 = vrot.lane.b32.xlu0 %v2892_v7, %s7947_s14  ;;  %v2081_v49 = vadd.f32 %v2077_v62, %v2067_v33  ;;  %v2641_v6 = vmul.f32 %v6906_v18, %v8492_v34  ;;  %v3028_v43 = vmul.f32 %v6829_v3, %v8494_v46  ;;  %v7093_v34 = vld [vmem:[#allocation2 + $0x52] sm:$0xff]  ;;  %v7101_v46 = vstv %s3108_s28 }
 0x391   : > { %v7063_v54 = vadd.f32 %v3042_v45, %v2556_v53  ;;  %v8495_v53 = vstv %s6737_s8 }
 0x392   : > { %2626 = vrot.lane.b32.xlu1 %v2621_v52, %s7947_s14  ;;  %v2577_v29 = vpop.permute.xlu0 %2576  ;;  %v7072_v39 = vadd.f32 %v6196_v32, %v2081_v49  ;;  %v2655_v32 = vmul.f32 %v6906_v18, %v8495_v53  ;;  %v2600_v52 = vmul.f32 %v6829_v3, %v8496_v63 }
 0x393   : > { %v2097_v51 = vpop.permute.xlu1 %2096  ;;  %v2582_v2 = vadd.f32 %v2577_v29, %v6707_v35  ;;  %v8498_v29 = vstv %s8493_s22 }
 0x394   : > { %2964 = vrot.lane.b32.xlu0 %v2960_v58, %s7947_s14  ;;  %v2101_v7 = vadd.f32 %v2097_v51, %v6716_v27  ;;  %v3096_v27 = vmul.f32 %v8498_v29, %v6770_v17 }
 0x395   : > { %s3392_s8 = sshll.u32 %s8497_s13, 7  ;;  %s3272_s0 = scalar_lea.sflag [#allocation5], %s8497_s13 }
 0x396   : > { %2646 = vrot.lane.b32.xlu1 %v2641_v6, %s7950_s25  ;;  %v2591_v13 = vpop.permute.xlu0 %2590  ;;  %v8500_v6 = vstv %s6749_s18  ;;  %s7108_s18 = scalar_lea.vmem [#allocation10], %s3392_s8 }
 0x397   : > { %v2596_v33 = vadd.f32 %v2591_v13, %v2582_v2  ;;  %v2111_v35 = vpop.permute.xlu1 %2110  ;;  %v2675_v51 = vmul.f32 %v7093_v34, %v8500_v6  ;;  %s3285_s12 = sshll.u32 %s7108_s18, 4  ;;  %s7557_s12 = int_to_ptr.vmem [resolvable:$true] %s3285_s12 }
 0x398   : > { %3032 = vrot.lane.b32.xlu0 %v3028_v43, %s7947_s14  ;;  %v2115_v45 = vadd.f32 %v2111_v35, %v2101_v7  ;;  %v8501_v7 = vstv %s6763_s9  ;;  %s8502_s9 = sld [smem:[#allocation134_spill]]  ;;  %s3954_s26 = scalar_lea.vmem %s7557_s12, 2048 }
 0x399   : > { %v2602_v62 = vadd.f32 %v2600_v52, %v2596_v33  ;;  %v2689_v33 = vmul.f32 %v7093_v34, %v8501_v7  ;;  %p3955_p5 = scmp.ne.s32.totalorder %s7557_s12, %s3954_s26  ;;  %p3961_p4 = scmp.lt.s32.totalorder %s7557_s12, %s3959_s10 }
 0x39a   : > { %2660 = vrot.lane.b32.xlu1 %v2655_v32, %s7947_s14  ;;  %v2611_v49 = vpop.permute.xlu0 %2610  ;;  %v2121_v58 = vadd.f32 %v8499_v59, %v2115_v45  ;;  %p3962_p12 = scmp.lt.s32.totalorder %s3960_s20, %s3954_s26 }
 0x39b   : > { %v2131_v2 = vpop.permute.xlu1 %2130  ;;  %v2616_v13 = vadd.f32 %v2611_v49, %v2602_v62  ;;  %p3956_p8 = pnand %p3955_p5, %p8530_p2 }
 0x39c   : > { %3100 = vrot.lane.b32.xlu0 %v3096_v27, %s7947_s14  ;;  %v2135_v53 = vadd.f32 %v2131_v2, %v2121_v58  ;;  %p3963_p0 = por %p3962_p12, %p3961_p4 }
 0x39d   : > { %p3957_p10 = pneg %p3956_p8 }
 0x39e   : > { %2680 = vrot.lane.b32.xlu1 %v2675_v51, %s7950_s25  ;;  %v2625_v43 = vpop.permute.xlu0 %2624  ;;  %v8503_v6 = vstv %s8502_s9 }
 0x39f   : > { %v2630_v32 = vadd.f32 %v2625_v43, %v2616_v13  ;;  %v2145_v63 = vpop.permute.xlu1 %2144  ;;  %v2668_v51 = vmul.f32 %v8503_v6, %v6770_v17  ;;  %v8506_v6 = vld [vmem:[#allocation115_spill] sm:$0xff]  ;;  %p3964_p7 = pnand %p3963_p0, %p3957_p10 }
 0x3a0   : > { %v2149_v35 = vadd.f32 %v2145_v63, %v2135_v53 }
 0x3a1   : > { %v3110_v52 = vadd.f32 %v7101_v46, %v2630_v32 }
 0x3a2   : > { %2694 = vrot.lane.b32.xlu1 %v2689_v33, %s7947_s14  ;;  %v2645_v45 = vpop.permute.xlu0 %2644  ;;  %v7127_v62 = vadd.f32 %v6206_v10, %v2149_v35 }
 0x3a3   : > { %3115 = vst.msk [vmem:[%s7108_s18] sm:$0x1] %vm3114_vm2, %v3110_v52  ;;  %v2165_v49 = vpop.permute.xlu1 %2164  ;;  %v2650_v29 = vadd.f32 %v2645_v45, %v6765_v25 }
 0x3a4   : > { %3118 = vst.msk [vmem:[%s7108_s18 + $0x1] sm:$0x2] %vm3117_vm3, %v3110_v52  ;;  %v2169_v59 = vadd.f32 %v2165_v49, %v6776_v0 }
 0x3a5   : > { %3121 = vst.msk [vmem:[%s7108_s18 + $0x2] sm:$0x4] %vm3120_vm4, %v3110_v52 }
 0x3a6   : > { %3124 = vst.msk [vmem:[%s7108_s18 + $0x3] sm:$0x8] %vm3123_vm5, %v3110_v52  ;;  %2714 = vrot.lane.b32.xlu1 %v6061_v5, %s7950_s25  ;;  %v2659_v27 = vpop.permute.xlu0 %2658 }
 0x3a7   : > { %3127 = vst.msk [vmem:[%s7108_s18 + $0x4] sm:$0x10] %vm3126_vm6, %v3110_v52  ;;  %v2664_v58 = vadd.f32 %v2659_v27, %v2650_v29  ;;  %v2179_v2 = vpop.permute.xlu1 %2178  ;;  %v8505_v29 = vstv %s8504_s17 }
 0x3a8   : > { %3130 = vst.msk [vmem:[%s7108_s18 + $0x5] sm:$0x20] %vm3129_vm7, %v3110_v52  ;;  %v2183_v13 = vadd.f32 %v2179_v2, %v2169_v59  ;;  %v2736_v27 = vmul.f32 %v6829_v3, %v8505_v29  ;;  %v7175_v2 = vstv %s3590_s6  ;;  %v2839_v29 = vmul.f32 %v6895_v9, %v2837_v12 }
 0x3a9   : > { %3133 = vst.msk [vmem:[%s7108_s18 + $0x6] sm:$0x40] %vm3132_vm8, %v3110_v52  ;;  %v2670_v10 = vadd.f32 %v2668_v51, %v2664_v58 }
 0x3aa   : > { %3136 = vst.msk [vmem:[%s7108_s18 + $0x7] sm:$0x80] %vm3135_vm9, %v3110_v52  ;;  %2728 = vrot.lane.b32.xlu1 %v6066_v19, %s7947_s14  ;;  %v2679_v25 = vpop.permute.xlu0 %2678  ;;  %v2189_v5 = vadd.f32 %v5590_v21, %v2183_v13 }
 0x3ab   : > { %v2199_v43 = vpop.permute.xlu1 %2198  ;;  %v2684_v0 = vadd.f32 %v2679_v25, %v2670_v10 }
 0x3ac   : > { %v2203_v33 = vadd.f32 %v2199_v43, %v2189_v5 }
 0x3ae   : > { %2748 = vrot.lane.b32.xlu1 %v5925_v23, %s7950_s25  ;;  %v2693_v7 = vpop.permute.xlu0 %2692 }
 0x3af   : > { %v2698_v53 = vadd.f32 %v2693_v7, %v2684_v0  ;;  %v2213_v19 = vpop.permute.xlu1 %2212 }
 0x3b0   : > { %v2217_v63 = vadd.f32 %v2213_v19, %v2203_v33 }
 0x3b1   : > { %v3112_v32 = vadd.f32 %v7101_v46, %v2698_v53 }
 0x3b2   : > { %2762 = vrot.lane.b32.xlu1 %v5930_v57, %s7947_s14  ;;  %v2713_v21 = vpop.permute.xlu0 %2712  ;;  %v7161_v23 = vadd.f32 %v6221_v1, %v2217_v63 }
 0x3b3   : > { %3116 = vst.msk [vmem:[%s7108_s18 + $0x1] sm:$0x1] %vm3114_vm2, %v3112_v32  ;;  %v2233_v57 = vpop.permute.xlu1 %2232  ;;  %v2718_v52 = vadd.f32 %v2713_v21, %v6817_v42 }
 0x3b4   : > { %3119 = vst.msk [vmem:[%s7108_s18 + $0x2] sm:$0x2] %vm3117_vm3, %v3112_v32  ;;  %v2237_v45 = vadd.f32 %v2233_v57, %v6823_v38 }
 0x3b5   : > { %3122 = vst.msk [vmem:[%s7108_s18 + $0x3] sm:$0x4] %vm3120_vm4, %v3112_v32 }
 0x3b6   : > { %3125 = vst.msk [vmem:[%s7108_s18 + $0x4] sm:$0x8] %vm3123_vm5, %v3112_v32  ;;  %2782 = vrot.lane.b32.xlu1 %v6076_v20, %s7950_s25  ;;  %v2727_v35 = vpop.permute.xlu0 %2726 }
 0x3b7   : > { %3128 = vst.msk [vmem:[%s7108_s18 + $0x5] sm:$0x10] %vm3126_vm6, %v3112_v32  ;;  %v2732_v49 = vadd.f32 %v2727_v35, %v2718_v52  ;;  %v2247_v59 = vpop.permute.xlu1 %2246  ;;  %v8509_v52 = vstv %s6850_s29  ;;  %s7222_s29 = sld [smem:[#allocation7 + $0x45]] }
 0x3b8   : > { %3131 = vst.msk [vmem:[%s7108_s18 + $0x6] sm:$0x20] %vm3129_vm7, %v3112_v32  ;;  %v2251_v58 = vadd.f32 %v2247_v59, %v2237_v45 }
 0x3b9   : > { %3134 = vst.msk [vmem:[%s7108_s18 + $0x7] sm:$0x40] %vm3132_vm8, %v3112_v32  ;;  %v2738_v1 = vadd.f32 %v2736_v27, %v2732_v49 }
 0x3ba   : > { %3137 = vst.msk [vmem:[%s7108_s18 + $0x8] sm:$0x80] %vm3135_vm9, %v3112_v32  ;;  %2796 = vrot.lane.b32.xlu1 %v6084_v41, %s7947_s14  ;;  %v2747_v42 = vpop.permute.xlu0 %2746  ;;  %v2257_v20 = vadd.f32 %v8506_v6, %v2251_v58  ;;  %v8508_v32 = vstv %s8507_s19 }
 0x3bb   : > { %v2267_v51 = vpop.permute.xlu1 %2266  ;;  %v2752_v38 = vadd.f32 %v2747_v42, %v2738_v1  ;;  %v2804_v63 = vmul.f32 %v8508_v32, %v6770_v17  ;;  %v2939_v32 = vstv %s7235_s16 }
 0x3bc   : > { %v2271_v13 = vadd.f32 %v2267_v51, %v2257_v20  ;;  %v8511_v20 = vld [vmem:[#allocation139_spill] sm:$0xff] }
 0x3be   : > { %2848 = vrot.lane.b32.xlu1 %v6089_v24, %s7950_s25  ;;  %v2761_v41 = vpop.permute.xlu0 %2760 }
 0x3bf   : > { %v2766_v10 = vadd.f32 %v2761_v41, %v2752_v38  ;;  %v2281_v25 = vpop.permute.xlu1 %2280 }
 0x3c0   : > { %v2285_v43 = vadd.f32 %v2281_v25, %v2271_v13 }
 0x3c1   : > { %v3156_v5 = vadd.f32 %v7175_v2, %v2766_v10  ;;  %v8512_v10 = vld [vmem:[#allocation140_spill] sm:$0xff] }
 0x3c2   : > { %2916 = vrot.lane.b32.xlu1 %v6094_v36, %s7950_s25  ;;  %v2781_v0 = vpop.permute.xlu0 %2780  ;;  %v7197_v24 = vadd.f32 %v6233_v11, %v2285_v43 }
 0x3c3   : > { %3591 = vst.msk [vmem:[%s7108_s18 + $0x20] sm:$0x1] %vm3114_vm2, %v3156_v5  ;;  %v2301_v36 = vpop.permute.xlu1 %2300  ;;  %v2786_v7 = vadd.f32 %v2781_v0, %v6863_v15  ;;  %v2323_v15 = vmul.f32 %v6630_v50, %v8509_v52 }
 0x3c4   : > { %3593 = vst.msk [vmem:[%s7108_s18 + $0x21] sm:$0x2] %vm3117_vm3, %v3156_v5  ;;  %v2305_v33 = vadd.f32 %v2301_v36, %v6872_v56  ;;  %v8513_v36 = vld [vmem:[#allocation141_spill] sm:$0xff] }
 0x3c5   : > { %3595 = vst.msk [vmem:[%s7108_s18 + $0x22] sm:$0x4] %vm3120_vm4, %v3156_v5 }
 0x3c6   : > { %3597 = vst.msk [vmem:[%s7108_s18 + $0x23] sm:$0x8] %vm3123_vm5, %v3156_v5  ;;  %2984 = vrot.lane.b32.xlu1 %v6104_v16, %s7950_s25  ;;  %v2795_v53 = vpop.permute.xlu0 %2794 }
 0x3c7   : > { %3599 = vst.msk [vmem:[%s7108_s18 + $0x24] sm:$0x10] %vm3126_vm6, %v3156_v5  ;;  %v2800_v19 = vadd.f32 %v2795_v53, %v2786_v7  ;;  %v2315_v21 = vpop.permute.xlu1 %2314 }
 0x3c8   : > { %3601 = vst.msk [vmem:[%s7108_s18 + $0x25] sm:$0x20] %vm3129_vm7, %v3156_v5  ;;  %v2319_v57 = vadd.f32 %v2315_v21, %v2305_v33 }
 0x3c9   : > { %3603 = vst.msk [vmem:[%s7108_s18 + $0x26] sm:$0x40] %vm3132_vm8, %v3156_v5  ;;  %v7208_v11 = vadd.f32 %v2804_v63, %v2800_v19 }
 0x3ca   : > { %3605 = vst.msk [vmem:[%s7108_s18 + $0x27] sm:$0x80] %vm3135_vm9, %v3156_v5  ;;  %3052 = vrot.lane.b32.xlu1 %v6115_v37, %s7950_s25  ;;  %v7213_v56 = vpop.permute.xlu0 %2814  ;;  %v2325_v35 = vadd.f32 %v2323_v15, %v2319_v57  ;;  %v8514_v57 = vld [vmem:[#allocation142_spill] sm:$0xff] }
 0x3cb   : > { %v2335_v16 = vpop.permute.xlu1 %2334 }
 0x3cc   : > { %v2339_v45 = vadd.f32 %v2335_v16, %v2325_v35 }
 0x3ce   : > { %2862 = vrot.lane.b32.xlu1 %v6120_v14, %s7947_s14  ;;  %v2851_v49 = vpop.permute.xlu0 %2850  ;;  %v8510_v14 = vld [vmem:[#allocation138_spill] sm:$0xff] }
 0x3cf   : > { %v2349_v17 = vpop.permute.xlu1 %2348 }
 0x3d0   : > { %v2353_v37 = vadd.f32 %v2349_v17, %v2339_v45  ;;  %v8515_v45 = vld [vmem:[#allocation143_spill] sm:$0xff] }
 0x3d2   : > { %2930 = vrot.lane.b32.xlu1 %v6127_v55, %s7947_s14  ;;  %v2919_v27 = vpop.permute.xlu0 %2918  ;;  %v2841_v50 = vadd.f32 %v2839_v29, %v2353_v37  ;;  %v2391_v55 = vmul.f32 %v6683_v44, %v2389_v22  ;;  %v2907_v44 = vmul.f32 %v6906_v18, %v2905_v26  ;;  %v2941_v26 = vmul.f32 %v7093_v34, %v2939_v32 }
 0x3d3   : > { %v2369_v59 = vpop.permute.xlu1 %2368 }
 0x3d4   : > { %v2373_v58 = vadd.f32 %v2369_v59, %v6926_v28  ;;  %v2855_v1 = vadd.f32 %v2851_v49, %v2841_v50  ;;  %v2871_v28 = vstv %s7222_s29  ;;  %v3890_v49 = vld [vmem:[#allocation2 + $0x39] sm:$0xff] }
 0x3d5   : > { %v2873_v43 = vmul.f32 %v6906_v18, %v2871_v28  ;;  %v2459_v17 = vmul.f32 %v3890_v49, %v2457_v61  ;;  %v8516_v59 = vld [vmem:[#allocation144_spill] sm:$0xff] }
 0x3d6   : > { %2998 = vrot.lane.b32.xlu1 %v8510_v14, %s7947_s14  ;;  %v2987_v42 = vpop.permute.xlu0 %2986 }
 0x3d7   : > { %v2383_v12 = vpop.permute.xlu1 %2382 }
 0x3d8   : > { %v2387_v6 = vadd.f32 %v2383_v12, %v2373_v58  ;;  %v8517_v12 = vld [vmem:[#allocation145_spill] sm:$0xff] }
 0x3da   : > { %3066 = vrot.lane.b32.xlu1 %v8511_v20, %s7947_s14  ;;  %v7232_v51 = vpop.permute.xlu0 %3054  ;;  %v2393_v38 = vadd.f32 %v2391_v55, %v2387_v6 }
 0x3db   : > { %v2403_v41 = vpop.permute.xlu1 %2402 }
 0x3dc   : > { %v2407_v13 = vadd.f32 %v2403_v41, %v2393_v38  ;;  %v3007_v38 = vstv %s7262_s5 }
 0x3de   : > { %2816 = vrot.lane.b32.xlu1 %v8512_v10, %s7950_s25  ;;  %v2865_v25 = vpop.permute.xlu0 %2864  ;;  %v8518_v10 = vld [vmem:[#allocation146_spill] sm:$0xff] }
 0x3df   : > { %v2869_v5 = vadd.f32 %v2865_v25, %v2855_v1  ;;  %v2417_v0 = vpop.permute.xlu1 %2416  ;;  %v2975_v1 = vmul.f32 %v6895_v9, %v2973_v47  ;;  %v3009_v9 = vmul.f32 %v6906_v18, %v3007_v38 }
 0x3e0   : > { %v2421_v22 = vadd.f32 %v2417_v0, %v2407_v13  ;;  %v8519_v0 = vld [vmem:[#allocation147_spill] sm:$0xff] }
 0x3e1   : > { %v7247_v7 = vadd.f32 %v2873_v43, %v2869_v5 }
 0x3e2   : > { %2884 = vrot.lane.b32.xlu1 %v8513_v36, %s7950_s25  ;;  %v2933_v33 = vpop.permute.xlu0 %2932  ;;  %v2909_v53 = vadd.f32 %v2907_v44, %v2421_v22  ;;  %v3891_v44 = vld [vmem:[#allocation2 + $0x3a] sm:$0xff] }
 0x3e3   : > { %v2437_v19 = vpop.permute.xlu1 %2436 }
 0x3e4   : > { %v2923_v63 = vadd.f32 %v2919_v27, %v2909_v53  ;;  %v2441_v21 = vadd.f32 %v2437_v19, %v6974_v31  ;;  %v2820_v53 = vadd.f32 %v7213_v56, %v7208_v11 }
 0x3e6   : > { %2952 = vrot.lane.b32.xlu1 %v8514_v57, %s7950_s25  ;;  %v3001_v52 = vpop.permute.xlu0 %3000  ;;  %v2937_v15 = vadd.f32 %v2933_v33, %v2923_v63 }
 0x3e7   : > { %v2451_v35 = vpop.permute.xlu1 %2450 }
 0x3e8   : > { %v2455_v16 = vadd.f32 %v2451_v35, %v2441_v21  ;;  %v7260_v29 = vadd.f32 %v2941_v26, %v2937_v15  ;;  %v3043_v15 = vmul.f32 %v6906_v18, %v3041_v4  ;;  %v8521_v35 = vld [vmem:[#allocation149_spill] sm:$0xff] }
 0x3ea   : > { %3020 = vrot.lane.b32.xlu1 %v8515_v45, %s7950_s25  ;;  %v3069_v31 = vpop.permute.xlu0 %3068  ;;  %v2461_v37 = vadd.f32 %v2459_v17, %v2455_v16 }
 0x3eb   : > { %v2471_v27 = vpop.permute.xlu1 %2470 }
 0x3ec   : > { %v2475_v50 = vadd.f32 %v2471_v27, %v2461_v37 }
 0x3ee   : > { %3088 = vrot.lane.b32.xlu1 %v8516_v59, %s7950_s25  ;;  %v7266_v58 = vpop.permute.xlu0 %2882  ;;  %s7292_s25 = sld [smem:[#allocation7 + $0xbd]] }
 0x3ef   : > { %v2485_v14 = vpop.permute.xlu1 %2484 }
 0x3f0   : > { %v2489_v61 = vadd.f32 %v2485_v14, %v2475_v50  ;;  %v8522_v50 = vld [vmem:[#allocation150_spill] sm:$0xff] }
 0x3f2   : > { %2830 = vrot.lane.b32.xlu1 %v8517_v12, %s7947_s14  ;;  %v7273_v6 = vpop.permute.xlu0 %2950  ;;  %v2977_v20 = vadd.f32 %v2975_v1, %v2489_v61 }
 0x3f3   : > { %v2505_v55 = vpop.permute.xlu1 %2504 }
 0x3f4   : > { %v2991_v41 = vadd.f32 %v2987_v42, %v2977_v20  ;;  %v2509_v13 = vadd.f32 %v2505_v55, %v7024_v48  ;;  %v2527_v42 = vmul.f32 %v3891_v44, %v2525_v60  ;;  %v8520_v60 = vld [vmem:[#allocation148_spill] sm:$0xff]  ;;  %v3075_v11 = vstv %s7292_s25  ;;  %v8523_v55 = vld [vmem:[#allocation151_spill] sm:$0xff] }
 0x3f5   : > { %v3077_v49 = vmul.f32 %v7093_v34, %v3075_v11  ;;  %v8524_v44 = vld [vmem:[#allocation152_spill] sm:$0xff] }
 0x3f6   : > { %2898 = vrot.lane.b32.xlu1 %v8518_v10, %s7947_s14  ;;  %v7279_v25 = vpop.permute.xlu0 %3018  ;;  %v3005_v5 = vadd.f32 %v3001_v52, %v2991_v41 }
 0x3f7   : > { %v2519_v47 = vpop.permute.xlu1 %2518 }
 0x3f8   : > { %v2523_v43 = vadd.f32 %v2519_v47, %v2509_v13  ;;  %v7288_v48 = vadd.f32 %v3009_v9, %v3005_v5 }
 0x3fa   : > { %2966 = vrot.lane.b32.xlu1 %v8519_v0, %s7947_s14  ;;  %v7290_v22 = vpop.permute.xlu0 %3086  ;;  %v2529_v36 = vadd.f32 %v2527_v42, %v2523_v43 }
 0x3fb   : > { %v2539_v33 = vpop.permute.xlu1 %2538 }
 0x3fc   : > { %v2543_v19 = vadd.f32 %v2539_v33, %v2529_v36 }
 0x3fe   : > { %3034 = vrot.lane.b32.xlu1 %v8520_v60, %s7947_s14  ;;  %v2829_v63 = vpop.permute.xlu0 %2828 }
 0x3ff   : > { %v2834_v21 = vadd.f32 %v2829_v63, %v2820_v53  ;;  %v2553_v57 = vpop.permute.xlu1 %2552 }
 0x400   : > { %v2557_v26 = vadd.f32 %v2553_v57, %v2543_v19 }
 0x401   : > { %v3158_v52 = vadd.f32 %v7175_v2, %v2834_v21 }
 0x402   : > { %3102 = vrot.lane.b32.xlu1 %v8521_v35, %s7947_s14  ;;  %v3045_v18 = vadd.f32 %v3043_v15, %v2557_v26  ;;  %s3623_s14 = sld [smem:[#allocation8 + $0x2]] }
 0x403   : > { %3592 = vst.msk [vmem:[%s7108_s18 + $0x21] sm:$0x1] %vm3114_vm2, %v3158_v52  ;;  %v2579_v4 = vpop.permute.xlu1 %2578 }
 0x404   : > { %3594 = vst.msk [vmem:[%s7108_s18 + $0x22] sm:$0x2] %vm3117_vm3, %v3158_v52  ;;  %v3059_v56 = vadd.f32 %v7232_v51, %v3045_v18  ;;  %v2583_v16 = vadd.f32 %v2579_v4, %v7072_v39 }
 0x405   : > { %3596 = vst.msk [vmem:[%s7108_s18 + $0x23] sm:$0x4] %vm3120_vm4, %v3158_v52 }
 0x406   : > { %3598 = vst.msk [vmem:[%s7108_s18 + $0x24] sm:$0x8] %vm3123_vm5, %v3158_v52  ;;  %v3073_v45 = vadd.f32 %v3069_v31, %v3059_v56 }
 0x407   : > { %3600 = vst.msk [vmem:[%s7108_s18 + $0x25] sm:$0x10] %vm3126_vm6, %v3158_v52  ;;  %v2593_v17 = vpop.permute.xlu1 %2592 }
 0x408   : > { %3602 = vst.msk [vmem:[%s7108_s18 + $0x26] sm:$0x20] %vm3129_vm7, %v3158_v52  ;;  %v2597_v37 = vadd.f32 %v2593_v17, %v2583_v16  ;;  %v7326_v27 = vadd.f32 %v3077_v49, %v3073_v45  ;;  %v2897_v16 = vpop.permute.xlu0 %2896  ;;  %v2872_v49 = vmul.f32 %v6829_v3, %v2871_v28 }
 0x409   : > { %3604 = vst.msk [vmem:[%s7108_s18 + $0x27] sm:$0x40] %vm3132_vm8, %v3158_v52 }
 0x40a   : > { %3606 = vst.msk [vmem:[%s7108_s18 + $0x28] sm:$0x80] %vm3135_vm9, %v3158_v52  ;;  %v2603_v59 = vadd.f32 %v8522_v50, %v2597_v37  ;;  %v8525_v52 = vld [vmem:[#allocation153_spill] sm:$0xff] }
 0x40b   : > { %v2613_v14 = vpop.permute.xlu1 %2612 }
 0x40c   : > { %v2617_v51 = vadd.f32 %v2613_v14, %v2603_v59  ;;  %v3892_v14 = vld [vmem:[#allocation2 + $0x4a] sm:$0xff] }
 0x40f   : > { %v2627_v1 = vpop.permute.xlu1 %2626 }
 0x410   : > { %v2631_v61 = vadd.f32 %v2627_v1, %v2617_v51  ;;  %v2940_v51 = vmul.f32 %v3892_v14, %v2939_v32 }
 0x412   : > { %v3111_v39 = vadd.f32 %v7101_v46, %v2631_v61  ;;  %v2965_v61 = vpop.permute.xlu0 %2964 }
 0x413   : > { %v2647_v31 = vpop.permute.xlu1 %2646 }
 0x414   : > { %3138 = vst.msk [vmem:[%s7108_s18 + $0x10] sm:$0x1] %vm3114_vm2, %v3111_v39  ;;  %v2651_v34 = vadd.f32 %v2647_v31, %v7127_v62 }
 0x415   : > { %3140 = vst.msk [vmem:[%s7108_s18 + $0x11] sm:$0x2] %vm3117_vm3, %v3111_v39 }
 0x416   : > { %3142 = vst.msk [vmem:[%s7108_s18 + $0x12] sm:$0x4] %vm3120_vm4, %v3111_v39 }
 0x417   : > { %3144 = vst.msk [vmem:[%s7108_s18 + $0x13] sm:$0x8] %vm3123_vm5, %v3111_v39  ;;  %v2661_v12 = vpop.permute.xlu1 %2660 }
 0x418   : > { %3146 = vst.msk [vmem:[%s7108_s18 + $0x14] sm:$0x10] %vm3126_vm6, %v3111_v39  ;;  %v2665_v20 = vadd.f32 %v2661_v12, %v2651_v34 }
 0x419   : > { %3148 = vst.msk [vmem:[%s7108_s18 + $0x15] sm:$0x20] %vm3129_vm7, %v3111_v39 }
 0x41a   : > { %3150 = vst.msk [vmem:[%s7108_s18 + $0x16] sm:$0x40] %vm3132_vm8, %v3111_v39  ;;  %v2671_v41 = vadd.f32 %v8523_v55, %v2665_v20 }
 0x41b   : > { %3152 = vst.msk [vmem:[%s7108_s18 + $0x17] sm:$0x80] %vm3135_vm9, %v3111_v39  ;;  %v2681_v13 = vpop.permute.xlu1 %2680  ;;  %v3893_v39 = vld [vmem:[#allocation2 + $0x49] sm:$0xff] }
 0x41c   : > { %v2685_v10 = vadd.f32 %v2681_v13, %v2671_v41  ;;  %v3008_v31 = vmul.f32 %v3893_v39, %v3007_v38  ;;  %v3076_v41 = vmul.f32 %v3892_v14, %v3075_v11 }
 0x41f   : > { %v2695_v5 = vpop.permute.xlu1 %2694 }
 0x420   : > { %v2699_v9 = vadd.f32 %v2695_v5, %v2685_v10  ;;  %v7424_v5 = vstv %s3656_s1 }
 0x422   : > { %v3113_v47 = vadd.f32 %v7101_v46, %v2699_v9 }
 0x423   : > { %v2715_v43 = vpop.permute.xlu1 %2714 }
 0x424   : > { %3139 = vst.msk [vmem:[%s7108_s18 + $0x11] sm:$0x1] %vm3114_vm2, %v3113_v47  ;;  %v2719_v46 = vadd.f32 %v2715_v43, %v7161_v23 }
 0x425   : > { %3141 = vst.msk [vmem:[%s7108_s18 + $0x12] sm:$0x2] %vm3117_vm3, %v3113_v47 }
 0x426   : > { %3143 = vst.msk [vmem:[%s7108_s18 + $0x13] sm:$0x4] %vm3120_vm4, %v3113_v47 }
 0x427   : > { %3145 = vst.msk [vmem:[%s7108_s18 + $0x14] sm:$0x8] %vm3123_vm5, %v3113_v47  ;;  %v2729_v62 = vpop.permute.xlu1 %2728 }
 0x428   : > { %3147 = vst.msk [vmem:[%s7108_s18 + $0x15] sm:$0x10] %vm3126_vm6, %v3113_v47  ;;  %v2733_v0 = vadd.f32 %v2729_v62, %v2719_v46 }
 0x429   : > { %3149 = vst.msk [vmem:[%s7108_s18 + $0x16] sm:$0x20] %vm3129_vm7, %v3113_v47 }
 0x42a   : > { %3151 = vst.msk [vmem:[%s7108_s18 + $0x17] sm:$0x40] %vm3132_vm8, %v3113_v47  ;;  %v2739_v42 = vadd.f32 %v8524_v44, %v2733_v0 }
 0x42b   : > { %3153 = vst.msk [vmem:[%s7108_s18 + $0x18] sm:$0x80] %vm3135_vm9, %v3113_v47  ;;  %v2749_v36 = vpop.permute.xlu1 %2748 }
 0x42c   : > { %v2753_v33 = vadd.f32 %v2749_v36, %v2739_v42 }
 0x42f   : > { %v2763_v53 = vpop.permute.xlu1 %2762 }
 0x430   : > { %v2767_v19 = vadd.f32 %v2763_v53, %v2753_v33 }
 0x432   : > { %v3157_v60 = vadd.f32 %v7175_v2, %v2767_v19 }
 0x433   : > { %v2783_v63 = vpop.permute.xlu1 %2782 }
 0x434   : > { %3607 = vst.msk [vmem:[%s7108_s18 + $0x30] sm:$0x1] %vm3114_vm2, %v3157_v60  ;;  %v2787_v23 = vadd.f32 %v2783_v63, %v7197_v24 }
 0x435   : > { %3609 = vst.msk [vmem:[%s7108_s18 + $0x31] sm:$0x2] %vm3117_vm3, %v3157_v60 }
 0x436   : > { %3611 = vst.msk [vmem:[%s7108_s18 + $0x32] sm:$0x4] %vm3120_vm4, %v3157_v60 }
 0x437   : > { %3613 = vst.msk [vmem:[%s7108_s18 + $0x33] sm:$0x8] %vm3123_vm5, %v3157_v60  ;;  %v2797_v21 = vpop.permute.xlu1 %2796 }
 0x438   : > { %3615 = vst.msk [vmem:[%s7108_s18 + $0x34] sm:$0x10] %vm3126_vm6, %v3157_v60  ;;  %v2801_v57 = vadd.f32 %v2797_v21, %v2787_v23 }
 0x439   : > { %3617 = vst.msk [vmem:[%s7108_s18 + $0x35] sm:$0x20] %vm3129_vm7, %v3157_v60 }
 0x43a   : > { %3619 = vst.msk [vmem:[%s7108_s18 + $0x36] sm:$0x40] %vm3132_vm8, %v3157_v60  ;;  %v7386_v15 = vadd.f32 %v8525_v52, %v2801_v57 }
 0x43b   : > { %3621 = vst.msk [vmem:[%s7108_s18 + $0x37] sm:$0x80] %vm3135_vm9, %v3157_v60  ;;  %v2849_v26 = vpop.permute.xlu1 %2848 }
 0x43c   : > { %v2854_v56 = vadd.f32 %v2849_v26, %v6920_v30  ;;  %v7396_v30 = vstv %s3623_s14 }
 0x43f   : > { %v2917_v35 = vpop.permute.xlu1 %2916 }
 0x440   : > { %v2922_v24 = vadd.f32 %v2917_v35, %v6968_v40 }
 0x443   : > { %v2985_v18 = vpop.permute.xlu1 %2984 }
 0x444   : > { %v2990_v3 = vadd.f32 %v2985_v18, %v7015_v8 }
 0x447   : > { %v3053_v4 = vpop.permute.xlu1 %3052 }
 0x448   : > { %v3058_v20 = vadd.f32 %v3053_v4, %v7063_v54  ;;  %v3033_v54 = vpop.permute.xlu0 %3032 }
 0x44b   : > { %v2863_v45 = vpop.permute.xlu1 %2862 }
 0x44c   : > { %v2868_v17 = vadd.f32 %v2863_v45, %v2854_v56  ;;  %v3101_v46 = vpop.permute.xlu0 %3100 }
 0x44e   : > { %v2874_v37 = vadd.f32 %v2872_v49, %v2868_v17 }
 0x44f   : > { %v2931_v50 = vpop.permute.xlu1 %2930 }
 0x450   : > { %v2888_v59 = vadd.f32 %v7266_v58, %v2874_v37  ;;  %v2936_v1 = vadd.f32 %v2931_v50, %v2922_v24 }
 0x452   : > { %v2902_v40 = vadd.f32 %v2897_v16, %v2888_v59  ;;  %v2942_v28 = vadd.f32 %v2940_v51, %v2936_v1 }
 0x453   : > { %v2999_v58 = vpop.permute.xlu1 %2998 }
 0x454   : > { %v2956_v32 = vadd.f32 %v7273_v6, %v2942_v28  ;;  %v3004_v34 = vadd.f32 %v2999_v58, %v2990_v3  ;;  %v3195_v12 = vadd.f32 %v7396_v30, %v2902_v40 }
 0x456   : > { %v2970_v55 = vadd.f32 %v2965_v61, %v2956_v32  ;;  %v3010_v8 = vadd.f32 %v3008_v31, %v3004_v34  ;;  %3624 = vst.msk [vmem:[%s7108_s18 + $0x40] sm:$0x1] %vm3114_vm2, %v3195_v12 }
 0x457   : > { %3626 = vst.msk [vmem:[%s7108_s18 + $0x41] sm:$0x2] %vm3117_vm3, %v3195_v12  ;;  %v3067_v6 = vpop.permute.xlu1 %3066 }
 0x458   : > { %3628 = vst.msk [vmem:[%s7108_s18 + $0x42] sm:$0x4] %vm3120_vm4, %v3195_v12  ;;  %v3024_v38 = vadd.f32 %v7279_v25, %v3010_v8  ;;  %v3072_v13 = vadd.f32 %v3067_v6, %v3058_v20  ;;  %v3197_v10 = vadd.f32 %v7396_v30, %v2970_v55 }
 0x459   : > { %3630 = vst.msk [vmem:[%s7108_s18 + $0x43] sm:$0x8] %vm3123_vm5, %v3195_v12 }
 0x45a   : > { %3632 = vst.msk [vmem:[%s7108_s18 + $0x44] sm:$0x10] %vm3126_vm6, %v3195_v12  ;;  %v3038_v9 = vadd.f32 %v3033_v54, %v3024_v38  ;;  %v3078_v47 = vadd.f32 %v3076_v41, %v3072_v13  ;;  %3633 = vst.msk [vmem:[%s7108_s18 + $0x45] sm:$0x10] %vm3126_vm6, %v3197_v10 }
 0x45b   : > { %3634 = vst.msk [vmem:[%s7108_s18 + $0x45] sm:$0x20] %vm3129_vm7, %v3195_v12  ;;  %3635 = vst.msk [vmem:[%s7108_s18 + $0x46] sm:$0x20] %vm3129_vm7, %v3197_v10  ;;  %v2817_v25 = vpop.permute.xlu1 %2816 }
 0x45c   : > { %3636 = vst.msk [vmem:[%s7108_s18 + $0x46] sm:$0x40] %vm3132_vm8, %v3195_v12  ;;  %3637 = vst.msk [vmem:[%s7108_s18 + $0x47] sm:$0x40] %vm3132_vm8, %v3197_v10  ;;  %v3092_v11 = vadd.f32 %v7290_v22, %v3078_v47  ;;  %v3234_v43 = vadd.f32 %v7424_v5, %v3038_v9  ;;  %v2821_v33 = vadd.f32 %v2817_v25, %v7386_v15 }
 0x45d   : > { %3638 = vst.msk [vmem:[%s7108_s18 + $0x47] sm:$0x80] %vm3135_vm9, %v3195_v12  ;;  %3639 = vst.msk [vmem:[%s7108_s18 + $0x48] sm:$0x80] %vm3135_vm9, %v3197_v10 }
 0x45e   : > { %3625 = vst.msk [vmem:[%s7108_s18 + $0x41] sm:$0x1] %vm3114_vm2, %v3197_v10  ;;  %v3106_v62 = vadd.f32 %v3101_v46, %v3092_v11  ;;  %3657 = vst.msk [vmem:[%s7108_s18 + $0x60] sm:$0x1] %vm3114_vm2, %v3234_v43 }
 0x45f   : > { %3627 = vst.msk [vmem:[%s7108_s18 + $0x42] sm:$0x2] %vm3117_vm3, %v3197_v10  ;;  %3659 = vst.msk [vmem:[%s7108_s18 + $0x61] sm:$0x2] %vm3117_vm3, %v3234_v43  ;;  %v2885_v22 = vpop.permute.xlu1 %2884 }
 0x460   : > { %3629 = vst.msk [vmem:[%s7108_s18 + $0x43] sm:$0x4] %vm3120_vm4, %v3197_v10  ;;  %3661 = vst.msk [vmem:[%s7108_s18 + $0x62] sm:$0x4] %vm3120_vm4, %v3234_v43  ;;  %v3236_v0 = vadd.f32 %v7424_v5, %v3106_v62  ;;  %v2889_v60 = vadd.f32 %v2885_v22, %v7247_v7 }
 0x461   : > { %3631 = vst.msk [vmem:[%s7108_s18 + $0x44] sm:$0x8] %vm3123_vm5, %v3197_v10  ;;  %3663 = vst.msk [vmem:[%s7108_s18 + $0x63] sm:$0x8] %vm3123_vm5, %v3234_v43 }
 0x462   : > { %3665 = vst.msk [vmem:[%s7108_s18 + $0x64] sm:$0x10] %vm3126_vm6, %v3234_v43  ;;  %3666 = vst.msk [vmem:[%s7108_s18 + $0x65] sm:$0x10] %vm3126_vm6, %v3236_v0 }
 0x463   : > { %3667 = vst.msk [vmem:[%s7108_s18 + $0x65] sm:$0x20] %vm3129_vm7, %v3234_v43  ;;  %3668 = vst.msk [vmem:[%s7108_s18 + $0x66] sm:$0x20] %vm3129_vm7, %v3236_v0  ;;  %v2953_v44 = vpop.permute.xlu1 %2952 }
 0x464   : > { %3669 = vst.msk [vmem:[%s7108_s18 + $0x66] sm:$0x40] %vm3132_vm8, %v3234_v43  ;;  %3670 = vst.msk [vmem:[%s7108_s18 + $0x67] sm:$0x40] %vm3132_vm8, %v3236_v0  ;;  %v2957_v7 = vadd.f32 %v2953_v44, %v7260_v29 }
 0x465   : > { %3671 = vst.msk [vmem:[%s7108_s18 + $0x67] sm:$0x80] %vm3135_vm9, %v3234_v43  ;;  %3672 = vst.msk [vmem:[%s7108_s18 + $0x68] sm:$0x80] %vm3135_vm9, %v3236_v0 }
 0x466   : > { %3658 = vst.msk [vmem:[%s7108_s18 + $0x61] sm:$0x1] %vm3114_vm2, %v3236_v0 }
 0x467   : > { %3660 = vst.msk [vmem:[%s7108_s18 + $0x62] sm:$0x2] %vm3117_vm3, %v3236_v0  ;;  %v3021_v42 = vpop.permute.xlu1 %3020 }
 0x468   : > { %3662 = vst.msk [vmem:[%s7108_s18 + $0x63] sm:$0x4] %vm3120_vm4, %v3236_v0  ;;  %v3025_v52 = vadd.f32 %v3021_v42, %v7288_v48 }
 0x469   : > { %3664 = vst.msk [vmem:[%s7108_s18 + $0x64] sm:$0x8] %vm3123_vm5, %v3236_v0 }
 0x46b   : > { %v3089_v36 = vpop.permute.xlu1 %3088 }
 0x46c   : > { %v3093_v35 = vadd.f32 %v3089_v36, %v7326_v27 }
 0x46f   : > { %v2831_v53 = vpop.permute.xlu1 %2830 }
 0x470   : > { %v2835_v19 = vadd.f32 %v2831_v53, %v2821_v33 }
 0x472   : > { %v3159_v63 = vadd.f32 %v7175_v2, %v2835_v19 }
 0x473   : > { %v2899_v23 = vpop.permute.xlu1 %2898 }
 0x474   : > { %3608 = vst.msk [vmem:[%s7108_s18 + $0x31] sm:$0x1] %vm3114_vm2, %v3159_v63  ;;  %v2903_v2 = vadd.f32 %v2899_v23, %v2889_v60 }
 0x475   : > { %3610 = vst.msk [vmem:[%s7108_s18 + $0x32] sm:$0x2] %vm3117_vm3, %v3159_v63 }
 0x476   : > { %3612 = vst.msk [vmem:[%s7108_s18 + $0x33] sm:$0x4] %vm3120_vm4, %v3159_v63  ;;  %v3196_v21 = vadd.f32 %v7396_v30, %v2903_v2 }
 0x477   : > { %3614 = vst.msk [vmem:[%s7108_s18 + $0x34] sm:$0x8] %vm3123_vm5, %v3159_v63  ;;  %v2967_v57 = vpop.permute.xlu1 %2966 }
 0x478   : > { %3616 = vst.msk [vmem:[%s7108_s18 + $0x35] sm:$0x10] %vm3126_vm6, %v3159_v63  ;;  %3648 = vst.msk [vmem:[%s7108_s18 + $0x54] sm:$0x10] %vm3126_vm6, %v3196_v21  ;;  %v2971_v29 = vadd.f32 %v2967_v57, %v2957_v7 }
 0x479   : > { %3618 = vst.msk [vmem:[%s7108_s18 + $0x36] sm:$0x20] %vm3129_vm7, %v3159_v63  ;;  %3650 = vst.msk [vmem:[%s7108_s18 + $0x55] sm:$0x20] %vm3129_vm7, %v3196_v21 }
 0x47a   : > { %3620 = vst.msk [vmem:[%s7108_s18 + $0x37] sm:$0x40] %vm3132_vm8, %v3159_v63  ;;  %3652 = vst.msk [vmem:[%s7108_s18 + $0x56] sm:$0x40] %vm3132_vm8, %v3196_v21  ;;  %v3198_v15 = vadd.f32 %v7396_v30, %v2971_v29 }
 0x47b   : > { %3622 = vst.msk [vmem:[%s7108_s18 + $0x38] sm:$0x80] %vm3135_vm9, %v3159_v63  ;;  %3654 = vst.msk [vmem:[%s7108_s18 + $0x57] sm:$0x80] %vm3135_vm9, %v3196_v21  ;;  %v3035_v26 = vpop.permute.xlu1 %3034 }
 0x47c   : > { %3640 = vst.msk [vmem:[%s7108_s18 + $0x50] sm:$0x1] %vm3114_vm2, %v3196_v21  ;;  %3641 = vst.msk [vmem:[%s7108_s18 + $0x51] sm:$0x1] %vm3114_vm2, %v3198_v15  ;;  %v3039_v48 = vadd.f32 %v3035_v26, %v3025_v52 }
 0x47d   : > { %3642 = vst.msk [vmem:[%s7108_s18 + $0x51] sm:$0x2] %vm3117_vm3, %v3196_v21  ;;  %3643 = vst.msk [vmem:[%s7108_s18 + $0x52] sm:$0x2] %vm3117_vm3, %v3198_v15 }
 0x47e   : > { %3644 = vst.msk [vmem:[%s7108_s18 + $0x52] sm:$0x4] %vm3120_vm4, %v3196_v21  ;;  %3645 = vst.msk [vmem:[%s7108_s18 + $0x53] sm:$0x4] %vm3120_vm4, %v3198_v15  ;;  %v3235_v18 = vadd.f32 %v7424_v5, %v3039_v48 }
 0x47f   : > { %3646 = vst.msk [vmem:[%s7108_s18 + $0x53] sm:$0x8] %vm3123_vm5, %v3196_v21  ;;  %3647 = vst.msk [vmem:[%s7108_s18 + $0x54] sm:$0x8] %vm3123_vm5, %v3198_v15  ;;  %v3103_v4 = vpop.permute.xlu1 %3102 }
 0x480   : > { %3649 = vst.msk [vmem:[%s7108_s18 + $0x55] sm:$0x10] %vm3126_vm6, %v3198_v15  ;;  %3681 = vst.msk [vmem:[%s7108_s18 + $0x74] sm:$0x10] %vm3126_vm6, %v3235_v18  ;;  %v3107_v27 = vadd.f32 %v3103_v4, %v3093_v35 }
 0x481   : > { %3651 = vst.msk [vmem:[%s7108_s18 + $0x56] sm:$0x20] %vm3129_vm7, %v3198_v15  ;;  %3683 = vst.msk [vmem:[%s7108_s18 + $0x75] sm:$0x20] %vm3129_vm7, %v3235_v18 }
 0x482   : > { %3653 = vst.msk [vmem:[%s7108_s18 + $0x57] sm:$0x40] %vm3132_vm8, %v3198_v15  ;;  %3685 = vst.msk [vmem:[%s7108_s18 + $0x76] sm:$0x40] %vm3132_vm8, %v3235_v18  ;;  %v3237_v56 = vadd.f32 %v7424_v5, %v3107_v27 }
 0x483   : > { %3655 = vst.msk [vmem:[%s7108_s18 + $0x58] sm:$0x80] %vm3135_vm9, %v3198_v15  ;;  %3687 = vst.msk [vmem:[%s7108_s18 + $0x77] sm:$0x80] %vm3135_vm9, %v3235_v18 }
 0x484   : > { %3673 = vst.msk [vmem:[%s7108_s18 + $0x70] sm:$0x1] %vm3114_vm2, %v3235_v18  ;;  %3674 = vst.msk [vmem:[%s7108_s18 + $0x71] sm:$0x1] %vm3114_vm2, %v3237_v56 }
 0x485   : > { %3675 = vst.msk [vmem:[%s7108_s18 + $0x71] sm:$0x2] %vm3117_vm3, %v3235_v18  ;;  %3676 = vst.msk [vmem:[%s7108_s18 + $0x72] sm:$0x2] %vm3117_vm3, %v3237_v56 }
 0x486   : > { %3677 = vst.msk [vmem:[%s7108_s18 + $0x72] sm:$0x4] %vm3120_vm4, %v3235_v18  ;;  %3678 = vst.msk [vmem:[%s7108_s18 + $0x73] sm:$0x4] %vm3120_vm4, %v3237_v56 }
 0x487   : > { %3679 = vst.msk [vmem:[%s7108_s18 + $0x73] sm:$0x8] %vm3123_vm5, %v3235_v18  ;;  %3680 = vst.msk [vmem:[%s7108_s18 + $0x74] sm:$0x8] %vm3123_vm5, %v3237_v56 }
 0x488   : > { %3682 = vst.msk [vmem:[%s7108_s18 + $0x75] sm:$0x10] %vm3126_vm6, %v3237_v56 }
 0x489   : > { %3684 = vst.msk [vmem:[%s7108_s18 + $0x76] sm:$0x20] %vm3129_vm7, %v3237_v56 }
 0x48a   : > { %3686 = vst.msk [vmem:[%s7108_s18 + $0x77] sm:$0x40] %vm3132_vm8, %v3237_v56 }
 0x48b   : > { %3688 = vst.msk [vmem:[%s7108_s18 + $0x78] sm:$0x80] %vm3135_vm9, %v3237_v56 }
 0x48c   : > { %3967 = shalt.err (!%p3964_p7)
}
 0x48d   : > { %s3968_s27 = scalar_lea.hbm %s7555_s21, 2048  ;;  %s3972_s28 = scalar_lea.hbm %s8529_s23, 4096 }
 0x48e   : > { %p3969_p11 = scmp.ne.s32.totalorder %s7555_s21, %s3968_s27  ;;  %p3973_p3 = scmp.lt.u32.totalorder %s7555_s21, %s8529_s23 }
 0x48f   : > { %p3974_p9 = scmp.lt.u32.totalorder %s3972_s28, %s3968_s27  ;;  %p3976_p5 = scmp.lt.u32.totalorder %s3968_s27, %s7555_s21 }
 0x490   : > { %p3970_p13 = pnand %p3969_p11, %p8530_p2 }
 0x491   : > { %p3975_p1 = por %p3974_p9, %p3973_p3 }
 0x492   : > { %p3971_p6 = pneg %p3970_p13 }
 0x493   : > { %p3977_p8 = por %p3976_p5, %p3975_p1 }
 0x495   : > { %p3978_p10 = pnand %p3977_p8, %p3971_p6 }
 0x497   : > { %3981 = shalt.err (!%p3978_p10)
}
 0x498   : > { %s4055_s9 = smov 128   ;;  %s4056_s17 = smov 8  }
 0x499   : > { %3706 = dma.vmem_to_hbm [thread:$0]  (%p8530_p2), %s7557_s12, 2048, %s7555_s21, %s3272_s0, %s4055_s9, %s4055_s9, %s4056_s17  }
 0x49a PF: > { %s8531_s6 = sld [smem:[#allocation15_spill]]  ;;  %s8532_s19 = sld [smem:[#allocation23_spill]] }
 0x49b   : > { %s8533_s29 = sld [smem:[#allocation18_spill]] }
 0x4a0   : > { %s3300_s16 = sand.u32 1, %s8531_s6   ;;  %p8534_p4 = scmp.ne.s32.totalorder %s8532_s19, 0 }
 0x4a1   : > { %p8535_p12 = scmp.ge.s32.totalorder %s8533_s29, 2  ;;  %s3301_s5 = scalar_lea.sflag [#allocation5], %s3300_s16 }
 0x4a3   : > { %p3720_p0 = pnand %p8535_p12, %p8534_p4 }
 0x4a5   : > { %4011 = dma.done.wait (!%p3720_p0), %s3301_s5, 2048  }
 0x4a6   : > { %4013 = vsyncadd (!%p3720_p0), %s3301_s5, 4294965248  ;;  %s8536_s15 = sld [smem:[#allocation20_spill]]  ;;  %s8537_s12 = sld [smem:[#allocation16_spill]] }
 0x4a7   : > { %s8538_s13 = sld [smem:[#allocation17_spill]]  ;;  %s8539_s14 = sld [smem:[#allocation21_spill]] }
 0x4ac   : > { %p18_p7 = scmp.ge.s32.totalorder %s8536_s15, 4  }
 0x4ae   :  { %20 = sbr.rel (!%p18_p7) target bundleno = 12 (0xc), region = 95 }
 0x4b5   :  { %3306 = vsyncpa [#allocation4], 1 }
 0x4b6   :  { %3308 = vsyncpa [#allocation4 + $0x1], 1 }
 0x4b7   :  { %3309 = vsyncpa [#allocation5], 1 }
 0x4b8   :  { %3311 = vsyncpa [#allocation5 + $0x1], 1 }
 0x4b9   :  { %3312 = vsyncpa [#allocation6], 1 }
 0x4ba   :  { %3314 = vsyncpa [#allocation6 + $0x1], 1 }
 0x4bb   :  { %3315 = vsyncpa [#allocation9], 1 }

</bundles_post_ra>
